<compile_context>
chip_gen: v7x
topology: tpu7x:2x2x1
jax: 0.10.0
libtpu: 0.0.40
codegen_flags: <defaults>
</compile_context>

<pallas_src>
import functools

import jax
import jax.numpy as jnp
from jax import lax
from jax.experimental import pallas as pl
from jax.experimental.pallas import tpu as pltpu

PAD = 128          # lane-dense hidden width (one full vreg lane dimension)
_UNROLL_MAX = 4    # fully unroll the hidden stack up to this depth


def _round_up(x, m):
    return (x + m - 1) // m * m


def _fcn_fused_kernel(x_ref, w0_ref, b0_ref, wh_ref, bh_ref, we_ref, be_ref,
                      o_ref, *, n_in, n_hid, mm_dtype):
    """Whole MLP fused for one batch tile.

    x_ref : [bt, n_in]                 f32 input tile (true feature dim)
    w0_ref: [n_in, PAD]                f32 fc_start weight, cols zero-padded
    b0_ref: [1, PAD]                   f32 fc_start bias, zero-padded lanes
    wh_ref: [max(n_hid,1), PAD, PAD]   hidden weights (mm_dtype), zero-padded
    bh_ref: [max(n_hid,1), PAD]        f32 hidden biases, zero-padded
    we_ref: [PAD, OUT_PAD]             final weight (mm_dtype), zero-padded
    be_ref: [1, OUT_PAD]               f32 final bias, zero-padded
    o_ref : [bt, OUT_PAD]              narrow output slab (true cols sliced outside)
    """
    # ---- fc_start: K = n_in is tiny (2 for a PINN) -> VPU broadcast-FMA ----
    # A [bt,2]@[2,128] MXU matmul is ~1.5% K-utilization; two vmul+vadd per
    # vreg on the VPU are essentially free and avoid the 2-lane LHS relayout.
    x = x_ref[...]                               # (bt, n_in) f32
    w0 = w0_ref[...]                             # (n_in, PAD) f32
    h = b0_ref[...]                              # (1, PAD) broadcasts over rows
    for k in range(n_in):
        h = h + x[:, k:k + 1] * w0[k:k + 1, :]   # (bt,1)*(1,PAD) -> (bt,PAD)
    h = jnp.tanh(h)                              # f32 tanh (no bf16 EUP on v5e)

    # ---- fc_hidden: (N_LAYERS-1) x (Linear(128->128) + tanh) -------------
    # Matmul operands in mm_dtype (bf16 = fast MXU path); accumulate, bias-add
    # and tanh stay f32.
    def hidden_layer(l, h):
        z = jnp.dot(h.astype(mm_dtype), wh_ref[l],
                    preferred_element_type=jnp.float32)
        return jnp.tanh(z + bh_ref[pl.ds(l, 1), :])

    if n_hid <= _UNROLL_MAX:
        for l in range(n_hid):                   # static unroll for shallow nets
            h = hidden_layer(l, h)
    else:
        # Deep PINNs: dynamic layer index keeps code size / spill pressure down.
        h = lax.fori_loop(0, n_hid, hidden_layer, h)

    # ---- fc_end: plain Linear(128 -> OUT_PAD), narrow output slab ---------
    z = jnp.dot(h.astype(mm_dtype), we_ref[...],
                preferred_element_type=jnp.float32)
    o_ref[...] = (z + be_ref[...]).astype(o_ref.dtype)


def pack_fcn_params(params, matmul_dtype=jnp.bfloat16):
    """Pad / stack / cast parameters ONCE (hoisted out of the per-call path).

    params: list of (w, b) with w shaped (in, out) — pre-transposed vs torch's
    nn.Linear (which stores (out, in) and computes x @ W.T + b).
    """
    n_total = len(params)              # N_LAYERS + 1 linear layers
    n_hid = n_total - 2                # hidden (Linear+tanh) layers after fc_start
    n_in = params[0][0].shape[0]
    n_out = params[-1][0].shape[1]
    out_pad = _round_up(n_out, 8)      # narrow slab: 16x fewer HBM bytes than 128

    w0, b0 = params[0]
    w0_p = jnp.pad(w0, ((0, 0), (0, PAD - w0.shape[1]))).astype(jnp.float32)
    b0_p = jnp.pad(b0, (0, PAD - b0.shape[0])).astype(jnp.float32)[None, :]

    if n_hid > 0:
        wh = jnp.stack([jnp.pad(w, ((0, PAD - w.shape[0]), (0, PAD - w.shape[1])))
                        for (w, _) in params[1:-1]]).astype(matmul_dtype)
        bh = jnp.stack([jnp.pad(b, (0, PAD - b.shape[0]))
                        for (_, b) in params[1:-1]]).astype(jnp.float32)
    else:  # N_LAYERS == 1: no hidden stack; dummy arrays are never read
        wh = jnp.zeros((1, PAD, PAD), matmul_dtype)
        bh = jnp.zeros((1, PAD), jnp.float32)

    we, be = params[-1]
    we_p = jnp.pad(we, ((0, PAD - we.shape[0]),
                        (0, out_pad - we.shape[1]))).astype(matmul_dtype)
    be_p = jnp.pad(be, (0, out_pad - be.shape[0])).astype(jnp.float32)[None, :]

    return dict(w0=w0_p, b0=b0_p, wh=wh, bh=bh, we=we_p, be=be_p,
                n_in=n_in, n_out=n_out, n_hid=n_hid, out_pad=out_pad,
                matmul_dtype=matmul_dtype)


def fcn_forward(packed, x, *, b_tile=2048, vmem_limit_bytes=None):
    """Forward pass of FCN as a single fused, batch-tiled Pallas kernel."""
    B, n_in = x.shape
    assert n_in == packed["n_in"]
    n_hid, out_pad, n_out = packed["n_hid"], packed["out_pad"], packed["n_out"]

    # Batch tiling: single tile for small B (per-grid-step overhead ~0.35 us),
    # bigger tiles for large B; bt stays a multiple of 8 (sublane). For v7x
    # large-B runs keep the grid a multiple of 2 so both TensorCores engage,
    # and cap bt ~8k (64 MiB physical VMEM) or pass vmem_limit_bytes.
    bt = min(b_tile, _round_up(B, 8))
    b_pad = _round_up(B, bt)
    x_p = jnp.pad(x, ((0, b_pad - B), (0, 0))) if b_pad != B else x
    grid = (b_pad // bt,)

    kernel = functools.partial(_fcn_fused_kernel, n_in=n_in, n_hid=n_hid,
                               mm_dtype=packed["matmul_dtype"])

    wh_blk = packed["wh"].shape        # (max(n_hid,1), PAD, PAD)
    bh_blk = packed["bh"].shape        # (max(n_hid,1), PAD)

    out = pl.pallas_call(
        kernel,
        out_shape=jax.ShapeDtypeStruct((b_pad, out_pad), jnp.float32),
        grid=grid,
        in_specs=[
            pl.BlockSpec((bt, n_in), lambda i: (i, 0)),        # x: tiled over batch
            pl.BlockSpec((n_in, PAD), lambda i: (0, 0)),       # w0: resident in VMEM
            pl.BlockSpec((1, PAD), lambda i: (0, 0)),          # b0
            pl.BlockSpec(wh_blk, lambda i: (0, 0, 0)),         # hidden weights: resident
            pl.BlockSpec(bh_blk, lambda i: (0, 0)),            # hidden biases
            pl.BlockSpec((PAD, out_pad), lambda i: (0, 0)),    # final weight
            pl.BlockSpec((1, out_pad), lambda i: (0, 0)),      # final bias
        ],
        out_specs=pl.BlockSpec((bt, out_pad), lambda i: (i, 0)),
        compiler_params=pltpu.CompilerParams(
            dimension_semantics=("parallel",),                 # shard batch across TCs
            vmem_limit_bytes=vmem_limit_bytes,
        ),
    )(x_p, packed["w0"], packed["b0"], packed["wh"], packed["bh"],
      packed["we"], packed["be"])

    # TODO(synk): for very large B, fuse the downstream PINN loss to consume the
    # padded slab directly instead of this slice (removes one full-slab pass).
    return out[:B, :n_out]


def init_fcn_params(key, n_input, n_output, n_hidden, n_layers):
    """Deterministic init mirroring the PyTorch FCN structure (weights (in,out))."""
    dims = [n_input] + [n_hidden] * n_layers + [n_output]
    params = []
    for i in range(len(dims) - 1):
        fan_in, fan_out = dims[i], dims[i + 1]
        key, kw, kb = jax.random.split(key, 3)
        bound = 1.0 / jnp.sqrt(fan_in)
        w = jax.random.uniform(kw, (fan_in, fan_out), jnp.float32, -bound, bound)
        b = jax.random.uniform(kb, (fan_out,), jnp.float32, -bound, bound)
        params.append((w, b))
    return params


def fcn_reference(params, x):
    """Pure-JAX f32 reference for correctness check."""
    h = x
    for (w, b) in params[:-1]:
        h = jnp.tanh(h @ w + b)
    w, b = params[-1]
    return h @ w + b


if __name__ == "__main__":
    # PINN-like configuration: FCN(N_INPUT=2, N_OUTPUT=1, N_HIDDEN=32, N_LAYERS=3)
    N_INPUT, N_OUTPUT, N_HIDDEN, N_LAYERS = 2, 1, 32, 3
    BATCH = 1000

    key = jax.random.PRNGKey(0)
    key, kx = jax.random.split(key)
    x = jax.random.normal(kx, (BATCH, N_INPUT), jnp.float32)
    params = init_fcn_params(key, N_INPUT, N_OUTPUT, N_HIDDEN, N_LAYERS)

    ref = fcn_reference(params, x)

    # 1) Exact-dtype path: f32 matmul operands must match the f32 reference tightly.
    out_f32 = jax.block_until_ready(
        fcn_forward(pack_fcn_params(params, jnp.float32), x))
    assert out_f32.shape == (BATCH, N_OUTPUT)
    assert jnp.allclose(out_f32, ref, atol=2e-5, rtol=2e-5), "f32 kernel mismatch"

    # 2) Fast path: bf16 matmul operands (f32 accumulate / bias / tanh) — the MXU
    #    fast path on v5e/v6e/v7x. Looser tolerance covers bf16 quantization.
    out_bf16 = jax.block_until_ready(
        fcn_forward(pack_fcn_params(params, jnp.bfloat16), x))
    assert out_bf16.shape == (BATCH, N_OUTPUT)
    assert jnp.allclose(out_bf16, ref, atol=3e-2, rtol=3e-2), "bf16 kernel drift too large"

    print("KERNEL_OK")
</pallas_src>

<mosaic_0001>
module attributes {stable_mosaic.version = 11 : i64} {
  func.func @_fcn_fused_kernel(%arg0: i32, %arg1: memref<1000x2xf32, #tpu.memory_space<vmem>>, %arg2: memref<2x128xf32, #tpu.memory_space<vmem>>, %arg3: memref<1x128xf32, #tpu.memory_space<vmem>>, %arg4: memref<2x128x128xf32, #tpu.memory_space<vmem>>, %arg5: memref<2x128xf32, #tpu.memory_space<vmem>>, %arg6: memref<128x8xf32, #tpu.memory_space<vmem>>, %arg7: memref<1x8xf32, #tpu.memory_space<vmem>>, %arg8: memref<1000x8xf32, #tpu.memory_space<vmem>>) attributes {dimension_semantics = [#tpu.dimension_semantics<parallel>], iteration_bounds = array<i64: 1>, scalar_prefetch = 0 : i64, scratch_operands = 0 : i64, tpu.core_type = #tpu.core_type<tc>, window_params = [{transform_indices = @transform_0, window_bounds = array<i64: 1000, 2>}, {pipeline_mode = #tpu.pipeline_mode<synchronous>, transform_indices = @transform_1, window_bounds = array<i64: 2, 128>}, {pipeline_mode = #tpu.pipeline_mode<synchronous>, transform_indices = @transform_2, window_bounds = array<i64: 1, 128>}, {pipeline_mode = #tpu.pipeline_mode<synchronous>, transform_indices = @transform_3, window_bounds = array<i64: 2, 128, 128>}, {pipeline_mode = #tpu.pipeline_mode<synchronous>, transform_indices = @transform_4, window_bounds = array<i64: 2, 128>}, {pipeline_mode = #tpu.pipeline_mode<synchronous>, transform_indices = @transform_5, window_bounds = array<i64: 128, 8>}, {pipeline_mode = #tpu.pipeline_mode<synchronous>, transform_indices = @transform_6, window_bounds = array<i64: 1, 8>}, {transform_indices = @transform_7, window_bounds = array<i64: 1000, 8>}]} {
    %c0 = arith.constant 0 : index
    %c0_0 = arith.constant 0 : index
    %0 = vector.load %arg1[%c0, %c0_0] : memref<1000x2xf32, #tpu.memory_space<vmem>>, vector<1000x2xf32>
    %c0_1 = arith.constant 0 : index
    %c0_2 = arith.constant 0 : index
    %1 = vector.load %arg2[%c0_1, %c0_2] : memref<2x128xf32, #tpu.memory_space<vmem>>, vector<2x128xf32>
    %c0_3 = arith.constant 0 : index
    %c0_4 = arith.constant 0 : index
    %2 = vector.load %arg3[%c0_3, %c0_4] : memref<1x128xf32, #tpu.memory_space<vmem>>, vector<1x128xf32>
    %3 = vector.extract_strided_slice %0 {offsets = [0, 0], sizes = [1000, 1], strides = [1, 1]} : vector<1000x2xf32> to vector<1000x1xf32>
    %4 = vector.extract_strided_slice %1 {offsets = [0, 0], sizes = [1, 128], strides = [1, 1]} : vector<2x128xf32> to vector<1x128xf32>
    %5 = vector.broadcast %3 : vector<1000x1xf32> to vector<1000x128xf32>
    %6 = vector.broadcast %4 : vector<1x128xf32> to vector<1000x128xf32>
    %7 = arith.mulf %5, %6 : vector<1000x128xf32>
    %8 = vector.broadcast %2 : vector<1x128xf32> to vector<1000x128xf32>
    %9 = arith.addf %8, %7 : vector<1000x128xf32>
    %10 = vector.extract_strided_slice %0 {offsets = [0, 1], sizes = [1000, 1], strides = [1, 1]} : vector<1000x2xf32> to vector<1000x1xf32>
    %11 = vector.extract_strided_slice %1 {offsets = [1, 0], sizes = [1, 128], strides = [1, 1]} : vector<2x128xf32> to vector<1x128xf32>
    %12 = vector.broadcast %10 : vector<1000x1xf32> to vector<1000x128xf32>
    %13 = vector.broadcast %11 : vector<1x128xf32> to vector<1000x128xf32>
    %14 = arith.mulf %12, %13 : vector<1000x128xf32>
    %15 = arith.addf %9, %14 : vector<1000x128xf32>
    %16 = math.tanh %15 : vector<1000x128xf32>
    %c0_5 = arith.constant 0 : index
    %c0_6 = arith.constant 0 : index
    %c0_7 = arith.constant 0 : index
    %17 = vector.load %arg4[%c0_5, %c0_6, %c0_7] : memref<2x128x128xf32, #tpu.memory_space<vmem>>, vector<1x128x128xf32>
    %18 = vector.shape_cast %17 : vector<1x128x128xf32> to vector<128x128xf32>
    %cst = arith.constant dense<0.000000e+00> : vector<1000x128xf32>
    %19 = tpu.matmul %16, %18, %cst {dimension_numbers = #tpu.dot_dimension_numbers<[1], [0], [0], [1], [0, 0, 1, 1], [], []>} : vector<1000x128xf32>, vector<128x128xf32>, vector<1000x128xf32> -> vector<1000x128xf32>
    %c0_8 = arith.constant 0 : index
    %c0_9 = arith.constant 0 : index
    %20 = vector.load %arg5[%c0_8, %c0_9] : memref<2x128xf32, #tpu.memory_space<vmem>>, vector<1x128xf32>
    %21 = vector.broadcast %20 : vector<1x128xf32> to vector<1000x128xf32>
    %22 = arith.addf %19, %21 : vector<1000x128xf32>
    %23 = math.tanh %22 : vector<1000x128xf32>
    %c1 = arith.constant 1 : index
    %c0_10 = arith.constant 0 : index
    %c0_11 = arith.constant 0 : index
    %24 = vector.load %arg4[%c1, %c0_10, %c0_11] : memref<2x128x128xf32, #tpu.memory_space<vmem>>, vector<1x128x128xf32>
    %25 = vector.shape_cast %24 : vector<1x128x128xf32> to vector<128x128xf32>
    %cst_12 = arith.constant dense<0.000000e+00> : vector<1000x128xf32>
    %26 = tpu.matmul %23, %25, %cst_12 {dimension_numbers = #tpu.dot_dimension_numbers<[1], [0], [0], [1], [0, 0, 1, 1], [], []>} : vector<1000x128xf32>, vector<128x128xf32>, vector<1000x128xf32> -> vector<1000x128xf32>
    %c1_13 = arith.constant 1 : index
    %c0_14 = arith.constant 0 : index
    %27 = vector.load %arg5[%c1_13, %c0_14] : memref<2x128xf32, #tpu.memory_space<vmem>>, vector<1x128xf32>
    %28 = vector.broadcast %27 : vector<1x128xf32> to vector<1000x128xf32>
    %29 = arith.addf %26, %28 : vector<1000x128xf32>
    %30 = math.tanh %29 : vector<1000x128xf32>
    %c0_15 = arith.constant 0 : index
    %c0_16 = arith.constant 0 : index
    %31 = vector.load %arg6[%c0_15, %c0_16] : memref<128x8xf32, #tpu.memory_space<vmem>>, vector<128x8xf32>
    %cst_17 = arith.constant dense<0.000000e+00> : vector<1000x8xf32>
    %32 = tpu.matmul %30, %31, %cst_17 {dimension_numbers = #tpu.dot_dimension_numbers<[1], [0], [0], [1], [0, 0, 1, 1], [], []>} : vector<1000x128xf32>, vector<128x8xf32>, vector<1000x8xf32> -> vector<1000x8xf32>
    %c0_18 = arith.constant 0 : index
    %c0_19 = arith.constant 0 : index
    %33 = vector.load %arg7[%c0_18, %c0_19] : memref<1x8xf32, #tpu.memory_space<vmem>>, vector<1x8xf32>
    %34 = vector.broadcast %33 : vector<1x8xf32> to vector<1000x8xf32>
    %35 = arith.addf %32, %34 : vector<1000x8xf32>
    %c0_20 = arith.constant 0 : index
    %c0_21 = arith.constant 0 : index
    %36 = vector.load %arg8[%c0_20, %c0_21] : memref<1000x8xf32, #tpu.memory_space<vmem>>, vector<1000x8xf32>
    tpu.vector_store %arg8[%c0_20, %c0_21], %35 {strides = array<i32>} : memref<1000x8xf32, #tpu.memory_space<vmem>>, vector<1000x8xf32>,
    return
  }
  func.func @transform_0(%arg0: i32) -> (i32, i32) {
    %c0_i32 = arith.constant 0 : i32
    %c0_i32_0 = arith.constant 0 : i32
    return %arg0, %c0_i32 : i32, i32
  }
  func.func @transform_1(%arg0: i32) -> (i32, i32) {
    %c0_i32 = arith.constant 0 : i32
    %c0_i32_0 = arith.constant 0 : i32
    %c0_i32_1 = arith.constant 0 : i32
    return %c0_i32, %c0_i32_0 : i32, i32
  }
  func.func @transform_2(%arg0: i32) -> (i32, i32) {
    %c0_i32 = arith.constant 0 : i32
    %c0_i32_0 = arith.constant 0 : i32
    %c0_i32_1 = arith.constant 0 : i32
    return %c0_i32, %c0_i32_0 : i32, i32
  }
  func.func @transform_3(%arg0: i32) -> (i32, i32, i32) {
    %c0_i32 = arith.constant 0 : i32
    %c0_i32_0 = arith.constant 0 : i32
    %c0_i32_1 = arith.constant 0 : i32
    %c0_i32_2 = arith.constant 0 : i32
    return %c0_i32, %c0_i32_0, %c0_i32_1 : i32, i32, i32
  }
  func.func @transform_4(%arg0: i32) -> (i32, i32) {
    %c0_i32 = arith.constant 0 : i32
    %c0_i32_0 = arith.constant 0 : i32
    %c0_i32_1 = arith.constant 0 : i32
    return %c0_i32, %c0_i32_0 : i32, i32
  }
  func.func @transform_5(%arg0: i32) -> (i32, i32) {
    %c0_i32 = arith.constant 0 : i32
    %c0_i32_0 = arith.constant 0 : i32
    %c0_i32_1 = arith.constant 0 : i32
    return %c0_i32, %c0_i32_0 : i32, i32
  }
  func.func @transform_6(%arg0: i32) -> (i32, i32) {
    %c0_i32 = arith.constant 0 : i32
    %c0_i32_0 = arith.constant 0 : i32
    %c0_i32_1 = arith.constant 0 : i32
    return %c0_i32, %c0_i32_0 : i32, i32
  }
  func.func @transform_7(%arg0: i32) -> (i32, i32) {
    %c0_i32 = arith.constant 0 : i32
    %c0_i32_0 = arith.constant 0 : i32
    return %arg0, %c0_i32 : i32, i32
  }
}

</mosaic_0001>

<bundles_post_ra>
// kernel: tpu_custom_call.1
= control target key start
LH: loop header
LB: loop body
LE: loop exit
PB: predicated region body
PF: predicated region fallthrough
CT: control target
= control target key end

     0   :  { %v10590_v0 = vmov 0   ;;  %v10586_v3 = vmov 0.0|0.0   ;;  %v10592_v4 = vmov 1   ;;  %vm7087_vm0 = vmmov 0   ;;  %s10578_s0 = inlined_call_operand.vmem [shape: f32[1000,2], index: 0, kind: input, shape index: {}]   ;;  %s10579_s3 = inlined_call_operand.vmem [shape: f32[2,128,128], index: 3, kind: input, shape index: {}]   ;;  %s10580_s1 = inlined_call_operand.vmem [shape: f32[2,128], index: 1, kind: input, shape index: {}]   ;;  %s10581_s2 = inlined_call_operand.vmem [shape: f32[1,128], index: 2, kind: input, shape index: {}]   ;;  %s10582_s5 = inlined_call_operand.vmem [shape: f32[128,8], index: 5, kind: input, shape index: {}]   ;;  %s10583_s4 = inlined_call_operand.vmem [shape: f32[2,128], index: 4, kind: input, shape index: {}]   ;;  %s10584_s6 = inlined_call_operand.vmem [shape: f32[1,8], index: 6, kind: input, shape index: {}]   ;;  %s10585_s7 = inlined_call_operand.vmem [shape: f32[1000,8], index: 7, kind: output, shape index: {}]  }
   0x1   :  { %6192 = vset.pattern.permute.xlu1 %v10590_v0  ;;  %6190 = vset.pattern.permute.xlu0 %v10590_v0  ;;  %v90_v1 = vld [vmem:[%s10578_s0 + $0x200] sm:$0xff]  ;;  %v89_v2 = vld [vmem:[%s10578_s0 + $0x1f8] sm:$0xff]  ;;  %v91_v5 = vld [vmem:[%s10578_s0 + $0x208] sm:$0xff]  ;;  %v10588_v21 = vmov 0.0   ;;  %vm4303_vm1 = vcmask 64512  }
   0x2   :  { %475 = vperm.xlu1 %6192, %v90_v1   ;;  %470 = vperm.xlu0 %6190, %v89_v2   ;;  %v92_v6 = vld [vmem:[%s10578_s0 + $0x210] sm:$0xff]  ;;  %v1917_v7 = vld [vmem:[%s10579_s3] sm:$0xff]  ;;  %v1918_v8 = vld [vmem:[%s10579_s3 + $0x8] sm:$0xff] }
   0x3   :  { %6169 = vmatprep.subr.bf16.mxu1 %v10586_v3  ;;  %6097 = vmatprep.subr.bf16.mxu0 %v10586_v3  ;;  %v1919_v9 = vld [vmem:[%s10579_s3 + $0x10] sm:$0xff]  ;;  %v93_v10 = vld [vmem:[%s10578_s0 + $0x218] sm:$0xff]  ;;  %v6098_v11 = vpack.c.bf16 %v1918_v8, %v1917_v7  ;;  %v1921_v14 = vld [vmem:[%s10579_s3 + $0x20] sm:$0xff] }
   0x4   :  { %v1920_v12 = vld [vmem:[%s10579_s3 + $0x18] sm:$0xff]  ;;  %v1922_v15 = vld [vmem:[%s10579_s3 + $0x28] sm:$0xff]  ;;  %v94_v16 = vld [vmem:[%s10578_s0 + $0x220] sm:$0xff]  ;;  %5097 = vmatprep.mubr.msk.f32.mxu1 %vm7087_vm0, %v10588_v21  ;;  %4908 = vmatprep.mubr.msk.f32.mxu0 %vm7087_vm0, %v10588_v21 }
   0x5   :  { %6177 = vmatpush3.bf16.msra.mxu1 %v6098_v11  ;;  %v6101_v13 = vpack.c.bf16 %v1920_v12, %v1919_v9  ;;  %6099 = vmatpush3.bf16.msra.mxu0 %v6098_v11  ;;  %v6104_v17 = vpack.c.bf16 %v1922_v15, %v1921_v14  ;;  %v1923_v18 = vld [vmem:[%s10579_s3 + $0x30] sm:$0xff]  ;;  %v1924_v19 = vld [vmem:[%s10579_s3 + $0x38] sm:$0xff]  ;;  %v7184_v20 = vld [vmem:[%s10578_s0 + $0x8] sm:$0xff]  ;;  %v778_v9 = vlaneseq }
   0x6   :  { %6193 = vset.pattern.permute.xlu1 %v10592_v4  ;;  %6191 = vset.pattern.permute.xlu0 %v10592_v4  ;;  %v26_v22 = vld [vmem:[%s10578_s0] sm:$0xff]  ;;  %v6107_v23 = vpack.c.bf16 %v1924_v19, %v1923_v18  ;;  %v1926_v25 = vld [vmem:[%s10579_s3 + $0x48] sm:$0xff]  ;;  %v7205_v26 = vld [vmem:[%s10578_s0 + $0x18] sm:$0xff] }
   0x7   :  { %1295 = vperm.xlu1 %6193, %v90_v1   ;;  %1291 = vperm.xlu0 %6191, %v89_v2   ;;  %v1925_v24 = vld [vmem:[%s10579_s3 + $0x40] sm:$0xff]  ;;  %v1927_v28 = vld [vmem:[%s10579_s3 + $0x50] sm:$0xff]  ;;  %v1928_v29 = vld [vmem:[%s10579_s3 + $0x58] sm:$0xff]  ;;  %v779_v11 = vshrl.u32 %v778_v9, 7 }
   0x8   :  { %6170 = vmatprep.subr.bf16.mxu1 %v10586_v3  ;;  %6100 = vmatprep.subr.bf16.mxu0 %v10586_v3  ;;  %v6110_v27 = vpack.c.bf16 %v1926_v25, %v1925_v24  ;;  %v7220_v30 = vld [vmem:[%s10578_s0 + $0x28] sm:$0xff]  ;;  %v6113_v32 = vpack.c.bf16 %v1928_v29, %v1927_v28  ;;  %v1929_v33 = vld [vmem:[%s10579_s3 + $0x60] sm:$0xff]  ;;  %v7239_v35 = vld [vmem:[%s10578_s0 + $0x38] sm:$0xff] }
   0x9   :  { %6178 = vmatpush3.bf16.msra.mxu1 %v6101_v13  ;;  %6102 = vmatpush3.bf16.msra.mxu0 %v6101_v13  ;;  %v7226_v31 = vld [vmem:[%s10578_s0 + $0x228] sm:$0xff]  ;;  %v96_v37 = vld [vmem:[%s10578_s0 + $0x230] sm:$0xff]  ;;  %v1932_v39 = vld [vmem:[%s10579_s3 + $0x78] sm:$0xff]  ;;  %v780_v14 = vsub.s32 0, %v779_v11 }
   0xa   :  { %6171 = vmatprep.subr.bf16.mxu1 %v10586_v3  ;;  %6103 = vmatprep.subr.bf16.mxu0 %v10586_v3  ;;  %v1930_v34 = vld [vmem:[%s10579_s3 + $0x68] sm:$0xff]  ;;  %v1931_v38 = vld [vmem:[%s10579_s3 + $0x70] sm:$0xff]  ;;  %v7266_v42 = vld [vmem:[%s10578_s0 + $0x58] sm:$0xff] }
   0xb   :  { %6194 = vset.pattern.permute.xlu1 %v10590_v0  ;;  %1299 = vperm.xlu0 %6191, %v91_v5   ;;  %v6116_v36 = vpack.c.bf16 %v1930_v34, %v1929_v33  ;;  %v7257_v40 = vld [vmem:[%s10578_s0 + $0x48] sm:$0xff]  ;;  %v6119_v41 = vpack.c.bf16 %v1932_v39, %v1931_v38  ;;  %v28_v44 = vld [vmem:[%s10578_s0 + $0x10] sm:$0xff]  ;;  %v7286_v45 = vld [vmem:[%s10578_s0 + $0x78] sm:$0xff] }
   0xc   :  { %480 = vperm.xlu1 %6194, %v91_v5   ;;  %v7274_v43 = vld [vmem:[%s10578_s0 + $0x68] sm:$0xff]  ;;  %v7298_v47 = vld [vmem:[%s10578_s0 + $0x238] sm:$0xff]  ;;  %v98_v49 = vld [vmem:[%s10578_s0 + $0x240] sm:$0xff] }
   0xd   :  { %6179 = vmatpush3.bf16.msra.mxu1 %v6104_v17  ;;  %6105 = vmatpush3.bf16.msra.mxu0 %v6104_v17  ;;  %v7293_v46 = vld [vmem:[%s10578_s0 + $0x88] sm:$0xff]  ;;  %v7304_v48 = vld [vmem:[%s10578_s0 + $0x98] sm:$0xff]  ;;  %v30_v53 = vld [vmem:[%s10578_s0 + $0x20] sm:$0xff] }
   0xe   :  { %6172 = vmatprep.subr.bf16.mxu1 %v10586_v3  ;;  %6106 = vmatprep.subr.bf16.mxu0 %v10586_v3  ;;  %v7314_v50 = vld [vmem:[%s10578_s0 + $0xa8] sm:$0xff]  ;;  %v7321_v51 = vld [vmem:[%s10578_s0 + $0xb8] sm:$0xff]  ;;  %v100_v58 = vld [vmem:[%s10578_s0 + $0x250] sm:$0xff] }
   0xf   :  { %1303 = vperm.xlu0 %6191, %v92_v6   ;;  %v7328_v52 = vld [vmem:[%s10578_s0 + $0xc8] sm:$0xff]  ;;  %v7338_v54 = vld [vmem:[%s10578_s0 + $0xd8] sm:$0xff]  ;;  %v32_v62 = vld [vmem:[%s10578_s0 + $0x30] sm:$0xff] }
  0x10   :  { %485 = vperm.xlu1 %6194, %v92_v6   ;;  %v7345_v55 = vld [vmem:[%s10578_s0 + $0xe8] sm:$0xff]  ;;  %v7356_v57 = vld [vmem:[%s10578_s0 + $0xf8] sm:$0xff]  ;;  %v102_v6 = vld [vmem:[%s10578_s0 + $0x260] sm:$0xff] }
  0x11   :  { %6180 = vmatpush3.bf16.msra.mxu1 %v6107_v23  ;;  %6108 = vmatpush3.bf16.msra.mxu0 %v6107_v23  ;;  %v7350_v56 = vld [vmem:[%s10578_s0 + $0x248] sm:$0xff]  ;;  %v7373_v60 = vld [vmem:[%s10578_s0 + $0x118] sm:$0xff]  ;;  %v34_v12 = vld [vmem:[%s10578_s0 + $0x40] sm:$0xff] }
  0x12   :  { %6173 = vmatprep.subr.bf16.mxu1 %v10586_v3  ;;  %6109 = vmatprep.subr.bf16.mxu0 %v10586_v3  ;;  %v7366_v59 = vld [vmem:[%s10578_s0 + $0x108] sm:$0xff]  ;;  %v7390_v63 = vld [vmem:[%s10578_s0 + $0x138] sm:$0xff]  ;;  %v151_v15 = vld [vmem:[%s10580_s1] sm:$0x3] }
  0x13   :  { %1307 = vperm.xlu0 %6191, %v93_v10   ;;  %v7380_v61 = vld [vmem:[%s10578_s0 + $0x128] sm:$0xff]  ;;  %v7402_v2 = vld [vmem:[%s10578_s0 + $0x258] sm:$0xff]  ;;  %v7440_v17 = vrot.slane %v151_v15, %v780_v14 }
  0x14   :  { %490 = vperm.xlu1 %6194, %v93_v10   ;;  %v7397_v1 = vld [vmem:[%s10578_s0 + $0x148] sm:$0xff]  ;;  %v7408_v5 = vld [vmem:[%s10578_s0 + $0x158] sm:$0xff] }
  0x15   :  { %6181 = vmatpush3.bf16.msra.mxu1 %v6110_v27  ;;  %6111 = vmatpush3.bf16.msra.mxu0 %v6110_v27  ;;  %v7418_v7 = vld [vmem:[%s10578_s0 + $0x168] sm:$0xff]  ;;  %v73_v8 = vld [vmem:[%s10578_s0 + $0x178] sm:$0xff]  ;;  %v7456_v27 = vld [vmem:[%s10581_s2] ss:$0 sm:$0xff] }
  0x16   :  { %6174 = vmatprep.subr.bf16.mxu1 %v10586_v3  ;;  %6112 = vmatprep.subr.bf16.mxu0 %v10586_v3  ;;  %v75_v10 = vld [vmem:[%s10578_s0 + $0x188] sm:$0xff]  ;;  %v77_v13 = vld [vmem:[%s10578_s0 + $0x198] sm:$0xff] }
  0x17   :  { %1311 = vperm.xlu0 %6191, %v94_v16   ;;  %v79_v18 = vld [vmem:[%s10578_s0 + $0x1a8] sm:$0xff] }
  0x18   :  { %495 = vperm.xlu1 %6194, %v94_v16   ;;  %v1540_v16 = vsub.s32 1, %v779_v11  ;;  %v7449_v24 = vld [vmem:[%s10578_s0 + $0x268] sm:$0xff]  ;;  %v36_v11 = vld [vmem:[%s10578_s0 + $0x50] sm:$0xff] }
  0x19   :  { %6182 = vmatpush3.bf16.msra.mxu1 %v6113_v32  ;;  %6114 = vmatpush3.bf16.msra.mxu0 %v6113_v32 }
  0x1a   :  { %6175 = vmatprep.subr.bf16.mxu1 %v10586_v3  ;;  %6115 = vmatprep.subr.bf16.mxu0 %v10586_v3  ;;  %v7451_v25 = vrot.slane %v151_v15, %v1540_v16 }
  0x1b   :  { %1043 = vperm.xlu0 %6191, %v7184_v20  }
  0x1c   :  { %155 = vperm.xlu1 %6194, %v26_v22  }
  0x1d   :  { %6183 = vmatpush3.bf16.msra.mxu1 %v6116_v36  ;;  %6117 = vmatpush3.bf16.msra.mxu0 %v6116_v36  ;;  %v104_v36 = vld [vmem:[%s10578_s0 + $0x270] sm:$0xff] }
  0x1e   :  { %6176 = vmatprep.subr.bf16.mxu1 %v10586_v3  ;;  %6118 = vmatprep.subr.bf16.mxu0 %v10586_v3 }
  0x1f   :  { %1051 = vperm.xlu0 %6191, %v7205_v26  }
  0x20   :  { %6195 = vset.pattern.permute.xlu1 %v10592_v4 }
  0x21   :  { %1039 = vperm.xlu1 %6195, %v26_v22   ;;  %6184 = vmatpush3.bf16.msra.mxu1 %v6119_v41 }
  0x22   :  { %6120 = vmatpush3.bf16.msra.mxu0 %v6119_v41  ;;  %6121 = vmatprep.subr.bf16.mxu1 %v10586_v3 }
  0x23   :  { %1059 = vperm.xlu0 %6191, %v7220_v30   ;;  %6145 = vmatprep.subr.bf16.mxu0 %v10586_v3  ;;  %v7684_v3 = vld [vmem:[%s10578_s0 + $0x308] sm:$0xff] }
  0x25   :  { %1315 = vperm.xlu1 %6195, %v7226_v31  }
  0x27   :  { %1067 = vperm.xlu0 %6191, %v7239_v35  }
  0x29   :  { %6196 = vset.pattern.permute.xlu1 %v10590_v0 }
  0x2a   :  { %505 = vperm.xlu1 %6196, %v96_v37  }
  0x2b   :  { %1075 = vperm.xlu0 %6191, %v7257_v40  }
  0x2e   :  { %6197 = vset.pattern.permute.xlu1 %v10592_v4 }
  0x2f   :  { %1083 = vperm.xlu0 %6191, %v7266_v42   ;;  %1319 = vperm.xlu1 %6197, %v96_v37  }
  0x33   :  { %1091 = vperm.xlu0 %6191, %v7274_v43   ;;  %6198 = vset.pattern.permute.xlu1 %v10590_v0 }
  0x34   :  { %165 = vperm.xlu1 %6198, %v28_v44  }
  0x37   :  { %1099 = vperm.xlu0 %6191, %v7286_v45  }
  0x38   :  { %6199 = vset.pattern.permute.xlu1 %v10592_v4 }
  0x39   :  { %1047 = vperm.xlu1 %6199, %v28_v44  }
  0x3b   :  { %1107 = vperm.xlu0 %6191, %v7293_v46  }
  0x3d   :  { %1323 = vperm.xlu1 %6199, %v7298_v47  }
  0x3f   :  { %1115 = vperm.xlu0 %6191, %v7304_v48  }
  0x41   :  { %6200 = vset.pattern.permute.xlu1 %v10590_v0 }
  0x42   :  { %515 = vperm.xlu1 %6200, %v98_v49  }
  0x43   :  { %1123 = vperm.xlu0 %6191, %v7314_v50  }
  0x46   :  { %6201 = vset.pattern.permute.xlu1 %v10592_v4 }
  0x47   :  { %1131 = vperm.xlu0 %6191, %v7321_v51   ;;  %1327 = vperm.xlu1 %6201, %v98_v49  }
  0x4b   :  { %1139 = vperm.xlu0 %6191, %v7328_v52   ;;  %6202 = vset.pattern.permute.xlu1 %v10590_v0 }
  0x4c   :  { %175 = vperm.xlu1 %6202, %v30_v53  }
  0x4f   :  { %1147 = vperm.xlu0 %6191, %v7338_v54  }
  0x50   :  { %6203 = vset.pattern.permute.xlu1 %v10592_v4 }
  0x51   :  { %1055 = vperm.xlu1 %6203, %v30_v53  }
  0x53   :  { %1155 = vperm.xlu0 %6191, %v7345_v55  }
  0x55   :  { %1331 = vperm.xlu1 %6203, %v7350_v56  }
  0x57   :  { %1163 = vperm.xlu0 %6191, %v7356_v57  }
  0x59   :  { %6204 = vset.pattern.permute.xlu1 %v10590_v0 }
  0x5a   :  { %525 = vperm.xlu1 %6204, %v100_v58  }
  0x5b   :  { %1171 = vperm.xlu0 %6191, %v7366_v59  }
  0x5e   :  { %6205 = vset.pattern.permute.xlu1 %v10592_v4 }
  0x5f   :  { %1179 = vperm.xlu0 %6191, %v7373_v60   ;;  %1335 = vperm.xlu1 %6205, %v100_v58  }
  0x63   :  { %1187 = vperm.xlu0 %6191, %v7380_v61   ;;  %6206 = vset.pattern.permute.xlu1 %v10590_v0 }
  0x64   :  { %185 = vperm.xlu1 %6206, %v32_v62  }
  0x67   :  { %1195 = vperm.xlu0 %6191, %v7390_v63  }
  0x68   :  { %6207 = vset.pattern.permute.xlu1 %v10592_v4 }
  0x69   :  { %1063 = vperm.xlu1 %6207, %v32_v62  }
  0x6b   :  { %1203 = vperm.xlu0 %6191, %v7397_v1  }
  0x6d   :  { %1339 = vperm.xlu1 %6207, %v7402_v2  }
  0x6f   :  { %1211 = vperm.xlu0 %6191, %v7408_v5  }
  0x71   :  { %6208 = vset.pattern.permute.xlu1 %v10590_v0 }
  0x72   :  { %535 = vperm.xlu1 %6208, %v102_v6  }
  0x73   :  { %1219 = vperm.xlu0 %6191, %v7418_v7  }
  0x76   :  { %6209 = vset.pattern.permute.xlu1 %v10592_v4 }
  0x77   :  { %1227 = vperm.xlu0 %6191, %v73_v8   ;;  %1343 = vperm.xlu1 %6209, %v102_v6  }
  0x7b   :  { %1235 = vperm.xlu0 %6191, %v75_v10   ;;  %6210 = vset.pattern.permute.xlu1 %v10590_v0 }
  0x7c   :  { %195 = vperm.xlu1 %6210, %v34_v12  }
  0x7f   :  { %1243 = vperm.xlu0 %6191, %v77_v13  }
  0x80   :  { %6211 = vset.pattern.permute.xlu1 %v10592_v4 }
  0x81   :  { %v476_v19 = vpop.permute.xlu1 %475  ;;  %1071 = vperm.xlu1 %6211, %v34_v12   ;;  %v471_v22 = vpop.permute.xlu0 %470 }
  0x82   :  { %v845_v23 = vmul.f32 %v7440_v17, %v471_v22  ;;  %v846_v29 = vmul.f32 %v7440_v17, %v476_v19 }
  0x83   :  { %1251 = vperm.xlu0 %6191, %v79_v18  }
  0x84   :  { %v976_v28 = vadd.f32 %v7456_v27, %v845_v23  ;;  %v977_v39 = vadd.f32 %v7456_v27, %v846_v29 }
  0x85   :  { %1347 = vperm.xlu1 %6211, %v7449_v24  }
  0x86   :  { %v1296_v32 = vpop.permute.xlu1 %1295  ;;  %v1292_v33 = vpop.permute.xlu0 %1291 }
  0x87   :  { %v1605_v34 = vmul.f32 %v7451_v25, %v1292_v33  ;;  %6301 = vset.pattern.permute.xlu0 %v10590_v0  ;;  %v1606_v37 = vmul.f32 %v7451_v25, %v1296_v32 }
  0x88   :  { %500 = vperm.xlu0 %6301, %v7226_v31  }
  0x89   :  { %v1730_v38 = vadd.f32 %v1605_v34, %v976_v28  ;;  %6212 = vset.pattern.permute.xlu1 %v10590_v0  ;;  %v1731_v49 = vadd.f32 %v1606_v37, %v977_v39  ;;  %v105_v34 = vld [vmem:[%s10578_s0 + $0x278] sm:$0xff] }
  0x8a   :  { %545 = vperm.xlu1 %6212, %v104_v36   ;;  %v1300_v41 = vpop.permute.xlu0 %1299 }
  0x8b   :  { %v481_v44 = vpop.permute.xlu1 %480  ;;  %6309 = vtanh.f32 %v1730_v38  ;;  %v1607_v58 = vmul.f32 %v7451_v25, %v1300_v41  ;;  %v106_v41 = vld [vmem:[%s10578_s0 + $0x280] sm:$0xff] }
  0x8c   :  { %v847_v53 = vmul.f32 %v7440_v17, %v481_v44  ;;  %160 = vperm.xlu0 %6301, %v7184_v20   ;;  %6311 = vtanh.f32 %v1731_v49 }
  0x8e   :  { %v978_v62 = vadd.f32 %v7456_v27, %v847_v53  ;;  %6213 = vset.pattern.permute.xlu1 %v10592_v4  ;;  %v1304_v31 = vpop.permute.xlu0 %1303 }
  0x8f   :  { %v486_v6 = vpop.permute.xlu1 %485  ;;  %1351 = vperm.xlu1 %6213, %v104_v36   ;;  %v1608_v10 = vmul.f32 %v7451_v25, %v1304_v31 }
  0x90   :  { %v1732_v8 = vadd.f32 %v1607_v58, %v978_v62  ;;  %v848_v9 = vmul.f32 %v7440_v17, %v486_v6  ;;  %510 = vperm.xlu0 %6301, %v7298_v47  }
  0x92   :  { %6313 = vtanh.f32 %v1732_v8  ;;  %v979_v20 = vadd.f32 %v7456_v27, %v848_v9  ;;  %v1308_v12 = vpop.permute.xlu0 %1307 }
  0x93   :  { %v491_v13 = vpop.permute.xlu1 %490  ;;  %6214 = vset.pattern.permute.xlu1 %v10590_v0  ;;  %v1609_v16 = vmul.f32 %v7451_v25, %v1308_v12 }
  0x94   :  { %v1733_v14 = vadd.f32 %v1608_v10, %v979_v20  ;;  %v849_v15 = vmul.f32 %v7440_v17, %v491_v13  ;;  %170 = vperm.xlu0 %6301, %v7205_v26   ;;  %205 = vperm.xlu1 %6214, %v36_v11  }
  0x95   :  { %v6310_v47 = vpop.eup %6309 }
  0x96   :  { %6315 = vtanh.f32 %v1733_v14  ;;  %v980_v18 = vadd.f32 %v7456_v27, %v849_v15  ;;  %v1312_v19 = vpop.permute.xlu0 %1311  ;;  %5098 = vmatmul.mubr.f32.vlgmr.msra.gmra.mrb[0].mxu1 %v6310_v47  ;;  %v6312_v26 = vpop.eup %6311  ;;  %v108_v15 = vld [vmem:[%s10578_s0 + $0x290] sm:$0xff] }
  0x97   :  { %v496_v22 = vpop.permute.xlu1 %495  ;;  %v1610_v29 = vmul.f32 %v7451_v25, %v1312_v19  ;;  %5100 = vmatprep.mubr.msk.f32.mxu1 %vm7087_vm0, %v10588_v21 }
  0x98   :  { %v1734_v23 = vadd.f32 %v1609_v16, %v980_v18  ;;  %v850_v28 = vmul.f32 %v7440_v17, %v496_v22  ;;  %520 = vperm.xlu0 %6301, %v7350_v56   ;;  %6215 = vset.pattern.permute.xlu1 %v10592_v4 }
  0x99   :  { %1079 = vperm.xlu1 %6215, %v36_v11  }
  0x9a   :  { %6317 = vtanh.f32 %v1734_v23  ;;  %v981_v32 = vadd.f32 %v7456_v27, %v850_v28  ;;  %v7494_v33 = vpop.permute.xlu0 %1043  ;;  %5101 = vmatmul.mubr.f32.gmra.mrb[2].mxu1 %v6312_v26  ;;  %v40_v23 = vld [vmem:[%s10578_s0 + $0x70] sm:$0xff] }
  0x9b   :  { %v156_v36 = vpop.permute.xlu1 %155  ;;  %5103 = vmatprep.mubr.msk.f32.mxu1 %vm7087_vm0, %v10588_v21 }
  0x9c   :  { %v6314_v37 = vpop.eup %6313  ;;  %v1735_v56 = vadd.f32 %v1610_v29, %v981_v32  ;;  %180 = vperm.xlu0 %6301, %v7220_v30   ;;  %v782_v38 = vmul.f32 %v7440_v17, %v156_v36 }
  0x9d   :  { %1355 = vperm.xlu1 %6215, %v105_v34  }
  0x9e   :  { %6319 = vtanh.f32 %v1735_v56  ;;  %v7503_v39 = vpop.permute.xlu0 %1051  ;;  %5104 = vmatmul.mubr.f32.gmra.mrb[4].mxu1 %v6314_v37  ;;  %v913_v30 = vadd.f32 %v7456_v27, %v782_v38  ;;  %v110_v37 = vld [vmem:[%s10578_s0 + $0x2a0] sm:$0xff] }
  0x9f   :  { %5106 = vmatprep.mubr.msk.f32.mxu1 %vm7087_vm0, %v10588_v21 }
  0xa0   :  { %v6316_v44 = vpop.eup %6315  ;;  %530 = vperm.xlu0 %6301, %v7402_v2   ;;  %v1040_v49 = vpop.permute.xlu1 %1039 }
  0xa1   :  { %v1542_v53 = vmul.f32 %v7451_v25, %v1040_v49  ;;  %6216 = vset.pattern.permute.xlu1 %v10590_v0 }
  0xa2   :  { %555 = vperm.xlu1 %6216, %v106_v41   ;;  %v7514_v58 = vpop.permute.xlu0 %1059  ;;  %5107 = vmatmul.mubr.f32.gmra.mrb[6].mxu1 %v6316_v44 }
  0xa3   :  { %v1667_v62 = vadd.f32 %v1542_v53, %v913_v30  ;;  %5109 = vmatprep.mubr.msk.f32.mxu1 %vm7087_vm0, %v10588_v21  ;;  %v7631_v53 = vld [vmem:[%s10578_s0 + $0x2d8] sm:$0xff] }
  0xa4   :  { %v6318_v31 = vpop.eup %6317  ;;  %190 = vperm.xlu0 %6301, %v7239_v35   ;;  %v7517_v6 = vpop.permute.xlu1 %1315  ;;  %v38_v35 = vld [vmem:[%s10578_s0 + $0x60] sm:$0xff] }
  0xa5   :  { %6321 = vtanh.f32 %v1667_v62 }
  0xa6   :  { %6217 = vset.pattern.permute.xlu1 %v10592_v4  ;;  %v7522_v2 = vpop.permute.xlu0 %1067  ;;  %5110 = vmatmul.mubr.f32.gmra.mrb[8].mxu1 %v6318_v31 }
  0xa7   :  { %1359 = vperm.xlu1 %6217, %v106_v41   ;;  %5112 = vmatprep.mubr.msk.f32.mxu1 %vm7087_vm0, %v10588_v21  ;;  %v7613_v41 = vld [vmem:[%s10578_s0 + $0x2c8] sm:$0xff] }
  0xa8   :  { %v6320_v8 = vpop.eup %6319  ;;  %540 = vperm.xlu0 %6301, %v7449_v24  }
  0xa9   :  { %v7527_v9 = vpop.permute.xlu1 %505 }
  0xaa   :  { %v7532_v10 = vpop.permute.xlu0 %1075  ;;  %5113 = vmatmul.mubr.f32.gmra.mrb[10].mxu1 %v6320_v8 }
  0xab   :  { %6218 = vset.pattern.permute.xlu1 %v10590_v0  ;;  %5115 = vmatprep.mubr.msk.f32.mxu1 %vm7087_vm0, %v10588_v21 }
  0xac   :  { %200 = vperm.xlu0 %6301, %v7257_v40   ;;  %215 = vperm.xlu1 %6218, %v38_v35   ;;  %v107_v40 = vld [vmem:[%s10578_s0 + $0x288] sm:$0xff] }
  0xae   :  { %v7538_v24 = vpop.permute.xlu1 %1319  ;;  %v7540_v11 = vpop.permute.xlu0 %1083 }
  0xaf   :  { %v6322_v20 = vpop.eup %6321 }
  0xb0   :  { %550 = vperm.xlu0 %6301, %v105_v34   ;;  %6219 = vset.pattern.permute.xlu1 %v10592_v4 }
  0xb1   :  { %4909 = vmatmul.mubr.f32.vlgmr.msra.gmra.mrb[0].mxu0 %v6322_v20  ;;  %1087 = vperm.xlu1 %6219, %v38_v35  }
  0xb2   :  { %v7543_v12 = vpop.permute.xlu0 %1091  ;;  %4911 = vmatprep.mubr.msk.f32.mxu0 %vm7087_vm0, %v10588_v21 }
  0xb3   :  { %v7550_v13 = vpop.permute.xlu1 %165 }
  0xb4   :  { %210 = vperm.xlu0 %6301, %v7266_v42   ;;  %v109_v42 = vld [vmem:[%s10578_s0 + $0x298] sm:$0xff] }
  0xb5   :  { %1363 = vperm.xlu1 %6219, %v107_v40  }
  0xb6   :  { %v7553_v14 = vpop.permute.xlu0 %1099 }
  0xb8   :  { %560 = vperm.xlu0 %6301, %v107_v40   ;;  %v7558_v16 = vpop.permute.xlu1 %1047  ;;  %v112_v40 = vld [vmem:[%s10578_s0 + $0x2b0] sm:$0xff] }
  0xb9   :  { %6220 = vset.pattern.permute.xlu1 %v10590_v0 }
  0xba   :  { %565 = vperm.xlu1 %6220, %v108_v15   ;;  %v7561_v47 = vpop.permute.xlu0 %1107 }
  0xbc   :  { %220 = vperm.xlu0 %6301, %v7274_v43   ;;  %v7564_v18 = vpop.permute.xlu1 %1323  ;;  %v111_v43 = vld [vmem:[%s10578_s0 + $0x2a8] sm:$0xff] }
  0xbe   :  { %6221 = vset.pattern.permute.xlu1 %v10592_v4  ;;  %v7570_v19 = vpop.permute.xlu0 %1115 }
  0xbf   :  { %1367 = vperm.xlu1 %6221, %v108_v15  }
  0xc0   :  { %570 = vperm.xlu0 %6301, %v109_v42  }
  0xc1   :  { %v7572_v22 = vpop.permute.xlu1 %515 }
  0xc2   :  { %v7577_v28 = vpop.permute.xlu0 %1123 }
  0xc3   :  { %6222 = vset.pattern.permute.xlu1 %v10590_v0 }
  0xc4   :  { %230 = vperm.xlu0 %6301, %v7286_v45   ;;  %225 = vperm.xlu1 %6222, %v40_v23   ;;  %v113_v45 = vld [vmem:[%s10578_s0 + $0x2b8] sm:$0xff] }
  0xc6   :  { %v7584_v29 = vpop.permute.xlu1 %1327  ;;  %v7586_v26 = vpop.permute.xlu0 %1131 }
  0xc8   :  { %580 = vperm.xlu0 %6301, %v111_v43   ;;  %6223 = vset.pattern.permute.xlu1 %v10592_v4 }
  0xc9   :  { %1095 = vperm.xlu1 %6223, %v40_v23   ;;  %v7666_v23 = vld [vmem:[%s10578_s0 + $0x2f8] sm:$0xff] }
  0xca   :  { %v7589_v32 = vpop.permute.xlu0 %1139 }
  0xcb   :  { %v7591_v34 = vpop.permute.xlu1 %175 }
  0xcc   :  { %240 = vperm.xlu0 %6301, %v7293_v46  }
  0xcd   :  { %1371 = vperm.xlu1 %6223, %v109_v42  }
  0xce   :  { %v7597_v36 = vpop.permute.xlu0 %1147 }
  0xcf   :  { %10594 = vst [vmem:[#allocation2_spill] sm:$0xff] %v7597_v36 }
  0xd0   :  { %590 = vperm.xlu0 %6301, %v113_v45   ;;  %v7602_v56 = vpop.permute.xlu1 %1055 }
  0xd1   :  { %6224 = vset.pattern.permute.xlu1 %v10590_v0 }
  0xd2   :  { %575 = vperm.xlu1 %6224, %v110_v37   ;;  %v7605_v38 = vpop.permute.xlu0 %1155 }
  0xd3   :  { %10595 = vst [vmem:[#allocation3_spill] sm:$0xff] %v7605_v38 }
  0xd4   :  { %250 = vperm.xlu0 %6301, %v7304_v48   ;;  %v7608_v46 = vpop.permute.xlu1 %1331  ;;  %v42_v48 = vld [vmem:[%s10578_s0 + $0x80] sm:$0xff] }
  0xd6   :  { %6225 = vset.pattern.permute.xlu1 %v10592_v4  ;;  %v7616_v44 = vpop.permute.xlu0 %1163 }
  0xd7   :  { %10596 = vst [vmem:[#allocation4_spill] sm:$0xff] %v7616_v44  ;;  %1375 = vperm.xlu1 %6225, %v110_v37  }
  0xd8   :  { %600 = vperm.xlu0 %6301, %v7613_v41  }
  0xd9   :  { %v7619_v49 = vpop.permute.xlu1 %525 }
  0xda   :  { %v7624_v30 = vpop.permute.xlu0 %1171 }
  0xdb   :  { %10597 = vst [vmem:[#allocation5_spill] sm:$0xff] %v7624_v30  ;;  %6226 = vset.pattern.permute.xlu1 %v10590_v0  ;;  %v1611_v30 = vmul.f32 %v7451_v25, %v7517_v6 }
  0xdc   :  { %260 = vperm.xlu0 %6301, %v7314_v50   ;;  %235 = vperm.xlu1 %6226, %v42_v48   ;;  %v7647_v50 = vld [vmem:[%s10578_s0 + $0x2e8] sm:$0xff] }
  0xde   :  { %v7633_v62 = vpop.permute.xlu1 %1335  ;;  %v7635_v31 = vpop.permute.xlu0 %1179 }
  0xdf   :  { %10598 = vst [vmem:[#allocation6_spill] sm:$0xff] %v7635_v31  ;;  %v46_v31 = vld [vmem:[%s10578_s0 + $0xa0] sm:$0xff] }
  0xe0   :  { %610 = vperm.xlu0 %6301, %v7631_v53   ;;  %6227 = vset.pattern.permute.xlu1 %v10592_v4 }
  0xe1   :  { %1103 = vperm.xlu1 %6227, %v42_v48  }
  0xe2   :  { %v7639_v8 = vpop.permute.xlu0 %1187 }
  0xe3   :  { %10599 = vst [vmem:[#allocation7_spill] sm:$0xff] %v7639_v8  ;;  %v7641_v35 = vpop.permute.xlu1 %185 }
  0xe4   :  { %270 = vperm.xlu0 %6301, %v7321_v51  }
  0xe5   :  { %1379 = vperm.xlu1 %6227, %v111_v43  }
  0xe6   :  { %v7649_v20 = vpop.permute.xlu0 %1195 }
  0xe7   :  { %10600 = vst [vmem:[#allocation8_spill] sm:$0xff] %v7649_v20 }
  0xe8   :  { %620 = vperm.xlu0 %6301, %v7647_v50   ;;  %v7655_v15 = vpop.permute.xlu1 %1063 }
  0xe9   :  { %6228 = vset.pattern.permute.xlu1 %v10590_v0 }
  0xea   :  { %585 = vperm.xlu1 %6228, %v112_v40   ;;  %v7658_v51 = vpop.permute.xlu0 %1203 }
  0xeb   :  { %10601 = vst [vmem:[#allocation9_spill] sm:$0xff] %v7658_v51  ;;  %v852_v51 = vmul.f32 %v7440_v17, %v7527_v9 }
  0xec   :  { %280 = vperm.xlu0 %6301, %v7328_v52   ;;  %v7661_v42 = vpop.permute.xlu1 %1339  ;;  %v44_v52 = vld [vmem:[%s10578_s0 + $0x90] sm:$0xff] }
  0xed   :  { %v983_v9 = vadd.f32 %v7456_v27, %v852_v51 }
  0xee   :  { %6229 = vset.pattern.permute.xlu1 %v10592_v4  ;;  %v7669_v43 = vpop.permute.xlu0 %1211 }
  0xef   :  { %10602 = vst [vmem:[#allocation10_spill] sm:$0xff] %v7669_v43  ;;  %1383 = vperm.xlu1 %6229, %v112_v40  }
  0xf0   :  { %630 = vperm.xlu0 %6301, %v7666_v23  }
  0xf1   :  { %v7672_v37 = vpop.permute.xlu1 %535 }
  0xf2   :  { %v7677_v48 = vpop.permute.xlu0 %1219 }
  0xf3   :  { %10603 = vst [vmem:[#allocation11_spill] sm:$0xff] %v7677_v48  ;;  %6230 = vset.pattern.permute.xlu1 %v10590_v0 }
  0xf4   :  { %290 = vperm.xlu0 %6301, %v7338_v54   ;;  %245 = vperm.xlu1 %6230, %v44_v52   ;;  %v7700_v54 = vld [vmem:[%s10578_s0 + $0x318] sm:$0xff] }
  0xf6   :  { %v7686_v40 = vpop.permute.xlu1 %1343  ;;  %v7688_v21 = vpop.permute.xlu0 %1227 }
  0xf7   :  { %10604 = vst [vmem:[#allocation12_spill] sm:$0xff] %v7688_v21  ;;  %v114_v21 = vld [vmem:[%s10578_s0 + $0x2c0] sm:$0xff] }
  0xf8   :  { %640 = vperm.xlu0 %6301, %v7684_v3   ;;  %6231 = vset.pattern.permute.xlu1 %v10592_v4  ;;  %v10607_v4 = vmov 0  }
  0xf9   :  { %1111 = vperm.xlu1 %6231, %v44_v52  }
  0xfa   :  { %v7692_v48 = vpop.permute.xlu0 %1235 }
  0xfb   :  { %10605 = vst [vmem:[#allocation13_spill] sm:$0xff] %v7692_v48  ;;  %v7694_v0 = vpop.permute.xlu1 %195  ;;  %v10609_v48 = vmov 1  }
  0xfc   :  { %300 = vperm.xlu0 %6301, %v7345_v55  }
  0xfd   :  { %1387 = vperm.xlu1 %6231, %v113_v45  }
  0xfe   :  { %v7702_v43 = vpop.permute.xlu0 %1243 }
  0xff   :  { %10606 = vst [vmem:[#allocation14_spill] sm:$0xff] %v7702_v43  ;;  %v127_v43 = vld [vmem:[%s10578_s0 + $0x328] sm:$0xff] }
 0x100   :  { %650 = vperm.xlu0 %6301, %v7700_v54   ;;  %v7708_v52 = vpop.permute.xlu1 %1071 }
 0x101   :  { %6232 = vset.pattern.permute.xlu1 %v10607_v4 }
 0x102   :  { %595 = vperm.xlu1 %6232, %v114_v21   ;;  %v7711_v55 = vpop.permute.xlu0 %1251 }
 0x103   :  { %10608 = vst [vmem:[#allocation15_spill] sm:$0xff] %v7711_v55  ;;  %v1612_v55 = vmul.f32 %v7451_v25, %v7538_v24  ;;  %v1543_v24 = vmul.f32 %v7451_v25, %v7494_v33 }
 0x104   :  { %310 = vperm.xlu0 %6301, %v7356_v57   ;;  %v7714_v45 = vpop.permute.xlu1 %1347 }
 0x105   :  { %v1737_v6 = vadd.f32 %v1612_v55, %v983_v9  ;;  %v1614_v9 = vmul.f32 %v7451_v25, %v7584_v29 }
 0x106   :  { %6233 = vset.pattern.permute.xlu1 %v10609_v48 }
 0x107   :  { %v501_v20 = vpop.permute.xlu0 %500  ;;  %1391 = vperm.xlu1 %6233, %v114_v21   ;;  %v784_v21 = vmul.f32 %v7440_v17, %v7550_v13  ;;  %v129_v13 = vld [vmem:[%s10578_s0 + $0x338] sm:$0xff] }
 0x108   :  { %v851_v8 = vmul.f32 %v7440_v17, %v501_v20  ;;  %660 = vperm.xlu0 %6301, %v127_v43  }
 0x109   :  { %v7725_v57 = vpop.permute.xlu1 %545  ;;  %v915_v33 = vadd.f32 %v7456_v27, %v784_v21 }
 0x10a   :  { %v982_v44 = vadd.f32 %v7456_v27, %v851_v8  ;;  %v1544_v8 = vmul.f32 %v7451_v25, %v7558_v16 }
 0x10b   :  { %v161_v20 = vpop.permute.xlu0 %160  ;;  %6234 = vset.pattern.permute.xlu1 %v10607_v4 }
 0x10c   :  { %v1736_v43 = vadd.f32 %v1611_v30, %v982_v44  ;;  %v783_v38 = vmul.f32 %v7440_v17, %v161_v20  ;;  %320 = vperm.xlu0 %6301, %v7366_v59   ;;  %255 = vperm.xlu1 %6234, %v46_v31   ;;  %v854_v44 = vmul.f32 %v7440_v17, %v7572_v22 }
 0x10d   :  { %v1669_v16 = vadd.f32 %v1544_v8, %v915_v33  ;;  %v786_v20 = vmul.f32 %v7440_v17, %v7591_v34  ;;  %v131_v34 = vld [vmem:[%s10578_s0 + $0x348] sm:$0xff] }
 0x10e   :  { %6323 = vtanh.f32 %v1736_v43  ;;  %v914_v51 = vadd.f32 %v7456_v27, %v783_v38  ;;  %v7747_v36 = vpop.permute.xlu1 %1351  ;;  %v1613_v38 = vmul.f32 %v7451_v25, %v7564_v18  ;;  %v985_v22 = vadd.f32 %v7456_v27, %v854_v44 }
 0x10f   :  { %v511_v59 = vpop.permute.xlu0 %510  ;;  %6325 = vtanh.f32 %v1737_v6  ;;  %v1545_v6 = vmul.f32 %v7451_v25, %v7503_v39  ;;  %v917_v39 = vadd.f32 %v7456_v27, %v786_v20 }
 0x110   :  { %v1668_v30 = vadd.f32 %v1543_v24, %v914_v51  ;;  %v853_v55 = vmul.f32 %v7440_v17, %v511_v59  ;;  %670 = vperm.xlu0 %6301, %v129_v13   ;;  %6235 = vset.pattern.permute.xlu1 %v10609_v48  ;;  %v1739_v18 = vadd.f32 %v1614_v9, %v985_v22  ;;  %v10610_v9 = vmov 0.0  }
 0x111   :  { %1119 = vperm.xlu1 %6235, %v46_v31   ;;  %v1546_v31 = vmul.f32 %v7451_v25, %v7602_v56 }
 0x112   :  { %6327 = vtanh.f32 %v1668_v30  ;;  %v984_v21 = vadd.f32 %v7456_v27, %v853_v55  ;;  %v856_v30 = vmul.f32 %v7440_v17, %v7619_v49  ;;  %v1615_v55 = vmul.f32 %v7451_v25, %v7608_v46 }
 0x113   :  { %v171_v24 = vpop.permute.xlu0 %170  ;;  %v7762_v43 = vpop.permute.xlu1 %205  ;;  %6329 = vtanh.f32 %v1669_v16  ;;  %v1671_v59 = vadd.f32 %v1546_v31, %v917_v39  ;;  %v788_v49 = vmul.f32 %v7440_v17, %v7641_v35  ;;  %v133_v35 = vld [vmem:[%s10578_s0 + $0x358] sm:$0xff] }
 0x114   :  { %v1738_v8 = vadd.f32 %v1613_v38, %v984_v21  ;;  %v785_v29 = vmul.f32 %v7440_v17, %v171_v24  ;;  %330 = vperm.xlu0 %6301, %v7373_v60   ;;  %v116_v60 = vld [vmem:[%s10578_s0 + $0x2d0] sm:$0xff]  ;;  %v1616_v21 = vmul.f32 %v7451_v25, %v7633_v62  ;;  %v1547_v24 = vmul.f32 %v7451_v25, %v7514_v58 }
 0x115   :  { %1395 = vperm.xlu1 %6235, %v7613_v41   ;;  %v1548_v62 = vmul.f32 %v7451_v25, %v7655_v15  ;;  %v919_v31 = vadd.f32 %v7456_v27, %v788_v49 }
 0x116   :  { %6331 = vtanh.f32 %v1738_v8  ;;  %v916_v13 = vadd.f32 %v7456_v27, %v785_v29  ;;  %v987_v29 = vadd.f32 %v7456_v27, %v856_v30  ;;  %v1618_v30 = vmul.f32 %v7451_v25, %v7686_v40 }
 0x117   :  { %v521_v51 = vpop.permute.xlu0 %520  ;;  %6333 = vtanh.f32 %v1739_v18  ;;  %v1550_v40 = vmul.f32 %v7451_v25, %v7708_v52 }
 0x118   :  { %v6324_v33 = vpop.eup %6323  ;;  %v1670_v44 = vadd.f32 %v1545_v6, %v916_v13  ;;  %v855_v56 = vmul.f32 %v7440_v17, %v521_v51  ;;  %680 = vperm.xlu0 %6301, %v131_v34   ;;  %v7780_v41 = vpop.permute.xlu1 %1079  ;;  %v1741_v18 = vadd.f32 %v1616_v21, %v987_v29  ;;  %v1673_v51 = vadd.f32 %v1548_v62, %v919_v31 }
 0x119   :  { %5116 = vmatmul.mubr.f32.gmra.mrb[12].mxu1 %v6324_v33  ;;  %6236 = vset.pattern.permute.xlu1 %v10607_v4  ;;  %v6326_v38 = vpop.eup %6325  ;;  %v858_v33 = vmul.f32 %v7440_v17, %v7672_v37  ;;  %v1620_v31 = vmul.f32 %v7451_v25, %v7747_v36 }
 0x11a   :  { %6335 = vtanh.f32 %v1670_v44  ;;  %v986_v16 = vadd.f32 %v7456_v27, %v855_v56  ;;  %605 = vperm.xlu1 %6236, %v116_v60   ;;  %5118 = vmatprep.mubr.msk.f32.mxu1 %vm7087_vm0, %v10610_v9  ;;  %v1617_v56 = vmul.f32 %v7451_v25, %v7661_v42 }
 0x11b   :  { %v181_v22 = vpop.permute.xlu0 %180  ;;  %6337 = vtanh.f32 %v1671_v59 }
 0x11c   :  { %v6328_v20 = vpop.eup %6327  ;;  %v1740_v46 = vadd.f32 %v1615_v55, %v986_v16  ;;  %v787_v6 = vmul.f32 %v7440_v17, %v181_v22  ;;  %340 = vperm.xlu0 %6301, %v7380_v61   ;;  %v7798_v8 = vpop.permute.xlu1 %1355  ;;  %v790_v55 = vmul.f32 %v7440_v17, %v7694_v0  ;;  %v989_v22 = vadd.f32 %v7456_v27, %v858_v33  ;;  %v135_v0 = vld [vmem:[%s10578_s0 + $0x368] sm:$0xff] }
 0x11d   :  { %4912 = vmatmul.mubr.f32.gmra.mrb[2].mxu0 %v6328_v20  ;;  %5119 = vmatmul.mubr.f32.gmra.mrb[14].mxu1 %v6326_v38  ;;  %v6330_v61 = vpop.eup %6329  ;;  %v1549_v38 = vmul.f32 %v7451_v25, %v7522_v2 }
 0x11e   :  { %6339 = vtanh.f32 %v1740_v46  ;;  %v918_v58 = vadd.f32 %v7456_v27, %v787_v6  ;;  %6237 = vset.pattern.permute.xlu1 %v10609_v48  ;;  %4914 = vmatprep.mubr.msk.f32.mxu0 %vm7087_vm0, %v10610_v9  ;;  %v921_v52 = vadd.f32 %v7456_v27, %v790_v55 }
 0x11f   :  { %v531_v34 = vpop.permute.xlu0 %530  ;;  %1399 = vperm.xlu1 %6237, %v116_v60   ;;  %5121 = vmatprep.mubr.msk.f32.mxu1 %vm7087_vm0, %v10610_v9  ;;  %v48_v60 = vld [vmem:[%s10578_s0 + $0xb0] sm:$0xff] }
 0x120   :  { %v6332_v15 = vpop.eup %6331  ;;  %v1672_v13 = vadd.f32 %v1547_v24, %v918_v58  ;;  %v857_v39 = vmul.f32 %v7440_v17, %v531_v34  ;;  %690 = vperm.xlu0 %6301, %v133_v35   ;;  %v1743_v24 = vadd.f32 %v1618_v30, %v989_v22  ;;  %v1675_v35 = vadd.f32 %v1550_v40, %v921_v52 }
 0x121   :  { %4915 = vmatmul.mubr.f32.gmra.mrb[4].mxu0 %v6330_v61  ;;  %5122 = vmatmul.mubr.f32.gmra.mrb[16].mxu1 %v6332_v15  ;;  %v7816_v44 = vpop.permute.xlu1 %555  ;;  %v6334_v37 = vpop.eup %6333  ;;  %v860_v58 = vmul.f32 %v7440_v17, %v7725_v57  ;;  %v1619_v61 = vmul.f32 %v7451_v25, %v7714_v45  ;;  %v792_v34 = vmul.f32 %v7440_v17, %v7762_v43 }
 0x122   :  { %6341 = vtanh.f32 %v1672_v13  ;;  %v988_v59 = vadd.f32 %v7456_v27, %v857_v39  ;;  %4917 = vmatprep.mubr.msk.f32.mxu0 %vm7087_vm0, %v10610_v9  ;;  %5124 = vmatprep.mubr.msk.f32.mxu1 %vm7087_vm0, %v10610_v9  ;;  %v1551_v13 = vmul.f32 %v7451_v25, %v7532_v10  ;;  %v1552_v43 = vmul.f32 %v7451_v25, %v7780_v41 }
 0x123   :  { %6343 = vtanh.f32 %v1741_v18  ;;  %v191_v16 = vpop.permute.xlu0 %190  ;;  %6238 = vset.pattern.permute.xlu1 %v10607_v4  ;;  %v991_v36 = vadd.f32 %v7456_v27, %v860_v58 }
 0x124   :  { %v6336_v42 = vpop.eup %6335  ;;  %v1742_v21 = vadd.f32 %v1617_v56, %v988_v59  ;;  %v789_v49 = vmul.f32 %v7440_v17, %v191_v16  ;;  %350 = vperm.xlu0 %6301, %v7390_v63   ;;  %265 = vperm.xlu1 %6238, %v48_v60   ;;  %6345 = vtanh.f32 %v1673_v51  ;;  %v923_v59 = vadd.f32 %v7456_v27, %v792_v34 }
 0x125   :  { %4918 = vmatmul.mubr.f32.gmra.mrb[6].mxu0 %v6336_v42  ;;  %5125 = vmatmul.mubr.f32.gmra.mrb[18].mxu1 %v6334_v37  ;;  %v6338_v63 = vpop.eup %6337  ;;  %v1745_v56 = vadd.f32 %v1620_v31, %v991_v36 }
 0x126   :  { %6347 = vtanh.f32 %v1742_v21  ;;  %v920_v2 = vadd.f32 %v7456_v27, %v789_v49  ;;  %v7844_v20 = vpop.permute.xlu1 %1359  ;;  %4920 = vmatprep.mubr.msk.f32.mxu0 %vm7087_vm0, %v10610_v9  ;;  %5127 = vmatprep.mubr.msk.f32.mxu1 %vm7087_vm0, %v10610_v9  ;;  %v1677_v42 = vadd.f32 %v1552_v43, %v923_v59  ;;  %v1621_v21 = vmul.f32 %v7451_v25, %v7798_v8 }
 0x127   :  { %v541_v46 = vpop.permute.xlu0 %540  ;;  %v1622_v22 = vmul.f32 %v7451_v25, %v7844_v20  ;;  %v1553_v8 = vmul.f32 %v7451_v25, %v7540_v11 }
 0x128   :  { %v6340_v6 = vpop.eup %6339  ;;  %v1674_v29 = vadd.f32 %v1549_v38, %v920_v2  ;;  %v859_v62 = vmul.f32 %v7440_v17, %v541_v46  ;;  %700 = vperm.xlu0 %6301, %v135_v0   ;;  %6239 = vset.pattern.permute.xlu1 %v10609_v48  ;;  %v862_v38 = vmul.f32 %v7440_v17, %v7816_v44 }
 0x129   :  { %1127 = vperm.xlu1 %6239, %v48_v60   ;;  %4921 = vmatmul.mubr.f32.gmra.mrb[8].mxu0 %v6338_v63  ;;  %v137_v60 = vld [vmem:[%s10578_s0 + $0x378] sm:$0xff] }
 0x12a   :  { %6349 = vtanh.f32 %v1674_v29  ;;  %v990_v18 = vadd.f32 %v7456_v27, %v859_v62  ;;  %5128 = vmatmul.mubr.f32.gmra.mrb[20].mxu1 %v6340_v6  ;;  %4923 = vmatprep.mubr.msk.f32.mxu0 %vm7087_vm0, %v10610_v9  ;;  %v993_v52 = vadd.f32 %v7456_v27, %v862_v38  ;;  %v139_v6 = vld [vmem:[%s10578_s0 + $0x388] sm:$0xff]  ;;  %v7059_v38 = vld [vmem:[%s10578_s0 + $0x178] sm:$0xff] }
 0x12b   :  { %6351 = vtanh.f32 %v1743_v24  ;;  %v201_v57 = vpop.permute.xlu0 %200  ;;  %v216_v15 = vpop.permute.xlu1 %215  ;;  %5130 = vmatprep.mubr.msk.f32.mxu1 %vm7087_vm0, %v10610_v9 }
 0x12c   :  { %v6342_v45 = vpop.eup %6341  ;;  %v1744_v39 = vadd.f32 %v1619_v61, %v990_v18  ;;  %v791_v51 = vmul.f32 %v7440_v17, %v201_v57  ;;  %360 = vperm.xlu0 %6301, %v7397_v1   ;;  %6353 = vtanh.f32 %v1675_v35  ;;  %v794_v40 = vmul.f32 %v7440_v17, %v216_v15  ;;  %v50_v57 = vld [vmem:[%s10578_s0 + $0xc0] sm:$0xff] }
 0x12d   :  { %v6344_v33 = vpop.eup %6343  ;;  %1403 = vperm.xlu1 %6239, %v7631_v53   ;;  %4924 = vmatmul.mubr.f32.gmra.mrb[10].mxu0 %v6342_v45  ;;  %v118_v53 = vld [vmem:[%s10578_s0 + $0x2e0] sm:$0xff] }
 0x12e   :  { %6355 = vtanh.f32 %v1744_v39  ;;  %v922_v10 = vadd.f32 %v7456_v27, %v791_v51  ;;  %5131 = vmatmul.mubr.f32.gmra.mrb[22].mxu1 %v6344_v33  ;;  %4926 = vmatprep.mubr.msk.f32.mxu0 %vm7087_vm0, %v10610_v9  ;;  %v6346_v1 = vpop.eup %6345  ;;  %v925_v62 = vadd.f32 %v7456_v27, %v794_v40  ;;  %v1555_v33 = vmul.f32 %v7451_v25, %v7543_v12 }
 0x12f   :  { %v551_v37 = vpop.permute.xlu0 %550  ;;  %5133 = vmatprep.mubr.msk.f32.mxu1 %vm7087_vm0, %v10610_v9 }
 0x130   :  { %v6348_v41 = vpop.eup %6347  ;;  %v1676_v30 = vadd.f32 %v1551_v13, %v922_v10  ;;  %v861_v55 = vmul.f32 %v7440_v17, %v551_v37  ;;  %710 = vperm.xlu0 %6301, %v137_v60   ;;  %v1088_v16 = vpop.permute.xlu1 %1087  ;;  %v141_v10 = vld [vmem:[%s10578_s0 + $0x398] sm:$0xff] }
 0x131   :  { %6240 = vset.pattern.permute.xlu1 %v10607_v4  ;;  %4927 = vmatmul.mubr.f32.gmra.mrb[12].mxu0 %v6346_v1  ;;  %v1554_v46 = vmul.f32 %v7451_v25, %v1088_v16 }
 0x132   :  { %6357 = vtanh.f32 %v1676_v30  ;;  %v992_v49 = vadd.f32 %v7456_v27, %v861_v55  ;;  %5134 = vmatmul.mubr.f32.gmra.mrb[24].mxu1 %v6348_v41  ;;  %615 = vperm.xlu1 %6240, %v118_v53  }
 0x133   :  { %6359 = vtanh.f32 %v1745_v56  ;;  %v211_v0 = vpop.permute.xlu0 %210  ;;  %4929 = vmatprep.mubr.msk.f32.mxu0 %vm7087_vm0, %v10610_v9  ;;  %5136 = vmatprep.mubr.msk.f32.mxu1 %vm7087_vm0, %v10610_v9  ;;  %v1679_v31 = vadd.f32 %v1554_v46, %v925_v62 }
 0x134   :  { %v6350_v44 = vpop.eup %6349  ;;  %v1746_v2 = vadd.f32 %v1621_v21, %v992_v49  ;;  %v793_v63 = vmul.f32 %v7440_v17, %v211_v0  ;;  %370 = vperm.xlu0 %6301, %v7408_v5   ;;  %v1364_v24 = vpop.permute.xlu1 %1363  ;;  %6361 = vtanh.f32 %v1677_v42  ;;  %v1747_v5 = vadd.f32 %v1622_v22, %v993_v52  ;;  %v143_v22 = vld [vmem:[%s10578_s0 + $0x3a8] sm:$0xff] }
 0x135   :  { %v6352_v20 = vpop.eup %6351  ;;  %4930 = vmatmul.mubr.f32.gmra.mrb[14].mxu0 %v6350_v44  ;;  %v1623_v15 = vmul.f32 %v7451_v25, %v1364_v24  ;;  %v120_v44 = vld [vmem:[%s10578_s0 + $0x2f0] sm:$0xff] }
 0x136   :  { %6363 = vtanh.f32 %v1746_v2  ;;  %v924_v11 = vadd.f32 %v7456_v27, %v793_v63  ;;  %5137 = vmatmul.mubr.f32.gmra.mrb[26].mxu1 %v6352_v20  ;;  %6241 = vset.pattern.permute.xlu1 %v10609_v48  ;;  %v6354_v29 = vpop.eup %6353  ;;  %v7969_v2 = vld [vmem:[%s10581_s2] ss:$0 sm:$0xff] }
 0x137   :  { %v561_v35 = vpop.permute.xlu0 %560  ;;  %1407 = vperm.xlu1 %6241, %v118_v53   ;;  %4932 = vmatprep.mubr.msk.f32.mxu0 %vm7087_vm0, %v10610_v9 }
 0x138   :  { %v6356_v58 = vpop.eup %6355  ;;  %v1678_v61 = vadd.f32 %v1553_v8, %v924_v11  ;;  %v863_v18 = vmul.f32 %v7440_v17, %v561_v35  ;;  %720 = vperm.xlu0 %6301, %v139_v6   ;;  %5139 = vmatprep.mubr.msk.f32.mxu1 %vm7087_vm0, %v10610_v9  ;;  %v1557_v8 = vmul.f32 %v7451_v25, %v7553_v14 }
 0x139   :  { %4933 = vmatmul.mubr.f32.gmra.mrb[16].mxu0 %v6354_v29  ;;  %v566_v34 = vpop.permute.xlu1 %565  ;;  %v7061_v29 = vld [vmem:[%s10578_s0 + $0x188] sm:$0xff] }
 0x13a   :  { %6365 = vtanh.f32 %v1678_v61  ;;  %v994_v45 = vadd.f32 %v7456_v27, %v863_v18  ;;  %5140 = vmatmul.mubr.f32.gmra.mrb[28].mxu1 %v6356_v58  ;;  %4935 = vmatprep.mubr.msk.f32.mxu0 %vm7087_vm0, %v10610_v9  ;;  %v864_v13 = vmul.f32 %v7440_v17, %v566_v34  ;;  %v145_v58 = vld [vmem:[%s10578_s0 + $0x3b8] sm:$0xff] }
 0x13b   :  { %6367 = vtanh.f32 %v1747_v5  ;;  %v221_v39 = vpop.permute.xlu0 %220  ;;  %6242 = vset.pattern.permute.xlu1 %v10607_v4  ;;  %5142 = vmatprep.mubr.msk.f32.mxu1 %vm7087_vm0, %v10610_v9 }
 0x13c   :  { %v6358_v51 = vpop.eup %6357  ;;  %v1748_v36 = vadd.f32 %v1623_v15, %v994_v45  ;;  %v795_v43 = vmul.f32 %v7440_v17, %v221_v39  ;;  %380 = vperm.xlu0 %6301, %v7418_v7   ;;  %275 = vperm.xlu1 %6242, %v50_v57   ;;  %6369 = vtanh.f32 %v1679_v31  ;;  %v995_v59 = vadd.f32 %v7456_v27, %v864_v13  ;;  %v52_v31 = vld [vmem:[%s10578_s0 + $0xd0] sm:$0xff]  ;;  %v7062_v15 = vld [vmem:[%s10578_s0 + $0x198] sm:$0xff]  ;;  %v147_v45 = vld [vmem:[%s10578_s0 + $0x3c8] sm:$0xff] }
 0x13d   :  { %v6360_v60 = vpop.eup %6359  ;;  %4936 = vmatmul.mubr.f32.gmra.mrb[18].mxu0 %v6358_v51 }
 0x13e   :  { %6371 = vtanh.f32 %v1748_v36  ;;  %v926_v1 = vadd.f32 %v7456_v27, %v795_v43  ;;  %5143 = vmatmul.mubr.f32.gmra.mrb[30].mxu1 %v6360_v60  ;;  %v1368_v56 = vpop.permute.xlu1 %1367  ;;  %4938 = vmatprep.mubr.msk.f32.mxu0 %vm7087_vm0, %v10610_v9  ;;  %v6362_v12 = vpop.eup %6361 }
 0x13f   :  { %v1624_v7 = vmul.f32 %v7451_v25, %v1368_v56  ;;  %v571_v37 = vpop.permute.xlu0 %570  ;;  %5145 = vmatprep.mubr.msk.f32.mxu1 %vm7087_vm0, %v10610_v9 }
 0x140   :  { %v6364_v53 = vpop.eup %6363  ;;  %v1680_v41 = vadd.f32 %v1555_v33, %v926_v1  ;;  %730 = vperm.xlu0 %6301, %v141_v10   ;;  %6243 = vset.pattern.permute.xlu1 %v10609_v48  ;;  %v865_v0 = vmul.f32 %v7440_v17, %v571_v37  ;;  %v1559_v37 = vmul.f32 %v7451_v25, %v7561_v47  ;;  %v81_v47 = vld [vmem:[%s10578_s0 + $0x1b8] sm:$0xff] }
 0x141   :  { %v1749_v30 = vadd.f32 %v1624_v7, %v995_v59  ;;  %1135 = vperm.xlu1 %6243, %v50_v57   ;;  %4939 = vmatmul.mubr.f32.gmra.mrb[20].mxu0 %v6362_v12  ;;  %v7063_v12 = vld [vmem:[%s10578_s0 + $0x1a8] sm:$0xff]  ;;  %v149_v7 = vld [vmem:[%s10578_s0 + $0x3d8] sm:$0xff] }
 0x142   :  { %6373 = vtanh.f32 %v1680_v41  ;;  %5146 = vmatmul.mubr.f32.gmra.mrb[32].mxu1 %v6364_v53  ;;  %4941 = vmatprep.mubr.msk.f32.mxu0 %vm7087_vm0, %v10610_v9  ;;  %v996_v14 = vadd.f32 %v7969_v2, %v865_v0 }
 0x143   :  { %6375 = vtanh.f32 %v1749_v30  ;;  %v231_v27 = vpop.permute.xlu0 %230  ;;  %v226_v55 = vpop.permute.xlu1 %225  ;;  %5148 = vmatprep.mubr.msk.f32.mxu1 %vm7087_vm0, %v10610_v9  ;;  %v122_v30 = vld [vmem:[%s10578_s0 + $0x300] sm:$0xff] }
 0x144   :  { %v6366_v16 = vpop.eup %6365  ;;  %v797_v42 = vmul.f32 %v7440_v17, %v231_v27  ;;  %390 = vperm.xlu0 %6301, %v7059_v38   ;;  %v796_v49 = vmul.f32 %v7440_v17, %v226_v55 }
 0x145   :  { %v6368_v21 = vpop.eup %6367  ;;  %1411 = vperm.xlu1 %6243, %v7647_v50   ;;  %4942 = vmatmul.mubr.f32.gmra.mrb[22].mxu0 %v6366_v16 }
 0x146   :  { %5149 = vmatmul.mubr.f32.gmra.mrb[34].mxu1 %v6368_v21  ;;  %4944 = vmatprep.mubr.msk.f32.mxu0 %vm7087_vm0, %v10610_v9  ;;  %v6370_v40 = vpop.eup %6369  ;;  %v928_v63 = vadd.f32 %v7969_v2, %v797_v42  ;;  %v927_v20 = vadd.f32 %v7969_v2, %v796_v49 }
 0x147   :  { %5151 = vmatprep.mubr.msk.f32.mxu1 %vm7087_vm0, %v10610_v9  ;;  %v581_v57 = vpop.permute.xlu0 %580 }
 0x148   :  { %v6372_v50 = vpop.eup %6371  ;;  %740 = vperm.xlu0 %6301, %v143_v22   ;;  %v1096_v24 = vpop.permute.xlu1 %1095  ;;  %v1682_v11 = vadd.f32 %v1557_v8, %v928_v63  ;;  %v867_v53 = vmul.f32 %v7440_v17, %v581_v57 }
 0x149   :  { %v1556_v52 = vmul.f32 %v7451_v25, %v1096_v24  ;;  %6244 = vset.pattern.permute.xlu1 %v10607_v4  ;;  %4945 = vmatmul.mubr.f32.gmra.mrb[24].mxu0 %v6370_v40 }
 0x14a   :  { %5152 = vmatmul.mubr.f32.gmra.mrb[36].mxu1 %v6372_v50  ;;  %625 = vperm.xlu1 %6244, %v120_v44   ;;  %v998_v16 = vadd.f32 %v7969_v2, %v867_v53 }
 0x14b   :  { %v1681_v46 = vadd.f32 %v1556_v52, %v927_v20  ;;  %5154 = vmatprep.mubr.msk.f32.mxu1 %vm7087_vm0, %v10610_v9  ;;  %4947 = vmatprep.mubr.msk.f32.mxu0 %vm7087_vm0, %v10610_v9  ;;  %v241_v60 = vpop.permute.xlu0 %240 }
 0x14c   :  { %v6374_v6 = vpop.eup %6373  ;;  %400 = vperm.xlu0 %6301, %v7061_v29   ;;  %v1372_v5 = vpop.permute.xlu1 %1371  ;;  %v799_v1 = vmul.f32 %v7440_v17, %v241_v60 }
 0x14d   :  { %v6376_v62 = vpop.eup %6375  ;;  %6377 = vtanh.f32 %v1681_v46  ;;  %v1625_v35 = vmul.f32 %v7451_v25, %v1372_v5  ;;  %4948 = vmatmul.mubr.f32.gmra.mrb[26].mxu0 %v6374_v6 }
 0x14e   :  { %6245 = vset.pattern.permute.xlu1 %v10609_v48  ;;  %5155 = vmatmul.mubr.f32.gmra.mrb[38].mxu1 %v6376_v62  ;;  %6379 = vtanh.f32 %v1682_v11  ;;  %v930_v41 = vadd.f32 %v7969_v2, %v799_v1 }
 0x14f   :  { %v1750_v61 = vadd.f32 %v1625_v35, %v996_v14  ;;  %1415 = vperm.xlu1 %6245, %v120_v44   ;;  %4950 = vmatprep.mubr.msk.f32.mxu0 %vm7087_vm0, %v10610_v9  ;;  %v54_v44 = vld [vmem:[%s10578_s0 + $0xe0] sm:$0xff]  ;;  %v591_v24 = vpop.permute.xlu0 %590 }
 0x150   :  { %750 = vperm.xlu0 %6301, %v145_v58   ;;  %5157 = vmatprep.mubr.msk.f32.mxu1 %vm7087_vm0, %v10610_v9  ;;  %v1684_v42 = vadd.f32 %v1559_v37, %v930_v41 }
 0x151   :  { %6381 = vtanh.f32 %v1750_v61  ;;  %v576_v18 = vpop.permute.xlu1 %575 }
 0x152   :  { %v866_v34 = vmul.f32 %v7440_v17, %v576_v18 }
 0x153   :  { %6246 = vset.pattern.permute.xlu1 %v10607_v4  ;;  %v251_v62 = vpop.permute.xlu0 %250 }
 0x154   :  { %410 = vperm.xlu0 %6301, %v7062_v15   ;;  %285 = vperm.xlu1 %6246, %v52_v31   ;;  %v997_v51 = vadd.f32 %v7969_v2, %v866_v34  ;;  %v801_v61 = vmul.f32 %v7440_v17, %v251_v62  ;;  %v1561_v15 = vmul.f32 %v7451_v25, %v7570_v19 }
 0x156   :  { %v1376_v13 = vpop.permute.xlu1 %1375 }
 0x157   :  { %v6378_v39 = vpop.eup %6377  ;;  %v1626_v33 = vmul.f32 %v7451_v25, %v1376_v13  ;;  %v932_v13 = vadd.f32 %v7969_v2, %v801_v61 }
 0x158   :  { %760 = vperm.xlu0 %6301, %v147_v45   ;;  %6247 = vset.pattern.permute.xlu1 %v10609_v48  ;;  %v6380_v43 = vpop.eup %6379  ;;  %v869_v45 = vmul.f32 %v7440_v17, %v591_v24  ;;  %v1563_v24 = vmul.f32 %v7451_v25, %v7577_v28 }
 0x159   :  { %v1751_v36 = vadd.f32 %v1626_v33, %v997_v51  ;;  %4951 = vmatmul.mubr.f32.gmra.mrb[28].mxu0 %v6378_v39  ;;  %1143 = vperm.xlu1 %6247, %v52_v31   ;;  %v1686_v60 = vadd.f32 %v1561_v15, %v932_v13 }
 0x15a   :  { %4953 = vmatprep.mubr.msk.f32.mxu0 %vm7087_vm0, %v10610_v9  ;;  %v1000_v19 = vadd.f32 %v7969_v2, %v869_v45 }
 0x15b   :  { %v6382_v10 = vpop.eup %6381  ;;  %6383 = vtanh.f32 %v1751_v36  ;;  %v236_v56 = vpop.permute.xlu1 %235 }
 0x15c   :  { %420 = vperm.xlu0 %6301, %v7063_v12   ;;  %5158 = vmatmul.mubr.f32.gmra.mrb[40].mxu1 %v6382_v10  ;;  %v798_v59 = vmul.f32 %v7440_v17, %v236_v56 }
 0x15d   :  { %1419 = vperm.xlu1 %6247, %v7666_v23   ;;  %5160 = vmatprep.mubr.msk.f32.mxu1 %vm7087_vm0, %v10610_v9 }
 0x15e   :  { %4954 = vmatmul.mubr.f32.gmra.mrb[30].mxu0 %v6380_v43  ;;  %v929_v27 = vadd.f32 %v7969_v2, %v798_v59 }
 0x15f   :  { %4956 = vmatprep.mubr.msk.f32.mxu0 %vm7087_vm0, %v10610_v9 }
 0x160   :  { %v1104_v23 = vpop.permute.xlu1 %1103  ;;  %770 = vperm.xlu0 %6301, %v149_v7  }
 0x161   :  { %v1558_v55 = vmul.f32 %v7451_v25, %v1104_v23  ;;  %6248 = vset.pattern.permute.xlu1 %v10607_v4 }
 0x162   :  { %635 = vperm.xlu1 %6248, %v122_v30  }
 0x163   :  { %v1683_v38 = vadd.f32 %v1558_v55, %v929_v27  ;;  %v601_v27 = vpop.permute.xlu0 %600 }
 0x164   :  { %v1380_v21 = vpop.permute.xlu1 %1379  ;;  %430 = vperm.xlu0 %6301, %v81_v47  }
 0x165   :  { %v6384_v49 = vpop.eup %6383  ;;  %6385 = vtanh.f32 %v1683_v38  ;;  %v1627_v22 = vmul.f32 %v7451_v25, %v1380_v21 }
 0x166   :  { %6249 = vset.pattern.permute.xlu1 %v10609_v48  ;;  %5161 = vmatmul.mubr.f32.gmra.mrb[42].mxu1 %v6384_v49  ;;  %6387 = vtanh.f32 %v1684_v42 }
 0x167   :  { %v1752_v40 = vadd.f32 %v1627_v22, %v998_v16  ;;  %1423 = vperm.xlu1 %6249, %v122_v30   ;;  %5163 = vmatprep.mubr.msk.f32.mxu1 %vm7087_vm0, %v10610_v9  ;;  %v56_v30 = vld [vmem:[%s10578_s0 + $0xf0] sm:$0xff] }
 0x168   :  { %6306 = vset.pattern.permute.xlu0 %v10609_v48 }
 0x169   :  { %6389 = vtanh.f32 %v1752_v40  ;;  %v586_v0 = vpop.permute.xlu1 %585  ;;  %1259 = vperm.xlu0 %6306, %v81_v47   ;;  %v8043_v50 = vpop.f32.mrb[0].mxu1 }
 0x16a   :  { %v868_v8 = vmul.f32 %v7440_v17, %v586_v0  ;;  %v5099_v63 = vpop.f32.mrb[1].mxu1  ;;  %v261_v40 = vpop.permute.xlu0 %260 }
 0x16b   :  { %6250 = vset.pattern.permute.xlu1 %v10607_v4 }
 0x16c   :  { %295 = vperm.xlu1 %6250, %v54_v44   ;;  %v999_v46 = vadd.f32 %v7969_v2, %v868_v8 }
 0x16d   :  { %v8047_v20 = vpop.f32.mrb[2].mxu1 }
 0x16e   :  { %v1384_v52 = vpop.permute.xlu1 %1383  ;;  %v5102_v6 = vpop.f32.mrb[3].mxu1 }
 0x16f   :  { %v6386_v14 = vpop.eup %6385  ;;  %v1628_v11 = vmul.f32 %v7451_v25, %v1384_v52  ;;  %v871_v52 = vmul.f32 %v7440_v17, %v601_v27  ;;  %v611_v45 = vpop.permute.xlu0 %610 }
 0x170   :  { %6251 = vset.pattern.permute.xlu1 %v10609_v48  ;;  %4957 = vmatmul.mubr.f32.gmra.mrb[32].mxu0 %v6386_v14  ;;  %v6388_v29 = vpop.eup %6387 }
 0x171   :  { %v1753_v5 = vadd.f32 %v1628_v11, %v999_v46  ;;  %1151 = vperm.xlu1 %6251, %v54_v44   ;;  %4959 = vmatprep.mubr.msk.f32.mxu0 %vm7087_vm0, %v10610_v9  ;;  %v8054_v35 = vpop.f32.mrb[4].mxu1  ;;  %v803_v44 = vmul.f32 %v7440_v17, %v261_v40  ;;  %v126_v46 = vld [vmem:[%s10578_s0 + $0x320] sm:$0xff]  ;;  %v60_v40 = vld [vmem:[%s10578_s0 + $0x110] sm:$0xff] }
 0x172   :  { %v5105_v18 = vpop.f32.mrb[5].mxu1 }
 0x173   :  { %v6390_v58 = vpop.eup %6389  ;;  %6391 = vtanh.f32 %v1753_v5  ;;  %v246_v31 = vpop.permute.xlu1 %245  ;;  %v934_v14 = vadd.f32 %v7969_v2, %v803_v44 }
 0x174   :  { %5164 = vmatmul.mubr.f32.gmra.mrb[44].mxu1 %v6390_v58  ;;  %4960 = vmatmul.mubr.f32.gmra.mrb[34].mxu0 %v6388_v29  ;;  %v800_v34 = vmul.f32 %v7440_v17, %v246_v31  ;;  %v1002_v29 = vadd.f32 %v7969_v2, %v871_v52 }
 0x175   :  { %1427 = vperm.xlu1 %6251, %v7684_v3   ;;  %5166 = vmatprep.mubr.msk.f32.mxu1 %vm7087_vm0, %v10610_v9  ;;  %v8061_v57 = vpop.f32.mrb[6].mxu1  ;;  %v124_v3 = vld [vmem:[%s10578_s0 + $0x310] sm:$0xff]  ;;  %v1688_v5 = vadd.f32 %v1563_v24, %v934_v14 }
 0x176   :  { %4962 = vmatprep.mubr.msk.f32.mxu0 %vm7087_vm0, %v10610_v9  ;;  %v5108_v39 = vpop.f32.mrb[7].mxu1  ;;  %v931_v33 = vadd.f32 %v7969_v2, %v800_v34  ;;  %v58_v34 = vld [vmem:[%s10578_s0 + $0x100] sm:$0xff] }
 0x178   :  { %v1112_v51 = vpop.permute.xlu1 %1111 }
 0x179   :  { %v1560_v36 = vmul.f32 %v7451_v25, %v1112_v51  ;;  %6252 = vset.pattern.permute.xlu1 %v10607_v4  ;;  %v8075_v43 = vpop.f32.mrb[8].mxu1 }
 0x17a   :  { %645 = vperm.xlu1 %6252, %v124_v3   ;;  %v5111_v1 = vpop.f32.mrb[9].mxu1 }
 0x17b   :  { %v1685_v10 = vadd.f32 %v1560_v36, %v931_v33 }
 0x17c   :  { %v1388_v56 = vpop.permute.xlu1 %1387 }
 0x17d   :  { %v6392_v12 = vpop.eup %6391  ;;  %6393 = vtanh.f32 %v1685_v10  ;;  %v1629_v59 = vmul.f32 %v7451_v25, %v1388_v56  ;;  %v8079_v7 = vpop.f32.mrb[10].mxu1 }
 0x17e   :  { %10611 = vst [vmem:[#allocation16_spill] sm:$0xff] %v8079_v7  ;;  %6253 = vset.pattern.permute.xlu1 %v10609_v48  ;;  %5167 = vmatmul.mubr.f32.gmra.mrb[46].mxu1 %v6392_v12  ;;  %6395 = vtanh.f32 %v1686_v60  ;;  %v5114_v53 = vpop.f32.mrb[11].mxu1  ;;  %v7064_v12 = vld [vmem:[%s10578_s0 + $0x328] sm:$0xff] }
 0x17f   :  { %v1754_v37 = vadd.f32 %v1629_v59, %v1000_v19  ;;  %1431 = vperm.xlu1 %6253, %v124_v3   ;;  %5169 = vmatprep.mubr.msk.f32.mxu1 %vm7087_vm0, %v10610_v9  ;;  %v271_v19 = vpop.permute.xlu0 %270  ;;  %v1565_v59 = vmul.f32 %v7451_v25, %v7586_v26 }
 0x180   :  { %v805_v10 = vmul.f32 %v7440_v17, %v271_v19  ;;  %v62_v19 = vld [vmem:[%s10578_s0 + $0x120] sm:$0xff] }
 0x181   :  { %6397 = vtanh.f32 %v1754_v37  ;;  %v596_v41 = vpop.permute.xlu1 %595  ;;  %v873_v37 = vmul.f32 %v7440_v17, %v611_v45 }
 0x182   :  { %v870_v23 = vmul.f32 %v7440_v17, %v596_v41  ;;  %v936_v53 = vadd.f32 %v7969_v2, %v805_v10  ;;  %v128_v41 = vld [vmem:[%s10578_s0 + $0x330] sm:$0xff] }
 0x183   :  { %6254 = vset.pattern.permute.xlu1 %v10607_v4  ;;  %v621_v44 = vpop.permute.xlu0 %620 }
 0x184   :  { %v8089_v55 = vpop.f32.mrb[0].mxu0  ;;  %305 = vperm.xlu1 %6254, %v56_v30   ;;  %v1001_v38 = vadd.f32 %v7969_v2, %v870_v23 }
 0x185   :  { %v4910_v47 = vpop.f32.mrb[1].mxu0 }
 0x186   :  { %v1392_v16 = vpop.permute.xlu1 %1391  ;;  %v1004_v47 = vadd.f32 %v7969_v2, %v873_v37 }
 0x187   :  { %v6394_v42 = vpop.eup %6393  ;;  %v1630_v21 = vmul.f32 %v7451_v25, %v1392_v16  ;;  %v1690_v16 = vadd.f32 %v1565_v59, %v936_v53 }
 0x188   :  { %6255 = vset.pattern.permute.xlu1 %v10609_v48  ;;  %4963 = vmatmul.mubr.f32.gmra.mrb[36].mxu0 %v6394_v42  ;;  %v6396_v49 = vpop.eup %6395 }
 0x189   :  { %v1755_v22 = vadd.f32 %v1630_v21, %v1001_v38  ;;  %1159 = vperm.xlu1 %6255, %v56_v30   ;;  %4965 = vmatprep.mubr.msk.f32.mxu0 %vm7087_vm0, %v10610_v9 }
 0x18b   :  { %v6398_v0 = vpop.eup %6397  ;;  %6399 = vtanh.f32 %v1755_v22  ;;  %v256_v8 = vpop.permute.xlu1 %255 }
 0x18c   :  { %5170 = vmatmul.mubr.f32.gmra.mrb[48].mxu1 %v6398_v0  ;;  %4966 = vmatmul.mubr.f32.gmra.mrb[38].mxu0 %v6396_v49  ;;  %v802_v63 = vmul.f32 %v7440_v17, %v256_v8 }
 0x18d   :  { %1435 = vperm.xlu1 %6255, %v7700_v54   ;;  %5172 = vmatprep.mubr.msk.f32.mxu1 %vm7087_vm0, %v10610_v9 }
 0x18e   :  { %4968 = vmatprep.mubr.msk.f32.mxu0 %vm7087_vm0, %v10610_v9  ;;  %v933_v54 = vadd.f32 %v7969_v2, %v802_v63 }
 0x190   :  { %v1120_v6 = vpop.permute.xlu1 %1119 }
 0x191   :  { %v1562_v11 = vmul.f32 %v7451_v25, %v1120_v6  ;;  %6256 = vset.pattern.permute.xlu1 %v10607_v4  ;;  %v281_v6 = vpop.permute.xlu0 %280 }
 0x192   :  { %655 = vperm.xlu1 %6256, %v126_v46  }
 0x193   :  { %v1687_v28 = vadd.f32 %v1562_v11, %v933_v54  ;;  %v807_v11 = vmul.f32 %v7440_v17, %v281_v6 }
 0x194   :  { %v1396_v62 = vpop.permute.xlu1 %1395 }
 0x195   :  { %v6400_v58 = vpop.eup %6399  ;;  %6401 = vtanh.f32 %v1687_v28  ;;  %v1631_v61 = vmul.f32 %v7451_v25, %v1396_v62  ;;  %v7065_v28 = vld [vmem:[%s10578_s0 + $0x338] sm:$0xff]  ;;  %v1567_v62 = vmul.f32 %v7451_v25, %v7589_v32  ;;  %v631_v10 = vpop.permute.xlu0 %630 }
 0x196   :  { %6257 = vset.pattern.permute.xlu1 %v10609_v48  ;;  %5173 = vmatmul.mubr.f32.gmra.mrb[50].mxu1 %v6400_v58  ;;  %6403 = vtanh.f32 %v1688_v5  ;;  %v875_v58 = vmul.f32 %v7440_v17, %v621_v44  ;;  %v4435_v44 = vld [vmem:[%s10579_s3 + $0x80] sm:$0xff] }
 0x197   :  { %v1756_v18 = vadd.f32 %v1631_v61, %v1002_v29  ;;  %1439 = vperm.xlu1 %6257, %v126_v46   ;;  %5175 = vmatprep.mubr.msk.f32.mxu1 %vm7087_vm0, %v10610_v9  ;;  %v938_v61 = vadd.f32 %v7969_v2, %v807_v11  ;;  %v10613_v11 = vmov 0.0|0.0  }
 0x198   :  { %v1006_v45 = vadd.f32 %v7969_v2, %v875_v58 }
 0x199   :  { %6405 = vtanh.f32 %v1756_v18  ;;  %v606_v31 = vpop.permute.xlu1 %605  ;;  %v130_v18 = vld [vmem:[%s10578_s0 + $0x340] sm:$0xff] }
 0x19a   :  { %v872_v15 = vmul.f32 %v7440_v17, %v606_v31 }
 0x19b   :  { %6258 = vset.pattern.permute.xlu1 %v10607_v4 }
 0x19c   :  { %315 = vperm.xlu1 %6258, %v58_v34   ;;  %v1003_v3 = vadd.f32 %v7969_v2, %v872_v15 }
 0x19e   :  { %v1400_v13 = vpop.permute.xlu1 %1399 }
 0x19f   :  { %v6402_v39 = vpop.eup %6401  ;;  %v1632_v51 = vmul.f32 %v7451_v25, %v1400_v13  ;;  %v1692_v13 = vadd.f32 %v1567_v62, %v938_v61 }
 0x1a0   :  { %6259 = vset.pattern.permute.xlu1 %v10609_v48  ;;  %4969 = vmatmul.mubr.f32.gmra.mrb[40].mxu0 %v6402_v39  ;;  %v6404_v33 = vpop.eup %6403 }
 0x1a1   :  { %v1757_v36 = vadd.f32 %v1632_v51, %v1003_v3  ;;  %1167 = vperm.xlu1 %6259, %v58_v34   ;;  %4971 = vmatprep.mubr.msk.f32.mxu0 %vm7087_vm0, %v10610_v9 }
 0x1a3   :  { %v6406_v60 = vpop.eup %6405  ;;  %6407 = vtanh.f32 %v1757_v36  ;;  %v266_v1 = vpop.permute.xlu1 %265 }
 0x1a4   :  { %5176 = vmatmul.mubr.f32.gmra.mrb[52].mxu1 %v6406_v60  ;;  %4972 = vmatmul.mubr.f32.gmra.mrb[42].mxu0 %v6404_v33  ;;  %v804_v56 = vmul.f32 %v7440_v17, %v266_v1 }
 0x1a5   :  { %1443 = vperm.xlu1 %6259, %v7064_v12   ;;  %5178 = vmatprep.mubr.msk.f32.mxu1 %vm7087_vm0, %v10610_v9 }
 0x1a6   :  { %4974 = vmatprep.mubr.msk.f32.mxu0 %vm7087_vm0, %v10610_v9  ;;  %v935_v23 = vadd.f32 %v7969_v2, %v804_v56 }
 0x1a8   :  { %v1128_v30 = vpop.permute.xlu1 %1127 }
 0x1a9   :  { %v1564_v27 = vmul.f32 %v7451_v25, %v1128_v30  ;;  %6260 = vset.pattern.permute.xlu1 %v10607_v4  ;;  %v291_v30 = vpop.permute.xlu0 %290 }
 0x1aa   :  { %665 = vperm.xlu1 %6260, %v128_v41  }
 0x1ab   :  { %v1689_v26 = vadd.f32 %v1564_v27, %v935_v23  ;;  %v809_v27 = vmul.f32 %v7440_v17, %v291_v30 }
 0x1ac   :  { %v1404_v42 = vpop.permute.xlu1 %1403 }
 0x1ad   :  { %v6408_v38 = vpop.eup %6407  ;;  %6409 = vtanh.f32 %v1689_v26  ;;  %v1633_v21 = vmul.f32 %v7451_v25, %v1404_v42  ;;  %v877_v26 = vmul.f32 %v7440_v17, %v631_v10  ;;  %v132_v42 = vld [vmem:[%s10578_s0 + $0x350] sm:$0xff]  ;;  %v641_v58 = vpop.permute.xlu0 %640 }
 0x1ae   :  { %6261 = vset.pattern.permute.xlu1 %v10609_v48  ;;  %5179 = vmatmul.mubr.f32.gmra.mrb[54].mxu1 %v6408_v38  ;;  %6411 = vtanh.f32 %v1690_v16  ;;  %v7066_v16 = vld [vmem:[%s10578_s0 + $0x348] sm:$0xff]  ;;  %v10612_v38 = vld [vmem:[#allocation2_spill] sm:$0xff]  ;;  %v879_v10 = vmul.f32 %v7440_v17, %v641_v58 }
 0x1af   :  { %v1758_v49 = vadd.f32 %v1633_v21, %v1004_v47  ;;  %1447 = vperm.xlu1 %6261, %v128_v41   ;;  %5181 = vmatprep.mubr.msk.f32.mxu1 %vm7087_vm0, %v10610_v9  ;;  %v1569_v21 = vmul.f32 %v7451_v25, %v10612_v38 }
 0x1b1   :  { %6413 = vtanh.f32 %v1758_v49  ;;  %v616_v22 = vpop.permute.xlu1 %615  ;;  %v940_v49 = vadd.f32 %v7969_v2, %v809_v27 }
 0x1b2   :  { %v874_v0 = vmul.f32 %v7440_v17, %v616_v22 }
 0x1b3   :  { %6262 = vset.pattern.permute.xlu1 %v10607_v4 }
 0x1b4   :  { %325 = vperm.xlu1 %6262, %v60_v40   ;;  %v1005_v24 = vadd.f32 %v7969_v2, %v874_v0 }
 0x1b6   :  { %v1408_v8 = vpop.permute.xlu1 %1407 }
 0x1b7   :  { %v6410_v63 = vpop.eup %6409  ;;  %v1634_v52 = vmul.f32 %v7451_v25, %v1408_v8  ;;  %v4436_v8 = vld [vmem:[%s10579_s3 + $0x88] sm:$0xff] }
 0x1b8   :  { %6263 = vset.pattern.permute.xlu1 %v10609_v48  ;;  %4975 = vmatmul.mubr.f32.gmra.mrb[44].mxu0 %v6410_v63  ;;  %v6412_v14 = vpop.eup %6411  ;;  %v6122_v63 = vpack.c.bf16 %v4436_v8, %v4435_v44  ;;  %v4437_v44 = vld [vmem:[%s10579_s3 + $0x90] sm:$0xff]  ;;  %v4438_v8 = vld [vmem:[%s10579_s3 + $0x98] sm:$0xff] }
 0x1b9   :  { %v1759_v46 = vadd.f32 %v1634_v52, %v1005_v24  ;;  %1175 = vperm.xlu1 %6263, %v60_v40   ;;  %4977 = vmatprep.mubr.msk.f32.mxu0 %vm7087_vm0, %v10610_v9  ;;  %v1008_v24 = vadd.f32 %v7969_v2, %v877_v26 }
 0x1ba   :  { %6123 = vmatpush3.bf16.msra.mxu1 %v6122_v63  ;;  %v6125_v63 = vpack.c.bf16 %v4438_v8, %v4437_v44 }
 0x1bb   :  { %v6414_v54 = vpop.eup %6413  ;;  %6415 = vtanh.f32 %v1759_v46  ;;  %v276_v29 = vpop.permute.xlu1 %275  ;;  %6124 = vmatprep.subr.bf16.mxu1 %v10613_v11 }
 0x1bc   :  { %5182 = vmatmul.mubr.f32.gmra.mrb[56].mxu1 %v6414_v54  ;;  %4978 = vmatmul.mubr.f32.gmra.mrb[46].mxu0 %v6412_v14  ;;  %v806_v5 = vmul.f32 %v7440_v17, %v276_v29  ;;  %v1694_v14 = vadd.f32 %v1569_v21, %v940_v49 }
 0x1bd   :  { %1451 = vperm.xlu1 %6263, %v7065_v28   ;;  %5184 = vmatprep.mubr.msk.f32.mxu1 %vm7087_vm0, %v10610_v9  ;;  %v64_v28 = vld [vmem:[%s10578_s0 + $0x130] sm:$0xff] }
 0x1be   :  { %4980 = vmatprep.mubr.msk.f32.mxu0 %vm7087_vm0, %v10610_v9  ;;  %v937_v34 = vadd.f32 %v7969_v2, %v806_v5  ;;  %6126 = vmatpush3.bf16.msra.mxu1 %v6125_v63 }
 0x1bf   :  { %6127 = vmatprep.subr.bf16.mxu1 %v10613_v11 }
 0x1c0   :  { %v1136_v31 = vpop.permute.xlu1 %1135 }
 0x1c1   :  { %v1566_v15 = vmul.f32 %v7451_v25, %v1136_v31  ;;  %6264 = vset.pattern.permute.xlu1 %v10607_v4 }
 0x1c2   :  { %675 = vperm.xlu1 %6264, %v130_v18  }
 0x1c3   :  { %v1691_v32 = vadd.f32 %v1566_v15, %v937_v34 }
 0x1c4   :  { %v1412_v39 = vpop.permute.xlu1 %1411 }
 0x1c5   :  { %v6416_v3 = vpop.eup %6415  ;;  %6417 = vtanh.f32 %v1691_v32  ;;  %v1635_v51 = vmul.f32 %v7451_v25, %v1412_v39  ;;  %v301_v39 = vpop.permute.xlu0 %300 }
 0x1c6   :  { %6265 = vset.pattern.permute.xlu1 %v10609_v48  ;;  %5185 = vmatmul.mubr.f32.gmra.mrb[58].mxu1 %v6416_v3  ;;  %6419 = vtanh.f32 %v1692_v13 }
 0x1c7   :  { %v1760_v33 = vadd.f32 %v1635_v51, %v1006_v45  ;;  %1455 = vperm.xlu1 %6265, %v130_v18   ;;  %5187 = vmatprep.mubr.msk.f32.mxu1 %vm7087_vm0, %v10610_v9  ;;  %v811_v51 = vmul.f32 %v7440_v17, %v301_v39 }
 0x1c9   :  { %6421 = vtanh.f32 %v1760_v33  ;;  %v626_v36 = vpop.permute.xlu1 %625 }
 0x1ca   :  { %v876_v60 = vmul.f32 %v7440_v17, %v626_v36 }
 0x1cb   :  { %6266 = vset.pattern.permute.xlu1 %v10607_v4 }
 0x1cc   :  { %335 = vperm.xlu1 %6266, %v62_v19   ;;  %v1007_v12 = vadd.f32 %v7969_v2, %v876_v60  ;;  %v134_v60 = vld [vmem:[%s10578_s0 + $0x360] sm:$0xff] }
 0x1ce   :  { %v1416_v1 = vpop.permute.xlu1 %1415 }
 0x1cf   :  { %v6418_v56 = vpop.eup %6417  ;;  %v1636_v59 = vmul.f32 %v7451_v25, %v1416_v1 }
 0x1d0   :  { %6267 = vset.pattern.permute.xlu1 %v10609_v48  ;;  %4981 = vmatmul.mubr.f32.gmra.mrb[48].mxu0 %v6418_v56  ;;  %v6420_v37 = vpop.eup %6419 }
 0x1d1   :  { %v1761_v53 = vadd.f32 %v1636_v59, %v1007_v12  ;;  %1183 = vperm.xlu1 %6267, %v62_v19   ;;  %4983 = vmatprep.mubr.msk.f32.mxu0 %vm7087_vm0, %v10610_v9  ;;  %v7067_v19 = vld [vmem:[%s10578_s0 + $0x358] sm:$0xff]  ;;  %v10616_v12 = vld [vmem:[#allocation3_spill] sm:$0xff] }
 0x1d2   :  { %v1571_v59 = vmul.f32 %v7451_v25, %v10616_v12 }
 0x1d3   :  { %v6422_v41 = vpop.eup %6421  ;;  %6423 = vtanh.f32 %v1761_v53  ;;  %v286_v23 = vpop.permute.xlu1 %285 }
 0x1d4   :  { %5188 = vmatmul.mubr.f32.gmra.mrb[60].mxu1 %v6422_v41  ;;  %4984 = vmatmul.mubr.f32.gmra.mrb[50].mxu0 %v6420_v37  ;;  %v808_v47 = vmul.f32 %v7440_v17, %v286_v23  ;;  %v942_v37 = vadd.f32 %v7969_v2, %v811_v51 }
 0x1d5   :  { %1459 = vperm.xlu1 %6267, %v7066_v16   ;;  %5190 = vmatprep.mubr.msk.f32.mxu1 %vm7087_vm0, %v10610_v9  ;;  %v1010_v16 = vadd.f32 %v7969_v2, %v879_v10 }
 0x1d6   :  { %4986 = vmatprep.mubr.msk.f32.mxu0 %vm7087_vm0, %v10610_v9  ;;  %v939_v40 = vadd.f32 %v7969_v2, %v808_v47  ;;  %v1696_v21 = vadd.f32 %v1571_v59, %v942_v37 }
 0x1d8   :  { %v1144_v22 = vpop.permute.xlu1 %1143 }
 0x1d9   :  { %v1568_v0 = vmul.f32 %v7451_v25, %v1144_v22  ;;  %6268 = vset.pattern.permute.xlu1 %v10607_v4 }
 0x1da   :  { %685 = vperm.xlu1 %6268, %v132_v42  }
 0x1db   :  { %v1693_v52 = vadd.f32 %v1568_v0, %v939_v40 }
 0x1dc   :  { %v1420_v46 = vpop.permute.xlu1 %1419 }
 0x1dd   :  { %v6424_v6 = vpop.eup %6423  ;;  %6425 = vtanh.f32 %v1693_v52  ;;  %v1637_v54 = vmul.f32 %v7451_v25, %v1420_v46 }
 0x1de   :  { %6269 = vset.pattern.permute.xlu1 %v10609_v48  ;;  %5191 = vmatmul.mubr.f32.gmra.mrb[62].mxu1 %v6424_v6  ;;  %6427 = vtanh.f32 %v1694_v14 }
 0x1df   :  { %v1762_v29 = vadd.f32 %v1637_v54, %v1008_v24  ;;  %1463 = vperm.xlu1 %6269, %v132_v42   ;;  %5193 = vmatprep.mubr.msk.f32.mxu1 %vm7087_vm0, %v10610_v9  ;;  %v66_v54 = vld [vmem:[%s10578_s0 + $0x140] sm:$0xff] }
 0x1e1   :  { %6429 = vtanh.f32 %v1762_v29  ;;  %v636_v5 = vpop.permute.xlu1 %635 }
 0x1e2   :  { %v878_v62 = vmul.f32 %v7440_v17, %v636_v5 }
 0x1e3   :  { %6270 = vset.pattern.permute.xlu1 %v10607_v4 }
 0x1e4   :  { %345 = vperm.xlu1 %6270, %v64_v28   ;;  %v1009_v31 = vadd.f32 %v7969_v2, %v878_v62 }
 0x1e6   :  { %v1424_v61 = vpop.permute.xlu1 %1423 }
 0x1e7   :  { %v6426_v18 = vpop.eup %6425  ;;  %v1638_v34 = vmul.f32 %v7451_v25, %v1424_v61 }
 0x1e8   :  { %6271 = vset.pattern.permute.xlu1 %v10609_v48  ;;  %4987 = vmatmul.mubr.f32.gmra.mrb[52].mxu0 %v6426_v18  ;;  %v6428_v45 = vpop.eup %6427 }
 0x1e9   :  { %v1763_v15 = vadd.f32 %v1638_v34, %v1009_v31  ;;  %1191 = vperm.xlu1 %6271, %v64_v28   ;;  %4989 = vmatprep.mubr.msk.f32.mxu0 %vm7087_vm0, %v10610_v9  ;;  %v651_v28 = vpop.permute.xlu0 %650 }
 0x1eb   :  { %v6430_v13 = vpop.eup %6429  ;;  %6431 = vtanh.f32 %v1763_v15  ;;  %v296_v32 = vpop.permute.xlu1 %295 }
 0x1ec   :  { %4990 = vmatmul.mubr.f32.gmra.mrb[54].mxu0 %v6428_v45  ;;  %v8237_v3 = vpop.f32.mrb[12].mxu1  ;;  %5194 = vmatmul.mubr.f32.gmra.mrb[64].mxu1 %v6430_v13  ;;  %v810_v33 = vmul.f32 %v7440_v17, %v296_v32 }
 0x1ed   :  { %10614 = vst [vmem:[#allocation2_spill] sm:$0xff] %v8237_v3  ;;  %v5117_v36 = vpop.f32.mrb[13].mxu1  ;;  %1467 = vperm.xlu1 %6271, %v7067_v19   ;;  %5196 = vmatprep.mubr.msk.f32.mxu1 %vm7087_vm0, %v10610_v9  ;;  %v311_v19 = vpop.permute.xlu0 %310 }
 0x1ee   :  { %4992 = vmatprep.mubr.msk.f32.mxu0 %vm7087_vm0, %v10610_v9  ;;  %v941_v53 = vadd.f32 %v7969_v2, %v810_v33 }
 0x1f0   :  { %v8252_v1 = vpop.f32.mrb[14].mxu1  ;;  %v1152_v56 = vpop.permute.xlu1 %1151 }
 0x1f1   :  { %10615 = vst [vmem:[#allocation17_spill] sm:$0xff] %v8252_v1  ;;  %v1570_v41 = vmul.f32 %v7451_v25, %v1152_v56  ;;  %v5120_v30 = vpop.f32.mrb[15].mxu1  ;;  %6272 = vset.pattern.permute.xlu1 %v10607_v4  ;;  %v8260_v23 = vpop.f32.mrb[2].mxu0  ;;  %v813_v56 = vmul.f32 %v7440_v17, %v311_v19 }
 0x1f2   :  { %695 = vperm.xlu1 %6272, %v134_v60   ;;  %v4913_v27 = vpop.f32.mrb[3].mxu0  ;;  %v661_v19 = vpop.permute.xlu0 %660 }
 0x1f3   :  { %v1695_v47 = vadd.f32 %v1570_v41, %v941_v53  ;;  %v7068_v41 = vld [vmem:[%s10578_s0 + $0x368] sm:$0xff]  ;;  %v881_v27 = vmul.f32 %v7440_v17, %v651_v28 }
 0x1f4   :  { %v8263_v26 = vpop.f32.mrb[4].mxu0  ;;  %v8265_v42 = vpop.f32.mrb[16].mxu1 }
 0x1f5   :  { %10617 = vst [vmem:[#allocation3_spill] sm:$0xff] %v8265_v42  ;;  %v6432_v38 = vpop.eup %6431  ;;  %6433 = vtanh.f32 %v1695_v47  ;;  %v1428_v49 = vpop.permute.xlu1 %1427  ;;  %v136_v47 = vld [vmem:[%s10578_s0 + $0x370] sm:$0xff] }
 0x1f6   :  { %v4916_v22 = vpop.f32.mrb[5].mxu0  ;;  %v1639_v40 = vmul.f32 %v7451_v25, %v1428_v49  ;;  %v5123_v0 = vpop.f32.mrb[17].mxu1  ;;  %6273 = vset.pattern.permute.xlu1 %v10609_v48  ;;  %5197 = vmatmul.mubr.f32.gmra.mrb[66].mxu1 %v6432_v38  ;;  %6435 = vtanh.f32 %v1696_v21  ;;  %v944_v21 = vadd.f32 %v7969_v2, %v813_v56 }
 0x1f7   :  { %1471 = vperm.xlu1 %6273, %v134_v60   ;;  %5199 = vmatprep.mubr.msk.f32.mxu1 %vm7087_vm0, %v10610_v9 }
 0x1f8   :  { %v1764_v24 = vadd.f32 %v1639_v40, %v1010_v16  ;;  %v8277_v52 = vpop.f32.mrb[18].mxu1  ;;  %v8279_v14 = vpop.f32.mrb[6].mxu0  ;;  %v10622_v16 = vld [vmem:[#allocation4_spill] sm:$0xff] }
 0x1f9   :  { %10618 = vst [vmem:[#allocation18_spill] sm:$0xff] %v8277_v52  ;;  %v5126_v46 = vpop.f32.mrb[19].mxu1  ;;  %v646_v6 = vpop.permute.xlu1 %645  ;;  %v1573_v38 = vmul.f32 %v7451_v25, %v10622_v16 }
 0x1fa   :  { %6437 = vtanh.f32 %v1764_v24  ;;  %v4919_v29 = vpop.f32.mrb[7].mxu0  ;;  %v880_v5 = vmul.f32 %v7440_v17, %v646_v6  ;;  %v1012_v24 = vadd.f32 %v7969_v2, %v881_v27 }
 0x1fb   :  { %6274 = vset.pattern.permute.xlu1 %v10607_v4  ;;  %v1698_v6 = vadd.f32 %v1573_v38, %v944_v21 }
 0x1fc   :  { %v8287_v62 = vpop.f32.mrb[8].mxu0  ;;  %355 = vperm.xlu1 %6274, %v66_v54   ;;  %v1011_v15 = vadd.f32 %v7969_v2, %v880_v5 }
 0x1fd   :  { %v8289_v58 = vpop.f32.mrb[20].mxu1  ;;  %v4922_v61 = vpop.f32.mrb[9].mxu0 }
 0x1fe   :  { %10619 = vst [vmem:[#allocation19_spill] sm:$0xff] %v8289_v58  ;;  %v5129_v18 = vpop.f32.mrb[21].mxu1  ;;  %v1432_v31 = vpop.permute.xlu1 %1431 }
 0x1ff   :  { %v6434_v34 = vpop.eup %6433  ;;  %v1640_v45 = vmul.f32 %v7451_v25, %v1432_v31 }
 0x200   :  { %6275 = vset.pattern.permute.xlu1 %v10609_v48  ;;  %4993 = vmatmul.mubr.f32.gmra.mrb[56].mxu0 %v6434_v34  ;;  %v8294_v13 = vpop.f32.mrb[10].mxu0  ;;  %v6436_v36 = vpop.eup %6435 }
 0x201   :  { %v1765_v32 = vadd.f32 %v1640_v45, %v1011_v15  ;;  %v8296_v39 = vpop.f32.mrb[22].mxu1  ;;  %1199 = vperm.xlu1 %6275, %v66_v54   ;;  %v4925_v51 = vpop.f32.mrb[11].mxu0  ;;  %4995 = vmatprep.mubr.msk.f32.mxu0 %vm7087_vm0, %v10610_v9 }
 0x202   :  { %10620 = vst [vmem:[#allocation20_spill] sm:$0xff] %v8296_v39  ;;  %v5132_v33 = vpop.f32.mrb[23].mxu1 }
 0x203   :  { %6439 = vtanh.f32 %v1765_v32  ;;  %v306_v60 = vpop.permute.xlu1 %305  ;;  %v68_v32 = vld [vmem:[%s10578_s0 + $0x150] sm:$0xff] }
 0x204   :  { %v6438_v10 = vpop.eup %6437  ;;  %v8301_v12 = vpop.f32.mrb[12].mxu0  ;;  %4996 = vmatmul.mubr.f32.gmra.mrb[58].mxu0 %v6436_v36  ;;  %v812_v59 = vmul.f32 %v7440_v17, %v306_v60 }
 0x205   :  { %v8304_v37 = vpop.f32.mrb[24].mxu1  ;;  %5200 = vmatmul.mubr.f32.gmra.mrb[68].mxu1 %v6438_v10  ;;  %v4928_v53 = vpop.f32.mrb[13].mxu0  ;;  %1475 = vperm.xlu1 %6275, %v7068_v41   ;;  %v4439_v41 = vld [vmem:[%s10579_s3 + $0xa0] sm:$0xff] }
 0x206   :  { %10621 = vst [vmem:[#allocation21_spill] sm:$0xff] %v8304_v37  ;;  %v5135_v30 = vpop.f32.mrb[25].mxu1  ;;  %5202 = vmatprep.mubr.msk.f32.mxu1 %vm7087_vm0, %v10610_v9  ;;  %4998 = vmatprep.mubr.msk.f32.mxu0 %vm7087_vm0, %v10610_v9  ;;  %v943_v40 = vadd.f32 %v7969_v2, %v812_v59 }
 0x207   :  { %v4440_v30 = vld [vmem:[%s10579_s3 + $0xa8] sm:$0xff] }
 0x208   :  { %v1160_v49 = vpop.permute.xlu1 %1159  ;;  %v8320_v22 = vpop.f32.mrb[14].mxu0  ;;  %v6128_v21 = vpack.c.bf16 %v4440_v30, %v4439_v41 }
 0x209   :  { %v8323_v0 = vpop.f32.mrb[26].mxu1  ;;  %v1572_v44 = vmul.f32 %v7451_v25, %v1160_v49  ;;  %6276 = vset.pattern.permute.xlu1 %v10607_v4  ;;  %v4931_v8 = vpop.f32.mrb[15].mxu0 }
 0x20a   :  { %10623 = vst [vmem:[#allocation4_spill] sm:$0xff] %v8323_v0  ;;  %v5138_v63 = vpop.f32.mrb[27].mxu1  ;;  %705 = vperm.xlu1 %6276, %v136_v47   ;;  %6129 = vmatpush3.bf16.msra.mxu1 %v6128_v21 }
 0x20b   :  { %v1697_v46 = vadd.f32 %v1572_v44, %v943_v40  ;;  %6130 = vmatprep.subr.bf16.mxu1 %v10613_v11 }
 0x20c   :  { %v8328_v54 = vpop.f32.mrb[16].mxu0  ;;  %v1436_v29 = vpop.permute.xlu1 %1435 }
 0x20d   :  { %v6440_v5 = vpop.eup %6439  ;;  %6441 = vtanh.f32 %v1697_v46  ;;  %v8330_v28 = vpop.f32.mrb[28].mxu1  ;;  %v1641_v61 = vmul.f32 %v7451_v25, %v1436_v29 }
 0x20e   :  { %10624 = vst [vmem:[#allocation22_spill] sm:$0xff] %v8330_v28  ;;  %v4934_v18 = vpop.f32.mrb[17].mxu0  ;;  %v5141_v31 = vpop.f32.mrb[29].mxu1  ;;  %6277 = vset.pattern.permute.xlu1 %v10609_v48  ;;  %5203 = vmatmul.mubr.f32.gmra.mrb[70].mxu1 %v6440_v5  ;;  %6443 = vtanh.f32 %v1698_v6 }
 0x20f   :  { %v1766_v34 = vadd.f32 %v1641_v61, %v1012_v24  ;;  %1479 = vperm.xlu1 %6277, %v136_v47   ;;  %5205 = vmatprep.mubr.msk.f32.mxu1 %vm7087_vm0, %v10610_v9  ;;  %v8358_v47 = vld [vmem:[%s10581_s2] ss:$0 sm:$0xff]  ;;  %v321_v6 = vpop.permute.xlu0 %320 }
 0x210   :  { %v8336_v2 = vpop.f32.mrb[18].mxu0  ;;  %v815_v5 = vmul.f32 %v7440_v17, %v321_v6 }
 0x211   :  { %6445 = vtanh.f32 %v1766_v34  ;;  %v8338_v15 = vpop.f32.mrb[30].mxu1  ;;  %v656_v45 = vpop.permute.xlu1 %655 }
 0x212   :  { %10625 = vst [vmem:[#allocation23_spill] sm:$0xff] %v8338_v15  ;;  %v5144_v51 = vpop.f32.mrb[31].mxu1  ;;  %v4937_v33 = vpop.f32.mrb[19].mxu0  ;;  %v882_v36 = vmul.f32 %v7440_v17, %v656_v45  ;;  %v7070_v45 = vld [vmem:[%s10578_s0 + $0x378] sm:$0xff] }
 0x213   :  { %6278 = vset.pattern.permute.xlu1 %v10607_v4  ;;  %v883_v51 = vmul.f32 %v7440_v17, %v661_v19  ;;  %v138_v33 = vld [vmem:[%s10578_s0 + $0x380] sm:$0xff] }
 0x214   :  { %v8345_v60 = vpop.f32.mrb[20].mxu0  ;;  %365 = vperm.xlu1 %6278, %v68_v32   ;;  %v1013_v16 = vadd.f32 %v8358_v47, %v882_v36  ;;  %v10629_v36 = vld [vmem:[#allocation5_spill] sm:$0xff] }
 0x215   :  { %v8347_v10 = vpop.f32.mrb[32].mxu1  ;;  %v4940_v56 = vpop.f32.mrb[21].mxu0  ;;  %v1014_v21 = vadd.f32 %v8358_v47, %v883_v51 }
 0x216   :  { %10626 = vst [vmem:[#allocation24_spill] sm:$0xff] %v8347_v10  ;;  %v5147_v59 = vpop.f32.mrb[33].mxu1  ;;  %v1440_v53 = vpop.permute.xlu1 %1439  ;;  %v1575_v56 = vmul.f32 %v7451_v25, %v10629_v36 }
 0x217   :  { %v6442_v27 = vpop.eup %6441  ;;  %v1642_v38 = vmul.f32 %v7451_v25, %v1440_v53  ;;  %v946_v59 = vadd.f32 %v8358_v47, %v815_v5 }
 0x218   :  { %6279 = vset.pattern.permute.xlu1 %v10609_v48  ;;  %4999 = vmatmul.mubr.f32.gmra.mrb[60].mxu0 %v6442_v27  ;;  %v8363_v49 = vpop.f32.mrb[22].mxu0  ;;  %v6444_v63 = vpop.eup %6443 }
 0x219   :  { %v1767_v40 = vadd.f32 %v1642_v38, %v1013_v16  ;;  %v8365_v44 = vpop.f32.mrb[34].mxu1  ;;  %1207 = vperm.xlu1 %6279, %v68_v32   ;;  %v4943_v8 = vpop.f32.mrb[23].mxu0  ;;  %5001 = vmatprep.mubr.msk.f32.mxu0 %vm7087_vm0, %v10610_v9 }
 0x21a   :  { %10627 = vst [vmem:[#allocation25_spill] sm:$0xff] %v8365_v44  ;;  %v5150_v24 = vpop.f32.mrb[35].mxu1  ;;  %v1700_v8 = vadd.f32 %v1575_v56, %v946_v59 }
 0x21b   :  { %v6446_v46 = vpop.eup %6445  ;;  %6447 = vtanh.f32 %v1767_v40  ;;  %v316_v29 = vpop.permute.xlu1 %315  ;;  %v8401_v24 = vld [vmem:[%s10578_s0 + $0x1c0] sm:$0xff] }
 0x21c   :  { %v8371_v61 = vpop.f32.mrb[24].mxu0  ;;  %5002 = vmatmul.mubr.f32.gmra.mrb[62].mxu0 %v6444_v63  ;;  %5206 = vmatmul.mubr.f32.gmra.mrb[72].mxu1 %v6446_v46  ;;  %v814_v18 = vmul.f32 %v7440_v17, %v316_v29  ;;  %v8409_v29 = vld [vmem:[%s10578_s0 + $0x1c8] sm:$0xff] }
 0x21d   :  { %v8374_v31 = vpop.f32.mrb[36].mxu1  ;;  %v4946_v34 = vpop.f32.mrb[25].mxu0  ;;  %1483 = vperm.xlu1 %6279, %v7070_v45   ;;  %5208 = vmatprep.mubr.msk.f32.mxu1 %vm7087_vm0, %v10610_v9 }
 0x21e   :  { %10628 = vst [vmem:[#allocation26_spill] sm:$0xff] %v8374_v31  ;;  %v5153_v32 = vpop.f32.mrb[37].mxu1  ;;  %5004 = vmatprep.mubr.msk.f32.mxu0 %vm7087_vm0, %v10610_v9  ;;  %v945_v30 = vadd.f32 %v8358_v47, %v814_v18  ;;  %1263 = vperm.xlu0 %6306, %v8401_v24   ;;  %v70_v34 = vld [vmem:[%s10578_s0 + $0x160] sm:$0xff] }
 0x21f   :  { %v8422_v32 = vld [vmem:[%s10578_s0 + $0x1d0] sm:$0xff] }
 0x220   :  { %v1168_v53 = vpop.permute.xlu1 %1167  ;;  %v8390_v41 = vpop.f32.mrb[26].mxu0 }
 0x221   :  { %v1574_v27 = vmul.f32 %v7451_v25, %v1168_v53  ;;  %v8394_v16 = vpop.f32.mrb[38].mxu1  ;;  %6280 = vset.pattern.permute.xlu1 %v10607_v4  ;;  %v4949_v19 = vpop.f32.mrb[27].mxu0 }
 0x222   :  { %10630 = vst [vmem:[#allocation5_spill] sm:$0xff] %v8394_v16  ;;  %v5156_v38 = vpop.f32.mrb[39].mxu1  ;;  %715 = vperm.xlu1 %6280, %v138_v33   ;;  %1267 = vperm.xlu0 %6306, %v8409_v29   ;;  %v8434_v19 = vld [vmem:[%s10578_s0 + $0x1d8] sm:$0xff] }
 0x223   :  { %v1699_v40 = vadd.f32 %v1574_v27, %v945_v30 }
 0x224   :  { %v1444_v63 = vpop.permute.xlu1 %1443 }
 0x225   :  { %v6448_v46 = vpop.eup %6447  ;;  %6449 = vtanh.f32 %v1699_v40  ;;  %v1643_v6 = vmul.f32 %v7451_v25, %v1444_v63 }
 0x226   :  { %6281 = vset.pattern.permute.xlu1 %v10609_v48  ;;  %5209 = vmatmul.mubr.f32.gmra.mrb[74].mxu1 %v6448_v46  ;;  %6451 = vtanh.f32 %v1700_v8 }
 0x227   :  { %v1768_v5 = vadd.f32 %v1643_v6, %v1014_v21  ;;  %1487 = vperm.xlu1 %6281, %v138_v33   ;;  %5211 = vmatprep.mubr.msk.f32.mxu1 %vm7087_vm0, %v10610_v9  ;;  %v671_v33 = vpop.permute.xlu0 %670 }
 0x228   :  { %1271 = vperm.xlu0 %6306, %v8422_v32  }
 0x229   :  { %6453 = vtanh.f32 %v1768_v5  ;;  %v666_v18 = vpop.permute.xlu1 %665 }
 0x22a   :  { %v884_v45 = vmul.f32 %v7440_v17, %v666_v18 }
 0x22b   :  { %6282 = vset.pattern.permute.xlu1 %v10607_v4  ;;  %v331_v6 = vpop.permute.xlu0 %330 }
 0x22c   :  { %v8424_v51 = vpop.f32.mrb[28].mxu0  ;;  %375 = vperm.xlu1 %6282, %v70_v34   ;;  %v1015_v53 = vadd.f32 %v8358_v47, %v884_v45  ;;  %1275 = vperm.xlu0 %6306, %v8434_v19   ;;  %v817_v18 = vmul.f32 %v7440_v17, %v331_v6  ;;  %v8473_v6 = vld [vmem:[%s10578_s0 + $0x1e8] sm:$0xff] }
 0x22d   :  { %v4952_v36 = vpop.f32.mrb[29].mxu0 }
 0x22e   :  { %v1448_v56 = vpop.permute.xlu1 %1447  ;;  %v7071_v36 = vld [vmem:[%s10578_s0 + $0x388] sm:$0xff] }
 0x22f   :  { %v6450_v59 = vpop.eup %6449  ;;  %v1644_v30 = vmul.f32 %v7451_v25, %v1448_v56  ;;  %v8429_v27 = vpop.f32.mrb[40].mxu1  ;;  %v4441_v56 = vld [vmem:[%s10579_s3 + $0xb0] sm:$0xff] }
 0x230   :  { %10631 = vst [vmem:[#allocation27_spill] sm:$0xff] %v8429_v27  ;;  %v5159_v38 = vpop.f32.mrb[41].mxu1  ;;  %6283 = vset.pattern.permute.xlu1 %v10609_v48  ;;  %5005 = vmatmul.mubr.f32.gmra.mrb[64].mxu0 %v6450_v59  ;;  %v6452_v8 = vpop.eup %6451  ;;  %v4442_v59 = vld [vmem:[%s10579_s3 + $0xb8] sm:$0xff] }
 0x231   :  { %v1769_v21 = vadd.f32 %v1644_v30, %v1015_v53  ;;  %1215 = vperm.xlu1 %6283, %v70_v34   ;;  %5007 = vmatprep.mubr.msk.f32.mxu0 %vm7087_vm0, %v10610_v9  ;;  %v8439_v40 = vpop.f32.mrb[30].mxu0  ;;  %v8446_v34 = vld [vmem:[%s10578_s0 + $0x1e0] sm:$0xff]  ;;  %v6131_v53 = vpack.c.bf16 %v4442_v59, %v4441_v56  ;;  %v885_v30 = vmul.f32 %v7440_v17, %v671_v33  ;;  %v140_v38 = vld [vmem:[%s10578_s0 + $0x390] sm:$0xff] }
 0x232   :  { %v4955_v63 = vpop.f32.mrb[31].mxu0  ;;  %1279 = vperm.xlu0 %6306, %v8446_v34  }
 0x233   :  { %v6454_v46 = vpop.eup %6453  ;;  %6455 = vtanh.f32 %v1769_v21  ;;  %v326_v5 = vpop.permute.xlu1 %325  ;;  %v10632_v21 = vld [vmem:[#allocation6_spill] sm:$0xff]  ;;  %v948_v63 = vadd.f32 %v8358_v47, %v817_v18  ;;  %6132 = vmatpush3.bf16.msra.mxu1 %v6131_v53  ;;  %v1016_v18 = vadd.f32 %v8358_v47, %v885_v30 }
 0x234   :  { %5008 = vmatmul.mubr.f32.gmra.mrb[66].mxu0 %v6452_v8  ;;  %5212 = vmatmul.mubr.f32.gmra.mrb[76].mxu1 %v6454_v46  ;;  %v816_v45 = vmul.f32 %v7440_v17, %v326_v5  ;;  %v1577_v8 = vmul.f32 %v7451_v25, %v10632_v21 }
 0x235   :  { %1491 = vperm.xlu1 %6283, %v7071_v36   ;;  %5214 = vmatprep.mubr.msk.f32.mxu1 %vm7087_vm0, %v10610_v9 }
 0x236   :  { %5010 = vmatprep.mubr.msk.f32.mxu0 %vm7087_vm0, %v10610_v9  ;;  %v947_v5 = vadd.f32 %v8358_v47, %v816_v45  ;;  %6133 = vmatprep.subr.bf16.mxu1 %v10613_v11  ;;  %v1702_v53 = vadd.f32 %v1577_v8, %v948_v63  ;;  %v72_v8 = vld [vmem:[%s10578_s0 + $0x170] sm:$0xff] }
 0x237   :  { %1283 = vperm.xlu0 %6306, %v8473_v6  }
 0x238   :  { %v1176_v46 = vpop.permute.xlu1 %1175 }
 0x239   :  { %v1576_v33 = vmul.f32 %v7451_v25, %v1176_v46  ;;  %v8477_v36 = vpop.f32.mrb[42].mxu1  ;;  %6284 = vset.pattern.permute.xlu1 %v10607_v4  ;;  %v8487_v46 = vld [vmem:[%s10578_s0 + $0x1f0] sm:$0xff] }
 0x23a   :  { %10633 = vst [vmem:[#allocation6_spill] sm:$0xff] %v8477_v36  ;;  %v5162_v56 = vpop.f32.mrb[43].mxu1  ;;  %725 = vperm.xlu1 %6284, %v140_v38  }
 0x23b   :  { %v1701_v59 = vadd.f32 %v1576_v33, %v947_v5  ;;  %1287 = vperm.xlu0 %6306, %v8487_v46  }
 0x23c   :  { %v1452_v21 = vpop.permute.xlu1 %1451 }
 0x23d   :  { %v6456_v27 = vpop.eup %6455  ;;  %6457 = vtanh.f32 %v1701_v59  ;;  %v1645_v45 = vmul.f32 %v7451_v25, %v1452_v21 }
 0x23e   :  { %6285 = vset.pattern.permute.xlu1 %v10609_v48  ;;  %5215 = vmatmul.mubr.f32.gmra.mrb[78].mxu1 %v6456_v27  ;;  %6459 = vtanh.f32 %v1702_v53 }
 0x23f   :  { %v1770_v56 = vadd.f32 %v1645_v45, %v1016_v18  ;;  %1495 = vperm.xlu1 %6285, %v140_v38   ;;  %5217 = vmatprep.mubr.msk.f32.mxu1 %vm7087_vm0, %v10610_v9  ;;  %v681_v38 = vpop.permute.xlu0 %680 }
 0x241   :  { %6461 = vtanh.f32 %v1770_v56  ;;  %v676_v30 = vpop.permute.xlu1 %675 }
 0x242   :  { %v886_v63 = vmul.f32 %v7440_v17, %v676_v30 }
 0x243   :  { %v8497_v5 = vpop.f32.mrb[32].mxu0  ;;  %6286 = vset.pattern.permute.xlu1 %v10607_v4  ;;  %v341_v31 = vpop.permute.xlu0 %340 }
 0x244   :  { %v4958_v27 = vpop.f32.mrb[33].mxu0  ;;  %385 = vperm.xlu1 %6286, %v72_v8   ;;  %v1017_v59 = vadd.f32 %v8358_v47, %v886_v63 }
 0x246   :  { %v1456_v33 = vpop.permute.xlu1 %1455 }
 0x247   :  { %v6458_v18 = vpop.eup %6457  ;;  %v1646_v53 = vmul.f32 %v7451_v25, %v1456_v33  ;;  %v8502_v21 = vpop.f32.mrb[44].mxu1  ;;  %v819_v33 = vmul.f32 %v7440_v17, %v341_v31  ;;  %v142_v31 = vld [vmem:[%s10578_s0 + $0x3a0] sm:$0xff] }
 0x248   :  { %10634 = vst [vmem:[#allocation28_spill] sm:$0xff] %v8502_v21  ;;  %v8504_v45 = vpop.f32.mrb[34].mxu0  ;;  %v5165_v56 = vpop.f32.mrb[45].mxu1  ;;  %6287 = vset.pattern.permute.xlu1 %v10609_v48  ;;  %5011 = vmatmul.mubr.f32.gmra.mrb[68].mxu0 %v6458_v18  ;;  %v7072_v18 = vld [vmem:[%s10578_s0 + $0x398] sm:$0xff] }
 0x249   :  { %v4961_v30 = vpop.f32.mrb[35].mxu0  ;;  %v1771_v36 = vadd.f32 %v1646_v53, %v1017_v59  ;;  %1223 = vperm.xlu1 %6287, %v72_v8   ;;  %5013 = vmatprep.mubr.msk.f32.mxu0 %vm7087_vm0, %v10610_v9  ;;  %v6460_v27 = vpop.eup %6459  ;;  %v950_v59 = vadd.f32 %v8358_v47, %v819_v33  ;;  %v4443_v33 = vld [vmem:[%s10579_s3 + $0xc0] sm:$0xff] }
 0x24b   :  { %v6462_v16 = vpop.eup %6461  ;;  %6463 = vtanh.f32 %v1771_v36  ;;  %v336_v63 = vpop.permute.xlu1 %335  ;;  %v887_v36 = vmul.f32 %v7440_v17, %v681_v38 }
 0x24c   :  { %5014 = vmatmul.mubr.f32.gmra.mrb[70].mxu0 %v6460_v27  ;;  %5218 = vmatmul.mubr.f32.gmra.mrb[80].mxu1 %v6462_v16  ;;  %v818_v56 = vmul.f32 %v7440_v17, %v336_v63  ;;  %v10635_v16 = vld [vmem:[#allocation7_spill] sm:$0xff] }
 0x24d   :  { %1499 = vperm.xlu1 %6287, %v7072_v18   ;;  %5220 = vmatprep.mubr.msk.f32.mxu1 %vm7087_vm0, %v10610_v9  ;;  %v1579_v8 = vmul.f32 %v7451_v25, %v10635_v16  ;;  %v1018_v38 = vadd.f32 %v8358_v47, %v887_v36 }
 0x24e   :  { %5016 = vmatprep.mubr.msk.f32.mxu0 %vm7087_vm0, %v10610_v9  ;;  %v949_v30 = vadd.f32 %v8358_v47, %v818_v56  ;;  %v4444_v56 = vld [vmem:[%s10579_s3 + $0xc8] sm:$0xff] }
 0x24f   :  { %v1704_v44 = vadd.f32 %v1579_v8, %v950_v59  ;;  %v74_v59 = vld [vmem:[%s10578_s0 + $0x180] sm:$0xff] }
 0x250   :  { %v1184_v53 = vpop.permute.xlu1 %1183 }
 0x251   :  { %v1578_v27 = vmul.f32 %v7451_v25, %v1184_v53  ;;  %v8527_v63 = vpop.f32.mrb[46].mxu1  ;;  %6288 = vset.pattern.permute.xlu1 %v10607_v4 }
 0x252   :  { %10636 = vst [vmem:[#allocation7_spill] sm:$0xff] %v8527_v63  ;;  %v5168_v18 = vpop.f32.mrb[47].mxu1  ;;  %735 = vperm.xlu1 %6288, %v142_v31   ;;  %v6134_v63 = vpack.c.bf16 %v4444_v56, %v4443_v33 }
 0x253   :  { %v1703_v21 = vadd.f32 %v1578_v27, %v949_v30  ;;  %v691_v30 = vpop.permute.xlu0 %690 }
 0x254   :  { %v1460_v10 = vpop.permute.xlu1 %1459  ;;  %6135 = vmatpush3.bf16.msra.mxu1 %v6134_v63 }
 0x255   :  { %v6464_v16 = vpop.eup %6463  ;;  %6465 = vtanh.f32 %v1703_v21  ;;  %v1647_v53 = vmul.f32 %v7451_v25, %v1460_v10  ;;  %6136 = vmatprep.subr.bf16.mxu1 %v10613_v11 }
 0x256   :  { %6289 = vset.pattern.permute.xlu1 %v10609_v48  ;;  %5221 = vmatmul.mubr.f32.gmra.mrb[82].mxu1 %v6464_v16  ;;  %6467 = vtanh.f32 %v1704_v44 }
 0x257   :  { %v1772_v36 = vadd.f32 %v1647_v53, %v1018_v38  ;;  %1503 = vperm.xlu1 %6289, %v142_v31   ;;  %5223 = vmatprep.mubr.msk.f32.mxu1 %vm7087_vm0, %v10610_v9 }
 0x259   :  { %6469 = vtanh.f32 %v1772_v36  ;;  %v686_v8 = vpop.permute.xlu1 %685 }
 0x25a   :  { %v888_v10 = vmul.f32 %v7440_v17, %v686_v8 }
 0x25b   :  { %v8546_v21 = vpop.f32.mrb[36].mxu0  ;;  %6290 = vset.pattern.permute.xlu1 %v10607_v4 }
 0x25c   :  { %v4964_v31 = vpop.f32.mrb[37].mxu0  ;;  %395 = vperm.xlu1 %6290, %v74_v59   ;;  %v1019_v63 = vadd.f32 %v8358_v47, %v888_v10 }
 0x25d   :  { %v351_v31 = vpop.permute.xlu0 %350 }
 0x25e   :  { %v1464_v27 = vpop.permute.xlu1 %1463 }
 0x25f   :  { %v6466_v44 = vpop.eup %6465  ;;  %v1648_v18 = vmul.f32 %v7451_v25, %v1464_v27  ;;  %v8551_v38 = vpop.f32.mrb[48].mxu1  ;;  %v821_v27 = vmul.f32 %v7440_v17, %v351_v31 }
 0x260   :  { %10637 = vst [vmem:[#allocation29_spill] sm:$0xff] %v8551_v38  ;;  %v8553_v33 = vpop.f32.mrb[38].mxu0  ;;  %v5171_v56 = vpop.f32.mrb[49].mxu1  ;;  %6291 = vset.pattern.permute.xlu1 %v10609_v48  ;;  %5017 = vmatmul.mubr.f32.gmra.mrb[72].mxu0 %v6466_v44  ;;  %v7073_v44 = vld [vmem:[%s10578_s0 + $0x3a8] sm:$0xff] }
 0x261   :  { %v4967_v16 = vpop.f32.mrb[39].mxu0  ;;  %v1773_v53 = vadd.f32 %v1648_v18, %v1019_v63  ;;  %1231 = vperm.xlu1 %6291, %v74_v59   ;;  %5019 = vmatprep.mubr.msk.f32.mxu0 %vm7087_vm0, %v10610_v9  ;;  %v6468_v36 = vpop.eup %6467  ;;  %v144_v59 = vld [vmem:[%s10578_s0 + $0x3b0] sm:$0xff] }
 0x262   :  { %v10638_v63 = vld [vmem:[#allocation8_spill] sm:$0xff]  ;;  %v952_v16 = vadd.f32 %v8358_v47, %v821_v27 }
 0x263   :  { %v6470_v8 = vpop.eup %6469  ;;  %6471 = vtanh.f32 %v1773_v53  ;;  %v346_v10 = vpop.permute.xlu1 %345  ;;  %v1581_v18 = vmul.f32 %v7451_v25, %v10638_v63 }
 0x264   :  { %5020 = vmatmul.mubr.f32.gmra.mrb[74].mxu0 %v6468_v36  ;;  %5224 = vmatmul.mubr.f32.gmra.mrb[84].mxu1 %v6470_v8  ;;  %v820_v56 = vmul.f32 %v7440_v17, %v346_v10  ;;  %v889_v36 = vmul.f32 %v7440_v17, %v691_v30 }
 0x265   :  { %1507 = vperm.xlu1 %6291, %v7073_v44   ;;  %5226 = vmatprep.mubr.msk.f32.mxu1 %vm7087_vm0, %v10610_v9  ;;  %v1706_v15 = vadd.f32 %v1581_v18, %v952_v16  ;;  %v76_v18 = vld [vmem:[%s10578_s0 + $0x190] sm:$0xff] }
 0x266   :  { %5022 = vmatprep.mubr.msk.f32.mxu0 %vm7087_vm0, %v10610_v9  ;;  %v951_v8 = vadd.f32 %v8358_v47, %v820_v56  ;;  %v1020_v63 = vadd.f32 %v8358_v47, %v889_v36 }
 0x268   :  { %v1192_v53 = vpop.permute.xlu1 %1191 }
 0x269   :  { %v1580_v31 = vmul.f32 %v7451_v25, %v1192_v53  ;;  %v8576_v10 = vpop.f32.mrb[50].mxu1  ;;  %6292 = vset.pattern.permute.xlu1 %v10607_v4 }
 0x26a   :  { %10639 = vst [vmem:[#allocation8_spill] sm:$0xff] %v8576_v10  ;;  %v5174_v44 = vpop.f32.mrb[51].mxu1  ;;  %745 = vperm.xlu1 %6292, %v144_v59  }
 0x26b   :  { %v1705_v38 = vadd.f32 %v1580_v31, %v951_v8 }
 0x26c   :  { %v1468_v28 = vpop.permute.xlu1 %1467 }
 0x26d   :  { %v6472_v0 = vpop.eup %6471  ;;  %6473 = vtanh.f32 %v1705_v38  ;;  %v1649_v27 = vmul.f32 %v7451_v25, %v1468_v28 }
 0x26e   :  { %6293 = vset.pattern.permute.xlu1 %v10609_v48  ;;  %5227 = vmatmul.mubr.f32.gmra.mrb[86].mxu1 %v6472_v0  ;;  %6475 = vtanh.f32 %v1706_v15  ;;  %v4445_v0 = vld [vmem:[%s10579_s3 + $0xd0] sm:$0xff]  ;;  %v4446_v15 = vld [vmem:[%s10579_s3 + $0xd8] sm:$0xff] }
 0x26f   :  { %v1774_v30 = vadd.f32 %v1649_v27, %v1020_v63  ;;  %1511 = vperm.xlu1 %6293, %v144_v59   ;;  %5229 = vmatprep.mubr.msk.f32.mxu1 %vm7087_vm0, %v10610_v9  ;;  %v701_v59 = vpop.permute.xlu0 %700  ;;  %v6137_v53 = vpack.c.bf16 %v4446_v15, %v4445_v0 }
 0x271   :  { %6477 = vtanh.f32 %v1774_v30  ;;  %v696_v56 = vpop.permute.xlu1 %695  ;;  %6138 = vmatpush3.bf16.msra.mxu1 %v6137_v53 }
 0x272   :  { %v890_v16 = vmul.f32 %v7440_v17, %v696_v56  ;;  %6139 = vmatprep.subr.bf16.mxu1 %v10613_v11 }
 0x273   :  { %v8588_v38 = vpop.f32.mrb[40].mxu0  ;;  %6294 = vset.pattern.permute.xlu1 %v10607_v4  ;;  %v361_v15 = vpop.permute.xlu0 %360 }
 0x274   :  { %v4970_v28 = vpop.f32.mrb[41].mxu0  ;;  %405 = vperm.xlu1 %6294, %v76_v18   ;;  %v1021_v31 = vadd.f32 %v8358_v47, %v890_v16 }
 0x276   :  { %v1472_v36 = vpop.permute.xlu1 %1471 }
 0x277   :  { %v6474_v8 = vpop.eup %6473  ;;  %v1650_v44 = vmul.f32 %v7451_v25, %v1472_v36  ;;  %v8599_v63 = vpop.f32.mrb[52].mxu1 }
 0x278   :  { %10640 = vst [vmem:[#allocation30_spill] sm:$0xff] %v8599_v63  ;;  %v8601_v27 = vpop.f32.mrb[42].mxu0  ;;  %v5177_v30 = vpop.f32.mrb[53].mxu1  ;;  %6295 = vset.pattern.permute.xlu1 %v10609_v48  ;;  %5023 = vmatmul.mubr.f32.gmra.mrb[76].mxu0 %v6474_v8  ;;  %v823_v63 = vmul.f32 %v7440_v17, %v361_v15  ;;  %v146_v8 = vld [vmem:[%s10578_s0 + $0x3c0] sm:$0xff] }
 0x279   :  { %v4973_v56 = vpop.f32.mrb[43].mxu0  ;;  %v1775_v28 = vadd.f32 %v1650_v44, %v1021_v31  ;;  %1239 = vperm.xlu1 %6295, %v76_v18   ;;  %5025 = vmatprep.mubr.msk.f32.mxu0 %vm7087_vm0, %v10610_v9  ;;  %v6476_v0 = vpop.eup %6475  ;;  %v7074_v18 = vld [vmem:[%s10578_s0 + $0x3b8] sm:$0xff] }
 0x27a   :  { %v10641_v31 = vld [vmem:[#allocation9_spill] sm:$0xff]  ;;  %v954_v30 = vadd.f32 %v8358_v47, %v823_v63 }
 0x27b   :  { %v6478_v16 = vpop.eup %6477  ;;  %6479 = vtanh.f32 %v1775_v28  ;;  %v356_v36 = vpop.permute.xlu1 %355  ;;  %v1583_v44 = vmul.f32 %v7451_v25, %v10641_v31  ;;  %v891_v28 = vmul.f32 %v7440_v17, %v701_v59 }
 0x27c   :  { %5026 = vmatmul.mubr.f32.gmra.mrb[78].mxu0 %v6476_v0  ;;  %5230 = vmatmul.mubr.f32.gmra.mrb[88].mxu1 %v6478_v16  ;;  %v822_v53 = vmul.f32 %v7440_v17, %v356_v36 }
 0x27d   :  { %1515 = vperm.xlu1 %6295, %v7074_v18   ;;  %5232 = vmatprep.mubr.msk.f32.mxu1 %vm7087_vm0, %v10610_v9  ;;  %v1708_v10 = vadd.f32 %v1583_v44, %v954_v30  ;;  %v1022_v31 = vadd.f32 %v8358_v47, %v891_v28  ;;  %v78_v44 = vld [vmem:[%s10578_s0 + $0x1a0] sm:$0xff]  ;;  %v4448_v28 = vld [vmem:[%s10579_s3 + $0xe8] sm:$0xff] }
 0x27e   :  { %5028 = vmatprep.mubr.msk.f32.mxu0 %vm7087_vm0, %v10610_v9  ;;  %v953_v0 = vadd.f32 %v8358_v47, %v822_v53 }
 0x280   :  { %v1200_v56 = vpop.permute.xlu1 %1199 }
 0x281   :  { %v1582_v16 = vmul.f32 %v7451_v25, %v1200_v56  ;;  %v8625_v15 = vpop.f32.mrb[54].mxu1  ;;  %6296 = vset.pattern.permute.xlu1 %v10607_v4 }
 0x282   :  { %10642 = vst [vmem:[#allocation9_spill] sm:$0xff] %v8625_v15  ;;  %v5180_v36 = vpop.f32.mrb[55].mxu1  ;;  %755 = vperm.xlu1 %6296, %v146_v8  }
 0x283   :  { %v1707_v18 = vadd.f32 %v1582_v16, %v953_v0 }
 0x284   :  { %v1476_v37 = vpop.permute.xlu1 %1475 }
 0x285   :  { %v6480_v39 = vpop.eup %6479  ;;  %6481 = vtanh.f32 %v1707_v18  ;;  %v1651_v63 = vmul.f32 %v7451_v25, %v1476_v37 }
 0x286   :  { %6297 = vset.pattern.permute.xlu1 %v10609_v48  ;;  %5233 = vmatmul.mubr.f32.gmra.mrb[90].mxu1 %v6480_v39  ;;  %6483 = vtanh.f32 %v1708_v10  ;;  %v711_v39 = vpop.permute.xlu0 %710  ;;  %v4447_v10 = vld [vmem:[%s10579_s3 + $0xe0] sm:$0xff] }
 0x287   :  { %v1776_v59 = vadd.f32 %v1651_v63, %v1022_v31  ;;  %1519 = vperm.xlu1 %6297, %v146_v8   ;;  %5235 = vmatprep.mubr.msk.f32.mxu1 %vm7087_vm0, %v10610_v9  ;;  %v6140_v63 = vpack.c.bf16 %v4448_v28, %v4447_v10 }
 0x289   :  { %6485 = vtanh.f32 %v1776_v59  ;;  %v706_v53 = vpop.permute.xlu1 %705  ;;  %6141 = vmatpush3.bf16.msra.mxu1 %v6140_v63  ;;  %v893_v63 = vmul.f32 %v7440_v17, %v711_v39 }
 0x28a   :  { %v892_v30 = vmul.f32 %v7440_v17, %v706_v53  ;;  %v371_v58 = vpop.permute.xlu0 %370  ;;  %6142 = vmatprep.subr.bf16.mxu1 %v10613_v11 }
 0x28b   :  { %v8637_v56 = vpop.f32.mrb[44].mxu0  ;;  %6298 = vset.pattern.permute.xlu1 %v10607_v4  ;;  %v825_v10 = vmul.f32 %v7440_v17, %v371_v58  ;;  %v10644_v58 = vld [vmem:[#allocation10_spill] sm:$0xff] }
 0x28c   :  { %v4976_v37 = vpop.f32.mrb[45].mxu0  ;;  %415 = vperm.xlu1 %6298, %v78_v44   ;;  %v1023_v16 = vadd.f32 %v8358_v47, %v892_v30 }
 0x28e   :  { %v1480_v8 = vpop.permute.xlu1 %1479 }
 0x28f   :  { %v6482_v0 = vpop.eup %6481  ;;  %v1652_v36 = vmul.f32 %v7451_v25, %v1480_v8  ;;  %v8648_v18 = vpop.f32.mrb[56].mxu1 }
 0x290   :  { %10643 = vst [vmem:[#allocation31_spill] sm:$0xff] %v8648_v18  ;;  %v8650_v31 = vpop.f32.mrb[46].mxu0  ;;  %v5183_v59 = vpop.f32.mrb[57].mxu1  ;;  %6299 = vset.pattern.permute.xlu1 %v10609_v48  ;;  %5029 = vmatmul.mubr.f32.gmra.mrb[80].mxu0 %v6482_v0  ;;  %v148_v0 = vld [vmem:[%s10578_s0 + $0x3d0] sm:$0xff] }
 0x291   :  { %v4979_v53 = vpop.f32.mrb[47].mxu0  ;;  %v1777_v37 = vadd.f32 %v1652_v36, %v1023_v16  ;;  %1247 = vperm.xlu1 %6299, %v78_v44   ;;  %5031 = vmatprep.mubr.msk.f32.mxu0 %vm7087_vm0, %v10610_v9  ;;  %v6484_v15 = vpop.eup %6483  ;;  %v7075_v44 = vld [vmem:[%s10578_s0 + $0x3c8] sm:$0xff]  ;;  %v956_v16 = vadd.f32 %v8358_v47, %v825_v10 }
 0x293   :  { %v6486_v30 = vpop.eup %6485  ;;  %6487 = vtanh.f32 %v1777_v37  ;;  %v366_v8 = vpop.permute.xlu1 %365 }
 0x294   :  { %5032 = vmatmul.mubr.f32.gmra.mrb[82].mxu0 %v6484_v15  ;;  %5236 = vmatmul.mubr.f32.gmra.mrb[92].mxu1 %v6486_v30  ;;  %v824_v28 = vmul.f32 %v7440_v17, %v366_v8  ;;  %v1585_v15 = vmul.f32 %v7451_v25, %v10644_v58  ;;  %v1024_v58 = vadd.f32 %v8358_v47, %v893_v63 }
 0x295   :  { %1523 = vperm.xlu1 %6299, %v7075_v44   ;;  %5238 = vmatprep.mubr.msk.f32.mxu1 %vm7087_vm0, %v10610_v9 }
 0x296   :  { %5034 = vmatprep.mubr.msk.f32.mxu0 %vm7087_vm0, %v10610_v9  ;;  %v955_v59 = vadd.f32 %v8358_v47, %v824_v28  ;;  %v1710_v44 = vadd.f32 %v1585_v15, %v956_v16  ;;  %v80_v15 = vld [vmem:[%s10578_s0 + $0x1b0] sm:$0xff] }
 0x298   :  { %v1208_v36 = vpop.permute.xlu1 %1207 }
 0x299   :  { %v1584_v53 = vmul.f32 %v7451_v25, %v1208_v36  ;;  %v8674_v37 = vpop.f32.mrb[58].mxu1  ;;  %6300 = vset.pattern.permute.xlu1 %v10607_v4 }
 0x29a   :  { %10645 = vst [vmem:[#allocation10_spill] sm:$0xff] %v8674_v37  ;;  %v5186_v30 = vpop.f32.mrb[59].mxu1  ;;  %765 = vperm.xlu1 %6300, %v148_v0  }
 0x29b   :  { %v1709_v8 = vadd.f32 %v1584_v53, %v955_v59 }
 0x29c   :  { %v1484_v18 = vpop.permute.xlu1 %1483 }
 0x29d   :  { %v6488_v52 = vpop.eup %6487  ;;  %6489 = vtanh.f32 %v1709_v8  ;;  %v1653_v10 = vmul.f32 %v7451_v25, %v1484_v18 }
 0x29e   :  { %6302 = vset.pattern.permute.xlu1 %v10609_v48  ;;  %5239 = vmatmul.mubr.f32.gmra.mrb[94].mxu1 %v6488_v52  ;;  %6491 = vtanh.f32 %v1710_v44  ;;  %v721_v52 = vpop.permute.xlu0 %720 }
 0x29f   :  { %v1778_v39 = vadd.f32 %v1653_v10, %v1024_v58  ;;  %1527 = vperm.xlu1 %6302, %v148_v0   ;;  %5241 = vmatprep.mubr.msk.f32.mxu1 %vm7087_vm0, %v10610_v9 }
 0x2a1   :  { %6493 = vtanh.f32 %v1778_v39  ;;  %v716_v28 = vpop.permute.xlu1 %715 }
 0x2a2   :  { %v894_v16 = vmul.f32 %v7440_v17, %v716_v28 }
 0x2a3   :  { %v8686_v36 = vpop.f32.mrb[48].mxu0  ;;  %6303 = vset.pattern.permute.xlu1 %v10607_v4 }
 0x2a4   :  { %v4982_v18 = vpop.f32.mrb[49].mxu0  ;;  %425 = vperm.xlu1 %6303, %v80_v15   ;;  %v1025_v59 = vadd.f32 %v8358_v47, %v894_v16 }
 0x2a5   :  { %v381_v18 = vpop.permute.xlu0 %380 }
 0x2a6   :  { %v1488_v0 = vpop.permute.xlu1 %1487 }
 0x2a7   :  { %v6490_v63 = vpop.eup %6489  ;;  %v1654_v53 = vmul.f32 %v7451_v25, %v1488_v0  ;;  %v8691_v30 = vpop.f32.mrb[60].mxu1  ;;  %v827_v0 = vmul.f32 %v7440_v17, %v381_v18 }
 0x2a8   :  { %10646 = vst [vmem:[#allocation32_spill] sm:$0xff] %v8691_v30  ;;  %v8693_v8 = vpop.f32.mrb[50].mxu0  ;;  %v5189_v44 = vpop.f32.mrb[61].mxu1  ;;  %6304 = vset.pattern.permute.xlu1 %v10609_v48  ;;  %5035 = vmatmul.mubr.f32.gmra.mrb[84].mxu0 %v6490_v63  ;;  %v7076_v63 = vld [vmem:[%s10578_s0 + $0x3d8] sm:$0xff] }
 0x2a9   :  { %v4985_v58 = vpop.f32.mrb[51].mxu0  ;;  %v1779_v10 = vadd.f32 %v1654_v53, %v1025_v59  ;;  %1255 = vperm.xlu1 %6304, %v80_v15   ;;  %5037 = vmatprep.mubr.msk.f32.mxu0 %vm7087_vm0, %v10610_v9  ;;  %v6492_v39 = vpop.eup %6491  ;;  %v150_v15 = vld [vmem:[%s10578_s0 + $0x3e0] sm:$0xff]  ;;  %v10647_v59 = vld [vmem:[#allocation11_spill] sm:$0xff] }
 0x2aa   :  { %v1587_v53 = vmul.f32 %v7451_v25, %v10647_v59  ;;  %v958_v58 = vadd.f32 %v8358_v47, %v827_v0  ;;  %v4450_v59 = vld [vmem:[%s10579_s3 + $0xf8] sm:$0xff] }
 0x2ab   :  { %v6494_v28 = vpop.eup %6493  ;;  %6495 = vtanh.f32 %v1779_v10  ;;  %v376_v16 = vpop.permute.xlu1 %375 }
 0x2ac   :  { %5038 = vmatmul.mubr.f32.gmra.mrb[86].mxu0 %v6492_v39  ;;  %5242 = vmatmul.mubr.f32.gmra.mrb[96].mxu1 %v6494_v28  ;;  %v826_v44 = vmul.f32 %v7440_v17, %v376_v16  ;;  %v895_v39 = vmul.f32 %v7440_v17, %v721_v52  ;;  %v1712_v37 = vadd.f32 %v1587_v53, %v958_v58  ;;  %v3590_v53 = vld [vmem:[%s10582_s5] sm:$0xff] }
 0x2ad   :  { %1531 = vperm.xlu1 %6304, %v7076_v63   ;;  %5244 = vmatprep.mubr.msk.f32.mxu1 %vm7087_vm0, %v10610_v9  ;;  %v4449_v63 = vld [vmem:[%s10579_s3 + $0xf0] sm:$0xff] }
 0x2ae   :  { %5040 = vmatprep.mubr.msk.f32.mxu0 %vm7087_vm0, %v10610_v9  ;;  %v957_v28 = vadd.f32 %v8358_v47, %v826_v44  ;;  %v6143_v30 = vpack.c.bf16 %v4450_v59, %v4449_v63 }
 0x2b0   :  { %v1216_v10 = vpop.permute.xlu1 %1215  ;;  %6144 = vmatpush3.bf16.msra.mxu1 %v6143_v30  ;;  %v3591_v30 = vld [vmem:[%s10582_s5 + $0x8] sm:$0xff] }
 0x2b1   :  { %v1586_v18 = vmul.f32 %v7451_v25, %v1216_v10  ;;  %v8716_v16 = vpop.f32.mrb[62].mxu1  ;;  %6305 = vset.pattern.permute.xlu1 %v10607_v4  ;;  %v6146_v58 = vpack.c.bf16 %v3591_v30, %v3590_v53 }
 0x2b2   :  { %10648 = vst [vmem:[#allocation11_spill] sm:$0xff] %v8716_v16  ;;  %v5192_v0 = vpop.f32.mrb[63].mxu1  ;;  %775 = vperm.xlu1 %6305, %v150_v15   ;;  %v1026_v16 = vadd.f32 %v8358_v47, %v895_v39 }
 0x2b3   :  { %v1711_v52 = vadd.f32 %v1586_v18, %v957_v28  ;;  %6147 = vmatpush3.bf16.msra.mxu0 %v6146_v58  ;;  %v731_v28 = vpop.permute.xlu0 %730 }
 0x2b4   :  { %v1492_v44 = vpop.permute.xlu1 %1491  ;;  %6148 = vmatprep.subr.bf16.mxu0 %v10613_v11 }
 0x2b5   :  { %v6496_v10 = vpop.eup %6495  ;;  %6497 = vtanh.f32 %v1711_v52  ;;  %v1655_v42 = vmul.f32 %v7451_v25, %v1492_v44 }
 0x2b6   :  { %6307 = vset.pattern.permute.xlu1 %v10609_v48  ;;  %5245 = vmatmul.mubr.f32.gmra.mrb[98].mxu1 %v6496_v10  ;;  %6499 = vtanh.f32 %v1712_v37 }
 0x2b7   :  { %v1780_v1 = vadd.f32 %v1655_v42, %v1026_v16  ;;  %1535 = vperm.xlu1 %6307, %v150_v15   ;;  %5247 = vmatprep.mubr.msk.f32.mxu1 %vm7087_vm0, %v10610_v9  ;;  %v391_v10 = vpop.permute.xlu0 %390 }
 0x2b8   :  { %v829_v30 = vmul.f32 %v7440_v17, %v391_v10 }
 0x2b9   :  { %6501 = vtanh.f32 %v1780_v1  ;;  %v726_v39 = vpop.permute.xlu1 %725 }
 0x2ba   :  { %v896_v48 = vmul.f32 %v7440_v17, %v726_v39 }
 0x2bb   :  { %v8737_v42 = vpop.f32.mrb[52].mxu0  ;;  %6308 = vset.pattern.permute.xlu1 %v10607_v4 }
 0x2bc   :  { %v4988_v15 = vpop.f32.mrb[53].mxu0  ;;  %435 = vperm.xlu1 %6308, %v8401_v24   ;;  %v1027_v37 = vadd.f32 %v8358_v47, %v896_v48  ;;  %v960_v48 = vadd.f32 %v8358_v47, %v829_v30 }
 0x2be   :  { %v1496_v18 = vpop.permute.xlu1 %1495 }
 0x2bf   :  { %v6498_v16 = vpop.eup %6497  ;;  %v1656_v1 = vmul.f32 %v7451_v25, %v1496_v18  ;;  %v8744_v63 = vpop.f32.mrb[54].mxu0 }
 0x2c0   :  { %v8746_v59 = vpop.f32.mrb[64].mxu1  ;;  %v4991_v0 = vpop.f32.mrb[55].mxu0  ;;  %440 = vperm.xlu1 %6308, %v8409_v29   ;;  %5041 = vmatmul.mubr.f32.gmra.mrb[88].mxu0 %v6498_v16  ;;  %v10650_v29 = vld [vmem:[#allocation12_spill] sm:$0xff] }
 0x2c1   :  { %10649 = vst [vmem:[#allocation33_spill] sm:$0xff] %v8746_v59  ;;  %v5195_v52 = vpop.f32.mrb[65].mxu1  ;;  %v1781_v4 = vadd.f32 %v1656_v1, %v1027_v37  ;;  %5043 = vmatprep.mubr.msk.f32.mxu0 %vm7087_vm0, %v10610_v9  ;;  %v6500_v24 = vpop.eup %6499  ;;  %v1589_v39 = vmul.f32 %v7451_v25, %v10650_v29 }
 0x2c3   :  { %v6502_v44 = vpop.eup %6501  ;;  %6503 = vtanh.f32 %v1781_v4  ;;  %v386_v53 = vpop.permute.xlu1 %385  ;;  %v1714_v52 = vadd.f32 %v1589_v39, %v960_v48 }
 0x2c4   :  { %445 = vperm.xlu1 %6308, %v8422_v32   ;;  %5044 = vmatmul.mubr.f32.gmra.mrb[90].mxu0 %v6500_v24  ;;  %v828_v58 = vmul.f32 %v7440_v17, %v386_v53  ;;  %v897_v32 = vmul.f32 %v7440_v17, %v731_v28 }
 0x2c5   :  { %5248 = vmatmul.mubr.f32.gmra.mrb[100].mxu1 %v6502_v44  ;;  %5046 = vmatprep.mubr.msk.f32.mxu0 %vm7087_vm0, %v10610_v9 }
 0x2c6   :  { %5250 = vmatprep.mubr.msk.f32.mxu1 %vm7087_vm0, %v10610_v9  ;;  %v959_v18 = vadd.f32 %v8358_v47, %v828_v58  ;;  %v1028_v44 = vadd.f32 %v8358_v47, %v897_v32  ;;  %v741_v58 = vpop.permute.xlu0 %740 }
 0x2c8   :  { %450 = vperm.xlu1 %6308, %v8434_v19   ;;  %v1224_v15 = vpop.permute.xlu1 %1223 }
 0x2c9   :  { %v1588_v16 = vmul.f32 %v7451_v25, %v1224_v15  ;;  %v8765_v37 = vpop.f32.mrb[66].mxu1 }
 0x2ca   :  { %10651 = vst [vmem:[#allocation12_spill] sm:$0xff] %v8765_v37  ;;  %v5198_v1 = vpop.f32.mrb[67].mxu1 }
 0x2cb   :  { %v1713_v0 = vadd.f32 %v1588_v16, %v959_v18  ;;  %v3593_v18 = vld [vmem:[%s10582_s5 + $0x18] sm:$0xff] }
 0x2cc   :  { %455 = vperm.xlu1 %6308, %v8446_v34   ;;  %v1500_v4 = vpop.permute.xlu1 %1499 }
 0x2cd   :  { %v6504_v24 = vpop.eup %6503  ;;  %6505 = vtanh.f32 %v1713_v0  ;;  %v1657_v19 = vmul.f32 %v7451_v25, %v1500_v4 }
 0x2ce   :  { %5251 = vmatmul.mubr.f32.gmra.mrb[102].mxu1 %v6504_v24  ;;  %6507 = vtanh.f32 %v1714_v52  ;;  %v401_v24 = vpop.permute.xlu0 %400 }
 0x2cf   :  { %v1782_v28 = vadd.f32 %v1657_v19, %v1028_v44  ;;  %5253 = vmatprep.mubr.msk.f32.mxu1 %vm7087_vm0, %v10610_v9  ;;  %v831_v19 = vmul.f32 %v7440_v17, %v401_v24 }
 0x2d0   :  { %460 = vperm.xlu1 %6308, %v8473_v6   ;;  %v3592_v6 = vld [vmem:[%s10582_s5 + $0x10] sm:$0xff] }
 0x2d1   :  { %6509 = vtanh.f32 %v1782_v28  ;;  %v736_v10 = vpop.permute.xlu1 %735  ;;  %v6149_v1 = vpack.c.bf16 %v3593_v18, %v3592_v6 }
 0x2d2   :  { %v898_v53 = vmul.f32 %v7440_v17, %v736_v10  ;;  %v10653_v10 = vld [vmem:[#allocation13_spill] sm:$0xff] }
 0x2d3   :  { %v8774_v34 = vpop.f32.mrb[56].mxu0  ;;  %6150 = vmatpush3.bf16.msra.mxu0 %v6149_v1 }
 0x2d4   :  { %v4994_v30 = vpop.f32.mrb[57].mxu0  ;;  %465 = vperm.xlu1 %6308, %v8487_v46   ;;  %v1029_v48 = vadd.f32 %v8358_v47, %v898_v53  ;;  %6151 = vmatprep.subr.bf16.mxu0 %v10613_v11  ;;  %v1591_v53 = vmul.f32 %v7451_v25, %v10653_v10 }
 0x2d5   :  { %v8803_v30 = vld [vmem:[%s10581_s2] ss:$0 sm:$0xff] }
 0x2d6   :  { %v1504_v29 = vpop.permute.xlu1 %1503 }
 0x2d7   :  { %v6506_v39 = vpop.eup %6505  ;;  %v1658_v15 = vmul.f32 %v7451_v25, %v1504_v29  ;;  %v8779_v32 = vpop.f32.mrb[58].mxu0  ;;  %v962_v29 = vadd.f32 %v8803_v30, %v831_v19 }
 0x2d8   :  { %v8787_v16 = vpop.f32.mrb[68].mxu1  ;;  %v4997_v46 = vpop.f32.mrb[59].mxu0  ;;  %5047 = vmatmul.mubr.f32.gmra.mrb[92].mxu0 %v6506_v39 }
 0x2d9   :  { %10652 = vst [vmem:[#allocation34_spill] sm:$0xff] %v8787_v16  ;;  %v1783_v0 = vadd.f32 %v1658_v15, %v1029_v48  ;;  %v5201_v52 = vpop.f32.mrb[69].mxu1  ;;  %5049 = vmatprep.mubr.msk.f32.mxu0 %vm7087_vm0, %v10610_v9  ;;  %v6508_v47 = vpop.eup %6507  ;;  %v899_v48 = vmul.f32 %v7440_v17, %v741_v58 }
 0x2db   :  { %v6510_v4 = vpop.eup %6509  ;;  %6511 = vtanh.f32 %v1783_v0  ;;  %v396_v44 = vpop.permute.xlu1 %395  ;;  %v1716_v0 = vadd.f32 %v1591_v53, %v962_v29 }
 0x2dc   :  { %5050 = vmatmul.mubr.f32.gmra.mrb[94].mxu0 %v6508_v47  ;;  %5254 = vmatmul.mubr.f32.gmra.mrb[104].mxu1 %v6510_v4  ;;  %v830_v28 = vmul.f32 %v7440_v17, %v396_v44  ;;  %v1030_v4 = vadd.f32 %v8803_v30, %v899_v48  ;;  %v751_v53 = vpop.permute.xlu0 %750 }
 0x2dd   :  { %5256 = vmatprep.mubr.msk.f32.mxu1 %vm7087_vm0, %v10610_v9  ;;  %5052 = vmatprep.mubr.msk.f32.mxu0 %vm7087_vm0, %v10610_v9 }
 0x2de   :  { %v961_v15 = vadd.f32 %v8803_v30, %v830_v28 }
 0x2e0   :  { %v1232_v39 = vpop.permute.xlu1 %1231 }
 0x2e1   :  { %v1590_v6 = vmul.f32 %v7451_v25, %v1232_v39  ;;  %v8809_v18 = vpop.f32.mrb[70].mxu1 }
 0x2e2   :  { %10654 = vst [vmem:[#allocation13_spill] sm:$0xff] %v8809_v18  ;;  %v5204_v46 = vpop.f32.mrb[71].mxu1 }
 0x2e3   :  { %v1715_v1 = vadd.f32 %v1590_v6, %v961_v15 }
 0x2e4   :  { %v1508_v52 = vpop.permute.xlu1 %1507 }
 0x2e5   :  { %v6512_v47 = vpop.eup %6511  ;;  %6513 = vtanh.f32 %v1715_v1  ;;  %v1659_v24 = vmul.f32 %v7451_v25, %v1508_v52 }
 0x2e6   :  { %5257 = vmatmul.mubr.f32.gmra.mrb[106].mxu1 %v6512_v47  ;;  %6515 = vtanh.f32 %v1716_v0 }
 0x2e7   :  { %v1784_v44 = vadd.f32 %v1659_v24, %v1030_v4  ;;  %5259 = vmatprep.mubr.msk.f32.mxu1 %vm7087_vm0, %v10610_v9  ;;  %v411_v24 = vpop.permute.xlu0 %410 }
 0x2e9   :  { %6517 = vtanh.f32 %v1784_v44  ;;  %v746_v58 = vpop.permute.xlu1 %745 }
 0x2ea   :  { %v900_v19 = vmul.f32 %v7440_v17, %v746_v58  ;;  %v833_v58 = vmul.f32 %v7440_v17, %v411_v24 }
 0x2eb   :  { %v8816_v28 = vpop.f32.mrb[60].mxu0 }
 0x2ec   :  { %v5000_v10 = vpop.f32.mrb[61].mxu0  ;;  %v1031_v48 = vadd.f32 %v8803_v30, %v900_v19  ;;  %v3594_v19 = vld [vmem:[%s10582_s5 + $0x20] sm:$0xff] }
 0x2ed   :  { %v3595_v10 = vld [vmem:[%s10582_s5 + $0x28] sm:$0xff] }
 0x2ee   :  { %v1512_v29 = vpop.permute.xlu1 %1511 }
 0x2ef   :  { %v6514_v39 = vpop.eup %6513  ;;  %v1660_v15 = vmul.f32 %v7451_v25, %v1512_v29  ;;  %v8820_v6 = vpop.f32.mrb[62].mxu0 }
 0x2f0   :  { %v8822_v46 = vpop.f32.mrb[72].mxu1  ;;  %v5003_v1 = vpop.f32.mrb[63].mxu0  ;;  %5053 = vmatmul.mubr.f32.gmra.mrb[96].mxu0 %v6514_v39  ;;  %v6152_v39 = vpack.c.bf16 %v3595_v10, %v3594_v19 }
 0x2f1   :  { %10655 = vst [vmem:[#allocation35_spill] sm:$0xff] %v8822_v46  ;;  %v5207_v0 = vpop.f32.mrb[73].mxu1  ;;  %v1785_v52 = vadd.f32 %v1660_v15, %v1031_v48  ;;  %5055 = vmatprep.mubr.msk.f32.mxu0 %vm7087_vm0, %v10610_v9  ;;  %v6516_v47 = vpop.eup %6515  ;;  %v10656_v48 = vld [vmem:[#allocation14_spill] sm:$0xff]  ;;  %v964_v1 = vadd.f32 %v8803_v30, %v833_v58 }
 0x2f2   :  { %6153 = vmatpush3.bf16.msra.mxu0 %v6152_v39  ;;  %v1593_v15 = vmul.f32 %v7451_v25, %v10656_v48 }
 0x2f3   :  { %v6518_v4 = vpop.eup %6517  ;;  %6519 = vtanh.f32 %v1785_v52  ;;  %v406_v44 = vpop.permute.xlu1 %405  ;;  %6154 = vmatprep.subr.bf16.mxu0 %v10613_v11  ;;  %v901_v52 = vmul.f32 %v7440_v17, %v751_v53 }
 0x2f4   :  { %5056 = vmatmul.mubr.f32.gmra.mrb[98].mxu0 %v6516_v47  ;;  %5260 = vmatmul.mubr.f32.gmra.mrb[108].mxu1 %v6518_v4  ;;  %v832_v29 = vmul.f32 %v7440_v17, %v406_v44  ;;  %v1718_v19 = vadd.f32 %v1593_v15, %v964_v1 }
 0x2f5   :  { %5262 = vmatprep.mubr.msk.f32.mxu1 %vm7087_vm0, %v10610_v9  ;;  %5058 = vmatprep.mubr.msk.f32.mxu0 %vm7087_vm0, %v10610_v9  ;;  %v1032_v48 = vadd.f32 %v8803_v30, %v901_v52 }
 0x2f6   :  { %v963_v47 = vadd.f32 %v8803_v30, %v832_v29  ;;  %v761_v29 = vpop.permute.xlu0 %760 }
 0x2f8   :  { %v1240_v0 = vpop.permute.xlu1 %1239 }
 0x2f9   :  { %v1592_v4 = vmul.f32 %v7451_v25, %v1240_v0  ;;  %v8845_v24 = vpop.f32.mrb[74].mxu1 }
 0x2fa   :  { %10657 = vst [vmem:[#allocation14_spill] sm:$0xff] %v8845_v24  ;;  %v5210_v44 = vpop.f32.mrb[75].mxu1 }
 0x2fb   :  { %v1717_v46 = vadd.f32 %v1592_v4, %v963_v47 }
 0x2fc   :  { %v1516_v10 = vpop.permute.xlu1 %1515 }
 0x2fd   :  { %v6520_v39 = vpop.eup %6519  ;;  %6521 = vtanh.f32 %v1717_v46  ;;  %v1661_v58 = vmul.f32 %v7451_v25, %v1516_v10 }
 0x2fe   :  { %5263 = vmatmul.mubr.f32.gmra.mrb[110].mxu1 %v6520_v39  ;;  %6523 = vtanh.f32 %v1718_v19  ;;  %v421_v19 = vpop.permute.xlu0 %420 }
 0x2ff   :  { %v1786_v18 = vadd.f32 %v1661_v58, %v1032_v48  ;;  %5265 = vmatprep.mubr.msk.f32.mxu1 %vm7087_vm0, %v10610_v9 }
 0x301   :  { %6525 = vtanh.f32 %v1786_v18  ;;  %v756_v53 = vpop.permute.xlu1 %755 }
 0x302   :  { %v902_v0 = vmul.f32 %v7440_v17, %v756_v53 }
 0x303   :  { %v8852_v47 = vpop.f32.mrb[64].mxu0 }
 0x304   :  { %v5006_v15 = vpop.f32.mrb[65].mxu0  ;;  %v1033_v46 = vadd.f32 %v8803_v30, %v902_v0  ;;  %v835_v0 = vmul.f32 %v7440_v17, %v421_v19 }
 0x306   :  { %v1520_v1 = vpop.permute.xlu1 %1519 }
 0x307   :  { %v6522_v4 = vpop.eup %6521  ;;  %v1662_v52 = vmul.f32 %v7451_v25, %v1520_v1  ;;  %v8856_v44 = vpop.f32.mrb[66].mxu0 }
 0x308   :  { %v8858_v10 = vpop.f32.mrb[76].mxu1  ;;  %v5009_v39 = vpop.f32.mrb[67].mxu0  ;;  %5059 = vmatmul.mubr.f32.gmra.mrb[100].mxu0 %v6522_v4  ;;  %v966_v4 = vadd.f32 %v8803_v30, %v835_v0  ;;  %v3597_v0 = vld [vmem:[%s10582_s5 + $0x38] sm:$0xff] }
 0x309   :  { %10658 = vst [vmem:[#allocation36_spill] sm:$0xff] %v8858_v10  ;;  %v5213_v18 = vpop.f32.mrb[77].mxu1  ;;  %v1787_v48 = vadd.f32 %v1662_v52, %v1033_v46  ;;  %5061 = vmatprep.mubr.msk.f32.mxu0 %vm7087_vm0, %v10610_v9  ;;  %v6524_v58 = vpop.eup %6523  ;;  %v903_v52 = vmul.f32 %v7440_v17, %v761_v29 }
 0x30b   :  { %v6526_v53 = vpop.eup %6525  ;;  %6527 = vtanh.f32 %v1787_v48  ;;  %v416_v15 = vpop.permute.xlu1 %415  ;;  %v10660_v48 = vld [vmem:[#allocation15_spill] sm:$0xff] }
 0x30c   :  { %5062 = vmatmul.mubr.f32.gmra.mrb[102].mxu0 %v6524_v58  ;;  %5266 = vmatmul.mubr.f32.gmra.mrb[112].mxu1 %v6526_v53  ;;  %v834_v1 = vmul.f32 %v7440_v17, %v416_v15  ;;  %v1595_v58 = vmul.f32 %v7451_v25, %v10660_v48  ;;  %v3596_v15 = vld [vmem:[%s10582_s5 + $0x30] sm:$0xff] }
 0x30d   :  { %5268 = vmatprep.mubr.msk.f32.mxu1 %vm7087_vm0, %v10610_v9  ;;  %5064 = vmatprep.mubr.msk.f32.mxu0 %vm7087_vm0, %v10610_v9  ;;  %v6155_v29 = vpack.c.bf16 %v3597_v0, %v3596_v15 }
 0x30e   :  { %v965_v39 = vadd.f32 %v8803_v30, %v834_v1  ;;  %v1720_v24 = vadd.f32 %v1595_v58, %v966_v4 }
 0x30f   :  { %6156 = vmatpush3.bf16.msra.mxu0 %v6155_v29 }
 0x310   :  { %v1248_v46 = vpop.permute.xlu1 %1247  ;;  %6157 = vmatprep.subr.bf16.mxu0 %v10613_v11 }
 0x311   :  { %v1594_v18 = vmul.f32 %v7451_v25, %v1248_v46  ;;  %v8872_v19 = vpop.f32.mrb[78].mxu1  ;;  %v1034_v46 = vadd.f32 %v8803_v30, %v903_v52 }
 0x312   :  { %10659 = vst [vmem:[#allocation37_spill] sm:$0xff] %v8872_v19  ;;  %v5216_v53 = vpop.f32.mrb[79].mxu1 }
 0x313   :  { %v1719_v10 = vadd.f32 %v1594_v18, %v965_v39  ;;  %v771_v53 = vpop.permute.xlu0 %770 }
 0x314   :  { %v1524_v1 = vpop.permute.xlu1 %1523 }
 0x315   :  { %v6528_v16 = vpop.eup %6527  ;;  %6529 = vtanh.f32 %v1719_v10  ;;  %v1663_v19 = vmul.f32 %v7451_v25, %v1524_v1 }
 0x316   :  { %5269 = vmatmul.mubr.f32.gmra.mrb[114].mxu1 %v6528_v16  ;;  %6531 = vtanh.f32 %v1720_v24 }
 0x317   :  { %v1788_v48 = vadd.f32 %v1663_v19, %v1034_v46  ;;  %5271 = vmatprep.mubr.msk.f32.mxu1 %vm7087_vm0, %v10610_v9  ;;  %v431_v10 = vpop.permute.xlu0 %430 }
 0x318   :  { %v837_v37 = vmul.f32 %v7440_v17, %v431_v10 }
 0x319   :  { %6533 = vtanh.f32 %v1788_v48  ;;  %v766_v39 = vpop.permute.xlu1 %765 }
 0x31a   :  { %v904_v4 = vmul.f32 %v7440_v17, %v766_v39 }
 0x31b   :  { %v8888_v18 = vpop.f32.mrb[68].mxu0 }
 0x31c   :  { %v5012_v52 = vpop.f32.mrb[69].mxu0  ;;  %v1035_v16 = vadd.f32 %v8803_v30, %v904_v4  ;;  %v1260_v4 = vpop.permute.xlu0 %1259 }
 0x31e   :  { %v1528_v58 = vpop.permute.xlu1 %1527 }
 0x31f   :  { %v6530_v15 = vpop.eup %6529  ;;  %v1664_v0 = vmul.f32 %v7451_v25, %v1528_v58  ;;  %v8892_v19 = vpop.f32.mrb[70].mxu0 }
 0x320   :  { %v8894_v29 = vpop.f32.mrb[80].mxu1  ;;  %v5015_v24 = vpop.f32.mrb[71].mxu0  ;;  %5065 = vmatmul.mubr.f32.gmra.mrb[104].mxu0 %v6530_v15  ;;  %v968_v15 = vadd.f32 %v8803_v30, %v837_v37 }
 0x321   :  { %10661 = vst [vmem:[#allocation15_spill] sm:$0xff] %v8894_v29  ;;  %v5219_v1 = vpop.f32.mrb[81].mxu1  ;;  %v1789_v46 = vadd.f32 %v1664_v0, %v1035_v16  ;;  %5067 = vmatprep.mubr.msk.f32.mxu0 %vm7087_vm0, %v10610_v9  ;;  %v6532_v48 = vpop.eup %6531  ;;  %v1597_v16 = vmul.f32 %v7451_v25, %v1260_v4  ;;  %v905_v24 = vmul.f32 %v7440_v17, %v771_v53 }
 0x322   :  { %v1264_v53 = vpop.permute.xlu0 %1263 }
 0x323   :  { %v6534_v39 = vpop.eup %6533  ;;  %6535 = vtanh.f32 %v1789_v46  ;;  %v426_v52 = vpop.permute.xlu1 %425  ;;  %v1036_v3 = vadd.f32 %v8803_v30, %v905_v24 }
 0x324   :  { %5068 = vmatmul.mubr.f32.gmra.mrb[106].mxu0 %v6532_v48  ;;  %5272 = vmatmul.mubr.f32.gmra.mrb[116].mxu1 %v6534_v39  ;;  %v836_v58 = vmul.f32 %v7440_v17, %v426_v52  ;;  %v1722_v52 = vadd.f32 %v1597_v16, %v968_v15  ;;  %v3598_v15 = vld [vmem:[%s10582_s5 + $0x40] sm:$0xff] }
 0x325   :  { %5274 = vmatprep.mubr.msk.f32.mxu1 %vm7087_vm0, %v10610_v9  ;;  %5070 = vmatprep.mubr.msk.f32.mxu0 %vm7087_vm0, %v10610_v9 }
 0x326   :  { %v967_v10 = vadd.f32 %v8803_v30, %v836_v58  ;;  %v1268_v16 = vpop.permute.xlu0 %1267 }
 0x328   :  { %v1256_v0 = vpop.permute.xlu1 %1255 }
 0x329   :  { %v1596_v1 = vmul.f32 %v7451_v25, %v1256_v0  ;;  %v8909_v46 = vpop.f32.mrb[82].mxu1 }
 0x32a   :  { %10662 = vst [vmem:[#allocation38_spill] sm:$0xff] %v8909_v46  ;;  %v5222_v48 = vpop.f32.mrb[83].mxu1 }
 0x32b   :  { %v1721_v39 = vadd.f32 %v1596_v1, %v967_v10 }
 0x32c   :  { %v1532_v29 = vpop.permute.xlu1 %1531 }
 0x32d   :  { %v6536_v59 = vpop.eup %6535  ;;  %6537 = vtanh.f32 %v1721_v39  ;;  %v1665_v37 = vmul.f32 %v7451_v25, %v1532_v29 }
 0x32e   :  { %5275 = vmatmul.mubr.f32.gmra.mrb[118].mxu1 %v6536_v59  ;;  %6539 = vtanh.f32 %v1722_v52  ;;  %v3599_v59 = vld [vmem:[%s10582_s5 + $0x48] sm:$0xff] }
 0x32f   :  { %v1790_v4 = vadd.f32 %v1665_v37, %v1036_v3  ;;  %5277 = vmatprep.mubr.msk.f32.mxu1 %vm7087_vm0, %v10610_v9  ;;  %v6158_v29 = vpack.c.bf16 %v3599_v59, %v3598_v15 }
 0x331   :  { %6541 = vtanh.f32 %v1790_v4  ;;  %v776_v58 = vpop.permute.xlu1 %775  ;;  %6159 = vmatpush3.bf16.msra.mxu0 %v6158_v29 }
 0x332   :  { %v906_v0 = vmul.f32 %v7440_v17, %v776_v58  ;;  %6160 = vmatprep.subr.bf16.mxu0 %v10613_v11 }
 0x333   :  { %v8916_v10 = vpop.f32.mrb[72].mxu0 }
 0x334   :  { %v5018_v3 = vpop.f32.mrb[73].mxu0  ;;  %v1037_v48 = vadd.f32 %v8803_v30, %v906_v0  ;;  %v8936_v0 = vld [vmem:[%s10583_s4] ss:$0 sm:$0xff] }
 0x335   :  { %v2005_v3 = vadd.f32 %v8936_v0, %v8089_v55  ;;  %v2010_v55 = vadd.f32 %v8936_v0, %v8260_v23 }
 0x336   :  { %v1536_v24 = vpop.permute.xlu1 %1535 }
 0x337   :  { %v6538_v1 = vpop.eup %6537  ;;  %v1666_v39 = vmul.f32 %v7451_v25, %v1536_v24  ;;  %v8926_v52 = vpop.f32.mrb[74].mxu0 }
 0x338   :  { %v8928_v37 = vpop.f32.mrb[84].mxu1  ;;  %v5021_v4 = vpop.f32.mrb[75].mxu0  ;;  %5071 = vmatmul.mubr.f32.gmra.mrb[108].mxu0 %v6538_v1 }
 0x339   :  { %10663 = vst [vmem:[#allocation39_spill] sm:$0xff] %v8928_v37  ;;  %v5225_v58 = vpop.f32.mrb[85].mxu1  ;;  %v1791_v46 = vadd.f32 %v1666_v39, %v1037_v48  ;;  %5073 = vmatprep.mubr.msk.f32.mxu0 %vm7087_vm0, %v10610_v9  ;;  %v6540_v15 = vpop.eup %6539  ;;  %v1598_v48 = vmul.f32 %v7451_v25, %v1264_v53  ;;  %v2015_v53 = vadd.f32 %v8936_v0, %v8263_v26 }
 0x33a   :  { %v1272_v24 = vpop.permute.xlu0 %1271 }
 0x33b   :  { %v6542_v59 = vpop.eup %6541  ;;  %6543 = vtanh.f32 %v1791_v46  ;;  %v436_v29 = vpop.permute.xlu1 %435 }
 0x33c   :  { %v838_v1 = vmul.f32 %v7440_v17, %v436_v29  ;;  %5074 = vmatmul.mubr.f32.gmra.mrb[110].mxu0 %v6540_v15  ;;  %5278 = vmatmul.mubr.f32.gmra.mrb[120].mxu1 %v6542_v59  ;;  %6545 = vtanh.f32 %v2005_v3  ;;  %v1599_v59 = vmul.f32 %v7451_v25, %v1268_v16  ;;  %v2020_v16 = vadd.f32 %v8936_v0, %v8279_v14 }
 0x33d   :  { %5280 = vmatprep.mubr.msk.f32.mxu1 %vm7087_vm0, %v10610_v9  ;;  %5076 = vmatprep.mubr.msk.f32.mxu0 %vm7087_vm0, %v10610_v9 }
 0x33e   :  { %v969_v39 = vadd.f32 %v8803_v30, %v838_v1  ;;  %v1276_v29 = vpop.permute.xlu0 %1275 }
 0x33f   :  { %v441_v46 = vpop.permute.xlu1 %440 }
 0x340   :  { %v1723_v4 = vadd.f32 %v1598_v48, %v969_v39  ;;  %v839_v58 = vmul.f32 %v7440_v17, %v441_v46  ;;  %v1600_v39 = vmul.f32 %v7451_v25, %v1272_v24 }
 0x341   :  { %v8950_v15 = vpop.f32.mrb[86].mxu1 }
 0x342   :  { %6547 = vtanh.f32 %v1723_v4  ;;  %v970_v37 = vadd.f32 %v8803_v30, %v839_v58  ;;  %v5228_v7 = vpop.f32.mrb[87].mxu1  ;;  %v1280_v26 = vpop.permute.xlu0 %1279  ;;  %v1601_v58 = vmul.f32 %v7451_v25, %v1276_v29 }
 0x343   :  { %6549 = vtanh.f32 %v2010_v55  ;;  %v446_v3 = vpop.permute.xlu1 %445 }
 0x344   :  { %v1724_v1 = vadd.f32 %v1599_v59, %v970_v37  ;;  %v840_v23 = vmul.f32 %v7440_v17, %v446_v3  ;;  %v2025_v59 = vadd.f32 %v8936_v0, %v8287_v62  ;;  %v2030_v62 = vadd.f32 %v8936_v0, %v8294_v13 }
 0x345   :  { %v6544_v48 = vpop.eup %6543 }
 0x346   :  { %6551 = vtanh.f32 %v1724_v1  ;;  %v971_v46 = vadd.f32 %v8803_v30, %v840_v23  ;;  %5281 = vmatmul.mubr.f32.gmra.mrb[122].mxu1 %v6544_v48  ;;  %v6546_v4 = vpop.eup %6545 }
 0x347   :  { %6553 = vtanh.f32 %v2015_v53  ;;  %v451_v7 = vpop.permute.xlu1 %450  ;;  %5315 = vmatprep.mubr.msk.f32.mxu1 %vm7087_vm0, %v10610_v9 }
 0x348   :  { %v1725_v55 = vadd.f32 %v1600_v39, %v971_v46  ;;  %v841_v37 = vmul.f32 %v7440_v17, %v451_v7  ;;  %v1602_v39 = vmul.f32 %v7451_v25, %v1280_v26  ;;  %v1284_v46 = vpop.permute.xlu0 %1283 }
 0x349   :  { %v1603_v13 = vmul.f32 %v7451_v25, %v1284_v46 }
 0x34a   :  { %6555 = vtanh.f32 %v1725_v55  ;;  %v972_v24 = vadd.f32 %v8803_v30, %v841_v37  ;;  %5316 = vmatmul.mubr.f32.vlgmr.msra.gmra.mrb[124].mxu1 %v6546_v4 }
 0x34b   :  { %6557 = vtanh.f32 %v2020_v16  ;;  %v8968_v14 = vpop.f32.mrb[76].mxu0  ;;  %v456_v53 = vpop.permute.xlu1 %455  ;;  %5318 = vmatprep.mubr.msk.f32.mxu1 %vm7087_vm0, %v10610_v9 }
 0x34c   :  { %v6548_v3 = vpop.eup %6547  ;;  %v1726_v1 = vadd.f32 %v1601_v58, %v972_v24  ;;  %v842_v23 = vmul.f32 %v7440_v17, %v456_v53  ;;  %v5024_v48 = vpop.f32.mrb[77].mxu0 }
 0x34d   :  { %v6550_v29 = vpop.eup %6549  ;;  %5077 = vmatmul.mubr.f32.gmra.mrb[112].mxu0 %v6548_v3  ;;  %v1288_v48 = vpop.permute.xlu0 %1287 }
 0x34e   :  { %6559 = vtanh.f32 %v1726_v1  ;;  %v973_v16 = vadd.f32 %v8803_v30, %v842_v23  ;;  %5319 = vmatmul.mubr.f32.gmra.mrb[126].mxu1 %v6550_v29  ;;  %5079 = vmatprep.mubr.msk.f32.mxu0 %vm7087_vm0, %v10610_v9 }
 0x34f   :  { %6561 = vtanh.f32 %v2025_v59  ;;  %v8979_v7 = vpop.f32.mrb[78].mxu0  ;;  %v8981_v55 = vpop.f32.mrb[88].mxu1  ;;  %5321 = vmatprep.mubr.msk.f32.mxu1 %vm7087_vm0, %v10610_v9  ;;  %v2035_v59 = vadd.f32 %v8936_v0, %v8301_v12  ;;  %v3600_v12 = vld [vmem:[%s10582_s5 + $0x50] sm:$0xff] }
 0x350   :  { %v6552_v26 = vpop.eup %6551  ;;  %v1727_v37 = vadd.f32 %v1602_v39, %v973_v16  ;;  %v461_v4 = vpop.permute.xlu1 %460  ;;  %v3601_v39 = vld [vmem:[%s10582_s5 + $0x58] sm:$0xff] }
 0x351   :  { %v5027_v58 = vpop.f32.mrb[79].mxu0  ;;  %v6554_v24 = vpop.eup %6553  ;;  %v843_v53 = vmul.f32 %v7440_v17, %v461_v4  ;;  %5080 = vmatmul.mubr.f32.gmra.mrb[114].mxu0 %v6552_v26  ;;  %v6161_v26 = vpack.c.bf16 %v3601_v39, %v3600_v12  ;;  %v1604_v4 = vmul.f32 %v7451_v25, %v1288_v48  ;;  %v2045_v25 = vadd.f32 %v8936_v0, %v8328_v54 }
 0x352   :  { %v5231_v3 = vpop.f32.mrb[89].mxu1  ;;  %6563 = vtanh.f32 %v1727_v37  ;;  %5322 = vmatmul.mubr.f32.gmra.mrb[128].mxu1 %v6554_v24  ;;  %5082 = vmatprep.mubr.msk.f32.mxu0 %vm7087_vm0, %v10610_v9  ;;  %v2040_v37 = vadd.f32 %v8936_v0, %v8320_v22  ;;  %v2060_v39 = vadd.f32 %v8936_v0, %v8363_v49 }
 0x353   :  { %6565 = vtanh.f32 %v2030_v62  ;;  %v974_v1 = vadd.f32 %v8803_v30, %v843_v53  ;;  %5324 = vmatprep.mubr.msk.f32.mxu1 %vm7087_vm0, %v10610_v9  ;;  %6162 = vmatpush3.bf16.msra.mxu0 %v6161_v26 }
 0x354   :  { %v6556_v23 = vpop.eup %6555  ;;  %v466_v29 = vpop.permute.xlu1 %465  ;;  %6567 = vtanh.f32 %v2035_v59  ;;  %6163 = vmatprep.subr.bf16.mxu0 %v10613_v11 }
 0x355   :  { %v6558_v16 = vpop.eup %6557  ;;  %v1728_v62 = vadd.f32 %v1603_v13, %v974_v1  ;;  %v844_v46 = vmul.f32 %v7440_v17, %v466_v29  ;;  %5083 = vmatmul.mubr.f32.gmra.mrb[116].mxu0 %v6556_v23  ;;  %v2050_v13 = vadd.f32 %v8936_v0, %v8336_v2  ;;  %v2055_v23 = vadd.f32 %v8936_v0, %v8345_v60 }
 0x356   :  { %5325 = vmatmul.mubr.f32.gmra.mrb[130].mxu1 %v6558_v16  ;;  %5085 = vmatprep.mubr.msk.f32.mxu0 %vm7087_vm0, %v10610_v9 }
 0x357   :  { %6569 = vtanh.f32 %v1728_v62  ;;  %v975_v58 = vadd.f32 %v8803_v30, %v844_v46  ;;  %5327 = vmatprep.mubr.msk.f32.mxu1 %vm7087_vm0, %v10610_v9 }
 0x358   :  { %v6560_v17 = vpop.eup %6559  ;;  %6571 = vtanh.f32 %v2040_v37  ;;  %v2065_v37 = vadd.f32 %v8936_v0, %v8371_v61 }
 0x359   :  { %v6562_v24 = vpop.eup %6561  ;;  %v1729_v53 = vadd.f32 %v1604_v4, %v975_v58  ;;  %5086 = vmatmul.mubr.f32.gmra.mrb[118].mxu0 %v6560_v17  ;;  %v9010_v22 = vpop.f32.mrb[90].mxu1  ;;  %v3602_v4 = vld [vmem:[%s10582_s5 + $0x60] sm:$0xff]  ;;  %v3603_v58 = vld [vmem:[%s10582_s5 + $0x68] sm:$0xff]  ;;  %v2070_v17 = vadd.f32 %v8936_v0, %v8390_v41 }
 0x35a   :  { %v5234_v3 = vpop.f32.mrb[91].mxu1  ;;  %5328 = vmatmul.mubr.f32.gmra.mrb[132].mxu1 %v6562_v24  ;;  %5088 = vmatprep.mubr.msk.f32.mxu0 %vm7087_vm0, %v10610_v9  ;;  %v6164_v61 = vpack.c.bf16 %v3603_v58, %v3602_v4  ;;  %v2115_v4 = vadd.f32 %v8936_v0, %v8637_v56  ;;  %v2120_v56 = vadd.f32 %v8936_v0, %v8650_v31 }
 0x35b   :  { %6573 = vtanh.f32 %v1729_v53  ;;  %5330 = vmatprep.mubr.msk.f32.mxu1 %vm7087_vm0, %v10610_v9  ;;  %v2130_v31 = vadd.f32 %v8936_v0, %v8693_v8  ;;  %v2140_v8 = vadd.f32 %v8936_v0, %v8744_v63  ;;  %v2150_v63 = vadd.f32 %v8936_v0, %v8779_v32 }
 0x35c   :  { %v6564_v30 = vpop.eup %6563  ;;  %6575 = vtanh.f32 %v2045_v25  ;;  %6165 = vmatpush3.bf16.msra.mxu0 %v6164_v61  ;;  %v2075_v25 = vadd.f32 %v8936_v0, %v8424_v51  ;;  %v2160_v32 = vadd.f32 %v8936_v0, %v8820_v6  ;;  %v2170_v6 = vadd.f32 %v8936_v0, %v8856_v44 }
 0x35d   :  { %v6566_v59 = vpop.eup %6565  ;;  %5089 = vmatmul.mubr.f32.gmra.mrb[120].mxu0 %v6564_v30  ;;  %6577 = vtanh.f32 %v2050_v13  ;;  %6166 = vmatprep.subr.bf16.mxu0 %v10613_v11  ;;  %v2080_v30 = vadd.f32 %v8936_v0, %v8439_v40  ;;  %v2085_v11 = vadd.f32 %v8936_v0, %v8497_v5  ;;  %v2090_v40 = vadd.f32 %v8936_v0, %v8504_v45 }
 0x35e   :  { %5331 = vmatmul.mubr.f32.gmra.mrb[134].mxu1 %v6566_v59  ;;  %5091 = vmatprep.mubr.msk.f32.mxu0 %vm7087_vm0, %v10610_v9  ;;  %v6568_v1 = vpop.eup %6567  ;;  %6579 = vtanh.f32 %v2055_v23  ;;  %v2100_v45 = vadd.f32 %v8936_v0, %v8553_v33  ;;  %v2110_v33 = vadd.f32 %v8936_v0, %v8601_v27  ;;  %v3605_v27 = vld [vmem:[%s10582_s5 + $0x78] sm:$0xff]  ;;  %v2180_v44 = vadd.f32 %v8936_v0, %v8892_v19 }
 0x35f   :  { %5333 = vmatprep.mubr.msk.f32.mxu1 %vm7087_vm0, %v10610_v9  ;;  %6581 = vtanh.f32 %v2060_v39  ;;  %v2190_v19 = vadd.f32 %v8936_v0, %v8926_v52  ;;  %v2200_v52 = vadd.f32 %v8936_v0, %v8979_v7 }
 0x360   :  { %6583 = vtanh.f32 %v2065_v37 }
 0x361   :  { %v6570_v54 = vpop.eup %6569  ;;  %6585 = vtanh.f32 %v2070_v17 }
 0x362   :  { %5092 = vmatmul.mubr.f32.gmra.mrb[122].mxu0 %v6570_v54  ;;  %5334 = vmatmul.mubr.f32.gmra.mrb[136].mxu1 %v6568_v1  ;;  %v6572_v2 = vpop.eup %6571  ;;  %6587 = vtanh.f32 %v2075_v25 }
 0x363   :  { %v9026_v48 = vpop.f32.mrb[80].mxu0  ;;  %5094 = vmatprep.mubr.msk.f32.mxu0 %vm7087_vm0, %v10610_v9  ;;  %5336 = vmatprep.mubr.msk.f32.mxu1 %vm7087_vm0, %v10610_v9  ;;  %6589 = vtanh.f32 %v2080_v30 }
 0x364   :  { %v5030_v29 = vpop.f32.mrb[81].mxu0  ;;  %6591 = vtanh.f32 %v2085_v11  ;;  %v2125_v11 = vadd.f32 %v8936_v0, %v8686_v36  ;;  %v2135_v36 = vadd.f32 %v8936_v0, %v8737_v42 }
 0x365   :  { %v6574_v12 = vpop.eup %6573  ;;  %6593 = vtanh.f32 %v2090_v40 }
 0x366   :  { %5095 = vmatmul.mubr.f32.gmra.mrb[124].mxu0 %v6574_v12  ;;  %5337 = vmatmul.mubr.f32.gmra.mrb[138].mxu1 %v6572_v2  ;;  %v6576_v26 = vpop.eup %6575  ;;  %v2095_v12 = vadd.f32 %v8936_v0, %v8546_v21  ;;  %v2105_v21 = vadd.f32 %v8936_v0, %v8588_v38  ;;  %v3604_v38 = vld [vmem:[%s10582_s5 + $0x70] sm:$0xff] }
 0x367   :  { %v9034_v16 = vpop.f32.mrb[82].mxu0  ;;  %v9036_v60 = vpop.f32.mrb[92].mxu1  ;;  %5339 = vmatprep.mubr.msk.f32.mxu1 %vm7087_vm0, %v10610_v9  ;;  %5722 = vmatprep.mubr.msk.f32.mxu0 %vm7087_vm0, %v10610_v9  ;;  %v6167_v61 = vpack.c.bf16 %v3605_v27, %v3604_v38 }
 0x368   :  { %v5033_v62 = vpop.f32.mrb[83].mxu0  ;;  %v5237_v46 = vpop.f32.mrb[93].mxu1  ;;  %6595 = vtanh.f32 %v2095_v12  ;;  %v2145_v12 = vadd.f32 %v8936_v0, %v8774_v34  ;;  %v2210_v7 = vadd.f32 %v8936_v0, %v9034_v16 }
 0x369   :  { %v6578_v49 = vpop.eup %6577  ;;  %6597 = vtanh.f32 %v2100_v45  ;;  %6168 = vmatpush3.bf16.msra.mxu0 %v6167_v61 }
 0x36a   :  { %5340 = vmatmul.mubr.f32.gmra.mrb[140].mxu1 %v6576_v26  ;;  %v6580_v24 = vpop.eup %6579  ;;  %6599 = vtanh.f32 %v2105_v21 }
 0x36b   :  { %5342 = vmatprep.mubr.msk.f32.mxu1 %vm7087_vm0, %v10610_v9  ;;  %v6582_v41 = vpop.eup %6581  ;;  %6601 = vtanh.f32 %v2110_v33  ;;  %v2155_v33 = vadd.f32 %v8936_v0, %v8816_v28  ;;  %v2165_v28 = vadd.f32 %v8936_v0, %v8852_v47 }
 0x36c   :  { %v6584_v59 = vpop.eup %6583  ;;  %6603 = vtanh.f32 %v2115_v4 }
 0x36d   :  { %v6586_v1 = vpop.eup %6585  ;;  %6605 = vtanh.f32 %v2120_v56 }
 0x36e   :  { %5343 = vmatmul.mubr.f32.gmra.mrb[142].mxu1 %v6578_v49  ;;  %v6588_v29 = vpop.eup %6587  ;;  %6607 = vtanh.f32 %v2125_v11 }
 0x36f   :  { %5345 = vmatprep.mubr.msk.f32.mxu1 %vm7087_vm0, %v10610_v9  ;;  %v6590_v39 = vpop.eup %6589  ;;  %6609 = vtanh.f32 %v2130_v31  ;;  %v2185_v31 = vadd.f32 %v8936_v0, %v8916_v10  ;;  %v2195_v10 = vadd.f32 %v8936_v0, %v8968_v14 }
 0x370   :  { %v6592_v62 = vpop.eup %6591  ;;  %6611 = vtanh.f32 %v2135_v36 }
 0x371   :  { %v9056_v53 = vpop.f32.mrb[94].mxu1  ;;  %v6594_v37 = vpop.eup %6593  ;;  %6613 = vtanh.f32 %v2140_v8 }
 0x372   :  { %v5240_v3 = vpop.f32.mrb[95].mxu1  ;;  %5346 = vmatmul.mubr.f32.gmra.mrb[144].mxu1 %v6580_v24  ;;  %v6596_v49 = vpop.eup %6595  ;;  %6615 = vtanh.f32 %v2145_v12  ;;  %v2205_v12 = vadd.f32 %v8936_v0, %v9026_v48 }
 0x373   :  { %5348 = vmatprep.mubr.msk.f32.mxu1 %vm7087_vm0, %v10610_v9  ;;  %v6598_v24 = vpop.eup %6597  ;;  %6617 = vtanh.f32 %v2150_v63 }
 0x374   :  { %v6600_v30 = vpop.eup %6599  ;;  %6619 = vtanh.f32 %v2155_v33 }
 0x375   :  { %6621 = vtanh.f32 %v2160_v32 }
 0x376   :  { %5349 = vmatmul.mubr.f32.gmra.mrb[146].mxu1 %v6582_v41  ;;  %6623 = vtanh.f32 %v2165_v28 }
 0x377   :  { %5351 = vmatprep.mubr.msk.f32.mxu1 %vm7087_vm0, %v10610_v9  ;;  %6625 = vtanh.f32 %v2170_v6 }
 0x37a   :  { %5352 = vmatmul.mubr.f32.gmra.mrb[148].mxu1 %v6584_v59 }
 0x37b   :  { %v9069_v13 = vpop.f32.mrb[84].mxu0  ;;  %5354 = vmatprep.mubr.msk.f32.mxu1 %vm7087_vm0, %v10610_v9 }
 0x37c   :  { %v5036_v51 = vpop.f32.mrb[85].mxu0  ;;  %v2215_v33 = vadd.f32 %v8936_v0, %v9069_v13 }
 0x37d   :  { %v6602_v51 = vpop.eup %6601 }
 0x37e   :  { %5355 = vmatmul.mubr.f32.gmra.mrb[150].mxu1 %v6586_v1  ;;  %v6604_v1 = vpop.eup %6603 }
 0x37f   :  { %v9075_v54 = vpop.f32.mrb[86].mxu0  ;;  %v9077_v23 = vpop.f32.mrb[96].mxu1  ;;  %5357 = vmatprep.mubr.msk.f32.mxu1 %vm7087_vm0, %v10610_v9 }
 0x380   :  { %v5039_v5 = vpop.f32.mrb[87].mxu0  ;;  %v5243_v2 = vpop.f32.mrb[97].mxu1  ;;  %v2220_v16 = vadd.f32 %v8936_v0, %v9075_v54 }
 0x381   :  { %v6606_v2 = vpop.eup %6605 }
 0x382   :  { %5358 = vmatmul.mubr.f32.gmra.mrb[152].mxu1 %v6588_v29  ;;  %v6608_v29 = vpop.eup %6607 }
 0x383   :  { %5360 = vmatprep.mubr.msk.f32.mxu1 %vm7087_vm0, %v10610_v9  ;;  %v6610_v45 = vpop.eup %6609 }
 0x386   :  { %5361 = vmatmul.mubr.f32.gmra.mrb[154].mxu1 %v6590_v39 }
 0x387   :  { %5363 = vmatprep.mubr.msk.f32.mxu1 %vm7087_vm0, %v10610_v9 }
 0x389   :  { %v9089_v46 = vpop.f32.mrb[98].mxu1 }
 0x38a   :  { %v5246_v26 = vpop.f32.mrb[99].mxu1  ;;  %5364 = vmatmul.mubr.f32.gmra.mrb[156].mxu1 %v6592_v62 }
 0x38b   :  { %5366 = vmatprep.mubr.msk.f32.mxu1 %vm7087_vm0, %v10610_v9 }
 0x38e   :  { %5367 = vmatmul.mubr.f32.gmra.mrb[158].mxu1 %v6594_v37  ;;  %v6612_v37 = vpop.eup %6611 }
 0x38f   :  { %5369 = vmatprep.mubr.msk.f32.mxu1 %vm7087_vm0, %v10610_v9 }
 0x392   :  { %5370 = vmatmul.mubr.f32.gmra.mrb[160].mxu1 %v6596_v49  ;;  %v6614_v49 = vpop.eup %6613 }
 0x393   :  { %v9101_v58 = vpop.f32.mrb[88].mxu0  ;;  %5372 = vmatprep.mubr.msk.f32.mxu1 %vm7087_vm0, %v10610_v9  ;;  %v6616_v4 = vpop.eup %6615 }
 0x394   :  { %v5042_v17 = vpop.f32.mrb[89].mxu0  ;;  %v2225_v13 = vadd.f32 %v8936_v0, %v9101_v58 }
 0x395   :  { %v6618_v17 = vpop.eup %6617 }
 0x396   :  { %5373 = vmatmul.mubr.f32.gmra.mrb[162].mxu1 %v6598_v24  ;;  %v6620_v61 = vpop.eup %6619  ;;  %v2175_v24 = vadd.f32 %v8936_v0, %v8888_v18 }
 0x397   :  { %v9113_v3 = vpop.f32.mrb[90].mxu0  ;;  %5375 = vmatprep.mubr.msk.f32.mxu1 %vm7087_vm0, %v10610_v9 }
 0x398   :  { %v9117_v25 = vpop.f32.mrb[100].mxu1  ;;  %v5045_v41 = vpop.f32.mrb[91].mxu0  ;;  %6627 = vtanh.f32 %v2175_v24  ;;  %v2230_v54 = vadd.f32 %v8936_v0, %v9113_v3 }
 0x399   :  { %v5249_v59 = vpop.f32.mrb[101].mxu1  ;;  %v6622_v41 = vpop.eup %6621  ;;  %6629 = vtanh.f32 %v2180_v44 }
 0x39a   :  { %5376 = vmatmul.mubr.f32.gmra.mrb[164].mxu1 %v6600_v30  ;;  %6631 = vtanh.f32 %v2185_v31 }
 0x39b   :  { %5378 = vmatprep.mubr.msk.f32.mxu1 %vm7087_vm0, %v10610_v9  ;;  %6633 = vtanh.f32 %v2190_v19 }
 0x39c   :  { %6635 = vtanh.f32 %v2195_v10 }
 0x39d   :  { %6637 = vtanh.f32 %v2200_v52 }
 0x39e   :  { %5379 = vmatmul.mubr.f32.gmra.mrb[166].mxu1 %v6602_v51  ;;  %v6624_v51 = vpop.eup %6623  ;;  %6639 = vtanh.f32 %v2205_v12 }
 0x39f   :  { %5381 = vmatprep.mubr.msk.f32.mxu1 %vm7087_vm0, %v10610_v9  ;;  %6641 = vtanh.f32 %v2210_v7 }
 0x3a0   :  { %6643 = vtanh.f32 %v2215_v33 }
 0x3a1   :  { %v9127_v40 = vpop.f32.mrb[102].mxu1  ;;  %6645 = vtanh.f32 %v2220_v16 }
 0x3a2   :  { %v5252_v5 = vpop.f32.mrb[103].mxu1  ;;  %5382 = vmatmul.mubr.f32.gmra.mrb[168].mxu1 %v6604_v1  ;;  %v6626_v1 = vpop.eup %6625  ;;  %6647 = vtanh.f32 %v2225_v13 }
 0x3a3   :  { %5384 = vmatprep.mubr.msk.f32.mxu1 %vm7087_vm0, %v10610_v9  ;;  %v6628_v5 = vpop.eup %6627  ;;  %6649 = vtanh.f32 %v2230_v54 }
 0x3a4   :  { %v6630_v8 = vpop.eup %6629 }
 0x3a6   :  { %5385 = vmatmul.mubr.f32.gmra.mrb[170].mxu1 %v6606_v2 }
 0x3a7   :  { %5387 = vmatprep.mubr.msk.f32.mxu1 %vm7087_vm0, %v10610_v9 }
 0x3aa   :  { %5388 = vmatmul.mubr.f32.gmra.mrb[172].mxu1 %v6608_v29  ;;  %v6632_v29 = vpop.eup %6631 }
 0x3ab   :  { %v9139_v39 = vpop.f32.mrb[92].mxu0  ;;  %5390 = vmatprep.mubr.msk.f32.mxu1 %vm7087_vm0, %v10610_v9 }
 0x3ac   :  { %v5048_v42 = vpop.f32.mrb[93].mxu0  ;;  %v2235_v6 = vadd.f32 %v8936_v0, %v9139_v39 }
 0x3ae   :  { %5391 = vmatmul.mubr.f32.gmra.mrb[174].mxu1 %v6610_v45  ;;  %v6634_v45 = vpop.eup %6633  ;;  %6651 = vtanh.f32 %v2235_v6 }
 0x3af   :  { %v9145_v62 = vpop.f32.mrb[94].mxu0  ;;  %v9147_v26 = vpop.f32.mrb[104].mxu1  ;;  %5393 = vmatprep.mubr.msk.f32.mxu1 %vm7087_vm0, %v10610_v9 }
 0x3b0   :  { %v5051_v34 = vpop.f32.mrb[95].mxu0  ;;  %v5255_v21 = vpop.f32.mrb[105].mxu1  ;;  %v2240_v3 = vadd.f32 %v8936_v0, %v9145_v62 }
 0x3b2   :  { %5394 = vmatmul.mubr.f32.gmra.mrb[176].mxu1 %v6612_v37  ;;  %v6636_v37 = vpop.eup %6635  ;;  %6653 = vtanh.f32 %v2240_v3 }
 0x3b3   :  { %5396 = vmatprep.mubr.msk.f32.mxu1 %vm7087_vm0, %v10610_v9 }
 0x3b6   :  { %5397 = vmatmul.mubr.f32.gmra.mrb[178].mxu1 %v6614_v49  ;;  %v6638_v49 = vpop.eup %6637 }
 0x3b7   :  { %5399 = vmatprep.mubr.msk.f32.mxu1 %vm7087_vm0, %v10610_v9  ;;  %v6640_v32 = vpop.eup %6639 }
 0x3b8   :  { %v6642_v28 = vpop.eup %6641 }
 0x3b9   :  { %v9159_v38 = vpop.f32.mrb[106].mxu1 }
 0x3ba   :  { %v5258_v27 = vpop.f32.mrb[107].mxu1  ;;  %5400 = vmatmul.mubr.f32.gmra.mrb[180].mxu1 %v6616_v4 }
 0x3bb   :  { %5402 = vmatprep.mubr.msk.f32.mxu1 %vm7087_vm0, %v10610_v9 }
 0x3be   :  { %5403 = vmatmul.mubr.f32.gmra.mrb[182].mxu1 %v6618_v17  ;;  %v6644_v17 = vpop.eup %6643 }
 0x3bf   :  { %5405 = vmatprep.mubr.msk.f32.mxu1 %vm7087_vm0, %v10610_v9  ;;  %v6646_v24 = vpop.eup %6645 }
 0x3c0   :  { %v6648_v39 = vpop.eup %6647 }
 0x3c2   :  { %5406 = vmatmul.mubr.f32.gmra.mrb[184].mxu1 %v6620_v61 }
 0x3c3   :  { %v9171_v56 = vpop.f32.mrb[96].mxu0  ;;  %5408 = vmatprep.mubr.msk.f32.mxu1 %vm7087_vm0, %v10610_v9 }
 0x3c4   :  { %v5054_v47 = vpop.f32.mrb[97].mxu0 }
 0x3c6   :  { %5409 = vmatmul.mubr.f32.gmra.mrb[186].mxu1 %v6622_v41 }
 0x3c7   :  { %v9177_v30 = vpop.f32.mrb[98].mxu0  ;;  %v9179_v59 = vpop.f32.mrb[108].mxu1  ;;  %5411 = vmatprep.mubr.msk.f32.mxu1 %vm7087_vm0, %v10610_v9 }
 0x3c8   :  { %v5057_v18 = vpop.f32.mrb[99].mxu0  ;;  %v5261_v11 = vpop.f32.mrb[109].mxu1  ;;  %v2250_v62 = vadd.f32 %v8936_v0, %v9177_v30 }
 0x3c9   :  { %v2245_v11 = vadd.f32 %v8936_v0, %v9171_v56 }
 0x3ca   :  { %5412 = vmatmul.mubr.f32.gmra.mrb[188].mxu1 %v6624_v51  ;;  %v6650_v51 = vpop.eup %6649 }
 0x3cb   :  { %5414 = vmatprep.mubr.msk.f32.mxu1 %vm7087_vm0, %v10610_v9  ;;  %6655 = vtanh.f32 %v2245_v11  ;;  %v6652_v31 = vpop.eup %6651 }
 0x3cc   :  { %6657 = vtanh.f32 %v2250_v62 }
 0x3ce   :  { %5415 = vmatmul.mubr.f32.gmra.mrb[190].mxu1 %v6626_v1 }
 0x3cf   :  { %5417 = vmatprep.mubr.msk.f32.mxu1 %vm7087_vm0, %v10610_v9 }
 0x3d1   :  { %v9191_v36 = vpop.f32.mrb[110].mxu1 }
 0x3d2   :  { %v5264_v2 = vpop.f32.mrb[111].mxu1  ;;  %5418 = vmatmul.mubr.f32.gmra.mrb[192].mxu1 %v6628_v5  ;;  %v6654_v5 = vpop.eup %6653 }
 0x3d3   :  { %5420 = vmatprep.mubr.msk.f32.mxu1 %vm7087_vm0, %v10610_v9 }
 0x3d5   :  { %v6656_v2 = vpop.eup %6655 }
 0x3d6   :  { %5421 = vmatmul.mubr.f32.gmra.mrb[194].mxu1 %v6630_v8 }
 0x3d7   :  { %5423 = vmatprep.mubr.msk.f32.mxu1 %vm7087_vm0, %v10610_v9 }
 0x3da   :  { %5424 = vmatmul.mubr.f32.gmra.mrb[196].mxu1 %v6632_v29  ;;  %v6658_v29 = vpop.eup %6657 }
 0x3db   :  { %v9203_v42 = vpop.f32.mrb[100].mxu0  ;;  %5426 = vmatprep.mubr.msk.f32.mxu1 %vm7087_vm0, %v10610_v9 }
 0x3dc   :  { %v5060_v14 = vpop.f32.mrb[101].mxu0  ;;  %v2255_v56 = vadd.f32 %v8936_v0, %v9203_v42 }
 0x3de   :  { %5427 = vmatmul.mubr.f32.gmra.mrb[198].mxu1 %v6634_v45  ;;  %6659 = vtanh.f32 %v2255_v56 }
 0x3df   :  { %v9209_v63 = vpop.f32.mrb[102].mxu0  ;;  %v9211_v34 = vpop.f32.mrb[112].mxu1  ;;  %5429 = vmatprep.mubr.msk.f32.mxu1 %vm7087_vm0, %v10610_v9 }
 0x3e0   :  { %v5063_v48 = vpop.f32.mrb[103].mxu0  ;;  %v5267_v21 = vpop.f32.mrb[113].mxu1  ;;  %v2260_v30 = vadd.f32 %v8936_v0, %v9209_v63 }
 0x3e2   :  { %5430 = vmatmul.mubr.f32.gmra.mrb[200].mxu1 %v6636_v37  ;;  %6661 = vtanh.f32 %v2260_v30 }
 0x3e3   :  { %5432 = vmatprep.mubr.msk.f32.mxu1 %vm7087_vm0, %v10610_v9 }
 0x3e6   :  { %5433 = vmatmul.mubr.f32.gmra.mrb[202].mxu1 %v6638_v49 }
 0x3e7   :  { %5435 = vmatprep.mubr.msk.f32.mxu1 %vm7087_vm0, %v10610_v9 }
 0x3e8   :  { %v6660_v63 = vpop.eup %6659 }
 0x3e9   :  { %v9223_v4 = vpop.f32.mrb[114].mxu1 }
 0x3ea   :  { %v5270_v27 = vpop.f32.mrb[115].mxu1  ;;  %5436 = vmatmul.mubr.f32.gmra.mrb[204].mxu1 %v6640_v32  ;;  %v9280_v32 = vld [vmem:[%s10583_s4 + $0x1] ss:$0 sm:$0xff] }
 0x3eb   :  { %5438 = vmatprep.mubr.msk.f32.mxu1 %vm7087_vm0, %v10610_v9 }
 0x3ec   :  { %v6662_v21 = vpop.eup %6661 }
 0x3ee   :  { %5439 = vmatmul.mubr.f32.gmra.mrb[206].mxu1 %v6642_v28 }
 0x3ef   :  { %5441 = vmatprep.mubr.msk.f32.mxu1 %vm7087_vm0, %v10610_v9 }
 0x3f2   :  { %5442 = vmatmul.mubr.f32.gmra.mrb[208].mxu1 %v6644_v17 }
 0x3f3   :  { %v2264_v61 = vpop.f32.mrb[104].mxu0  ;;  %5444 = vmatprep.mubr.msk.f32.mxu1 %vm7087_vm0, %v10610_v9 }
 0x3f4   :  { %v5066_v58 = vpop.f32.mrb[105].mxu0  ;;  %v2265_v10 = vadd.f32 %v8936_v0, %v2264_v61 }
 0x3f6   :  { %5445 = vmatmul.mubr.f32.gmra.mrb[210].mxu1 %v6646_v24  ;;  %6663 = vtanh.f32 %v2265_v10 }
 0x3f7   :  { %v2269_v47 = vpop.f32.mrb[106].mxu0  ;;  %v9239_v41 = vpop.f32.mrb[116].mxu1  ;;  %5447 = vmatprep.mubr.msk.f32.mxu1 %vm7087_vm0, %v10610_v9 }
 0x3f8   :  { %v5069_v44 = vpop.f32.mrb[107].mxu0  ;;  %v5273_v18 = vpop.f32.mrb[117].mxu1  ;;  %v2270_v12 = vadd.f32 %v8936_v0, %v2269_v47 }
 0x3fa   :  { %5448 = vmatmul.mubr.f32.gmra.mrb[212].mxu1 %v6648_v39  ;;  %6665 = vtanh.f32 %v2270_v12 }
 0x3fb   :  { %5450 = vmatprep.mubr.msk.f32.mxu1 %vm7087_vm0, %v10610_v9 }
 0x3fe   :  { %5451 = vmatmul.mubr.f32.gmra.mrb[214].mxu1 %v6650_v51 }
 0x3ff   :  { %5453 = vmatprep.mubr.msk.f32.mxu1 %vm7087_vm0, %v10610_v9 }
 0x400   :  { %v6664_v33 = vpop.eup %6663 }
 0x401   :  { %v9251_v1 = vpop.f32.mrb[118].mxu1 }
 0x402   :  { %v5276_v19 = vpop.f32.mrb[119].mxu1  ;;  %5454 = vmatmul.mubr.f32.gmra.mrb[216].mxu1 %v6652_v31 }
 0x403   :  { %5456 = vmatprep.mubr.msk.f32.mxu1 %vm7087_vm0, %v10610_v9 }
 0x404   :  { %v6666_v27 = vpop.eup %6665 }
 0x406   :  { %5457 = vmatmul.mubr.f32.gmra.mrb[218].mxu1 %v6654_v5 }
 0x407   :  { %5459 = vmatprep.mubr.msk.f32.mxu1 %vm7087_vm0, %v10610_v9 }
 0x40a   :  { %5460 = vmatmul.mubr.f32.gmra.mrb[220].mxu1 %v6656_v2 }
 0x40b   :  { %v2274_v8 = vpop.f32.mrb[108].mxu0  ;;  %5462 = vmatprep.mubr.msk.f32.mxu1 %vm7087_vm0, %v10610_v9 }
 0x40c   :  { %v5072_v52 = vpop.f32.mrb[109].mxu0  ;;  %v2275_v48 = vadd.f32 %v8936_v0, %v2274_v8 }
 0x40e   :  { %5463 = vmatmul.mubr.f32.gmra.mrb[222].mxu1 %v6658_v29  ;;  %6667 = vtanh.f32 %v2275_v48 }
 0x40f   :  { %v2279_v42 = vpop.f32.mrb[110].mxu0  ;;  %v9265_v14 = vpop.f32.mrb[120].mxu1  ;;  %5465 = vmatprep.mubr.msk.f32.mxu1 %vm7087_vm0, %v10610_v9 }
 0x410   :  { %v5075_v45 = vpop.f32.mrb[111].mxu0  ;;  %v5279_v7 = vpop.f32.mrb[121].mxu1  ;;  %v2280_v37 = vadd.f32 %v8936_v0, %v2279_v42 }
 0x412   :  { %5466 = vmatmul.mubr.f32.gmra.mrb[224].mxu1 %v6660_v63  ;;  %6669 = vtanh.f32 %v2280_v37 }
 0x413   :  { %5468 = vmatprep.mubr.msk.f32.mxu1 %vm7087_vm0, %v10610_v9 }
 0x416   :  { %5469 = vmatmul.mubr.f32.gmra.mrb[226].mxu1 %v6662_v21 }
 0x417   :  { %5471 = vmatprep.mubr.msk.f32.mxu1 %vm7087_vm0, %v10610_v9 }
 0x418   :  { %v6668_v6 = vpop.eup %6667 }
 0x419   :  { %v9275_v49 = vpop.f32.mrb[122].mxu1 }
 0x41a   :  { %v5282_v16 = vpop.f32.mrb[123].mxu1  ;;  %5472 = vmatmul.mubr.f32.gmra.mrb[228].mxu1 %v6664_v33 }
 0x41b   :  { %5474 = vmatprep.mubr.msk.f32.mxu1 %vm7087_vm0, %v10610_v9 }
 0x41c   :  { %v6670_v18 = vpop.eup %6669 }
 0x41d   :  { %v2841_v13 = vpop.f32.mrb[124].mxu1 }
 0x41e   :  { %v2842_v28 = vadd.f32 %v9280_v32, %v2841_v13  ;;  %v5317_v54 = vpop.f32.mrb[125].mxu1  ;;  %5475 = vmatmul.mubr.f32.gmra.mrb[230].mxu1 %v6666_v27 }
 0x41f   :  { %5477 = vmatprep.mubr.msk.f32.mxu1 %vm7087_vm0, %v10610_v9 }
 0x420   :  { %6671 = vtanh.f32 %v2842_v28  ;;  %v2284_v17 = vpop.f32.mrb[112].mxu0 }
 0x421   :  { %v2285_v61 = vadd.f32 %v8936_v0, %v2284_v17  ;;  %v5078_v58 = vpop.f32.mrb[113].mxu0  ;;  %v2846_v24 = vpop.f32.mrb[126].mxu1 }
 0x422   :  { %v2847_v3 = vadd.f32 %v9280_v32, %v2846_v24  ;;  %v5320_v47 = vpop.f32.mrb[127].mxu1  ;;  %5478 = vmatmul.mubr.f32.gmra.mrb[232].mxu1 %v6668_v6 }
 0x423   :  { %6673 = vtanh.f32 %v2285_v61  ;;  %5480 = vmatprep.mubr.msk.f32.mxu1 %vm7087_vm0, %v10610_v9 }
 0x424   :  { %6675 = vtanh.f32 %v2847_v3  ;;  %v2289_v44 = vpop.f32.mrb[114].mxu0 }
 0x425   :  { %v2290_v39 = vadd.f32 %v8936_v0, %v2289_v44  ;;  %v5081_v11 = vpop.f32.mrb[115].mxu0  ;;  %v2851_v51 = vpop.f32.mrb[128].mxu1 }
 0x426   :  { %v2852_v62 = vadd.f32 %v9280_v32, %v2851_v51  ;;  %v5323_v31 = vpop.f32.mrb[129].mxu1  ;;  %5481 = vmatmul.mubr.f32.gmra.mrb[234].mxu1 %v6670_v18 }
 0x427   :  { %6677 = vtanh.f32 %v2290_v39  ;;  %5483 = vmatprep.mubr.msk.f32.mxu1 %vm7087_vm0, %v10610_v9 }
 0x428   :  { %6679 = vtanh.f32 %v2852_v62  ;;  %v2294_v19 = vpop.f32.mrb[116].mxu0 }
 0x429   :  { %v2295_v56 = vadd.f32 %v8936_v0, %v2294_v19  ;;  %v5084_v5 = vpop.f32.mrb[117].mxu0  ;;  %v2856_v30 = vpop.f32.mrb[130].mxu1 }
 0x42a   :  { %v6672_v2 = vpop.eup %6671  ;;  %v2857_v10 = vadd.f32 %v9280_v32, %v2856_v30  ;;  %v5326_v8 = vpop.f32.mrb[131].mxu1 }
 0x42b   :  { %6681 = vtanh.f32 %v2295_v56  ;;  %5723 = vmatmul.mubr.f32.vlgmr.msra.gmra.mrb[126].mxu0 %v6672_v2 }
 0x42c   :  { %6683 = vtanh.f32 %v2857_v10  ;;  %v2299_v52 = vpop.f32.mrb[118].mxu0  ;;  %5725 = vmatprep.mubr.msk.f32.mxu0 %vm7087_vm0, %v10610_v9 }
 0x42d   :  { %v6674_v29 = vpop.eup %6673  ;;  %v2300_v12 = vadd.f32 %v8936_v0, %v2299_v52  ;;  %v5087_v42 = vpop.f32.mrb[119].mxu0 }
 0x42e   :  { %v2861_v45 = vpop.f32.mrb[132].mxu1  ;;  %v6676_v7 = vpop.eup %6675  ;;  %5484 = vmatmul.mubr.f32.gmra.mrb[236].mxu1 %v6674_v29 }
 0x42f   :  { %v2862_v63 = vadd.f32 %v9280_v32, %v2861_v45  ;;  %v5329_v48 = vpop.f32.mrb[133].mxu1  ;;  %6685 = vtanh.f32 %v2300_v12  ;;  %5726 = vmatmul.mubr.f32.gmra.mrb[128].mxu0 %v6676_v7  ;;  %5486 = vmatprep.mubr.msk.f32.mxu1 %vm7087_vm0, %v10610_v9 }
 0x430   :  { %v2304_v21 = vpop.f32.mrb[120].mxu0  ;;  %5728 = vmatprep.mubr.msk.f32.mxu0 %vm7087_vm0, %v10610_v9 }
 0x431   :  { %6687 = vtanh.f32 %v2862_v63  ;;  %v6678_v37 = vpop.eup %6677  ;;  %v2305_v33 = vadd.f32 %v8936_v0, %v2304_v21  ;;  %v5090_v16 = vpop.f32.mrb[121].mxu0 }
 0x432   :  { %v2866_v27 = vpop.f32.mrb[134].mxu1  ;;  %v6680_v13 = vpop.eup %6679  ;;  %5487 = vmatmul.mubr.f32.gmra.mrb[238].mxu1 %v6678_v37 }
 0x433   :  { %v2867_v28 = vadd.f32 %v9280_v32, %v2866_v27  ;;  %v5332_v54 = vpop.f32.mrb[135].mxu1  ;;  %6689 = vtanh.f32 %v2305_v33  ;;  %5729 = vmatmul.mubr.f32.gmra.mrb[130].mxu0 %v6680_v13  ;;  %5489 = vmatprep.mubr.msk.f32.mxu1 %vm7087_vm0, %v10610_v9 }
 0x434   :  { %5731 = vmatprep.mubr.msk.f32.mxu0 %vm7087_vm0, %v10610_v9 }
 0x435   :  { %6691 = vtanh.f32 %v2867_v28  ;;  %v6682_v17 = vpop.eup %6681  ;;  %v2309_v6 = vpop.f32.mrb[122].mxu0 }
 0x436   :  { %v2871_v61 = vpop.f32.mrb[136].mxu1  ;;  %v6684_v58 = vpop.eup %6683  ;;  %v2310_v24 = vadd.f32 %v8936_v0, %v2309_v6  ;;  %5490 = vmatmul.mubr.f32.gmra.mrb[240].mxu1 %v6682_v17  ;;  %v9320_v0 = vld [vmem:[%s10583_s4] ss:$0 sm:$0xff] }
 0x437   :  { %v5093_v3 = vpop.f32.mrb[123].mxu0  ;;  %v2872_v47 = vadd.f32 %v9280_v32, %v2871_v61  ;;  %v5335_v44 = vpop.f32.mrb[137].mxu1  ;;  %5732 = vmatmul.mubr.f32.gmra.mrb[132].mxu0 %v6684_v58  ;;  %5492 = vmatprep.mubr.msk.f32.mxu1 %vm7087_vm0, %v10610_v9  ;;  %v2320_v5 = vadd.f32 %v9320_v0, %v8043_v50  ;;  %v2325_v50 = vadd.f32 %v9320_v0, %v8047_v20 }
 0x438   :  { %6693 = vtanh.f32 %v2310_v24  ;;  %5734 = vmatprep.mubr.msk.f32.mxu0 %vm7087_vm0, %v10610_v9  ;;  %v2330_v63 = vadd.f32 %v9320_v0, %v8054_v35  ;;  %v2335_v16 = vadd.f32 %v9320_v0, %v8061_v57  ;;  %v2340_v17 = vadd.f32 %v9320_v0, %v8075_v43  ;;  %v10664_v3 = vld [vmem:[#allocation16_spill] sm:$0xff] }
 0x439   :  { %v6686_v18 = vpop.eup %6685  ;;  %6695 = vtanh.f32 %v2872_v47  ;;  %v2314_v39 = vpop.f32.mrb[124].mxu0  ;;  %v2345_v47 = vadd.f32 %v9320_v0, %v10664_v3  ;;  %v10670_v3 = vld [vmem:[#allocation20_spill] sm:$0xff] }
 0x43a   :  { %v2876_v11 = vpop.f32.mrb[138].mxu1  ;;  %v2315_v62 = vadd.f32 %v9320_v0, %v2314_v39  ;;  %v5096_v31 = vpop.f32.mrb[125].mxu0  ;;  %5493 = vmatmul.mubr.f32.gmra.mrb[242].mxu1 %v6686_v18 }
 0x43b   :  { %v6688_v51 = vpop.eup %6687  ;;  %v2877_v19 = vadd.f32 %v9280_v32, %v2876_v11  ;;  %v5338_v56 = vpop.f32.mrb[139].mxu1  ;;  %5495 = vmatprep.mubr.msk.f32.mxu1 %vm7087_vm0, %v10610_v9 }
 0x43c   :  { %5735 = vmatmul.mubr.f32.gmra.mrb[134].mxu0 %v6688_v51  ;;  %6697 = vtanh.f32 %v2315_v62  ;;  %v10665_v51 = vld [vmem:[#allocation2_spill] sm:$0xff] }
 0x43d   :  { %5737 = vmatprep.mubr.msk.f32.mxu0 %vm7087_vm0, %v10610_v9  ;;  %v6690_v30 = vpop.eup %6689  ;;  %6699 = vtanh.f32 %v2877_v19  ;;  %v2881_v2 = vpop.f32.mrb[140].mxu1  ;;  %v2350_v62 = vadd.f32 %v9320_v0, %v10665_v51  ;;  %v10671_v51 = vld [vmem:[#allocation21_spill] sm:$0xff] }
 0x43e   :  { %v2882_v8 = vadd.f32 %v9280_v32, %v2881_v2  ;;  %v5341_v52 = vpop.f32.mrb[141].mxu1  ;;  %5496 = vmatmul.mubr.f32.gmra.mrb[244].mxu1 %v6690_v30  ;;  %6701 = vtanh.f32 %v2320_v5  ;;  %v10666_v2 = vld [vmem:[#allocation17_spill] sm:$0xff] }
 0x43f   :  { %v6692_v10 = vpop.eup %6691  ;;  %5498 = vmatprep.mubr.msk.f32.mxu1 %vm7087_vm0, %v10610_v9 }
 0x440   :  { %5738 = vmatmul.mubr.f32.gmra.mrb[136].mxu0 %v6692_v10  ;;  %6703 = vtanh.f32 %v2882_v8  ;;  %v2355_v10 = vadd.f32 %v9320_v0, %v10666_v2  ;;  %v10672_v2 = vld [vmem:[#allocation4_spill] sm:$0xff] }
 0x441   :  { %5740 = vmatprep.mubr.msk.f32.mxu0 %vm7087_vm0, %v10610_v9  ;;  %v2886_v29 = vpop.f32.mrb[142].mxu1  ;;  %6705 = vtanh.f32 %v2325_v50 }
 0x442   :  { %v6694_v12 = vpop.eup %6693  ;;  %v2887_v42 = vadd.f32 %v9280_v32, %v2886_v29  ;;  %v5344_v45 = vpop.f32.mrb[143].mxu1 }
 0x443   :  { %v6696_v7 = vpop.eup %6695  ;;  %5499 = vmatmul.mubr.f32.gmra.mrb[246].mxu1 %v6694_v12 }
 0x444   :  { %6707 = vtanh.f32 %v2887_v42  ;;  %5741 = vmatmul.mubr.f32.gmra.mrb[138].mxu0 %v6696_v7  ;;  %5501 = vmatprep.mubr.msk.f32.mxu1 %vm7087_vm0, %v10610_v9  ;;  %v10667_v42 = vld [vmem:[#allocation3_spill] sm:$0xff] }
 0x445   :  { %v2891_v20 = vpop.f32.mrb[144].mxu1  ;;  %5743 = vmatprep.mubr.msk.f32.mxu0 %vm7087_vm0, %v10610_v9  ;;  %6709 = vtanh.f32 %v2330_v63  ;;  %v2360_v45 = vadd.f32 %v9320_v0, %v10667_v42  ;;  %v10673_v42 = vld [vmem:[#allocation22_spill] sm:$0xff] }
 0x446   :  { %v6698_v48 = vpop.eup %6697  ;;  %v2892_v21 = vadd.f32 %v9280_v32, %v2891_v20  ;;  %v5347_v37 = vpop.f32.mrb[145].mxu1 }
 0x447   :  { %v6700_v33 = vpop.eup %6699  ;;  %5502 = vmatmul.mubr.f32.gmra.mrb[248].mxu1 %v6698_v48  ;;  %v10668_v37 = vld [vmem:[#allocation18_spill] sm:$0xff] }
 0x448   :  { %6711 = vtanh.f32 %v2892_v21  ;;  %5744 = vmatmul.mubr.f32.gmra.mrb[140].mxu0 %v6700_v33  ;;  %5504 = vmatprep.mubr.msk.f32.mxu1 %vm7087_vm0, %v10610_v9  ;;  %v6702_v35 = vpop.eup %6701  ;;  %v2365_v33 = vadd.f32 %v9320_v0, %v10668_v37  ;;  %v10674_v37 = vld [vmem:[#allocation23_spill] sm:$0xff] }
 0x449   :  { %v2896_v27 = vpop.f32.mrb[146].mxu1  ;;  %5746 = vmatprep.mubr.msk.f32.mxu0 %vm7087_vm0, %v10610_v9  ;;  %6713 = vtanh.f32 %v2335_v16 }
 0x44a   :  { %v6704_v13 = vpop.eup %6703  ;;  %v2897_v28 = vadd.f32 %v9280_v32, %v2896_v27  ;;  %v5350_v54 = vpop.f32.mrb[147].mxu1 }
 0x44b   :  { %5505 = vmatmul.mubr.f32.gmra.mrb[250].mxu1 %v6702_v35  ;;  %v6706_v57 = vpop.eup %6705  ;;  %v10669_v54 = vld [vmem:[#allocation19_spill] sm:$0xff] }
 0x44c   :  { %6715 = vtanh.f32 %v2897_v28  ;;  %5747 = vmatmul.mubr.f32.gmra.mrb[142].mxu0 %v6704_v13  ;;  %5507 = vmatprep.mubr.msk.f32.mxu1 %vm7087_vm0, %v10610_v9 }
 0x44d   :  { %v2901_v6 = vpop.f32.mrb[148].mxu1  ;;  %5749 = vmatprep.mubr.msk.f32.mxu0 %vm7087_vm0, %v10610_v9  ;;  %6717 = vtanh.f32 %v2340_v17  ;;  %v2370_v17 = vadd.f32 %v9320_v0, %v10669_v54  ;;  %v10675_v54 = vld [vmem:[#allocation24_spill] sm:$0xff] }
 0x44e   :  { %v6708_v61 = vpop.eup %6707  ;;  %v2902_v58 = vadd.f32 %v9280_v32, %v2901_v6  ;;  %v5353_v24 = vpop.f32.mrb[149].mxu1 }
 0x44f   :  { %5508 = vmatmul.mubr.f32.gmra.mrb[252].mxu1 %v6706_v57  ;;  %v6710_v43 = vpop.eup %6709 }
 0x450   :  { %6719 = vtanh.f32 %v2902_v58  ;;  %5750 = vmatmul.mubr.f32.gmra.mrb[144].mxu0 %v6708_v61  ;;  %5510 = vmatprep.mubr.msk.f32.mxu1 %vm7087_vm0, %v10610_v9 }
 0x451   :  { %v2906_v44 = vpop.f32.mrb[150].mxu1  ;;  %5752 = vmatprep.mubr.msk.f32.mxu0 %vm7087_vm0, %v10610_v9  ;;  %6721 = vtanh.f32 %v2345_v47  ;;  %v2375_v47 = vadd.f32 %v9320_v0, %v10670_v3  ;;  %v10676_v3 = vld [vmem:[#allocation25_spill] sm:$0xff] }
 0x452   :  { %v6712_v18 = vpop.eup %6711  ;;  %v2907_v39 = vadd.f32 %v9280_v32, %v2906_v44  ;;  %v5356_v11 = vpop.f32.mrb[151].mxu1 }
 0x453   :  { %5511 = vmatmul.mubr.f32.gmra.mrb[254].mxu1 %v6710_v43  ;;  %v6714_v31 = vpop.eup %6713 }
 0x454   :  { %6723 = vtanh.f32 %v2907_v39  ;;  %5753 = vmatmul.mubr.f32.gmra.mrb[146].mxu0 %v6712_v18  ;;  %5513 = vmatprep.mubr.msk.f32.mxu1 %vm7087_vm0, %v10610_v9 }
 0x455   :  { %v2911_v19 = vpop.f32.mrb[152].mxu1  ;;  %5755 = vmatprep.mubr.msk.f32.mxu0 %vm7087_vm0, %v10610_v9  ;;  %6725 = vtanh.f32 %v2350_v62  ;;  %v2380_v62 = vadd.f32 %v9320_v0, %v10671_v51  ;;  %v10677_v51 = vld [vmem:[#allocation26_spill] sm:$0xff] }
 0x456   :  { %v6716_v56 = vpop.eup %6715  ;;  %v2912_v5 = vadd.f32 %v9280_v32, %v2911_v19  ;;  %v5359_v30 = vpop.f32.mrb[153].mxu1 }
 0x457   :  { %5514 = vmatmul.mubr.f32.gmra.mrb[0].mxu1 %v6714_v31  ;;  %v6718_v8 = vpop.eup %6717 }
 0x458   :  { %6727 = vtanh.f32 %v2912_v5  ;;  %5756 = vmatmul.mubr.f32.gmra.mrb[148].mxu0 %v6716_v56  ;;  %5516 = vmatprep.mubr.msk.f32.mxu1 %vm7087_vm0, %v10610_v9 }
 0x459   :  { %v2916_v52 = vpop.f32.mrb[154].mxu1  ;;  %5758 = vmatprep.mubr.msk.f32.mxu0 %vm7087_vm0, %v10610_v9  ;;  %6729 = vtanh.f32 %v2355_v10  ;;  %v2385_v10 = vadd.f32 %v9320_v0, %v10672_v2  ;;  %v10678_v2 = vld [vmem:[#allocation5_spill] sm:$0xff] }
 0x45a   :  { %v6720_v50 = vpop.eup %6719  ;;  %v2917_v29 = vadd.f32 %v9280_v32, %v2916_v52  ;;  %v5362_v12 = vpop.f32.mrb[155].mxu1 }
 0x45b   :  { %5517 = vmatmul.mubr.f32.gmra.mrb[2].mxu1 %v6718_v8  ;;  %v6722_v7 = vpop.eup %6721 }
 0x45c   :  { %6731 = vtanh.f32 %v2917_v29  ;;  %5759 = vmatmul.mubr.f32.gmra.mrb[150].mxu0 %v6720_v50  ;;  %5519 = vmatprep.mubr.msk.f32.mxu1 %vm7087_vm0, %v10610_v9 }
 0x45d   :  { %v2921_v63 = vpop.f32.mrb[156].mxu1  ;;  %5761 = vmatprep.mubr.msk.f32.mxu0 %vm7087_vm0, %v10610_v9  ;;  %6733 = vtanh.f32 %v2360_v45  ;;  %v2390_v45 = vadd.f32 %v9320_v0, %v10673_v42  ;;  %v10679_v42 = vld [vmem:[#allocation27_spill] sm:$0xff] }
 0x45e   :  { %v6724_v20 = vpop.eup %6723  ;;  %v2922_v48 = vadd.f32 %v9280_v32, %v2921_v63  ;;  %v5365_v21 = vpop.f32.mrb[157].mxu1 }
 0x45f   :  { %5520 = vmatmul.mubr.f32.gmra.mrb[4].mxu1 %v6722_v7  ;;  %v6726_v16 = vpop.eup %6725 }
 0x460   :  { %6735 = vtanh.f32 %v2922_v48  ;;  %5762 = vmatmul.mubr.f32.gmra.mrb[152].mxu0 %v6724_v20  ;;  %5522 = vmatprep.mubr.msk.f32.mxu1 %vm7087_vm0, %v10610_v9 }
 0x461   :  { %v2926_v35 = vpop.f32.mrb[158].mxu1  ;;  %5764 = vmatprep.mubr.msk.f32.mxu0 %vm7087_vm0, %v10610_v9  ;;  %6737 = vtanh.f32 %v2365_v33  ;;  %v2395_v33 = vadd.f32 %v9320_v0, %v10674_v37  ;;  %v10680_v37 = vld [vmem:[#allocation6_spill] sm:$0xff] }
 0x462   :  { %v6728_v27 = vpop.eup %6727  ;;  %v2927_v13 = vadd.f32 %v9280_v32, %v2926_v35  ;;  %v5368_v28 = vpop.f32.mrb[159].mxu1 }
 0x463   :  { %5523 = vmatmul.mubr.f32.gmra.mrb[6].mxu1 %v6726_v16  ;;  %v6730_v57 = vpop.eup %6729 }
 0x464   :  { %6739 = vtanh.f32 %v2927_v13  ;;  %5765 = vmatmul.mubr.f32.gmra.mrb[154].mxu0 %v6728_v27  ;;  %5525 = vmatprep.mubr.msk.f32.mxu1 %vm7087_vm0, %v10610_v9 }
 0x465   :  { %v2931_v6 = vpop.f32.mrb[160].mxu1  ;;  %5767 = vmatprep.mubr.msk.f32.mxu0 %vm7087_vm0, %v10610_v9  ;;  %6741 = vtanh.f32 %v2370_v17  ;;  %v2400_v17 = vadd.f32 %v9320_v0, %v10675_v54  ;;  %v10681_v54 = vld [vmem:[#allocation28_spill] sm:$0xff] }
 0x466   :  { %v6732_v61 = vpop.eup %6731  ;;  %v2932_v58 = vadd.f32 %v9280_v32, %v2931_v6  ;;  %v5371_v24 = vpop.f32.mrb[161].mxu1 }
 0x467   :  { %5526 = vmatmul.mubr.f32.gmra.mrb[8].mxu1 %v6730_v57  ;;  %v6734_v43 = vpop.eup %6733 }
 0x468   :  { %6743 = vtanh.f32 %v2932_v58  ;;  %5768 = vmatmul.mubr.f32.gmra.mrb[156].mxu0 %v6732_v61  ;;  %5528 = vmatprep.mubr.msk.f32.mxu1 %vm7087_vm0, %v10610_v9 }
 0x469   :  { %v2936_v44 = vpop.f32.mrb[162].mxu1  ;;  %5770 = vmatprep.mubr.msk.f32.mxu0 %vm7087_vm0, %v10610_v9  ;;  %6745 = vtanh.f32 %v2375_v47  ;;  %v2405_v47 = vadd.f32 %v9320_v0, %v10676_v3  ;;  %v10682_v3 = vld [vmem:[#allocation7_spill] sm:$0xff] }
 0x46a   :  { %v6736_v18 = vpop.eup %6735  ;;  %v2937_v39 = vadd.f32 %v9280_v32, %v2936_v44  ;;  %v5374_v11 = vpop.f32.mrb[163].mxu1 }
 0x46b   :  { %5529 = vmatmul.mubr.f32.gmra.mrb[10].mxu1 %v6734_v43  ;;  %v6738_v31 = vpop.eup %6737 }
 0x46c   :  { %6747 = vtanh.f32 %v2937_v39  ;;  %5771 = vmatmul.mubr.f32.gmra.mrb[158].mxu0 %v6736_v18  ;;  %5531 = vmatprep.mubr.msk.f32.mxu1 %vm7087_vm0, %v10610_v9 }
 0x46d   :  { %v2941_v19 = vpop.f32.mrb[164].mxu1  ;;  %5773 = vmatprep.mubr.msk.f32.mxu0 %vm7087_vm0, %v10610_v9  ;;  %6749 = vtanh.f32 %v2380_v62  ;;  %v2410_v62 = vadd.f32 %v9320_v0, %v10677_v51  ;;  %v10683_v51 = vld [vmem:[#allocation29_spill] sm:$0xff] }
 0x46e   :  { %v6740_v56 = vpop.eup %6739  ;;  %v2942_v5 = vadd.f32 %v9280_v32, %v2941_v19  ;;  %v5377_v30 = vpop.f32.mrb[165].mxu1 }
 0x46f   :  { %5532 = vmatmul.mubr.f32.gmra.mrb[12].mxu1 %v6738_v31  ;;  %v6742_v8 = vpop.eup %6741 }
 0x470   :  { %6751 = vtanh.f32 %v2942_v5  ;;  %5774 = vmatmul.mubr.f32.gmra.mrb[160].mxu0 %v6740_v56  ;;  %5534 = vmatprep.mubr.msk.f32.mxu1 %vm7087_vm0, %v10610_v9 }
 0x471   :  { %v2946_v52 = vpop.f32.mrb[166].mxu1  ;;  %5776 = vmatprep.mubr.msk.f32.mxu0 %vm7087_vm0, %v10610_v9  ;;  %6753 = vtanh.f32 %v2385_v10  ;;  %v2415_v10 = vadd.f32 %v9320_v0, %v10678_v2  ;;  %v10684_v2 = vld [vmem:[#allocation8_spill] sm:$0xff] }
 0x472   :  { %v6744_v50 = vpop.eup %6743  ;;  %v2947_v29 = vadd.f32 %v9280_v32, %v2946_v52  ;;  %v5380_v12 = vpop.f32.mrb[167].mxu1 }
 0x473   :  { %5535 = vmatmul.mubr.f32.gmra.mrb[14].mxu1 %v6742_v8  ;;  %v6746_v7 = vpop.eup %6745 }
 0x474   :  { %6755 = vtanh.f32 %v2947_v29  ;;  %5777 = vmatmul.mubr.f32.gmra.mrb[162].mxu0 %v6744_v50  ;;  %5537 = vmatprep.mubr.msk.f32.mxu1 %vm7087_vm0, %v10610_v9 }
 0x475   :  { %v2951_v63 = vpop.f32.mrb[168].mxu1  ;;  %5779 = vmatprep.mubr.msk.f32.mxu0 %vm7087_vm0, %v10610_v9  ;;  %6757 = vtanh.f32 %v2390_v45  ;;  %v2420_v45 = vadd.f32 %v9320_v0, %v10679_v42  ;;  %v10685_v42 = vld [vmem:[#allocation30_spill] sm:$0xff] }
 0x476   :  { %v6748_v20 = vpop.eup %6747  ;;  %v2952_v48 = vadd.f32 %v9280_v32, %v2951_v63  ;;  %v5383_v21 = vpop.f32.mrb[169].mxu1 }
 0x477   :  { %5538 = vmatmul.mubr.f32.gmra.mrb[16].mxu1 %v6746_v7  ;;  %v6750_v16 = vpop.eup %6749 }
 0x478   :  { %6759 = vtanh.f32 %v2952_v48  ;;  %5780 = vmatmul.mubr.f32.gmra.mrb[164].mxu0 %v6748_v20  ;;  %5540 = vmatprep.mubr.msk.f32.mxu1 %vm7087_vm0, %v10610_v9 }
 0x479   :  { %v2956_v35 = vpop.f32.mrb[170].mxu1  ;;  %5782 = vmatprep.mubr.msk.f32.mxu0 %vm7087_vm0, %v10610_v9  ;;  %6761 = vtanh.f32 %v2395_v33  ;;  %v2425_v33 = vadd.f32 %v9320_v0, %v10680_v37  ;;  %v10686_v37 = vld [vmem:[#allocation9_spill] sm:$0xff] }
 0x47a   :  { %v6752_v27 = vpop.eup %6751  ;;  %v2957_v13 = vadd.f32 %v9280_v32, %v2956_v35  ;;  %v5386_v28 = vpop.f32.mrb[171].mxu1 }
 0x47b   :  { %5541 = vmatmul.mubr.f32.gmra.mrb[18].mxu1 %v6750_v16  ;;  %v6754_v57 = vpop.eup %6753 }
 0x47c   :  { %6763 = vtanh.f32 %v2957_v13  ;;  %5783 = vmatmul.mubr.f32.gmra.mrb[166].mxu0 %v6752_v27  ;;  %5543 = vmatprep.mubr.msk.f32.mxu1 %vm7087_vm0, %v10610_v9 }
 0x47d   :  { %v2961_v6 = vpop.f32.mrb[172].mxu1  ;;  %5785 = vmatprep.mubr.msk.f32.mxu0 %vm7087_vm0, %v10610_v9  ;;  %6765 = vtanh.f32 %v2400_v17  ;;  %v2430_v17 = vadd.f32 %v9320_v0, %v10681_v54  ;;  %v10687_v54 = vld [vmem:[#allocation31_spill] sm:$0xff] }
 0x47e   :  { %v6756_v61 = vpop.eup %6755  ;;  %v2962_v58 = vadd.f32 %v9280_v32, %v2961_v6  ;;  %v5389_v24 = vpop.f32.mrb[173].mxu1 }
 0x47f   :  { %5544 = vmatmul.mubr.f32.gmra.mrb[20].mxu1 %v6754_v57  ;;  %v6758_v43 = vpop.eup %6757 }
 0x480   :  { %6767 = vtanh.f32 %v2962_v58  ;;  %5786 = vmatmul.mubr.f32.gmra.mrb[168].mxu0 %v6756_v61  ;;  %5546 = vmatprep.mubr.msk.f32.mxu1 %vm7087_vm0, %v10610_v9 }
 0x481   :  { %v2966_v44 = vpop.f32.mrb[174].mxu1  ;;  %5788 = vmatprep.mubr.msk.f32.mxu0 %vm7087_vm0, %v10610_v9  ;;  %6769 = vtanh.f32 %v2405_v47  ;;  %v2435_v47 = vadd.f32 %v9320_v0, %v10682_v3  ;;  %v10688_v3 = vld [vmem:[#allocation10_spill] sm:$0xff] }
 0x482   :  { %v6760_v18 = vpop.eup %6759  ;;  %v2967_v39 = vadd.f32 %v9280_v32, %v2966_v44  ;;  %v5392_v11 = vpop.f32.mrb[175].mxu1 }
 0x483   :  { %5547 = vmatmul.mubr.f32.gmra.mrb[22].mxu1 %v6758_v43  ;;  %v6762_v31 = vpop.eup %6761 }
 0x484   :  { %6771 = vtanh.f32 %v2967_v39  ;;  %5789 = vmatmul.mubr.f32.gmra.mrb[170].mxu0 %v6760_v18  ;;  %5549 = vmatprep.mubr.msk.f32.mxu1 %vm7087_vm0, %v10610_v9 }
 0x485   :  { %v2971_v19 = vpop.f32.mrb[176].mxu1  ;;  %5791 = vmatprep.mubr.msk.f32.mxu0 %vm7087_vm0, %v10610_v9  ;;  %6773 = vtanh.f32 %v2410_v62  ;;  %v2440_v62 = vadd.f32 %v9320_v0, %v10683_v51  ;;  %v10689_v51 = vld [vmem:[#allocation32_spill] sm:$0xff] }
 0x486   :  { %v6764_v56 = vpop.eup %6763  ;;  %v2972_v5 = vadd.f32 %v9280_v32, %v2971_v19  ;;  %v5395_v30 = vpop.f32.mrb[177].mxu1 }
 0x487   :  { %5550 = vmatmul.mubr.f32.gmra.mrb[24].mxu1 %v6762_v31  ;;  %v6766_v8 = vpop.eup %6765 }
 0x488   :  { %6775 = vtanh.f32 %v2972_v5  ;;  %5792 = vmatmul.mubr.f32.gmra.mrb[172].mxu0 %v6764_v56  ;;  %5552 = vmatprep.mubr.msk.f32.mxu1 %vm7087_vm0, %v10610_v9 }
 0x489   :  { %v2976_v52 = vpop.f32.mrb[178].mxu1  ;;  %5794 = vmatprep.mubr.msk.f32.mxu0 %vm7087_vm0, %v10610_v9  ;;  %6777 = vtanh.f32 %v2415_v10  ;;  %v2445_v10 = vadd.f32 %v9320_v0, %v10684_v2  ;;  %v10690_v2 = vld [vmem:[#allocation11_spill] sm:$0xff] }
 0x48a   :  { %v6768_v50 = vpop.eup %6767  ;;  %v2977_v29 = vadd.f32 %v9280_v32, %v2976_v52  ;;  %v5398_v12 = vpop.f32.mrb[179].mxu1 }
 0x48b   :  { %5553 = vmatmul.mubr.f32.gmra.mrb[26].mxu1 %v6766_v8  ;;  %v6770_v7 = vpop.eup %6769 }
 0x48c   :  { %6779 = vtanh.f32 %v2977_v29  ;;  %5795 = vmatmul.mubr.f32.gmra.mrb[174].mxu0 %v6768_v50  ;;  %5555 = vmatprep.mubr.msk.f32.mxu1 %vm7087_vm0, %v10610_v9 }
 0x48d   :  { %v2981_v63 = vpop.f32.mrb[180].mxu1  ;;  %5797 = vmatprep.mubr.msk.f32.mxu0 %vm7087_vm0, %v10610_v9  ;;  %6781 = vtanh.f32 %v2420_v45  ;;  %v2450_v45 = vadd.f32 %v9320_v0, %v10685_v42  ;;  %v10691_v42 = vld [vmem:[#allocation33_spill] sm:$0xff] }
 0x48e   :  { %v6772_v20 = vpop.eup %6771  ;;  %v2982_v48 = vadd.f32 %v9280_v32, %v2981_v63  ;;  %v5401_v21 = vpop.f32.mrb[181].mxu1 }
 0x48f   :  { %5556 = vmatmul.mubr.f32.gmra.mrb[28].mxu1 %v6770_v7  ;;  %v6774_v16 = vpop.eup %6773 }
 0x490   :  { %6783 = vtanh.f32 %v2982_v48  ;;  %5798 = vmatmul.mubr.f32.gmra.mrb[176].mxu0 %v6772_v20  ;;  %5558 = vmatprep.mubr.msk.f32.mxu1 %vm7087_vm0, %v10610_v9 }
 0x491   :  { %v2986_v35 = vpop.f32.mrb[182].mxu1  ;;  %5800 = vmatprep.mubr.msk.f32.mxu0 %vm7087_vm0, %v10610_v9  ;;  %6785 = vtanh.f32 %v2425_v33  ;;  %v2455_v33 = vadd.f32 %v9320_v0, %v10686_v37  ;;  %v10692_v37 = vld [vmem:[#allocation12_spill] sm:$0xff] }
 0x492   :  { %v6776_v27 = vpop.eup %6775  ;;  %v2987_v13 = vadd.f32 %v9280_v32, %v2986_v35  ;;  %v5404_v28 = vpop.f32.mrb[183].mxu1 }
 0x493   :  { %5559 = vmatmul.mubr.f32.gmra.mrb[30].mxu1 %v6774_v16  ;;  %v6778_v57 = vpop.eup %6777 }
 0x494   :  { %6787 = vtanh.f32 %v2987_v13  ;;  %5801 = vmatmul.mubr.f32.gmra.mrb[178].mxu0 %v6776_v27  ;;  %5561 = vmatprep.mubr.msk.f32.mxu1 %vm7087_vm0, %v10610_v9 }
 0x495   :  { %v2991_v6 = vpop.f32.mrb[184].mxu1  ;;  %5803 = vmatprep.mubr.msk.f32.mxu0 %vm7087_vm0, %v10610_v9  ;;  %6789 = vtanh.f32 %v2430_v17  ;;  %v2460_v17 = vadd.f32 %v9320_v0, %v10687_v54  ;;  %v10693_v54 = vld [vmem:[#allocation34_spill] sm:$0xff] }
 0x496   :  { %v6780_v61 = vpop.eup %6779  ;;  %v2992_v58 = vadd.f32 %v9280_v32, %v2991_v6  ;;  %v5407_v24 = vpop.f32.mrb[185].mxu1 }
 0x497   :  { %5562 = vmatmul.mubr.f32.gmra.mrb[32].mxu1 %v6778_v57  ;;  %v6782_v43 = vpop.eup %6781 }
 0x498   :  { %6791 = vtanh.f32 %v2992_v58  ;;  %5804 = vmatmul.mubr.f32.gmra.mrb[180].mxu0 %v6780_v61  ;;  %5564 = vmatprep.mubr.msk.f32.mxu1 %vm7087_vm0, %v10610_v9 }
 0x499   :  { %v2996_v44 = vpop.f32.mrb[186].mxu1  ;;  %5806 = vmatprep.mubr.msk.f32.mxu0 %vm7087_vm0, %v10610_v9  ;;  %6793 = vtanh.f32 %v2435_v47  ;;  %v2465_v47 = vadd.f32 %v9320_v0, %v10688_v3  ;;  %v10694_v3 = vld [vmem:[#allocation13_spill] sm:$0xff] }
 0x49a   :  { %v6784_v18 = vpop.eup %6783  ;;  %v2997_v39 = vadd.f32 %v9280_v32, %v2996_v44  ;;  %v5410_v11 = vpop.f32.mrb[187].mxu1 }
 0x49b   :  { %5565 = vmatmul.mubr.f32.gmra.mrb[34].mxu1 %v6782_v43  ;;  %v6786_v31 = vpop.eup %6785 }
 0x49c   :  { %6795 = vtanh.f32 %v2997_v39  ;;  %5807 = vmatmul.mubr.f32.gmra.mrb[182].mxu0 %v6784_v18  ;;  %5567 = vmatprep.mubr.msk.f32.mxu1 %vm7087_vm0, %v10610_v9 }
 0x49d   :  { %v3001_v19 = vpop.f32.mrb[188].mxu1  ;;  %5809 = vmatprep.mubr.msk.f32.mxu0 %vm7087_vm0, %v10610_v9  ;;  %6797 = vtanh.f32 %v2440_v62  ;;  %v2470_v62 = vadd.f32 %v9320_v0, %v10689_v51  ;;  %v10695_v51 = vld [vmem:[#allocation35_spill] sm:$0xff] }
 0x49e   :  { %v6788_v56 = vpop.eup %6787  ;;  %v3002_v5 = vadd.f32 %v9280_v32, %v3001_v19  ;;  %v5413_v30 = vpop.f32.mrb[189].mxu1 }
 0x49f   :  { %5568 = vmatmul.mubr.f32.gmra.mrb[36].mxu1 %v6786_v31  ;;  %v6790_v8 = vpop.eup %6789 }
 0x4a0   :  { %6799 = vtanh.f32 %v3002_v5  ;;  %5810 = vmatmul.mubr.f32.gmra.mrb[184].mxu0 %v6788_v56  ;;  %5570 = vmatprep.mubr.msk.f32.mxu1 %vm7087_vm0, %v10610_v9 }
 0x4a1   :  { %v3006_v52 = vpop.f32.mrb[190].mxu1  ;;  %5812 = vmatprep.mubr.msk.f32.mxu0 %vm7087_vm0, %v10610_v9  ;;  %6801 = vtanh.f32 %v2445_v10  ;;  %v2475_v10 = vadd.f32 %v9320_v0, %v10690_v2  ;;  %v10696_v2 = vld [vmem:[#allocation14_spill] sm:$0xff] }
 0x4a2   :  { %v6792_v50 = vpop.eup %6791  ;;  %v3007_v29 = vadd.f32 %v9280_v32, %v3006_v52  ;;  %v5416_v12 = vpop.f32.mrb[191].mxu1 }
 0x4a3   :  { %5571 = vmatmul.mubr.f32.gmra.mrb[38].mxu1 %v6790_v8  ;;  %v6794_v7 = vpop.eup %6793 }
 0x4a4   :  { %6803 = vtanh.f32 %v3007_v29  ;;  %5813 = vmatmul.mubr.f32.gmra.mrb[186].mxu0 %v6792_v50  ;;  %5573 = vmatprep.mubr.msk.f32.mxu1 %vm7087_vm0, %v10610_v9 }
 0x4a5   :  { %v3011_v63 = vpop.f32.mrb[192].mxu1  ;;  %5815 = vmatprep.mubr.msk.f32.mxu0 %vm7087_vm0, %v10610_v9  ;;  %6805 = vtanh.f32 %v2450_v45  ;;  %v2480_v45 = vadd.f32 %v9320_v0, %v10691_v42  ;;  %v10697_v42 = vld [vmem:[#allocation36_spill] sm:$0xff] }
 0x4a6   :  { %v6796_v20 = vpop.eup %6795  ;;  %v3012_v48 = vadd.f32 %v9280_v32, %v3011_v63  ;;  %v5419_v21 = vpop.f32.mrb[193].mxu1 }
 0x4a7   :  { %5574 = vmatmul.mubr.f32.gmra.mrb[40].mxu1 %v6794_v7  ;;  %v6798_v16 = vpop.eup %6797 }
 0x4a8   :  { %6807 = vtanh.f32 %v3012_v48  ;;  %5816 = vmatmul.mubr.f32.gmra.mrb[188].mxu0 %v6796_v20  ;;  %5576 = vmatprep.mubr.msk.f32.mxu1 %vm7087_vm0, %v10610_v9 }
 0x4a9   :  { %v3016_v35 = vpop.f32.mrb[194].mxu1  ;;  %5818 = vmatprep.mubr.msk.f32.mxu0 %vm7087_vm0, %v10610_v9  ;;  %6809 = vtanh.f32 %v2455_v33  ;;  %v2485_v33 = vadd.f32 %v9320_v0, %v10692_v37  ;;  %v10698_v37 = vld [vmem:[#allocation37_spill] sm:$0xff] }
 0x4aa   :  { %v6800_v27 = vpop.eup %6799  ;;  %v3017_v13 = vadd.f32 %v9280_v32, %v3016_v35  ;;  %v5422_v28 = vpop.f32.mrb[195].mxu1 }
 0x4ab   :  { %5577 = vmatmul.mubr.f32.gmra.mrb[42].mxu1 %v6798_v16  ;;  %v6802_v57 = vpop.eup %6801 }
 0x4ac   :  { %6811 = vtanh.f32 %v3017_v13  ;;  %5819 = vmatmul.mubr.f32.gmra.mrb[190].mxu0 %v6800_v27  ;;  %5579 = vmatprep.mubr.msk.f32.mxu1 %vm7087_vm0, %v10610_v9 }
 0x4ad   :  { %v3021_v6 = vpop.f32.mrb[196].mxu1  ;;  %5821 = vmatprep.mubr.msk.f32.mxu0 %vm7087_vm0, %v10610_v9  ;;  %6813 = vtanh.f32 %v2460_v17  ;;  %v2490_v17 = vadd.f32 %v9320_v0, %v10693_v54  ;;  %v10699_v54 = vld [vmem:[#allocation15_spill] sm:$0xff] }
 0x4ae   :  { %v6804_v61 = vpop.eup %6803  ;;  %v3022_v58 = vadd.f32 %v9280_v32, %v3021_v6  ;;  %v5425_v24 = vpop.f32.mrb[197].mxu1 }
 0x4af   :  { %5580 = vmatmul.mubr.f32.gmra.mrb[44].mxu1 %v6802_v57  ;;  %v6806_v43 = vpop.eup %6805 }
 0x4b0   :  { %6815 = vtanh.f32 %v3022_v58  ;;  %5822 = vmatmul.mubr.f32.gmra.mrb[192].mxu0 %v6804_v61  ;;  %5582 = vmatprep.mubr.msk.f32.mxu1 %vm7087_vm0, %v10610_v9 }
 0x4b1   :  { %v3026_v44 = vpop.f32.mrb[198].mxu1  ;;  %5824 = vmatprep.mubr.msk.f32.mxu0 %vm7087_vm0, %v10610_v9  ;;  %6817 = vtanh.f32 %v2465_v47  ;;  %v2495_v47 = vadd.f32 %v9320_v0, %v10694_v3  ;;  %v10700_v3 = vld [vmem:[#allocation38_spill] sm:$0xff] }
 0x4b2   :  { %v6808_v18 = vpop.eup %6807  ;;  %v3027_v39 = vadd.f32 %v9280_v32, %v3026_v44  ;;  %v5428_v11 = vpop.f32.mrb[199].mxu1 }
 0x4b3   :  { %5583 = vmatmul.mubr.f32.gmra.mrb[46].mxu1 %v6806_v43  ;;  %v6810_v31 = vpop.eup %6809 }
 0x4b4   :  { %6819 = vtanh.f32 %v3027_v39  ;;  %5825 = vmatmul.mubr.f32.gmra.mrb[194].mxu0 %v6808_v18  ;;  %5585 = vmatprep.mubr.msk.f32.mxu1 %vm7087_vm0, %v10610_v9 }
 0x4b5   :  { %v3031_v19 = vpop.f32.mrb[200].mxu1  ;;  %5827 = vmatprep.mubr.msk.f32.mxu0 %vm7087_vm0, %v10610_v9  ;;  %6821 = vtanh.f32 %v2470_v62  ;;  %v2500_v62 = vadd.f32 %v9320_v0, %v10695_v51  ;;  %v10701_v51 = vld [vmem:[#allocation39_spill] sm:$0xff] }
 0x4b6   :  { %v6812_v56 = vpop.eup %6811  ;;  %v3032_v5 = vadd.f32 %v9280_v32, %v3031_v19  ;;  %v5431_v30 = vpop.f32.mrb[201].mxu1 }
 0x4b7   :  { %5586 = vmatmul.mubr.f32.gmra.mrb[48].mxu1 %v6810_v31  ;;  %v6814_v8 = vpop.eup %6813 }
 0x4b8   :  { %6823 = vtanh.f32 %v3032_v5  ;;  %5828 = vmatmul.mubr.f32.gmra.mrb[196].mxu0 %v6812_v56  ;;  %5588 = vmatprep.mubr.msk.f32.mxu1 %vm7087_vm0, %v10610_v9 }
 0x4b9   :  { %v3036_v52 = vpop.f32.mrb[202].mxu1  ;;  %5830 = vmatprep.mubr.msk.f32.mxu0 %vm7087_vm0, %v10610_v9  ;;  %6825 = vtanh.f32 %v2475_v10  ;;  %v2505_v10 = vadd.f32 %v9320_v0, %v10696_v2 }
 0x4ba   :  { %v6816_v50 = vpop.eup %6815  ;;  %v3037_v29 = vadd.f32 %v9280_v32, %v3036_v52  ;;  %v5434_v12 = vpop.f32.mrb[203].mxu1 }
 0x4bb   :  { %5589 = vmatmul.mubr.f32.gmra.mrb[50].mxu1 %v6814_v8  ;;  %v6818_v7 = vpop.eup %6817 }
 0x4bc   :  { %6827 = vtanh.f32 %v3037_v29  ;;  %5831 = vmatmul.mubr.f32.gmra.mrb[198].mxu0 %v6816_v50  ;;  %5591 = vmatprep.mubr.msk.f32.mxu1 %vm7087_vm0, %v10610_v9 }
 0x4bd   :  { %v3041_v63 = vpop.f32.mrb[204].mxu1  ;;  %5833 = vmatprep.mubr.msk.f32.mxu0 %vm7087_vm0, %v10610_v9  ;;  %6829 = vtanh.f32 %v2480_v45  ;;  %v2510_v45 = vadd.f32 %v9320_v0, %v10697_v42 }
 0x4be   :  { %v6820_v20 = vpop.eup %6819  ;;  %v3042_v48 = vadd.f32 %v9280_v32, %v3041_v63  ;;  %v5437_v21 = vpop.f32.mrb[205].mxu1 }
 0x4bf   :  { %5592 = vmatmul.mubr.f32.gmra.mrb[52].mxu1 %v6818_v7  ;;  %v6822_v16 = vpop.eup %6821 }
 0x4c0   :  { %6831 = vtanh.f32 %v3042_v48  ;;  %5834 = vmatmul.mubr.f32.gmra.mrb[200].mxu0 %v6820_v20  ;;  %5594 = vmatprep.mubr.msk.f32.mxu1 %vm7087_vm0, %v10610_v9 }
 0x4c1   :  { %v3046_v35 = vpop.f32.mrb[206].mxu1  ;;  %5836 = vmatprep.mubr.msk.f32.mxu0 %vm7087_vm0, %v10610_v9  ;;  %6833 = vtanh.f32 %v2485_v33  ;;  %v2515_v33 = vadd.f32 %v9320_v0, %v10698_v37 }
 0x4c2   :  { %v6824_v27 = vpop.eup %6823  ;;  %v3047_v13 = vadd.f32 %v9280_v32, %v3046_v35  ;;  %v5440_v28 = vpop.f32.mrb[207].mxu1 }
 0x4c3   :  { %5595 = vmatmul.mubr.f32.gmra.mrb[54].mxu1 %v6822_v16  ;;  %v6826_v57 = vpop.eup %6825 }
 0x4c4   :  { %6835 = vtanh.f32 %v3047_v13  ;;  %5837 = vmatmul.mubr.f32.gmra.mrb[202].mxu0 %v6824_v27  ;;  %5597 = vmatprep.mubr.msk.f32.mxu1 %vm7087_vm0, %v10610_v9 }
 0x4c5   :  { %v3051_v6 = vpop.f32.mrb[208].mxu1  ;;  %5839 = vmatprep.mubr.msk.f32.mxu0 %vm7087_vm0, %v10610_v9  ;;  %6837 = vtanh.f32 %v2490_v17  ;;  %v2520_v17 = vadd.f32 %v9320_v0, %v10699_v54 }
 0x4c6   :  { %v6828_v61 = vpop.eup %6827  ;;  %v3052_v58 = vadd.f32 %v9280_v32, %v3051_v6  ;;  %v5443_v24 = vpop.f32.mrb[209].mxu1  ;;  %v9578_v32 = vld [vmem:[%s10583_s4 + $0x1] ss:$0 sm:$0xff] }
 0x4c7   :  { %5598 = vmatmul.mubr.f32.gmra.mrb[56].mxu1 %v6826_v57  ;;  %v6830_v43 = vpop.eup %6829 }
 0x4c8   :  { %6839 = vtanh.f32 %v3052_v58  ;;  %5840 = vmatmul.mubr.f32.gmra.mrb[204].mxu0 %v6828_v61  ;;  %5600 = vmatprep.mubr.msk.f32.mxu1 %vm7087_vm0, %v10610_v9 }
 0x4c9   :  { %v3056_v44 = vpop.f32.mrb[210].mxu1  ;;  %5842 = vmatprep.mubr.msk.f32.mxu0 %vm7087_vm0, %v10610_v9  ;;  %6841 = vtanh.f32 %v2495_v47  ;;  %v2525_v47 = vadd.f32 %v9320_v0, %v10700_v3 }
 0x4ca   :  { %v6832_v18 = vpop.eup %6831  ;;  %v3057_v39 = vadd.f32 %v9578_v32, %v3056_v44  ;;  %v5446_v11 = vpop.f32.mrb[211].mxu1 }
 0x4cb   :  { %5601 = vmatmul.mubr.f32.gmra.mrb[58].mxu1 %v6830_v43  ;;  %v6834_v31 = vpop.eup %6833 }
 0x4cc   :  { %6843 = vtanh.f32 %v3057_v39  ;;  %5843 = vmatmul.mubr.f32.gmra.mrb[206].mxu0 %v6832_v18  ;;  %5603 = vmatprep.mubr.msk.f32.mxu1 %vm7087_vm0, %v10610_v9 }
 0x4cd   :  { %v3061_v19 = vpop.f32.mrb[212].mxu1  ;;  %5845 = vmatprep.mubr.msk.f32.mxu0 %vm7087_vm0, %v10610_v9  ;;  %6845 = vtanh.f32 %v2500_v62  ;;  %v2530_v62 = vadd.f32 %v9320_v0, %v10701_v51  ;;  %v9633_v0 = vld [vmem:[%s10583_s4] ss:$0 sm:$0xff] }
 0x4ce   :  { %v6836_v56 = vpop.eup %6835  ;;  %v3062_v5 = vadd.f32 %v9578_v32, %v3061_v19  ;;  %v5449_v30 = vpop.f32.mrb[213].mxu1  ;;  %v2535_v2 = vadd.f32 %v9633_v0, %v8950_v15  ;;  %v2555_v54 = vadd.f32 %v9633_v0, %v9056_v53  ;;  %v2560_v53 = vadd.f32 %v9633_v0, %v9077_v23 }
 0x4cf   :  { %5604 = vmatmul.mubr.f32.gmra.mrb[60].mxu1 %v6834_v31  ;;  %v6838_v8 = vpop.eup %6837  ;;  %v2565_v23 = vadd.f32 %v9633_v0, %v9089_v46 }
 0x4d0   :  { %6847 = vtanh.f32 %v3062_v5  ;;  %5846 = vmatmul.mubr.f32.gmra.mrb[208].mxu0 %v6836_v56  ;;  %5606 = vmatprep.mubr.msk.f32.mxu1 %vm7087_vm0, %v10610_v9 }
 0x4d1   :  { %v3066_v52 = vpop.f32.mrb[214].mxu1  ;;  %5848 = vmatprep.mubr.msk.f32.mxu0 %vm7087_vm0, %v10610_v9  ;;  %6849 = vtanh.f32 %v2505_v10 }
 0x4d2   :  { %v6840_v50 = vpop.eup %6839  ;;  %v3067_v29 = vadd.f32 %v9578_v32, %v3066_v52  ;;  %v5452_v12 = vpop.f32.mrb[215].mxu1 }
 0x4d3   :  { %5607 = vmatmul.mubr.f32.gmra.mrb[62].mxu1 %v6838_v8  ;;  %v6842_v7 = vpop.eup %6841  ;;  %v2540_v12 = vadd.f32 %v9633_v0, %v8981_v55 }
 0x4d4   :  { %6851 = vtanh.f32 %v3067_v29  ;;  %5849 = vmatmul.mubr.f32.gmra.mrb[210].mxu0 %v6840_v50  ;;  %5609 = vmatprep.mubr.msk.f32.mxu1 %vm7087_vm0, %v10610_v9 }
 0x4d5   :  { %v3071_v63 = vpop.f32.mrb[216].mxu1  ;;  %5851 = vmatprep.mubr.msk.f32.mxu0 %vm7087_vm0, %v10610_v9  ;;  %6853 = vtanh.f32 %v2510_v45 }
 0x4d6   :  { %v6844_v20 = vpop.eup %6843  ;;  %v3072_v48 = vadd.f32 %v9578_v32, %v3071_v63  ;;  %v5455_v21 = vpop.f32.mrb[217].mxu1 }
 0x4d7   :  { %5610 = vmatmul.mubr.f32.gmra.mrb[64].mxu1 %v6842_v7  ;;  %v6846_v16 = vpop.eup %6845 }
 0x4d8   :  { %6855 = vtanh.f32 %v3072_v48  ;;  %5852 = vmatmul.mubr.f32.gmra.mrb[212].mxu0 %v6844_v20  ;;  %5612 = vmatprep.mubr.msk.f32.mxu1 %vm7087_vm0, %v10610_v9  ;;  %v2545_v20 = vadd.f32 %v9633_v0, %v9010_v22 }
 0x4d9   :  { %v3076_v35 = vpop.f32.mrb[218].mxu1  ;;  %5854 = vmatprep.mubr.msk.f32.mxu0 %vm7087_vm0, %v10610_v9  ;;  %6857 = vtanh.f32 %v2515_v33 }
 0x4da   :  { %v6848_v27 = vpop.eup %6847  ;;  %v3077_v13 = vadd.f32 %v9578_v32, %v3076_v35  ;;  %v5458_v28 = vpop.f32.mrb[219].mxu1 }
 0x4db   :  { %5613 = vmatmul.mubr.f32.gmra.mrb[66].mxu1 %v6846_v16  ;;  %v6850_v57 = vpop.eup %6849  ;;  %v2550_v16 = vadd.f32 %v9633_v0, %v9036_v60 }
 0x4dc   :  { %6859 = vtanh.f32 %v3077_v13  ;;  %5855 = vmatmul.mubr.f32.gmra.mrb[214].mxu0 %v6848_v27  ;;  %5615 = vmatprep.mubr.msk.f32.mxu1 %vm7087_vm0, %v10610_v9 }
 0x4dd   :  { %v3081_v6 = vpop.f32.mrb[220].mxu1  ;;  %5857 = vmatprep.mubr.msk.f32.mxu0 %vm7087_vm0, %v10610_v9  ;;  %6861 = vtanh.f32 %v2520_v17 }
 0x4de   :  { %v6852_v61 = vpop.eup %6851  ;;  %v3082_v58 = vadd.f32 %v9578_v32, %v3081_v6  ;;  %v5461_v24 = vpop.f32.mrb[221].mxu1 }
 0x4df   :  { %5616 = vmatmul.mubr.f32.gmra.mrb[68].mxu1 %v6850_v57  ;;  %v6854_v43 = vpop.eup %6853 }
 0x4e0   :  { %6863 = vtanh.f32 %v3082_v58  ;;  %5858 = vmatmul.mubr.f32.gmra.mrb[216].mxu0 %v6852_v61  ;;  %5618 = vmatprep.mubr.msk.f32.mxu1 %vm7087_vm0, %v10610_v9  ;;  %v9677_v58 = vld [vmem:[%s10584_s6] ss:$0 sm:$0xff] }
 0x4e1   :  { %v3086_v44 = vpop.f32.mrb[222].mxu1  ;;  %5860 = vmatprep.mubr.msk.f32.mxu0 %vm7087_vm0, %v10610_v9  ;;  %6865 = vtanh.f32 %v2525_v47 }
 0x4e2   :  { %v6856_v18 = vpop.eup %6855  ;;  %v3087_v39 = vadd.f32 %v9578_v32, %v3086_v44  ;;  %v5464_v11 = vpop.f32.mrb[223].mxu1 }
 0x4e3   :  { %5619 = vmatmul.mubr.f32.gmra.mrb[70].mxu1 %v6854_v43  ;;  %v6858_v31 = vpop.eup %6857 }
 0x4e4   :  { %6867 = vtanh.f32 %v3087_v39  ;;  %5861 = vmatmul.mubr.f32.gmra.mrb[218].mxu0 %v6856_v18  ;;  %5621 = vmatprep.mubr.msk.f32.mxu1 %vm7087_vm0, %v10610_v9 }
 0x4e5   :  { %v3091_v19 = vpop.f32.mrb[224].mxu1  ;;  %5863 = vmatprep.mubr.msk.f32.mxu0 %vm7087_vm0, %v10610_v9  ;;  %6869 = vtanh.f32 %v2530_v62 }
 0x4e6   :  { %v6860_v56 = vpop.eup %6859  ;;  %v3092_v5 = vadd.f32 %v9578_v32, %v3091_v19  ;;  %v5467_v30 = vpop.f32.mrb[225].mxu1 }
 0x4e7   :  { %5622 = vmatmul.mubr.f32.gmra.mrb[72].mxu1 %v6858_v31  ;;  %v6862_v10 = vpop.eup %6861  ;;  %v2570_v31 = vadd.f32 %v9633_v0, %v9117_v25 }
 0x4e8   :  { %6871 = vtanh.f32 %v3092_v5  ;;  %5864 = vmatmul.mubr.f32.gmra.mrb[220].mxu0 %v6860_v56  ;;  %5624 = vmatprep.mubr.msk.f32.mxu1 %vm7087_vm0, %v10610_v9 }
 0x4e9   :  { %v3096_v8 = vpop.f32.mrb[226].mxu1  ;;  %5866 = vmatprep.mubr.msk.f32.mxu0 %vm7087_vm0, %v10610_v9  ;;  %6873 = vtanh.f32 %v2535_v2 }
 0x4ea   :  { %v6864_v52 = vpop.eup %6863  ;;  %v3097_v50 = vadd.f32 %v9578_v32, %v3096_v8  ;;  %v5470_v29 = vpop.f32.mrb[227].mxu1 }
 0x4eb   :  { %5625 = vmatmul.mubr.f32.gmra.mrb[74].mxu1 %v6862_v10  ;;  %v6866_v15 = vpop.eup %6865 }
 0x4ec   :  { %6875 = vtanh.f32 %v3097_v50  ;;  %5867 = vmatmul.mubr.f32.gmra.mrb[222].mxu0 %v6864_v52  ;;  %5627 = vmatprep.mubr.msk.f32.mxu1 %vm7087_vm0, %v10610_v9  ;;  %v2575_v52 = vadd.f32 %v9633_v0, %v9127_v40 }
 0x4ed   :  { %v3101_v42 = vpop.f32.mrb[228].mxu1  ;;  %5869 = vmatprep.mubr.msk.f32.mxu0 %vm7087_vm0, %v10610_v9  ;;  %6877 = vtanh.f32 %v2540_v12 }
 0x4ee   :  { %v6868_v45 = vpop.eup %6867  ;;  %v3102_v7 = vadd.f32 %v9578_v32, %v3101_v42  ;;  %v5473_v63 = vpop.f32.mrb[229].mxu1 }
 0x4ef   :  { %5628 = vmatmul.mubr.f32.gmra.mrb[76].mxu1 %v6866_v15  ;;  %v6870_v55 = vpop.eup %6869 }
 0x4f0   :  { %6879 = vtanh.f32 %v3102_v7  ;;  %5870 = vmatmul.mubr.f32.gmra.mrb[224].mxu0 %v6868_v45  ;;  %5630 = vmatprep.mubr.msk.f32.mxu1 %vm7087_vm0, %v10610_v9  ;;  %v2580_v7 = vadd.f32 %v9633_v0, %v9147_v26 }
 0x4f1   :  { %v3106_v48 = vpop.f32.mrb[230].mxu1  ;;  %5872 = vmatprep.mubr.msk.f32.mxu0 %vm7087_vm0, %v10610_v9  ;;  %6881 = vtanh.f32 %v2545_v20 }
 0x4f2   :  { %v6872_v21 = vpop.eup %6871  ;;  %v3107_v37 = vadd.f32 %v9578_v32, %v3106_v48  ;;  %v5476_v33 = vpop.f32.mrb[231].mxu1 }
 0x4f3   :  { %5631 = vmatmul.mubr.f32.gmra.mrb[78].mxu1 %v6870_v55  ;;  %v6874_v22 = vpop.eup %6873 }
 0x4f4   :  { %6883 = vtanh.f32 %v3107_v37  ;;  %5873 = vmatmul.mubr.f32.gmra.mrb[226].mxu0 %v6872_v21  ;;  %5633 = vmatprep.mubr.msk.f32.mxu1 %vm7087_vm0, %v10610_v9 }
 0x4f5   :  { %v3111_v35 = vpop.f32.mrb[232].mxu1  ;;  %5875 = vmatprep.mubr.msk.f32.mxu0 %vm7087_vm0, %v10610_v9  ;;  %6885 = vtanh.f32 %v2550_v16  ;;  %v2585_v16 = vadd.f32 %v9633_v0, %v9159_v38 }
 0x4f6   :  { %v6876_v27 = vpop.eup %6875  ;;  %v3112_v13 = vadd.f32 %v9578_v32, %v3111_v35  ;;  %v5479_v28 = vpop.f32.mrb[233].mxu1 }
 0x4f7   :  { %5634 = vmatmul.mubr.f32.gmra.mrb[80].mxu1 %v6874_v22  ;;  %v6878_v60 = vpop.eup %6877 }
 0x4f8   :  { %6887 = vtanh.f32 %v3112_v13  ;;  %5876 = vmatmul.mubr.f32.gmra.mrb[228].mxu0 %v6876_v27  ;;  %5636 = vmatprep.mubr.msk.f32.mxu1 %vm7087_vm0, %v10610_v9 }
 0x4f9   :  { %v3116_v17 = vpop.f32.mrb[234].mxu1  ;;  %5878 = vmatprep.mubr.msk.f32.mxu0 %vm7087_vm0, %v10610_v9  ;;  %6889 = vtanh.f32 %v2555_v54 }
 0x4fa   :  { %v6880_v57 = vpop.eup %6879  ;;  %v3117_v6 = vadd.f32 %v9578_v32, %v3116_v17  ;;  %v5482_v61 = vpop.f32.mrb[235].mxu1 }
 0x4fb   :  { %5637 = vmatmul.mubr.f32.gmra.mrb[82].mxu1 %v6878_v60  ;;  %v6882_v24 = vpop.eup %6881 }
 0x4fc   :  { %6891 = vtanh.f32 %v3117_v6  ;;  %5879 = vmatmul.mubr.f32.gmra.mrb[230].mxu0 %v6880_v57  ;;  %5639 = vmatprep.mubr.msk.f32.mxu1 %vm7087_vm0, %v10610_v9  ;;  %v2590_v6 = vadd.f32 %v9633_v0, %v9179_v59 }
 0x4fd   :  { %5881 = vmatprep.mubr.msk.f32.mxu0 %vm7087_vm0, %v10610_v9  ;;  %6893 = vtanh.f32 %v2560_v53 }
 0x4fe   :  { %v6884_v3 = vpop.eup %6883  ;;  %v3679_v47 = vpop.f32.mrb[126].mxu0  ;;  %6895 = vtanh.f32 %v2565_v23  ;;  %v2595_v23 = vadd.f32 %v9633_v0, %v9191_v36 }
 0x4ff   :  { %5640 = vmatmul.mubr.f32.gmra.mrb[84].mxu1 %v6882_v24  ;;  %v3680_v43 = vadd.f32 %v9677_v58, %v3679_v47  ;;  %v5724_v44 = vpop.f32.mrb[127].mxu0  ;;  %v6886_v18 = vpop.eup %6885 }
 0x500   :  { %5882 = vmatmul.mubr.f32.gmra.mrb[232].mxu0 %v6884_v3  ;;  %5642 = vmatprep.mubr.msk.f32.mxu1 %vm7087_vm0, %v10610_v9 }
 0x501   :  { %4304 = vst.msk [vmem:[%s10585_s7] sm:$0xff] %vm4303_vm1, %v3680_v43  ;;  %v3121_v39 = vpop.f32.mrb[236].mxu1  ;;  %5884 = vmatprep.mubr.msk.f32.mxu0 %vm7087_vm0, %v10610_v9 }
 0x502   :  { %v6888_v46 = vpop.eup %6887  ;;  %v3122_v11 = vadd.f32 %v9578_v32, %v3121_v39  ;;  %v5485_v51 = vpop.f32.mrb[237].mxu1 }
 0x503   :  { %v3684_v62 = vpop.f32.mrb[128].mxu0  ;;  %5643 = vmatmul.mubr.f32.gmra.mrb[86].mxu1 %v6886_v18  ;;  %v6890_v5 = vpop.eup %6889 }
 0x504   :  { %v3685_v19 = vadd.f32 %v9677_v58, %v3684_v62  ;;  %v5727_v56 = vpop.f32.mrb[129].mxu0  ;;  %6897 = vtanh.f32 %v3122_v11  ;;  %5885 = vmatmul.mubr.f32.gmra.mrb[234].mxu0 %v6888_v46  ;;  %5645 = vmatprep.mubr.msk.f32.mxu1 %vm7087_vm0, %v10610_v9  ;;  %v2600_v62 = vadd.f32 %v9633_v0, %v9211_v34 }
 0x505   :  { %v3126_v30 = vpop.f32.mrb[238].mxu1  ;;  %5887 = vmatprep.mubr.msk.f32.mxu0 %vm7087_vm0, %v10610_v9  ;;  %6899 = vtanh.f32 %v2570_v31 }
 0x506   :  { %4305 = vst.msk [vmem:[%s10585_s7 + $0x8] sm:$0xff] %vm4303_vm1, %v3685_v19  ;;  %v6892_v25 = vpop.eup %6891  ;;  %v3127_v2 = vadd.f32 %v9578_v32, %v3126_v30  ;;  %v5488_v10 = vpop.f32.mrb[239].mxu1 }
 0x507   :  { %v3689_v8 = vpop.f32.mrb[130].mxu0  ;;  %5646 = vmatmul.mubr.f32.gmra.mrb[88].mxu1 %v6890_v5  ;;  %v6894_v15 = vpop.eup %6893  ;;  %v2605_v10 = vadd.f32 %v9633_v0, %v9223_v4 }
 0x508   :  { %v3690_v50 = vadd.f32 %v9677_v58, %v3689_v8  ;;  %v5730_v29 = vpop.f32.mrb[131].mxu0  ;;  %6901 = vtanh.f32 %v3127_v2  ;;  %5888 = vmatmul.mubr.f32.gmra.mrb[236].mxu0 %v6892_v25  ;;  %5648 = vmatprep.mubr.msk.f32.mxu1 %vm7087_vm0, %v10610_v9  ;;  %v6896_v55 = vpop.eup %6895 }
 0x509   :  { %v3131_v12 = vpop.f32.mrb[240].mxu1  ;;  %5890 = vmatprep.mubr.msk.f32.mxu0 %vm7087_vm0, %v10610_v9  ;;  %6903 = vtanh.f32 %v2575_v52 }
 0x50a   :  { %4306 = vst.msk [vmem:[%s10585_s7 + $0x10] sm:$0xff] %vm4303_vm1, %v3690_v50  ;;  %v3132_v40 = vadd.f32 %v9578_v32, %v3131_v12  ;;  %v5491_v42 = vpop.f32.mrb[241].mxu1  ;;  %v3694_v45 = vpop.f32.mrb[132].mxu0 }
 0x50b   :  { %5649 = vmatmul.mubr.f32.gmra.mrb[90].mxu1 %v6894_v15  ;;  %v3695_v63 = vadd.f32 %v9677_v58, %v3694_v45  ;;  %v5733_v20 = vpop.f32.mrb[133].mxu0  ;;  %v2610_v42 = vadd.f32 %v9633_v0, %v9239_v41 }
 0x50c   :  { %6905 = vtanh.f32 %v3132_v40  ;;  %5651 = vmatprep.mubr.msk.f32.mxu1 %vm7087_vm0, %v10610_v9 }
 0x50d   :  { %4307 = vst.msk [vmem:[%s10585_s7 + $0x18] sm:$0xff] %vm4303_vm1, %v3695_v63  ;;  %v3136_v48 = vpop.f32.mrb[242].mxu1  ;;  %6907 = vtanh.f32 %v2580_v7 }
 0x50e   :  { %v6898_v21 = vpop.eup %6897  ;;  %v3137_v37 = vadd.f32 %v9578_v32, %v3136_v48  ;;  %v5494_v33 = vpop.f32.mrb[243].mxu1 }
 0x50f   :  { %v3699_v26 = vpop.f32.mrb[134].mxu0  ;;  %5652 = vmatmul.mubr.f32.gmra.mrb[92].mxu1 %v6896_v55  ;;  %5891 = vmatmul.mubr.f32.gmra.mrb[238].mxu0 %v6898_v21  ;;  %v6900_v27 = vpop.eup %6899 }
 0x510   :  { %v3700_v22 = vadd.f32 %v9677_v58, %v3699_v26  ;;  %v5736_v35 = vpop.f32.mrb[135].mxu0  ;;  %6909 = vtanh.f32 %v3137_v37  ;;  %5654 = vmatprep.mubr.msk.f32.mxu1 %vm7087_vm0, %v10610_v9  ;;  %5893 = vmatprep.mubr.msk.f32.mxu0 %vm7087_vm0, %v10610_v9  ;;  %v2615_v37 = vadd.f32 %v9633_v0, %v9251_v1 }
 0x511   :  { %v3141_v13 = vpop.f32.mrb[244].mxu1  ;;  %6911 = vtanh.f32 %v2585_v16 }
 0x512   :  { %4308 = vst.msk [vmem:[%s10585_s7 + $0x20] sm:$0xff] %vm4303_vm1, %v3700_v22  ;;  %v6902_v38 = vpop.eup %6901  ;;  %v3142_v28 = vadd.f32 %v9578_v32, %v3141_v13  ;;  %v5497_v54 = vpop.f32.mrb[245].mxu1 }
 0x513   :  { %v3704_v60 = vpop.f32.mrb[136].mxu0  ;;  %5655 = vmatmul.mubr.f32.gmra.mrb[94].mxu1 %v6900_v27  ;;  %5894 = vmatmul.mubr.f32.gmra.mrb[240].mxu0 %v6902_v38  ;;  %v6904_v61 = vpop.eup %6903  ;;  %v2620_v38 = vadd.f32 %v9633_v0, %v9265_v14 }
 0x514   :  { %v3705_v17 = vadd.f32 %v9677_v58, %v3704_v60  ;;  %v5739_v57 = vpop.f32.mrb[137].mxu0  ;;  %6913 = vtanh.f32 %v3142_v28  ;;  %5657 = vmatprep.mubr.msk.f32.mxu1 %vm7087_vm0, %v10610_v9  ;;  %5896 = vmatprep.mubr.msk.f32.mxu0 %vm7087_vm0, %v10610_v9 }
 0x515   :  { %6915 = vtanh.f32 %v2590_v6 }
 0x516   :  { %4309 = vst.msk [vmem:[%s10585_s7 + $0x28] sm:$0xff] %vm4303_vm1, %v3705_v17  ;;  %v6906_v53 = vpop.eup %6905  ;;  %v3146_v24 = vpop.f32.mrb[246].mxu1 }
 0x517   :  { %v3147_v3 = vadd.f32 %v9578_v32, %v3146_v24  ;;  %v5500_v47 = vpop.f32.mrb[247].mxu1  ;;  %5658 = vmatmul.mubr.f32.gmra.mrb[96].mxu1 %v6904_v61  ;;  %v3709_v59 = vpop.f32.mrb[138].mxu0  ;;  %5897 = vmatmul.mubr.f32.gmra.mrb[242].mxu0 %v6906_v53  ;;  %v2625_v53 = vadd.f32 %v9633_v0, %v9275_v49 }
 0x518   :  { %v3710_v43 = vadd.f32 %v9677_v58, %v3709_v59  ;;  %v5742_v44 = vpop.f32.mrb[139].mxu0  ;;  %5660 = vmatprep.mubr.msk.f32.mxu1 %vm7087_vm0, %v10610_v9  ;;  %5899 = vmatprep.mubr.msk.f32.mxu0 %vm7087_vm0, %v10610_v9  ;;  %v6908_v18 = vpop.eup %6907 }
 0x519   :  { %6917 = vtanh.f32 %v3147_v3 }
 0x51a   :  { %v6910_v39 = vpop.eup %6909  ;;  %4310 = vst.msk [vmem:[%s10585_s7 + $0x30] sm:$0xff] %vm4303_vm1, %v3710_v43  ;;  %v3151_v46 = vpop.f32.mrb[248].mxu1  ;;  %6919 = vtanh.f32 %v2595_v23 }
 0x51b   :  { %v3152_v36 = vadd.f32 %v9578_v32, %v3151_v46  ;;  %v5503_v11 = vpop.f32.mrb[249].mxu1  ;;  %5661 = vmatmul.mubr.f32.gmra.mrb[98].mxu1 %v6908_v18  ;;  %v3714_v51 = vpop.f32.mrb[140].mxu0  ;;  %5900 = vmatmul.mubr.f32.gmra.mrb[244].mxu0 %v6910_v39 }
 0x51c   :  { %v3715_v31 = vadd.f32 %v9677_v58, %v3714_v51  ;;  %v5745_v19 = vpop.f32.mrb[141].mxu0  ;;  %5663 = vmatprep.mubr.msk.f32.mxu1 %vm7087_vm0, %v10610_v9  ;;  %5902 = vmatprep.mubr.msk.f32.mxu0 %vm7087_vm0, %v10610_v9  ;;  %v6912_v56 = vpop.eup %6911 }
 0x51d   :  { %6921 = vtanh.f32 %v3152_v36 }
 0x51e   :  { %v6914_v5 = vpop.eup %6913  ;;  %4311 = vst.msk [vmem:[%s10585_s7 + $0x38] sm:$0xff] %vm4303_vm1, %v3715_v31  ;;  %v3156_v30 = vpop.f32.mrb[250].mxu1  ;;  %6923 = vtanh.f32 %v2600_v62 }
 0x51f   :  { %v3157_v34 = vadd.f32 %v9578_v32, %v3156_v30  ;;  %v5506_v25 = vpop.f32.mrb[251].mxu1  ;;  %5664 = vmatmul.mubr.f32.gmra.mrb[100].mxu1 %v6912_v56  ;;  %v3719_v2 = vpop.f32.mrb[142].mxu0  ;;  %5903 = vmatmul.mubr.f32.gmra.mrb[246].mxu0 %v6914_v5 }
 0x520   :  { %v3720_v8 = vadd.f32 %v9677_v58, %v3719_v2  ;;  %v5748_v52 = vpop.f32.mrb[143].mxu0  ;;  %5666 = vmatprep.mubr.msk.f32.mxu1 %vm7087_vm0, %v10610_v9  ;;  %5905 = vmatprep.mubr.msk.f32.mxu0 %vm7087_vm0, %v10610_v9  ;;  %v6916_v50 = vpop.eup %6915 }
 0x521   :  { %6925 = vtanh.f32 %v3157_v34 }
 0x522   :  { %4312 = vst.msk [vmem:[%s10585_s7 + $0x40] sm:$0xff] %vm4303_vm1, %v3720_v8  ;;  %v3161_v29 = vpop.f32.mrb[252].mxu1  ;;  %6927 = vtanh.f32 %v2605_v10 }
 0x523   :  { %v6918_v12 = vpop.eup %6917  ;;  %v3162_v4 = vadd.f32 %v9578_v32, %v3161_v29  ;;  %v5509_v15 = vpop.f32.mrb[253].mxu1  ;;  %5667 = vmatmul.mubr.f32.gmra.mrb[102].mxu1 %v6916_v50 }
 0x524   :  { %v3724_v40 = vpop.f32.mrb[144].mxu0  ;;  %5906 = vmatmul.mubr.f32.gmra.mrb[248].mxu0 %v6918_v12  ;;  %5669 = vmatprep.mubr.msk.f32.mxu1 %vm7087_vm0, %v10610_v9  ;;  %v6920_v63 = vpop.eup %6919 }
 0x525   :  { %v3725_v45 = vadd.f32 %v9677_v58, %v3724_v40  ;;  %v5751_v7 = vpop.f32.mrb[145].mxu0  ;;  %6929 = vtanh.f32 %v3162_v4  ;;  %5908 = vmatprep.mubr.msk.f32.mxu0 %vm7087_vm0, %v10610_v9 }
 0x526   :  { %v3166_v20 = vpop.f32.mrb[254].mxu1  ;;  %6931 = vtanh.f32 %v2610_v42 }
 0x527   :  { %4313 = vst.msk [vmem:[%s10585_s7 + $0x48] sm:$0xff] %vm4303_vm1, %v3725_v45  ;;  %v6922_v55 = vpop.eup %6921  ;;  %v3167_v41 = vadd.f32 %v9578_v32, %v3166_v20  ;;  %v5512_v48 = vpop.f32.mrb[255].mxu1  ;;  %5670 = vmatmul.mubr.f32.gmra.mrb[104].mxu1 %v6920_v63 }
 0x528   :  { %v3729_v21 = vpop.f32.mrb[146].mxu0  ;;  %5909 = vmatmul.mubr.f32.gmra.mrb[250].mxu0 %v6922_v55  ;;  %5672 = vmatprep.mubr.msk.f32.mxu1 %vm7087_vm0, %v10610_v9  ;;  %v6924_v16 = vpop.eup %6923 }
 0x529   :  { %v3730_v33 = vadd.f32 %v9677_v58, %v3729_v21  ;;  %v5754_v26 = vpop.f32.mrb[147].mxu0  ;;  %6933 = vtanh.f32 %v3167_v41  ;;  %5911 = vmatprep.mubr.msk.f32.mxu0 %vm7087_vm0, %v10610_v9 }
 0x52a   :  { %v3171_v22 = vpop.f32.mrb[0].mxu1  ;;  %6935 = vtanh.f32 %v2615_v37 }
 0x52b   :  { %4314 = vst.msk [vmem:[%s10585_s7 + $0x50] sm:$0xff] %vm4303_vm1, %v3730_v33  ;;  %v6926_v35 = vpop.eup %6925  ;;  %v3172_v1 = vadd.f32 %v9578_v32, %v3171_v22  ;;  %v5515_v27 = vpop.f32.mrb[1].mxu1  ;;  %5673 = vmatmul.mubr.f32.gmra.mrb[106].mxu1 %v6924_v16 }
 0x52c   :  { %v3734_v13 = vpop.f32.mrb[148].mxu0  ;;  %5912 = vmatmul.mubr.f32.gmra.mrb[252].mxu0 %v6926_v35  ;;  %5675 = vmatprep.mubr.msk.f32.mxu1 %vm7087_vm0, %v10610_v9  ;;  %v6928_v60 = vpop.eup %6927 }
 0x52d   :  { %v3735_v28 = vadd.f32 %v9677_v58, %v3734_v13  ;;  %v5757_v54 = vpop.f32.mrb[149].mxu0  ;;  %6937 = vtanh.f32 %v3172_v1  ;;  %5914 = vmatprep.mubr.msk.f32.mxu0 %vm7087_vm0, %v10610_v9 }
 0x52e   :  { %v3176_v17 = vpop.f32.mrb[2].mxu1  ;;  %6939 = vtanh.f32 %v2620_v38 }
 0x52f   :  { %4315 = vst.msk [vmem:[%s10585_s7 + $0x58] sm:$0xff] %vm4303_vm1, %v3735_v28  ;;  %v6930_v57 = vpop.eup %6929  ;;  %v3177_v14 = vadd.f32 %v9578_v32, %v3176_v17  ;;  %v5518_v6 = vpop.f32.mrb[3].mxu1  ;;  %5676 = vmatmul.mubr.f32.gmra.mrb[108].mxu1 %v6928_v60 }
 0x530   :  { %v3739_v61 = vpop.f32.mrb[150].mxu0  ;;  %5915 = vmatmul.mubr.f32.gmra.mrb[254].mxu0 %v6930_v57  ;;  %5678 = vmatprep.mubr.msk.f32.mxu1 %vm7087_vm0, %v10610_v9  ;;  %v6932_v47 = vpop.eup %6931 }
 0x531   :  { %v3740_v24 = vadd.f32 %v9677_v58, %v3739_v61  ;;  %v5760_v3 = vpop.f32.mrb[151].mxu0  ;;  %6941 = vtanh.f32 %v3177_v14  ;;  %5917 = vmatprep.mubr.msk.f32.mxu0 %vm7087_vm0, %v10610_v9 }
 0x532   :  { %v3181_v59 = vpop.f32.mrb[4].mxu1  ;;  %6943 = vtanh.f32 %v2625_v53 }
 0x533   :  { %4316 = vst.msk [vmem:[%s10585_s7 + $0x60] sm:$0xff] %vm4303_vm1, %v3740_v24  ;;  %v6934_v23 = vpop.eup %6933  ;;  %v3182_v49 = vadd.f32 %v9578_v32, %v3181_v59  ;;  %v5521_v0 = vpop.f32.mrb[5].mxu1  ;;  %5679 = vmatmul.mubr.f32.gmra.mrb[110].mxu1 %v6932_v47 }
 0x534   :  { %v3744_v43 = vpop.f32.mrb[152].mxu0  ;;  %5918 = vmatmul.mubr.f32.gmra.mrb[0].mxu0 %v6934_v23  ;;  %5681 = vmatprep.mubr.msk.f32.mxu1 %vm7087_vm0, %v10610_v9  ;;  %v6936_v39 = vpop.eup %6935 }
 0x535   :  { %v3745_v44 = vadd.f32 %v9677_v58, %v3744_v43  ;;  %v5763_v18 = vpop.f32.mrb[153].mxu0  ;;  %6945 = vtanh.f32 %v3182_v49  ;;  %5920 = vmatprep.mubr.msk.f32.mxu0 %vm7087_vm0, %v10610_v9 }
 0x536   :  { %v3186_v46 = vpop.f32.mrb[6].mxu1 }
 0x537   :  { %4317 = vst.msk [vmem:[%s10585_s7 + $0x68] sm:$0xff] %vm4303_vm1, %v3745_v44  ;;  %v6938_v36 = vpop.eup %6937  ;;  %v3187_v11 = vadd.f32 %v9578_v32, %v3186_v46  ;;  %v5524_v51 = vpop.f32.mrb[7].mxu1  ;;  %5682 = vmatmul.mubr.f32.gmra.mrb[112].mxu1 %v6936_v39 }
 0x538   :  { %v3749_v62 = vpop.f32.mrb[154].mxu0  ;;  %5921 = vmatmul.mubr.f32.gmra.mrb[2].mxu0 %v6938_v36  ;;  %5684 = vmatprep.mubr.msk.f32.mxu1 %vm7087_vm0, %v10610_v9  ;;  %v6940_v56 = vpop.eup %6939 }
 0x539   :  { %v3750_v31 = vadd.f32 %v9677_v58, %v3749_v62  ;;  %v5766_v19 = vpop.f32.mrb[155].mxu0  ;;  %6947 = vtanh.f32 %v3187_v11  ;;  %5923 = vmatprep.mubr.msk.f32.mxu0 %vm7087_vm0, %v10610_v9 }
 0x53a   :  { %v3191_v5 = vpop.f32.mrb[8].mxu1 }
 0x53b   :  { %4318 = vst.msk [vmem:[%s10585_s7 + $0x70] sm:$0xff] %vm4303_vm1, %v3750_v31  ;;  %v6942_v30 = vpop.eup %6941  ;;  %v3192_v34 = vadd.f32 %v9578_v32, %v3191_v5  ;;  %v5527_v25 = vpop.f32.mrb[9].mxu1  ;;  %5685 = vmatmul.mubr.f32.gmra.mrb[114].mxu1 %v6940_v56 }
 0x53c   :  { %v3754_v2 = vpop.f32.mrb[156].mxu0  ;;  %5924 = vmatmul.mubr.f32.gmra.mrb[4].mxu0 %v6942_v30  ;;  %5687 = vmatprep.mubr.msk.f32.mxu1 %vm7087_vm0, %v10610_v9  ;;  %v6944_v52 = vpop.eup %6943 }
 0x53d   :  { %v3755_v10 = vadd.f32 %v9677_v58, %v3754_v2  ;;  %v5769_v8 = vpop.f32.mrb[157].mxu0  ;;  %6949 = vtanh.f32 %v3192_v34  ;;  %5926 = vmatprep.mubr.msk.f32.mxu0 %vm7087_vm0, %v10610_v9 }
 0x53e   :  { %v3196_v50 = vpop.f32.mrb[10].mxu1 }
 0x53f   :  { %4319 = vst.msk [vmem:[%s10585_s7 + $0x78] sm:$0xff] %vm4303_vm1, %v3755_v10  ;;  %v6946_v29 = vpop.eup %6945  ;;  %v3197_v12 = vadd.f32 %v9578_v32, %v3196_v50  ;;  %v5530_v4 = vpop.f32.mrb[11].mxu1  ;;  %5688 = vmatmul.mubr.f32.gmra.mrb[116].mxu1 %v6944_v52 }
 0x540   :  { %v3759_v15 = vpop.f32.mrb[158].mxu0  ;;  %5927 = vmatmul.mubr.f32.gmra.mrb[6].mxu0 %v6946_v29 }
 0x541   :  { %v3760_v40 = vadd.f32 %v9677_v58, %v3759_v15  ;;  %v5772_v42 = vpop.f32.mrb[159].mxu0  ;;  %6951 = vtanh.f32 %v3197_v12  ;;  %5929 = vmatprep.mubr.msk.f32.mxu0 %vm7087_vm0, %v10610_v9 }
 0x542   :  { %v3201_v45 = vpop.f32.mrb[12].mxu1 }
 0x543   :  { %4320 = vst.msk [vmem:[%s10585_s7 + $0x80] sm:$0xff] %vm4303_vm1, %v3760_v40  ;;  %v6948_v7 = vpop.eup %6947  ;;  %v3202_v63 = vadd.f32 %v9578_v32, %v3201_v45  ;;  %v5533_v20 = vpop.f32.mrb[13].mxu1 }
 0x544   :  { %v3764_v55 = vpop.f32.mrb[160].mxu0  ;;  %5930 = vmatmul.mubr.f32.gmra.mrb[8].mxu0 %v6948_v7 }
 0x545   :  { %v3765_v41 = vadd.f32 %v9677_v58, %v3764_v55  ;;  %v5775_v48 = vpop.f32.mrb[161].mxu0  ;;  %6953 = vtanh.f32 %v3202_v63  ;;  %5932 = vmatprep.mubr.msk.f32.mxu0 %vm7087_vm0, %v10610_v9 }
 0x546   :  { %v3206_v21 = vpop.f32.mrb[14].mxu1 }
 0x547   :  { %4321 = vst.msk [vmem:[%s10585_s7 + $0x88] sm:$0xff] %vm4303_vm1, %v3765_v41  ;;  %v6950_v37 = vpop.eup %6949  ;;  %v3207_v33 = vadd.f32 %v9578_v32, %v3206_v21  ;;  %v5536_v26 = vpop.f32.mrb[15].mxu1 }
 0x548   :  { %v3769_v16 = vpop.f32.mrb[162].mxu0  ;;  %5933 = vmatmul.mubr.f32.gmra.mrb[10].mxu0 %v6950_v37 }
 0x549   :  { %v3770_v22 = vadd.f32 %v9677_v58, %v3769_v16  ;;  %v5778_v35 = vpop.f32.mrb[163].mxu0  ;;  %6955 = vtanh.f32 %v3207_v33  ;;  %5935 = vmatprep.mubr.msk.f32.mxu0 %vm7087_vm0, %v10610_v9 }
 0x54a   :  { %v3211_v1 = vpop.f32.mrb[16].mxu1 }
 0x54b   :  { %4322 = vst.msk [vmem:[%s10585_s7 + $0x90] sm:$0xff] %vm4303_vm1, %v3770_v22  ;;  %v6952_v27 = vpop.eup %6951  ;;  %v3212_v13 = vadd.f32 %v9578_v32, %v3211_v1  ;;  %v5539_v38 = vpop.f32.mrb[17].mxu1 }
 0x54c   :  { %v3774_v28 = vpop.f32.mrb[164].mxu0  ;;  %5936 = vmatmul.mubr.f32.gmra.mrb[12].mxu0 %v6952_v27 }
 0x54d   :  { %v3775_v54 = vadd.f32 %v9677_v58, %v3774_v28  ;;  %v5781_v60 = vpop.f32.mrb[165].mxu0  ;;  %6957 = vtanh.f32 %v3212_v13  ;;  %5938 = vmatprep.mubr.msk.f32.mxu0 %vm7087_vm0, %v10610_v9 }
 0x54e   :  { %v3216_v17 = vpop.f32.mrb[18].mxu1 }
 0x54f   :  { %4323 = vst.msk [vmem:[%s10585_s7 + $0x98] sm:$0xff] %vm4303_vm1, %v3775_v54  ;;  %v6954_v57 = vpop.eup %6953  ;;  %v3217_v14 = vadd.f32 %v9578_v32, %v3216_v17  ;;  %v5542_v6 = vpop.f32.mrb[19].mxu1 }
 0x550   :  { %v3779_v61 = vpop.f32.mrb[166].mxu0  ;;  %5939 = vmatmul.mubr.f32.gmra.mrb[14].mxu0 %v6954_v57 }
 0x551   :  { %v3780_v53 = vadd.f32 %v9677_v58, %v3779_v61  ;;  %v5784_v24 = vpop.f32.mrb[167].mxu0  ;;  %6959 = vtanh.f32 %v3217_v14  ;;  %5941 = vmatprep.mubr.msk.f32.mxu0 %vm7087_vm0, %v10610_v9 }
 0x552   :  { %v3221_v3 = vpop.f32.mrb[20].mxu1 }
 0x553   :  { %4324 = vst.msk [vmem:[%s10585_s7 + $0xa0] sm:$0xff] %vm4303_vm1, %v3780_v53  ;;  %v6956_v47 = vpop.eup %6955  ;;  %v3222_v59 = vadd.f32 %v9578_v32, %v3221_v3  ;;  %v5545_v23 = vpop.f32.mrb[21].mxu1 }
 0x554   :  { %v3784_v49 = vpop.f32.mrb[168].mxu0  ;;  %5942 = vmatmul.mubr.f32.gmra.mrb[16].mxu0 %v6956_v47 }
 0x555   :  { %v3785_v0 = vadd.f32 %v9677_v58, %v3784_v49  ;;  %v5787_v43 = vpop.f32.mrb[169].mxu0  ;;  %6961 = vtanh.f32 %v3222_v59  ;;  %5944 = vmatprep.mubr.msk.f32.mxu0 %vm7087_vm0, %v10610_v9 }
 0x556   :  { %v3226_v44 = vpop.f32.mrb[22].mxu1 }
 0x557   :  { %4325 = vst.msk [vmem:[%s10585_s7 + $0xa8] sm:$0xff] %vm4303_vm1, %v3785_v0  ;;  %v6958_v18 = vpop.eup %6957  ;;  %v3227_v39 = vadd.f32 %v9578_v32, %v3226_v44  ;;  %v5548_v46 = vpop.f32.mrb[23].mxu1 }
 0x558   :  { %v3789_v36 = vpop.f32.mrb[170].mxu0  ;;  %5945 = vmatmul.mubr.f32.gmra.mrb[18].mxu0 %v6958_v18 }
 0x559   :  { %v3790_v11 = vadd.f32 %v9677_v58, %v3789_v36  ;;  %v5790_v51 = vpop.f32.mrb[171].mxu0  ;;  %6963 = vtanh.f32 %v3227_v39  ;;  %5947 = vmatprep.mubr.msk.f32.mxu0 %vm7087_vm0, %v10610_v9 }
 0x55a   :  { %v3231_v62 = vpop.f32.mrb[24].mxu1 }
 0x55b   :  { %4326 = vst.msk [vmem:[%s10585_s7 + $0xb0] sm:$0xff] %vm4303_vm1, %v3790_v11  ;;  %v6960_v31 = vpop.eup %6959  ;;  %v3232_v19 = vadd.f32 %v9578_v32, %v3231_v62  ;;  %v5551_v56 = vpop.f32.mrb[25].mxu1 }
 0x55c   :  { %v3794_v5 = vpop.f32.mrb[172].mxu0  ;;  %5948 = vmatmul.mubr.f32.gmra.mrb[20].mxu0 %v6960_v31 }
 0x55d   :  { %v3795_v30 = vadd.f32 %v9677_v58, %v3794_v5  ;;  %v5793_v34 = vpop.f32.mrb[173].mxu0  ;;  %6965 = vtanh.f32 %v3232_v19  ;;  %5950 = vmatprep.mubr.msk.f32.mxu0 %vm7087_vm0, %v10610_v9 }
 0x55e   :  { %v3236_v25 = vpop.f32.mrb[26].mxu1 }
 0x55f   :  { %4327 = vst.msk [vmem:[%s10585_s7 + $0xb8] sm:$0xff] %vm4303_vm1, %v3795_v30  ;;  %v6962_v2 = vpop.eup %6961  ;;  %v3237_v10 = vadd.f32 %v9578_v32, %v3236_v25  ;;  %v5554_v8 = vpop.f32.mrb[27].mxu1 }
 0x560   :  { %v3799_v52 = vpop.f32.mrb[174].mxu0  ;;  %5951 = vmatmul.mubr.f32.gmra.mrb[22].mxu0 %v6962_v2 }
 0x561   :  { %v3800_v50 = vadd.f32 %v9677_v58, %v3799_v52  ;;  %v5796_v29 = vpop.f32.mrb[175].mxu0  ;;  %6967 = vtanh.f32 %v3237_v10  ;;  %5953 = vmatprep.mubr.msk.f32.mxu0 %vm7087_vm0, %v10610_v9 }
 0x562   :  { %v3241_v12 = vpop.f32.mrb[28].mxu1 }
 0x563   :  { %4328 = vst.msk [vmem:[%s10585_s7 + $0xc0] sm:$0xff] %vm4303_vm1, %v3800_v50  ;;  %v6964_v4 = vpop.eup %6963  ;;  %v3242_v15 = vadd.f32 %v9578_v32, %v3241_v12  ;;  %v5557_v40 = vpop.f32.mrb[29].mxu1  ;;  %v9947_v32 = vld [vmem:[%s10583_s4 + $0x1] ss:$0 sm:$0xff] }
 0x564   :  { %v3804_v42 = vpop.f32.mrb[176].mxu0  ;;  %5954 = vmatmul.mubr.f32.gmra.mrb[24].mxu0 %v6964_v4 }
 0x565   :  { %v3805_v45 = vadd.f32 %v9677_v58, %v3804_v42  ;;  %v5799_v7 = vpop.f32.mrb[177].mxu0  ;;  %6969 = vtanh.f32 %v3242_v15  ;;  %5956 = vmatprep.mubr.msk.f32.mxu0 %vm7087_vm0, %v10610_v9 }
 0x566   :  { %v3246_v63 = vpop.f32.mrb[30].mxu1 }
 0x567   :  { %4329 = vst.msk [vmem:[%s10585_s7 + $0xc8] sm:$0xff] %vm4303_vm1, %v3805_v45  ;;  %v6966_v20 = vpop.eup %6965  ;;  %v3247_v55 = vadd.f32 %v9947_v32, %v3246_v63  ;;  %v5560_v41 = vpop.f32.mrb[31].mxu1 }
 0x568   :  { %v3809_v48 = vpop.f32.mrb[178].mxu0  ;;  %5957 = vmatmul.mubr.f32.gmra.mrb[26].mxu0 %v6966_v20 }
 0x569   :  { %v3810_v21 = vadd.f32 %v9677_v58, %v3809_v48  ;;  %v5802_v37 = vpop.f32.mrb[179].mxu0  ;;  %6971 = vtanh.f32 %v3247_v55  ;;  %5959 = vmatprep.mubr.msk.f32.mxu0 %vm7087_vm0, %v10610_v9 }
 0x56a   :  { %v3251_v33 = vpop.f32.mrb[32].mxu1 }
 0x56b   :  { %4330 = vst.msk [vmem:[%s10585_s7 + $0xd0] sm:$0xff] %vm4303_vm1, %v3810_v21  ;;  %v6968_v26 = vpop.eup %6967  ;;  %v3252_v16 = vadd.f32 %v9947_v32, %v3251_v33  ;;  %v5563_v22 = vpop.f32.mrb[33].mxu1 }
 0x56c   :  { %v3814_v35 = vpop.f32.mrb[180].mxu0  ;;  %5960 = vmatmul.mubr.f32.gmra.mrb[28].mxu0 %v6968_v26 }
 0x56d   :  { %v3815_v1 = vadd.f32 %v9677_v58, %v3814_v35  ;;  %v5805_v27 = vpop.f32.mrb[181].mxu0  ;;  %6973 = vtanh.f32 %v3252_v16  ;;  %5962 = vmatprep.mubr.msk.f32.mxu0 %vm7087_vm0, %v10610_v9 }
 0x56e   :  { %v3256_v13 = vpop.f32.mrb[34].mxu1 }
 0x56f   :  { %4331 = vst.msk [vmem:[%s10585_s7 + $0xd8] sm:$0xff] %vm4303_vm1, %v3815_v1  ;;  %v6970_v38 = vpop.eup %6969  ;;  %v3257_v28 = vadd.f32 %v9947_v32, %v3256_v13  ;;  %v5566_v54 = vpop.f32.mrb[35].mxu1 }
 0x570   :  { %v3819_v60 = vpop.f32.mrb[182].mxu0  ;;  %5963 = vmatmul.mubr.f32.gmra.mrb[30].mxu0 %v6970_v38 }
 0x571   :  { %v3820_v17 = vadd.f32 %v9677_v58, %v3819_v60  ;;  %v5808_v57 = vpop.f32.mrb[183].mxu0  ;;  %6975 = vtanh.f32 %v3257_v28  ;;  %5965 = vmatprep.mubr.msk.f32.mxu0 %vm7087_vm0, %v10610_v9 }
 0x572   :  { %v3261_v14 = vpop.f32.mrb[36].mxu1 }
 0x573   :  { %4332 = vst.msk [vmem:[%s10585_s7 + $0xe0] sm:$0xff] %vm4303_vm1, %v3820_v17  ;;  %v6972_v6 = vpop.eup %6971  ;;  %v3262_v61 = vadd.f32 %v9947_v32, %v3261_v14  ;;  %v5569_v53 = vpop.f32.mrb[37].mxu1 }
 0x574   :  { %v3824_v24 = vpop.f32.mrb[184].mxu0  ;;  %5966 = vmatmul.mubr.f32.gmra.mrb[32].mxu0 %v6972_v6 }
 0x575   :  { %v3825_v3 = vadd.f32 %v9677_v58, %v3824_v24  ;;  %v5811_v47 = vpop.f32.mrb[185].mxu0  ;;  %6977 = vtanh.f32 %v3262_v61  ;;  %5968 = vmatprep.mubr.msk.f32.mxu0 %vm7087_vm0, %v10610_v9 }
 0x576   :  { %v3266_v59 = vpop.f32.mrb[38].mxu1 }
 0x577   :  { %4333 = vst.msk [vmem:[%s10585_s7 + $0xe8] sm:$0xff] %vm4303_vm1, %v3825_v3  ;;  %v6974_v23 = vpop.eup %6973  ;;  %v3267_v49 = vadd.f32 %v9947_v32, %v3266_v59  ;;  %v5572_v0 = vpop.f32.mrb[39].mxu1 }
 0x578   :  { %v3829_v43 = vpop.f32.mrb[186].mxu0  ;;  %5969 = vmatmul.mubr.f32.gmra.mrb[34].mxu0 %v6974_v23 }
 0x579   :  { %v3830_v44 = vadd.f32 %v9677_v58, %v3829_v43  ;;  %v5814_v18 = vpop.f32.mrb[187].mxu0  ;;  %6979 = vtanh.f32 %v3267_v49  ;;  %5971 = vmatprep.mubr.msk.f32.mxu0 %vm7087_vm0, %v10610_v9 }
 0x57a   :  { %v3271_v39 = vpop.f32.mrb[40].mxu1 }
 0x57b   :  { %4334 = vst.msk [vmem:[%s10585_s7 + $0xf0] sm:$0xff] %vm4303_vm1, %v3830_v44  ;;  %v6976_v46 = vpop.eup %6975  ;;  %v3272_v36 = vadd.f32 %v9947_v32, %v3271_v39  ;;  %v5575_v11 = vpop.f32.mrb[41].mxu1 }
 0x57c   :  { %v3834_v51 = vpop.f32.mrb[188].mxu0  ;;  %5972 = vmatmul.mubr.f32.gmra.mrb[36].mxu0 %v6976_v46 }
 0x57d   :  { %v3835_v62 = vadd.f32 %v9677_v58, %v3834_v51  ;;  %v5817_v31 = vpop.f32.mrb[189].mxu0  ;;  %6981 = vtanh.f32 %v3272_v36  ;;  %5974 = vmatprep.mubr.msk.f32.mxu0 %vm7087_vm0, %v10610_v9 }
 0x57e   :  { %v3276_v19 = vpop.f32.mrb[42].mxu1 }
 0x57f   :  { %4335 = vst.msk [vmem:[%s10585_s7 + $0xf8] sm:$0xff] %vm4303_vm1, %v3835_v62  ;;  %v6978_v56 = vpop.eup %6977  ;;  %v3277_v5 = vadd.f32 %v9947_v32, %v3276_v19  ;;  %v5578_v30 = vpop.f32.mrb[43].mxu1 }
 0x580   :  { %v3839_v34 = vpop.f32.mrb[190].mxu0  ;;  %5975 = vmatmul.mubr.f32.gmra.mrb[38].mxu0 %v6978_v56 }
 0x581   :  { %v3840_v25 = vadd.f32 %v9677_v58, %v3839_v34  ;;  %v5820_v2 = vpop.f32.mrb[191].mxu0  ;;  %6983 = vtanh.f32 %v3277_v5  ;;  %5977 = vmatprep.mubr.msk.f32.mxu0 %vm7087_vm0, %v10610_v9 }
 0x582   :  { %v3281_v10 = vpop.f32.mrb[44].mxu1 }
 0x583   :  { %4336 = vst.msk [vmem:[%s10585_s7 + $0x100] sm:$0xff] %vm4303_vm1, %v3840_v25  ;;  %v6980_v8 = vpop.eup %6979  ;;  %v3282_v52 = vadd.f32 %v9947_v32, %v3281_v10  ;;  %v5581_v50 = vpop.f32.mrb[45].mxu1 }
 0x584   :  { %v3844_v29 = vpop.f32.mrb[192].mxu0  ;;  %5978 = vmatmul.mubr.f32.gmra.mrb[40].mxu0 %v6980_v8 }
 0x585   :  { %v3845_v12 = vadd.f32 %v9677_v58, %v3844_v29  ;;  %v5823_v4 = vpop.f32.mrb[193].mxu0  ;;  %6985 = vtanh.f32 %v3282_v52  ;;  %5980 = vmatprep.mubr.msk.f32.mxu0 %vm7087_vm0, %v10610_v9 }
 0x586   :  { %v3286_v15 = vpop.f32.mrb[46].mxu1 }
 0x587   :  { %4337 = vst.msk [vmem:[%s10585_s7 + $0x108] sm:$0xff] %vm4303_vm1, %v3845_v12  ;;  %v6982_v40 = vpop.eup %6981  ;;  %v3287_v42 = vadd.f32 %v9947_v32, %v3286_v15  ;;  %v5584_v45 = vpop.f32.mrb[47].mxu1 }
 0x588   :  { %v3849_v7 = vpop.f32.mrb[194].mxu0  ;;  %5981 = vmatmul.mubr.f32.gmra.mrb[42].mxu0 %v6982_v40 }
 0x589   :  { %v3850_v63 = vadd.f32 %v9677_v58, %v3849_v7  ;;  %v5826_v20 = vpop.f32.mrb[195].mxu0  ;;  %6987 = vtanh.f32 %v3287_v42  ;;  %5983 = vmatprep.mubr.msk.f32.mxu0 %vm7087_vm0, %v10610_v9 }
 0x58a   :  { %v3291_v55 = vpop.f32.mrb[48].mxu1 }
 0x58b   :  { %4338 = vst.msk [vmem:[%s10585_s7 + $0x110] sm:$0xff] %vm4303_vm1, %v3850_v63  ;;  %v6984_v41 = vpop.eup %6983  ;;  %v3292_v48 = vadd.f32 %v9947_v32, %v3291_v55  ;;  %v5587_v21 = vpop.f32.mrb[49].mxu1 }
 0x58c   :  { %v3854_v37 = vpop.f32.mrb[196].mxu0  ;;  %5984 = vmatmul.mubr.f32.gmra.mrb[44].mxu0 %v6984_v41 }
 0x58d   :  { %v3855_v33 = vadd.f32 %v9677_v58, %v3854_v37  ;;  %v5829_v26 = vpop.f32.mrb[197].mxu0  ;;  %6989 = vtanh.f32 %v3292_v48  ;;  %5986 = vmatprep.mubr.msk.f32.mxu0 %vm7087_vm0, %v10610_v9 }
 0x58e   :  { %v3296_v16 = vpop.f32.mrb[50].mxu1 }
 0x58f   :  { %4339 = vst.msk [vmem:[%s10585_s7 + $0x118] sm:$0xff] %vm4303_vm1, %v3855_v33  ;;  %v6986_v22 = vpop.eup %6985  ;;  %v3297_v35 = vadd.f32 %v9947_v32, %v3296_v16  ;;  %v5590_v1 = vpop.f32.mrb[51].mxu1 }
 0x590   :  { %v3859_v27 = vpop.f32.mrb[198].mxu0  ;;  %5987 = vmatmul.mubr.f32.gmra.mrb[46].mxu0 %v6986_v22 }
 0x591   :  { %v3860_v13 = vadd.f32 %v9677_v58, %v3859_v27  ;;  %v5832_v38 = vpop.f32.mrb[199].mxu0  ;;  %6991 = vtanh.f32 %v3297_v35  ;;  %5989 = vmatprep.mubr.msk.f32.mxu0 %vm7087_vm0, %v10610_v9 }
 0x592   :  { %v3301_v28 = vpop.f32.mrb[52].mxu1 }
 0x593   :  { %4340 = vst.msk [vmem:[%s10585_s7 + $0x120] sm:$0xff] %vm4303_vm1, %v3860_v13  ;;  %v6988_v54 = vpop.eup %6987  ;;  %v3302_v60 = vadd.f32 %v9947_v32, %v3301_v28  ;;  %v5593_v17 = vpop.f32.mrb[53].mxu1 }
 0x594   :  { %v3864_v57 = vpop.f32.mrb[200].mxu0  ;;  %5990 = vmatmul.mubr.f32.gmra.mrb[48].mxu0 %v6988_v54 }
 0x595   :  { %v3865_v14 = vadd.f32 %v9677_v58, %v3864_v57  ;;  %v5835_v6 = vpop.f32.mrb[201].mxu0  ;;  %6993 = vtanh.f32 %v3302_v60  ;;  %5992 = vmatprep.mubr.msk.f32.mxu0 %vm7087_vm0, %v10610_v9 }
 0x596   :  { %v3306_v61 = vpop.f32.mrb[54].mxu1 }
 0x597   :  { %4341 = vst.msk [vmem:[%s10585_s7 + $0x128] sm:$0xff] %vm4303_vm1, %v3865_v14  ;;  %v6990_v53 = vpop.eup %6989  ;;  %v3307_v24 = vadd.f32 %v9947_v32, %v3306_v61  ;;  %v5596_v3 = vpop.f32.mrb[55].mxu1 }
 0x598   :  { %v3869_v47 = vpop.f32.mrb[202].mxu0  ;;  %5993 = vmatmul.mubr.f32.gmra.mrb[50].mxu0 %v6990_v53 }
 0x599   :  { %v3870_v59 = vadd.f32 %v9677_v58, %v3869_v47  ;;  %v5838_v23 = vpop.f32.mrb[203].mxu0  ;;  %6995 = vtanh.f32 %v3307_v24  ;;  %5995 = vmatprep.mubr.msk.f32.mxu0 %vm7087_vm0, %v10610_v9 }
 0x59a   :  { %v3311_v49 = vpop.f32.mrb[56].mxu1 }
 0x59b   :  { %4342 = vst.msk [vmem:[%s10585_s7 + $0x130] sm:$0xff] %vm4303_vm1, %v3870_v59  ;;  %v6992_v0 = vpop.eup %6991  ;;  %v3312_v43 = vadd.f32 %v9947_v32, %v3311_v49  ;;  %v5599_v44 = vpop.f32.mrb[57].mxu1 }
 0x59c   :  { %v3874_v18 = vpop.f32.mrb[204].mxu0  ;;  %5996 = vmatmul.mubr.f32.gmra.mrb[52].mxu0 %v6992_v0 }
 0x59d   :  { %v3875_v39 = vadd.f32 %v9677_v58, %v3874_v18  ;;  %v5841_v46 = vpop.f32.mrb[205].mxu0  ;;  %6997 = vtanh.f32 %v3312_v43  ;;  %5998 = vmatprep.mubr.msk.f32.mxu0 %vm7087_vm0, %v10610_v9  ;;  %v10065_v58 = vld [vmem:[%s10584_s6] ss:$0 sm:$0xff] }
 0x59e   :  { %v3316_v36 = vpop.f32.mrb[58].mxu1 }
 0x59f   :  { %4343 = vst.msk [vmem:[%s10585_s7 + $0x138] sm:$0xff] %vm4303_vm1, %v3875_v39  ;;  %v6994_v11 = vpop.eup %6993  ;;  %v3317_v51 = vadd.f32 %v9947_v32, %v3316_v36  ;;  %v5602_v62 = vpop.f32.mrb[59].mxu1 }
 0x5a0   :  { %v3879_v31 = vpop.f32.mrb[206].mxu0  ;;  %5999 = vmatmul.mubr.f32.gmra.mrb[54].mxu0 %v6994_v11 }
 0x5a1   :  { %v3880_v19 = vadd.f32 %v10065_v58, %v3879_v31  ;;  %v5844_v56 = vpop.f32.mrb[207].mxu0  ;;  %6999 = vtanh.f32 %v3317_v51  ;;  %6001 = vmatprep.mubr.msk.f32.mxu0 %vm7087_vm0, %v10610_v9 }
 0x5a2   :  { %v3321_v5 = vpop.f32.mrb[60].mxu1 }
 0x5a3   :  { %4344 = vst.msk [vmem:[%s10585_s7 + $0x140] sm:$0xff] %vm4303_vm1, %v3880_v19  ;;  %v6996_v30 = vpop.eup %6995  ;;  %v3322_v34 = vadd.f32 %v9947_v32, %v3321_v5  ;;  %v5605_v25 = vpop.f32.mrb[61].mxu1 }
 0x5a4   :  { %v3884_v2 = vpop.f32.mrb[208].mxu0  ;;  %6002 = vmatmul.mubr.f32.gmra.mrb[56].mxu0 %v6996_v30 }
 0x5a5   :  { %v3885_v10 = vadd.f32 %v10065_v58, %v3884_v2  ;;  %v5847_v8 = vpop.f32.mrb[209].mxu0  ;;  %7001 = vtanh.f32 %v3322_v34  ;;  %6004 = vmatprep.mubr.msk.f32.mxu0 %vm7087_vm0, %v10610_v9 }
 0x5a6   :  { %v3326_v52 = vpop.f32.mrb[62].mxu1 }
 0x5a7   :  { %4345 = vst.msk [vmem:[%s10585_s7 + $0x148] sm:$0xff] %vm4303_vm1, %v3885_v10  ;;  %v6998_v50 = vpop.eup %6997  ;;  %v3327_v29 = vadd.f32 %v9947_v32, %v3326_v52  ;;  %v5608_v12 = vpop.f32.mrb[63].mxu1 }
 0x5a8   :  { %v3889_v4 = vpop.f32.mrb[210].mxu0  ;;  %6005 = vmatmul.mubr.f32.gmra.mrb[58].mxu0 %v6998_v50 }
 0x5a9   :  { %v3890_v15 = vadd.f32 %v10065_v58, %v3889_v4  ;;  %v5850_v40 = vpop.f32.mrb[211].mxu0  ;;  %7003 = vtanh.f32 %v3327_v29  ;;  %6007 = vmatprep.mubr.msk.f32.mxu0 %vm7087_vm0, %v10610_v9 }
 0x5aa   :  { %v3331_v42 = vpop.f32.mrb[64].mxu1 }
 0x5ab   :  { %4346 = vst.msk [vmem:[%s10585_s7 + $0x150] sm:$0xff] %vm4303_vm1, %v3890_v15  ;;  %v7000_v45 = vpop.eup %6999  ;;  %v3332_v7 = vadd.f32 %v9947_v32, %v3331_v42  ;;  %v5611_v63 = vpop.f32.mrb[65].mxu1 }
 0x5ac   :  { %v3894_v20 = vpop.f32.mrb[212].mxu0  ;;  %6008 = vmatmul.mubr.f32.gmra.mrb[60].mxu0 %v7000_v45 }
 0x5ad   :  { %v3895_v55 = vadd.f32 %v10065_v58, %v3894_v20  ;;  %v5853_v41 = vpop.f32.mrb[213].mxu0  ;;  %7005 = vtanh.f32 %v3332_v7  ;;  %6010 = vmatprep.mubr.msk.f32.mxu0 %vm7087_vm0, %v10610_v9 }
 0x5ae   :  { %v3336_v48 = vpop.f32.mrb[66].mxu1 }
 0x5af   :  { %4347 = vst.msk [vmem:[%s10585_s7 + $0x158] sm:$0xff] %vm4303_vm1, %v3895_v55  ;;  %v7002_v21 = vpop.eup %7001  ;;  %v3337_v37 = vadd.f32 %v9947_v32, %v3336_v48  ;;  %v5614_v33 = vpop.f32.mrb[67].mxu1 }
 0x5b0   :  { %v3899_v26 = vpop.f32.mrb[214].mxu0  ;;  %6011 = vmatmul.mubr.f32.gmra.mrb[62].mxu0 %v7002_v21 }
 0x5b1   :  { %v3900_v16 = vadd.f32 %v10065_v58, %v3899_v26  ;;  %v5856_v22 = vpop.f32.mrb[215].mxu0  ;;  %7007 = vtanh.f32 %v3337_v37  ;;  %6013 = vmatprep.mubr.msk.f32.mxu0 %vm7087_vm0, %v10610_v9 }
 0x5b2   :  { %v3341_v35 = vpop.f32.mrb[68].mxu1 }
 0x5b3   :  { %4348 = vst.msk [vmem:[%s10585_s7 + $0x160] sm:$0xff] %vm4303_vm1, %v3900_v16  ;;  %v7004_v1 = vpop.eup %7003  ;;  %v3342_v27 = vadd.f32 %v9947_v32, %v3341_v35  ;;  %v5617_v13 = vpop.f32.mrb[69].mxu1 }
 0x5b4   :  { %v3904_v38 = vpop.f32.mrb[216].mxu0  ;;  %6014 = vmatmul.mubr.f32.gmra.mrb[64].mxu0 %v7004_v1 }
 0x5b5   :  { %v3905_v28 = vadd.f32 %v10065_v58, %v3904_v38  ;;  %v5859_v54 = vpop.f32.mrb[217].mxu0  ;;  %7009 = vtanh.f32 %v3342_v27  ;;  %6016 = vmatprep.mubr.msk.f32.mxu0 %vm7087_vm0, %v10610_v9 }
 0x5b6   :  { %v3346_v60 = vpop.f32.mrb[70].mxu1 }
 0x5b7   :  { %4349 = vst.msk [vmem:[%s10585_s7 + $0x168] sm:$0xff] %vm4303_vm1, %v3905_v28  ;;  %v7006_v17 = vpop.eup %7005  ;;  %v3347_v57 = vadd.f32 %v9947_v32, %v3346_v60  ;;  %v5620_v14 = vpop.f32.mrb[71].mxu1 }
 0x5b8   :  { %v3909_v6 = vpop.f32.mrb[218].mxu0  ;;  %6017 = vmatmul.mubr.f32.gmra.mrb[66].mxu0 %v7006_v17 }
 0x5b9   :  { %v3910_v61 = vadd.f32 %v10065_v58, %v3909_v6  ;;  %v5862_v53 = vpop.f32.mrb[219].mxu0  ;;  %7011 = vtanh.f32 %v3347_v57  ;;  %6019 = vmatprep.mubr.msk.f32.mxu0 %vm7087_vm0, %v10610_v9 }
 0x5ba   :  { %v3351_v24 = vpop.f32.mrb[72].mxu1 }
 0x5bb   :  { %4350 = vst.msk [vmem:[%s10585_s7 + $0x170] sm:$0xff] %vm4303_vm1, %v3910_v61  ;;  %v7008_v3 = vpop.eup %7007  ;;  %v3352_v47 = vadd.f32 %v9947_v32, %v3351_v24  ;;  %v5623_v59 = vpop.f32.mrb[73].mxu1 }
 0x5bc   :  { %v3914_v23 = vpop.f32.mrb[220].mxu0  ;;  %6020 = vmatmul.mubr.f32.gmra.mrb[68].mxu0 %v7008_v3 }
 0x5bd   :  { %v3915_v49 = vadd.f32 %v10065_v58, %v3914_v23  ;;  %v5865_v0 = vpop.f32.mrb[221].mxu0  ;;  %7013 = vtanh.f32 %v3352_v47  ;;  %6022 = vmatprep.mubr.msk.f32.mxu0 %vm7087_vm0, %v10610_v9 }
 0x5be   :  { %v3356_v43 = vpop.f32.mrb[74].mxu1 }
 0x5bf   :  { %4351 = vst.msk [vmem:[%s10585_s7 + $0x178] sm:$0xff] %vm4303_vm1, %v3915_v49  ;;  %v7010_v44 = vpop.eup %7009  ;;  %v3357_v18 = vadd.f32 %v9947_v32, %v3356_v43  ;;  %v5626_v39 = vpop.f32.mrb[75].mxu1 }
 0x5c0   :  { %v3919_v46 = vpop.f32.mrb[222].mxu0  ;;  %6023 = vmatmul.mubr.f32.gmra.mrb[70].mxu0 %v7010_v44 }
 0x5c1   :  { %v3920_v36 = vadd.f32 %v10065_v58, %v3919_v46  ;;  %v5868_v11 = vpop.f32.mrb[223].mxu0  ;;  %7015 = vtanh.f32 %v3357_v18  ;;  %6025 = vmatprep.mubr.msk.f32.mxu0 %vm7087_vm0, %v10610_v9 }
 0x5c2   :  { %v3361_v51 = vpop.f32.mrb[76].mxu1 }
 0x5c3   :  { %4352 = vst.msk [vmem:[%s10585_s7 + $0x180] sm:$0xff] %vm4303_vm1, %v3920_v36  ;;  %v7012_v62 = vpop.eup %7011  ;;  %v3362_v31 = vadd.f32 %v9947_v32, %v3361_v51  ;;  %v5629_v19 = vpop.f32.mrb[77].mxu1 }
 0x5c4   :  { %v3924_v56 = vpop.f32.mrb[224].mxu0  ;;  %6026 = vmatmul.mubr.f32.gmra.mrb[72].mxu0 %v7012_v62 }
 0x5c5   :  { %v3925_v5 = vadd.f32 %v10065_v58, %v3924_v56  ;;  %v5871_v30 = vpop.f32.mrb[225].mxu0  ;;  %7017 = vtanh.f32 %v3362_v31  ;;  %6028 = vmatprep.mubr.msk.f32.mxu0 %vm7087_vm0, %v10610_v9 }
 0x5c6   :  { %v3366_v34 = vpop.f32.mrb[78].mxu1 }
 0x5c7   :  { %4353 = vst.msk [vmem:[%s10585_s7 + $0x188] sm:$0xff] %vm4303_vm1, %v3925_v5  ;;  %v7014_v25 = vpop.eup %7013  ;;  %v3367_v2 = vadd.f32 %v9947_v32, %v3366_v34  ;;  %v5632_v10 = vpop.f32.mrb[79].mxu1 }
 0x5c8   :  { %v3929_v8 = vpop.f32.mrb[226].mxu0  ;;  %6029 = vmatmul.mubr.f32.gmra.mrb[74].mxu0 %v7014_v25 }
 0x5c9   :  { %v3930_v52 = vadd.f32 %v10065_v58, %v3929_v8  ;;  %v5874_v50 = vpop.f32.mrb[227].mxu0  ;;  %7019 = vtanh.f32 %v3367_v2  ;;  %6031 = vmatprep.mubr.msk.f32.mxu0 %vm7087_vm0, %v10610_v9 }
 0x5ca   :  { %v3371_v29 = vpop.f32.mrb[80].mxu1 }
 0x5cb   :  { %4354 = vst.msk [vmem:[%s10585_s7 + $0x190] sm:$0xff] %vm4303_vm1, %v3930_v52  ;;  %v7016_v12 = vpop.eup %7015  ;;  %v3372_v4 = vadd.f32 %v9947_v32, %v3371_v29  ;;  %v5635_v15 = vpop.f32.mrb[81].mxu1 }
 0x5cc   :  { %v3934_v40 = vpop.f32.mrb[228].mxu0  ;;  %6032 = vmatmul.mubr.f32.gmra.mrb[76].mxu0 %v7016_v12 }
 0x5cd   :  { %v3935_v42 = vadd.f32 %v10065_v58, %v3934_v40  ;;  %v5877_v45 = vpop.f32.mrb[229].mxu0  ;;  %7021 = vtanh.f32 %v3372_v4  ;;  %6034 = vmatprep.mubr.msk.f32.mxu0 %vm7087_vm0, %v10610_v9 }
 0x5ce   :  { %v3376_v7 = vpop.f32.mrb[82].mxu1 }
 0x5cf   :  { %4355 = vst.msk [vmem:[%s10585_s7 + $0x198] sm:$0xff] %vm4303_vm1, %v3935_v42  ;;  %v7018_v63 = vpop.eup %7017  ;;  %v3377_v20 = vadd.f32 %v9947_v32, %v3376_v7  ;;  %v5638_v55 = vpop.f32.mrb[83].mxu1 }
 0x5d0   :  { %v3939_v41 = vpop.f32.mrb[230].mxu0  ;;  %6035 = vmatmul.mubr.f32.gmra.mrb[78].mxu0 %v7018_v63 }
 0x5d1   :  { %v3940_v48 = vadd.f32 %v10065_v58, %v3939_v41  ;;  %v5880_v21 = vpop.f32.mrb[231].mxu0  ;;  %7023 = vtanh.f32 %v3377_v20  ;;  %6037 = vmatprep.mubr.msk.f32.mxu0 %vm7087_vm0, %v10610_v9 }
 0x5d2   :  { %v3381_v37 = vpop.f32.mrb[84].mxu1 }
 0x5d3   :  { %4356 = vst.msk [vmem:[%s10585_s7 + $0x1a0] sm:$0xff] %vm4303_vm1, %v3940_v48  ;;  %v7020_v33 = vpop.eup %7019  ;;  %v3382_v26 = vadd.f32 %v9947_v32, %v3381_v37  ;;  %v5641_v16 = vpop.f32.mrb[85].mxu1 }
 0x5d4   :  { %v3944_v22 = vpop.f32.mrb[232].mxu0  ;;  %6038 = vmatmul.mubr.f32.gmra.mrb[80].mxu0 %v7020_v33 }
 0x5d5   :  { %v3945_v35 = vadd.f32 %v10065_v58, %v3944_v22  ;;  %v5883_v1 = vpop.f32.mrb[233].mxu0  ;;  %7025 = vtanh.f32 %v3382_v26  ;;  %6040 = vmatprep.mubr.msk.f32.mxu0 %vm7087_vm0, %v10610_v9 }
 0x5d6   :  { %v3386_v27 = vpop.f32.mrb[86].mxu1 }
 0x5d7   :  { %4357 = vst.msk [vmem:[%s10585_s7 + $0x1a8] sm:$0xff] %vm4303_vm1, %v3945_v35  ;;  %v7022_v13 = vpop.eup %7021  ;;  %v3387_v38 = vadd.f32 %v9947_v32, %v3386_v27  ;;  %v5644_v28 = vpop.f32.mrb[87].mxu1 }
 0x5d8   :  { %v3949_v54 = vpop.f32.mrb[234].mxu0  ;;  %6041 = vmatmul.mubr.f32.gmra.mrb[82].mxu0 %v7022_v13 }
 0x5d9   :  { %v3950_v60 = vadd.f32 %v10065_v58, %v3949_v54  ;;  %v5886_v17 = vpop.f32.mrb[235].mxu0  ;;  %7027 = vtanh.f32 %v3387_v38  ;;  %6043 = vmatprep.mubr.msk.f32.mxu0 %vm7087_vm0, %v10610_v9 }
 0x5da   :  { %v3391_v57 = vpop.f32.mrb[88].mxu1 }
 0x5db   :  { %4358 = vst.msk [vmem:[%s10585_s7 + $0x1b0] sm:$0xff] %vm4303_vm1, %v3950_v60  ;;  %v7024_v14 = vpop.eup %7023  ;;  %v3392_v6 = vadd.f32 %v9947_v32, %v3391_v57  ;;  %v5647_v61 = vpop.f32.mrb[89].mxu1 }
 0x5dc   :  { %v3954_v53 = vpop.f32.mrb[236].mxu0  ;;  %6044 = vmatmul.mubr.f32.gmra.mrb[84].mxu0 %v7024_v14 }
 0x5dd   :  { %v3955_v24 = vadd.f32 %v10065_v58, %v3954_v53  ;;  %v5889_v3 = vpop.f32.mrb[237].mxu0  ;;  %7029 = vtanh.f32 %v3392_v6  ;;  %6046 = vmatprep.mubr.msk.f32.mxu0 %vm7087_vm0, %v10610_v9 }
 0x5de   :  { %v3396_v47 = vpop.f32.mrb[90].mxu1 }
 0x5df   :  { %4359 = vst.msk [vmem:[%s10585_s7 + $0x1b8] sm:$0xff] %vm4303_vm1, %v3955_v24  ;;  %v7026_v59 = vpop.eup %7025  ;;  %v3397_v23 = vadd.f32 %v9947_v32, %v3396_v47  ;;  %v5650_v49 = vpop.f32.mrb[91].mxu1 }
 0x5e0   :  { %6047 = vmatmul.mubr.f32.gmra.mrb[86].mxu0 %v7026_v59 }
 0x5e1   :  { %7031 = vtanh.f32 %v3397_v23  ;;  %6049 = vmatprep.mubr.msk.f32.mxu0 %vm7087_vm0, %v10610_v9 }
 0x5e2   :  { %v3401_v0 = vpop.f32.mrb[92].mxu1  ;;  %v3959_v43 = vpop.f32.mrb[238].mxu0 }
 0x5e3   :  { %v7028_v44 = vpop.eup %7027  ;;  %v3402_v18 = vadd.f32 %v9947_v32, %v3401_v0  ;;  %v5653_v39 = vpop.f32.mrb[93].mxu1  ;;  %v3960_v46 = vadd.f32 %v10065_v58, %v3959_v43 }
 0x5e4   :  { %v5892_v36 = vpop.f32.mrb[239].mxu0  ;;  %6050 = vmatmul.mubr.f32.gmra.mrb[88].mxu0 %v7028_v44 }
 0x5e5   :  { %7033 = vtanh.f32 %v3402_v18  ;;  %4360 = vst.msk [vmem:[%s10585_s7 + $0x1c0] sm:$0xff] %vm4303_vm1, %v3960_v46  ;;  %6052 = vmatprep.mubr.msk.f32.mxu0 %vm7087_vm0, %v10610_v9 }
 0x5e6   :  { %v3406_v11 = vpop.f32.mrb[94].mxu1  ;;  %v3964_v51 = vpop.f32.mrb[240].mxu0 }
 0x5e7   :  { %v7030_v62 = vpop.eup %7029  ;;  %v3407_v31 = vadd.f32 %v9947_v32, %v3406_v11  ;;  %v5656_v19 = vpop.f32.mrb[95].mxu1  ;;  %v3965_v56 = vadd.f32 %v10065_v58, %v3964_v51 }
 0x5e8   :  { %v5895_v5 = vpop.f32.mrb[241].mxu0  ;;  %6053 = vmatmul.mubr.f32.gmra.mrb[90].mxu0 %v7030_v62 }
 0x5e9   :  { %7035 = vtanh.f32 %v3407_v31  ;;  %4361 = vst.msk [vmem:[%s10585_s7 + $0x1c8] sm:$0xff] %vm4303_vm1, %v3965_v56  ;;  %6055 = vmatprep.mubr.msk.f32.mxu0 %vm7087_vm0, %v10610_v9 }
 0x5ea   :  { %v3411_v30 = vpop.f32.mrb[96].mxu1  ;;  %v3969_v34 = vpop.f32.mrb[242].mxu0 }
 0x5eb   :  { %v7032_v25 = vpop.eup %7031  ;;  %v3412_v2 = vadd.f32 %v9947_v32, %v3411_v30  ;;  %v5659_v10 = vpop.f32.mrb[97].mxu1  ;;  %v3970_v8 = vadd.f32 %v10065_v58, %v3969_v34 }
 0x5ec   :  { %v5898_v52 = vpop.f32.mrb[243].mxu0  ;;  %6056 = vmatmul.mubr.f32.gmra.mrb[92].mxu0 %v7032_v25 }
 0x5ed   :  { %7037 = vtanh.f32 %v3412_v2  ;;  %4362 = vst.msk [vmem:[%s10585_s7 + $0x1d0] sm:$0xff] %vm4303_vm1, %v3970_v8  ;;  %6058 = vmatprep.mubr.msk.f32.mxu0 %vm7087_vm0, %v10610_v9 }
 0x5ee   :  { %v3416_v50 = vpop.f32.mrb[98].mxu1  ;;  %v3974_v29 = vpop.f32.mrb[244].mxu0 }
 0x5ef   :  { %v7034_v12 = vpop.eup %7033  ;;  %v3417_v4 = vadd.f32 %v9947_v32, %v3416_v50  ;;  %v5662_v15 = vpop.f32.mrb[99].mxu1  ;;  %v3975_v40 = vadd.f32 %v10065_v58, %v3974_v29 }
 0x5f0   :  { %v5901_v42 = vpop.f32.mrb[245].mxu0  ;;  %6059 = vmatmul.mubr.f32.gmra.mrb[94].mxu0 %v7034_v12 }
 0x5f1   :  { %7039 = vtanh.f32 %v3417_v4  ;;  %4363 = vst.msk [vmem:[%s10585_s7 + $0x1d8] sm:$0xff] %vm4303_vm1, %v3975_v40  ;;  %6061 = vmatprep.mubr.msk.f32.mxu0 %vm7087_vm0, %v10610_v9 }
 0x5f2   :  { %v3421_v45 = vpop.f32.mrb[100].mxu1  ;;  %v3979_v7 = vpop.f32.mrb[246].mxu0 }
 0x5f3   :  { %v7036_v63 = vpop.eup %7035  ;;  %v3422_v20 = vadd.f32 %v9947_v32, %v3421_v45  ;;  %v5665_v55 = vpop.f32.mrb[101].mxu1  ;;  %v3980_v41 = vadd.f32 %v10065_v58, %v3979_v7 }
 0x5f4   :  { %v5904_v48 = vpop.f32.mrb[247].mxu0  ;;  %6062 = vmatmul.mubr.f32.gmra.mrb[96].mxu0 %v7036_v63 }
 0x5f5   :  { %7041 = vtanh.f32 %v3422_v20  ;;  %4364 = vst.msk [vmem:[%s10585_s7 + $0x1e0] sm:$0xff] %vm4303_vm1, %v3980_v41  ;;  %6064 = vmatprep.mubr.msk.f32.mxu0 %vm7087_vm0, %v10610_v9 }
 0x5f6   :  { %v3426_v21 = vpop.f32.mrb[102].mxu1 }
 0x5f7   :  { %v7038_v37 = vpop.eup %7037  ;;  %v3427_v33 = vadd.f32 %v9947_v32, %v3426_v21  ;;  %v5668_v26 = vpop.f32.mrb[103].mxu1 }
 0x5f8   :  { %v3984_v16 = vpop.f32.mrb[248].mxu0  ;;  %6065 = vmatmul.mubr.f32.gmra.mrb[98].mxu0 %v7038_v37 }
 0x5f9   :  { %v3985_v22 = vadd.f32 %v10065_v58, %v3984_v16  ;;  %v5907_v35 = vpop.f32.mrb[249].mxu0  ;;  %7043 = vtanh.f32 %v3427_v33  ;;  %6067 = vmatprep.mubr.msk.f32.mxu0 %vm7087_vm0, %v10610_v9 }
 0x5fa   :  { %v3431_v1 = vpop.f32.mrb[104].mxu1 }
 0x5fb   :  { %4365 = vst.msk [vmem:[%s10585_s7 + $0x1e8] sm:$0xff] %vm4303_vm1, %v3985_v22  ;;  %v7040_v27 = vpop.eup %7039  ;;  %v3432_v13 = vadd.f32 %v9947_v32, %v3431_v1  ;;  %v5671_v38 = vpop.f32.mrb[105].mxu1 }
 0x5fc   :  { %v3989_v28 = vpop.f32.mrb[250].mxu0  ;;  %6068 = vmatmul.mubr.f32.gmra.mrb[100].mxu0 %v7040_v27 }
 0x5fd   :  { %v3990_v54 = vadd.f32 %v10065_v58, %v3989_v28  ;;  %v5910_v60 = vpop.f32.mrb[251].mxu0  ;;  %7045 = vtanh.f32 %v3432_v13  ;;  %6070 = vmatprep.mubr.msk.f32.mxu0 %vm7087_vm0, %v10610_v9 }
 0x5fe   :  { %v3436_v17 = vpop.f32.mrb[106].mxu1 }
 0x5ff   :  { %4366 = vst.msk [vmem:[%s10585_s7 + $0x1f0] sm:$0xff] %vm4303_vm1, %v3990_v54  ;;  %v7042_v57 = vpop.eup %7041  ;;  %v3437_v14 = vadd.f32 %v9947_v32, %v3436_v17  ;;  %v5674_v6 = vpop.f32.mrb[107].mxu1 }
 0x600   :  { %v3994_v61 = vpop.f32.mrb[252].mxu0  ;;  %6071 = vmatmul.mubr.f32.gmra.mrb[102].mxu0 %v7042_v57 }
 0x601   :  { %v3995_v53 = vadd.f32 %v10065_v58, %v3994_v61  ;;  %v5913_v24 = vpop.f32.mrb[253].mxu0  ;;  %7047 = vtanh.f32 %v3437_v14  ;;  %6073 = vmatprep.mubr.msk.f32.mxu0 %vm7087_vm0, %v10610_v9 }
 0x602   :  { %v3441_v3 = vpop.f32.mrb[108].mxu1 }
 0x603   :  { %4367 = vst.msk [vmem:[%s10585_s7 + $0x1f8] sm:$0xff] %vm4303_vm1, %v3995_v53  ;;  %v7044_v47 = vpop.eup %7043  ;;  %v3442_v59 = vadd.f32 %v9947_v32, %v3441_v3  ;;  %v5677_v23 = vpop.f32.mrb[109].mxu1 }
 0x604   :  { %v3999_v49 = vpop.f32.mrb[254].mxu0  ;;  %6074 = vmatmul.mubr.f32.gmra.mrb[104].mxu0 %v7044_v47 }
 0x605   :  { %v4000_v0 = vadd.f32 %v10065_v58, %v3999_v49  ;;  %v5916_v43 = vpop.f32.mrb[255].mxu0  ;;  %7049 = vtanh.f32 %v3442_v59  ;;  %6076 = vmatprep.mubr.msk.f32.mxu0 %vm7087_vm0, %v10610_v9 }
 0x606   :  { %v3446_v44 = vpop.f32.mrb[110].mxu1 }
 0x607   :  { %4368 = vst.msk [vmem:[%s10585_s7 + $0x200] sm:$0xff] %vm4303_vm1, %v4000_v0  ;;  %v7046_v18 = vpop.eup %7045  ;;  %v3447_v39 = vadd.f32 %v9947_v32, %v3446_v44  ;;  %v5680_v46 = vpop.f32.mrb[111].mxu1 }
 0x608   :  { %v4004_v36 = vpop.f32.mrb[0].mxu0  ;;  %6077 = vmatmul.mubr.f32.gmra.mrb[106].mxu0 %v7046_v18 }
 0x609   :  { %v4005_v11 = vadd.f32 %v10065_v58, %v4004_v36  ;;  %v5919_v51 = vpop.f32.mrb[1].mxu0  ;;  %7051 = vtanh.f32 %v3447_v39  ;;  %6079 = vmatprep.mubr.msk.f32.mxu0 %vm7087_vm0, %v10610_v9 }
 0x60a   :  { %v3451_v62 = vpop.f32.mrb[112].mxu1 }
 0x60b   :  { %4369 = vst.msk [vmem:[%s10585_s7 + $0x208] sm:$0xff] %vm4303_vm1, %v4005_v11  ;;  %v7048_v31 = vpop.eup %7047  ;;  %v3452_v19 = vadd.f32 %v9947_v32, %v3451_v62  ;;  %v5683_v56 = vpop.f32.mrb[113].mxu1 }
 0x60c   :  { %v4009_v5 = vpop.f32.mrb[2].mxu0  ;;  %6080 = vmatmul.mubr.f32.gmra.mrb[108].mxu0 %v7048_v31 }
 0x60d   :  { %v4010_v30 = vadd.f32 %v10065_v58, %v4009_v5  ;;  %v5922_v34 = vpop.f32.mrb[3].mxu0  ;;  %7053 = vtanh.f32 %v3452_v19  ;;  %6082 = vmatprep.mubr.msk.f32.mxu0 %vm7087_vm0, %v10610_v9 }
 0x60e   :  { %v3456_v25 = vpop.f32.mrb[114].mxu1 }
 0x60f   :  { %4370 = vst.msk [vmem:[%s10585_s7 + $0x210] sm:$0xff] %vm4303_vm1, %v4010_v30  ;;  %v7050_v2 = vpop.eup %7049  ;;  %v3457_v10 = vadd.f32 %v9947_v32, %v3456_v25  ;;  %v5686_v8 = vpop.f32.mrb[115].mxu1 }
 0x610   :  { %v4014_v52 = vpop.f32.mrb[4].mxu0  ;;  %6083 = vmatmul.mubr.f32.gmra.mrb[110].mxu0 %v7050_v2 }
 0x611   :  { %v4015_v50 = vadd.f32 %v10065_v58, %v4014_v52  ;;  %v5925_v29 = vpop.f32.mrb[5].mxu0  ;;  %7055 = vtanh.f32 %v3457_v10  ;;  %6085 = vmatprep.mubr.msk.f32.mxu0 %vm7087_vm0, %v10610_v9 }
 0x612   :  { %v3461_v12 = vpop.f32.mrb[116].mxu1 }
 0x613   :  { %4371 = vst.msk [vmem:[%s10585_s7 + $0x218] sm:$0xff] %vm4303_vm1, %v4015_v50  ;;  %v7052_v4 = vpop.eup %7051  ;;  %v3462_v15 = vadd.f32 %v9947_v32, %v3461_v12  ;;  %v5689_v40 = vpop.f32.mrb[117].mxu1 }
 0x614   :  { %v4019_v42 = vpop.f32.mrb[6].mxu0  ;;  %6086 = vmatmul.mubr.f32.gmra.mrb[112].mxu0 %v7052_v4 }
 0x615   :  { %v4020_v45 = vadd.f32 %v10065_v58, %v4019_v42  ;;  %v5928_v7 = vpop.f32.mrb[7].mxu0  ;;  %7057 = vtanh.f32 %v3462_v15  ;;  %6088 = vmatprep.mubr.msk.f32.mxu0 %vm7087_vm0, %v10610_v9 }
 0x617   :  { %4372 = vst.msk [vmem:[%s10585_s7 + $0x220] sm:$0xff] %vm4303_vm1, %v4020_v45  ;;  %v7054_v63 = vpop.eup %7053  ;;  %v4024_v20 = vpop.f32.mrb[8].mxu0 }
 0x618   :  { %v4025_v55 = vadd.f32 %v10065_v58, %v4024_v20  ;;  %v5931_v32 = vpop.f32.mrb[9].mxu0  ;;  %6089 = vmatmul.mubr.f32.gmra.mrb[114].mxu0 %v7054_v63 }
 0x619   :  { %6091 = vmatprep.mubr.msk.f32.mxu0 %vm7087_vm0, %v10610_v9 }
 0x61a   :  { %4373 = vst.msk [vmem:[%s10585_s7 + $0x228] sm:$0xff] %vm4303_vm1, %v4025_v55 }
 0x61b   :  { %v7056_v41 = vpop.eup %7055  ;;  %v4029_v48 = vpop.f32.mrb[10].mxu0 }
 0x61c   :  { %v4030_v21 = vadd.f32 %v10065_v58, %v4029_v48  ;;  %v5934_v37 = vpop.f32.mrb[11].mxu0  ;;  %6092 = vmatmul.mubr.f32.gmra.mrb[116].mxu0 %v7056_v41 }
 0x61d   :  { %6094 = vmatprep.mubr.msk.f32.mxu0 %vm7087_vm0, %v10610_v9 }
 0x61e   :  { %4374 = vst.msk [vmem:[%s10585_s7 + $0x230] sm:$0xff] %vm4303_vm1, %v4030_v21 }
 0x61f   :  { %v7058_v33 = vpop.eup %7057  ;;  %v4034_v26 = vpop.f32.mrb[12].mxu0 }
 0x620   :  { %v4035_v16 = vadd.f32 %v10065_v58, %v4034_v26  ;;  %v5937_v22 = vpop.f32.mrb[13].mxu0  ;;  %6095 = vmatmul.mubr.f32.gmra.mrb[118].mxu0 %v7058_v33 }
 0x622   :  { %4375 = vst.msk [vmem:[%s10585_s7 + $0x238] sm:$0xff] %vm4303_vm1, %v4035_v16 }
 0x623   :  { %v4039_v35 = vpop.f32.mrb[14].mxu0 }
 0x624   :  { %v4040_v1 = vadd.f32 %v10065_v58, %v4039_v35  ;;  %v5940_v9 = vpop.f32.mrb[15].mxu0 }
 0x626   :  { %4376 = vst.msk [vmem:[%s10585_s7 + $0x240] sm:$0xff] %vm4303_vm1, %v4040_v1 }
 0x627   :  { %v4044_v27 = vpop.f32.mrb[16].mxu0 }
 0x628   :  { %v4045_v13 = vadd.f32 %v10065_v58, %v4044_v27  ;;  %v5943_v38 = vpop.f32.mrb[17].mxu0 }
 0x62a   :  { %4377 = vst.msk [vmem:[%s10585_s7 + $0x248] sm:$0xff] %vm4303_vm1, %v4045_v13 }
 0x62b   :  { %v4049_v28 = vpop.f32.mrb[18].mxu0 }
 0x62c   :  { %v4050_v54 = vadd.f32 %v10065_v58, %v4049_v28  ;;  %v5946_v60 = vpop.f32.mrb[19].mxu0 }
 0x62e   :  { %4378 = vst.msk [vmem:[%s10585_s7 + $0x250] sm:$0xff] %vm4303_vm1, %v4050_v54 }
 0x62f   :  { %v4054_v17 = vpop.f32.mrb[20].mxu0 }
 0x630   :  { %v4055_v57 = vadd.f32 %v10065_v58, %v4054_v17  ;;  %v5949_v14 = vpop.f32.mrb[21].mxu0 }
 0x632   :  { %4379 = vst.msk [vmem:[%s10585_s7 + $0x258] sm:$0xff] %vm4303_vm1, %v4055_v57 }
 0x633   :  { %v4059_v6 = vpop.f32.mrb[22].mxu0 }
 0x634   :  { %v4060_v61 = vadd.f32 %v10065_v58, %v4059_v6  ;;  %v5952_v53 = vpop.f32.mrb[23].mxu0 }
 0x636   :  { %4380 = vst.msk [vmem:[%s10585_s7 + $0x260] sm:$0xff] %vm4303_vm1, %v4060_v61 }
 0x637   :  { %v4064_v24 = vpop.f32.mrb[24].mxu0 }
 0x638   :  { %v4065_v3 = vadd.f32 %v10065_v58, %v4064_v24  ;;  %v5955_v47 = vpop.f32.mrb[25].mxu0 }
 0x63a   :  { %4381 = vst.msk [vmem:[%s10585_s7 + $0x268] sm:$0xff] %vm4303_vm1, %v4065_v3 }
 0x63b   :  { %v4069_v59 = vpop.f32.mrb[26].mxu0 }
 0x63c   :  { %v4070_v23 = vadd.f32 %v10065_v58, %v4069_v59  ;;  %v5958_v49 = vpop.f32.mrb[27].mxu0 }
 0x63e   :  { %4382 = vst.msk [vmem:[%s10585_s7 + $0x270] sm:$0xff] %vm4303_vm1, %v4070_v23 }
 0x63f   :  { %v4074_v0 = vpop.f32.mrb[28].mxu0 }
 0x640   :  { %v4075_v43 = vadd.f32 %v10065_v58, %v4074_v0  ;;  %v5961_v44 = vpop.f32.mrb[29].mxu0 }
 0x642   :  { %4383 = vst.msk [vmem:[%s10585_s7 + $0x278] sm:$0xff] %vm4303_vm1, %v4075_v43 }
 0x643   :  { %v4079_v18 = vpop.f32.mrb[30].mxu0 }
 0x644   :  { %v4080_v39 = vadd.f32 %v10065_v58, %v4079_v18  ;;  %v5964_v46 = vpop.f32.mrb[31].mxu0 }
 0x646   :  { %4384 = vst.msk [vmem:[%s10585_s7 + $0x280] sm:$0xff] %vm4303_vm1, %v4080_v39 }
 0x647   :  { %v4084_v36 = vpop.f32.mrb[32].mxu0 }
 0x648   :  { %v4085_v11 = vadd.f32 %v10065_v58, %v4084_v36  ;;  %v5967_v51 = vpop.f32.mrb[33].mxu0 }
 0x64a   :  { %4385 = vst.msk [vmem:[%s10585_s7 + $0x288] sm:$0xff] %vm4303_vm1, %v4085_v11 }
 0x64b   :  { %v4089_v62 = vpop.f32.mrb[34].mxu0 }
 0x64c   :  { %v4090_v31 = vadd.f32 %v10065_v58, %v4089_v62  ;;  %v5970_v19 = vpop.f32.mrb[35].mxu0 }
 0x64e   :  { %4386 = vst.msk [vmem:[%s10585_s7 + $0x290] sm:$0xff] %vm4303_vm1, %v4090_v31 }
 0x64f   :  { %v4094_v56 = vpop.f32.mrb[36].mxu0 }
 0x650   :  { %v4095_v5 = vadd.f32 %v10065_v58, %v4094_v56  ;;  %v5973_v30 = vpop.f32.mrb[37].mxu0 }
 0x652   :  { %4387 = vst.msk [vmem:[%s10585_s7 + $0x298] sm:$0xff] %vm4303_vm1, %v4095_v5 }
 0x653   :  { %v4099_v34 = vpop.f32.mrb[38].mxu0 }
 0x654   :  { %v4100_v25 = vadd.f32 %v10065_v58, %v4099_v34  ;;  %v5976_v2 = vpop.f32.mrb[39].mxu0 }
 0x656   :  { %4388 = vst.msk [vmem:[%s10585_s7 + $0x2a0] sm:$0xff] %vm4303_vm1, %v4100_v25 }
 0x657   :  { %v4104_v10 = vpop.f32.mrb[40].mxu0 }
 0x658   :  { %v4105_v8 = vadd.f32 %v10065_v58, %v4104_v10  ;;  %v5979_v52 = vpop.f32.mrb[41].mxu0 }
 0x65a   :  { %4389 = vst.msk [vmem:[%s10585_s7 + $0x2a8] sm:$0xff] %vm4303_vm1, %v4105_v8 }
 0x65b   :  { %v4109_v50 = vpop.f32.mrb[42].mxu0 }
 0x65c   :  { %v4110_v29 = vadd.f32 %v10065_v58, %v4109_v50  ;;  %v5982_v12 = vpop.f32.mrb[43].mxu0 }
 0x65e   :  { %4390 = vst.msk [vmem:[%s10585_s7 + $0x2b0] sm:$0xff] %vm4303_vm1, %v4110_v29 }
 0x65f   :  { %v4114_v4 = vpop.f32.mrb[44].mxu0 }
 0x660   :  { %v4115_v15 = vadd.f32 %v10065_v58, %v4114_v4  ;;  %v5985_v40 = vpop.f32.mrb[45].mxu0 }
 0x662   :  { %4391 = vst.msk [vmem:[%s10585_s7 + $0x2b8] sm:$0xff] %vm4303_vm1, %v4115_v15 }
 0x663   :  { %v4119_v42 = vpop.f32.mrb[46].mxu0 }
 0x664   :  { %v4120_v45 = vadd.f32 %v10065_v58, %v4119_v42  ;;  %v5988_v7 = vpop.f32.mrb[47].mxu0 }
 0x666   :  { %4392 = vst.msk [vmem:[%s10585_s7 + $0x2c0] sm:$0xff] %vm4303_vm1, %v4120_v45 }
 0x667   :  { %v4124_v63 = vpop.f32.mrb[48].mxu0 }
 0x668   :  { %v4125_v20 = vadd.f32 %v10065_v58, %v4124_v63  ;;  %v5991_v55 = vpop.f32.mrb[49].mxu0 }
 0x66a   :  { %4393 = vst.msk [vmem:[%s10585_s7 + $0x2c8] sm:$0xff] %vm4303_vm1, %v4125_v20 }
 0x66b   :  { %v4129_v32 = vpop.f32.mrb[50].mxu0 }
 0x66c   :  { %v4130_v41 = vadd.f32 %v10065_v58, %v4129_v32  ;;  %v5994_v48 = vpop.f32.mrb[51].mxu0 }
 0x66e   :  { %4394 = vst.msk [vmem:[%s10585_s7 + $0x2d0] sm:$0xff] %vm4303_vm1, %v4130_v41 }
 0x66f   :  { %v4134_v21 = vpop.f32.mrb[52].mxu0 }
 0x670   :  { %v4135_v37 = vadd.f32 %v10065_v58, %v4134_v21  ;;  %v5997_v33 = vpop.f32.mrb[53].mxu0 }
 0x672   :  { %4395 = vst.msk [vmem:[%s10585_s7 + $0x2d8] sm:$0xff] %vm4303_vm1, %v4135_v37 }
 0x673   :  { %v4139_v26 = vpop.f32.mrb[54].mxu0 }
 0x674   :  { %v4140_v16 = vadd.f32 %v10065_v58, %v4139_v26  ;;  %v6000_v22 = vpop.f32.mrb[55].mxu0 }
 0x676   :  { %4396 = vst.msk [vmem:[%s10585_s7 + $0x2e0] sm:$0xff] %vm4303_vm1, %v4140_v16 }
 0x677   :  { %v4144_v35 = vpop.f32.mrb[56].mxu0 }
 0x678   :  { %v4145_v1 = vadd.f32 %v10065_v58, %v4144_v35  ;;  %v6003_v9 = vpop.f32.mrb[57].mxu0 }
 0x67a   :  { %4397 = vst.msk [vmem:[%s10585_s7 + $0x2e8] sm:$0xff] %vm4303_vm1, %v4145_v1 }
 0x67b   :  { %v4149_v27 = vpop.f32.mrb[58].mxu0 }
 0x67c   :  { %v4150_v13 = vadd.f32 %v10065_v58, %v4149_v27  ;;  %v6006_v38 = vpop.f32.mrb[59].mxu0 }
 0x67e   :  { %4398 = vst.msk [vmem:[%s10585_s7 + $0x2f0] sm:$0xff] %vm4303_vm1, %v4150_v13  ;;  %v7083_v13 = vld [vmem:[%s10584_s6] ss:$0 sm:$0xff] }
 0x67f   :  { %v4154_v28 = vpop.f32.mrb[60].mxu0 }
 0x680   :  { %v4155_v54 = vadd.f32 %v10065_v58, %v4154_v28  ;;  %v6009_v60 = vpop.f32.mrb[61].mxu0 }
 0x682   :  { %4399 = vst.msk [vmem:[%s10585_s7 + $0x2f8] sm:$0xff] %vm4303_vm1, %v4155_v54 }
 0x683   :  { %v4159_v17 = vpop.f32.mrb[62].mxu0 }
 0x684   :  { %v4160_v57 = vadd.f32 %v10065_v58, %v4159_v17  ;;  %v6012_v14 = vpop.f32.mrb[63].mxu0 }
 0x686   :  { %4400 = vst.msk [vmem:[%s10585_s7 + $0x300] sm:$0xff] %vm4303_vm1, %v4160_v57 }
 0x687   :  { %v4164_v6 = vpop.f32.mrb[64].mxu0 }
 0x688   :  { %v4165_v61 = vadd.f32 %v10065_v58, %v4164_v6  ;;  %v6015_v53 = vpop.f32.mrb[65].mxu0 }
 0x68a   :  { %4401 = vst.msk [vmem:[%s10585_s7 + $0x308] sm:$0xff] %vm4303_vm1, %v4165_v61 }
 0x68b   :  { %v4169_v24 = vpop.f32.mrb[66].mxu0 }
 0x68c   :  { %v4170_v3 = vadd.f32 %v10065_v58, %v4169_v24  ;;  %v6018_v47 = vpop.f32.mrb[67].mxu0 }
 0x68e   :  { %4402 = vst.msk [vmem:[%s10585_s7 + $0x310] sm:$0xff] %vm4303_vm1, %v4170_v3 }
 0x68f   :  { %v4174_v59 = vpop.f32.mrb[68].mxu0 }
 0x690   :  { %v4175_v23 = vadd.f32 %v10065_v58, %v4174_v59  ;;  %v6021_v49 = vpop.f32.mrb[69].mxu0 }
 0x692   :  { %4403 = vst.msk [vmem:[%s10585_s7 + $0x318] sm:$0xff] %vm4303_vm1, %v4175_v23 }
 0x693   :  { %v4179_v0 = vpop.f32.mrb[70].mxu0 }
 0x694   :  { %v4180_v43 = vadd.f32 %v10065_v58, %v4179_v0  ;;  %v6024_v44 = vpop.f32.mrb[71].mxu0 }
 0x696   :  { %4404 = vst.msk [vmem:[%s10585_s7 + $0x320] sm:$0xff] %vm4303_vm1, %v4180_v43 }
 0x697   :  { %v4184_v18 = vpop.f32.mrb[72].mxu0 }
 0x698   :  { %v4185_v39 = vadd.f32 %v10065_v58, %v4184_v18  ;;  %v6027_v46 = vpop.f32.mrb[73].mxu0 }
 0x69a   :  { %4405 = vst.msk [vmem:[%s10585_s7 + $0x328] sm:$0xff] %vm4303_vm1, %v4185_v39 }
 0x69b   :  { %v4189_v36 = vpop.f32.mrb[74].mxu0 }
 0x69c   :  { %v4190_v11 = vadd.f32 %v10065_v58, %v4189_v36  ;;  %v6030_v51 = vpop.f32.mrb[75].mxu0 }
 0x69e   :  { %4406 = vst.msk [vmem:[%s10585_s7 + $0x330] sm:$0xff] %vm4303_vm1, %v4190_v11 }
 0x69f   :  { %v4194_v62 = vpop.f32.mrb[76].mxu0 }
 0x6a0   :  { %v4195_v31 = vadd.f32 %v10065_v58, %v4194_v62  ;;  %v6033_v19 = vpop.f32.mrb[77].mxu0 }
 0x6a2   :  { %4407 = vst.msk [vmem:[%s10585_s7 + $0x338] sm:$0xff] %vm4303_vm1, %v4195_v31 }
 0x6a3   :  { %v4199_v56 = vpop.f32.mrb[78].mxu0 }
 0x6a4   :  { %v4200_v5 = vadd.f32 %v10065_v58, %v4199_v56  ;;  %v6036_v30 = vpop.f32.mrb[79].mxu0 }
 0x6a6   :  { %4408 = vst.msk [vmem:[%s10585_s7 + $0x340] sm:$0xff] %vm4303_vm1, %v4200_v5 }
 0x6a7   :  { %v4204_v34 = vpop.f32.mrb[80].mxu0 }
 0x6a8   :  { %v4205_v25 = vadd.f32 %v10065_v58, %v4204_v34  ;;  %v6039_v2 = vpop.f32.mrb[81].mxu0 }
 0x6aa   :  { %4409 = vst.msk [vmem:[%s10585_s7 + $0x348] sm:$0xff] %vm4303_vm1, %v4205_v25 }
 0x6ab   :  { %v4209_v10 = vpop.f32.mrb[82].mxu0 }
 0x6ac   :  { %v4210_v8 = vadd.f32 %v10065_v58, %v4209_v10  ;;  %v6042_v52 = vpop.f32.mrb[83].mxu0 }
 0x6ae   :  { %4410 = vst.msk [vmem:[%s10585_s7 + $0x350] sm:$0xff] %vm4303_vm1, %v4210_v8 }
 0x6af   :  { %v4214_v50 = vpop.f32.mrb[84].mxu0 }
 0x6b0   :  { %v4215_v29 = vadd.f32 %v10065_v58, %v4214_v50  ;;  %v6045_v12 = vpop.f32.mrb[85].mxu0 }
 0x6b2   :  { %4411 = vst.msk [vmem:[%s10585_s7 + $0x358] sm:$0xff] %vm4303_vm1, %v4215_v29 }
 0x6b3   :  { %v4219_v4 = vpop.f32.mrb[86].mxu0 }
 0x6b4   :  { %v4220_v15 = vadd.f32 %v10065_v58, %v4219_v4  ;;  %v6048_v40 = vpop.f32.mrb[87].mxu0 }
 0x6b6   :  { %4412 = vst.msk [vmem:[%s10585_s7 + $0x360] sm:$0xff] %vm4303_vm1, %v4220_v15 }
 0x6b7   :  { %v4224_v42 = vpop.f32.mrb[88].mxu0 }
 0x6b8   :  { %v4225_v45 = vadd.f32 %v10065_v58, %v4224_v42  ;;  %v6051_v7 = vpop.f32.mrb[89].mxu0 }
 0x6ba   :  { %4413 = vst.msk [vmem:[%s10585_s7 + $0x368] sm:$0xff] %vm4303_vm1, %v4225_v45 }
 0x6bb   :  { %v4229_v63 = vpop.f32.mrb[90].mxu0 }
 0x6bc   :  { %v4230_v20 = vadd.f32 %v10065_v58, %v4229_v63  ;;  %v6054_v55 = vpop.f32.mrb[91].mxu0 }
 0x6be   :  { %4414 = vst.msk [vmem:[%s10585_s7 + $0x370] sm:$0xff] %vm4303_vm1, %v4230_v20 }
 0x6bf   :  { %v4234_v32 = vpop.f32.mrb[92].mxu0 }
 0x6c0   :  { %v4235_v41 = vadd.f32 %v10065_v58, %v4234_v32  ;;  %v6057_v48 = vpop.f32.mrb[93].mxu0 }
 0x6c2   :  { %4415 = vst.msk [vmem:[%s10585_s7 + $0x378] sm:$0xff] %vm4303_vm1, %v4235_v41 }
 0x6c3   :  { %v4239_v21 = vpop.f32.mrb[94].mxu0 }
 0x6c4   :  { %v4240_v37 = vadd.f32 %v10065_v58, %v4239_v21  ;;  %v6060_v33 = vpop.f32.mrb[95].mxu0 }
 0x6c6   :  { %4416 = vst.msk [vmem:[%s10585_s7 + $0x380] sm:$0xff] %vm4303_vm1, %v4240_v37 }
 0x6c7   :  { %v4244_v26 = vpop.f32.mrb[96].mxu0 }
 0x6c8   :  { %v4245_v16 = vadd.f32 %v10065_v58, %v4244_v26  ;;  %v6063_v22 = vpop.f32.mrb[97].mxu0 }
 0x6ca   :  { %4417 = vst.msk [vmem:[%s10585_s7 + $0x388] sm:$0xff] %vm4303_vm1, %v4245_v16 }
 0x6cb   :  { %v4249_v35 = vpop.f32.mrb[98].mxu0 }
 0x6cc   :  { %v4250_v1 = vadd.f32 %v10065_v58, %v4249_v35  ;;  %v6066_v9 = vpop.f32.mrb[99].mxu0 }
 0x6ce   :  { %4418 = vst.msk [vmem:[%s10585_s7 + $0x390] sm:$0xff] %vm4303_vm1, %v4250_v1 }
 0x6cf   :  { %v4254_v27 = vpop.f32.mrb[100].mxu0 }
 0x6d0   :  { %v4255_v38 = vadd.f32 %v7083_v13, %v4254_v27  ;;  %v6069_v28 = vpop.f32.mrb[101].mxu0 }
 0x6d2   :  { %4419 = vst.msk [vmem:[%s10585_s7 + $0x398] sm:$0xff] %vm4303_vm1, %v4255_v38 }
 0x6d3   :  { %v4259_v54 = vpop.f32.mrb[102].mxu0 }
 0x6d4   :  { %v4260_v58 = vadd.f32 %v7083_v13, %v4259_v54  ;;  %v6072_v60 = vpop.f32.mrb[103].mxu0 }
 0x6d6   :  { %4420 = vst.msk [vmem:[%s10585_s7 + $0x3a0] sm:$0xff] %vm4303_vm1, %v4260_v58 }
 0x6d7   :  { %v4264_v17 = vpop.f32.mrb[104].mxu0 }
 0x6d8   :  { %v4265_v57 = vadd.f32 %v7083_v13, %v4264_v17  ;;  %v6075_v14 = vpop.f32.mrb[105].mxu0 }
 0x6da   :  { %4421 = vst.msk [vmem:[%s10585_s7 + $0x3a8] sm:$0xff] %vm4303_vm1, %v4265_v57 }
 0x6db   :  { %v4269_v6 = vpop.f32.mrb[106].mxu0 }
 0x6dc   :  { %v4270_v61 = vadd.f32 %v7083_v13, %v4269_v6  ;;  %v6078_v53 = vpop.f32.mrb[107].mxu0 }
 0x6de   :  { %4422 = vst.msk [vmem:[%s10585_s7 + $0x3b0] sm:$0xff] %vm4303_vm1, %v4270_v61 }
 0x6df   :  { %v4274_v24 = vpop.f32.mrb[108].mxu0 }
 0x6e0   :  { %v4275_v3 = vadd.f32 %v7083_v13, %v4274_v24  ;;  %v6081_v47 = vpop.f32.mrb[109].mxu0 }
 0x6e2   :  { %4423 = vst.msk [vmem:[%s10585_s7 + $0x3b8] sm:$0xff] %vm4303_vm1, %v4275_v3 }
 0x6e3   :  { %v4279_v59 = vpop.f32.mrb[110].mxu0 }
 0x6e4   :  { %v4280_v23 = vadd.f32 %v7083_v13, %v4279_v59  ;;  %v6084_v49 = vpop.f32.mrb[111].mxu0 }
 0x6e6   :  { %4424 = vst.msk [vmem:[%s10585_s7 + $0x3c0] sm:$0xff] %vm4303_vm1, %v4280_v23 }
 0x6e7   :  { %v4284_v0 = vpop.f32.mrb[112].mxu0 }
 0x6e8   :  { %v4285_v43 = vadd.f32 %v7083_v13, %v4284_v0  ;;  %v6087_v44 = vpop.f32.mrb[113].mxu0 }
 0x6ea   :  { %4425 = vst.msk [vmem:[%s10585_s7 + $0x3c8] sm:$0xff] %vm4303_vm1, %v4285_v43 }
 0x6eb   :  { %v4289_v18 = vpop.f32.mrb[114].mxu0 }
 0x6ec   :  { %v4290_v39 = vadd.f32 %v7083_v13, %v4289_v18  ;;  %v6090_v46 = vpop.f32.mrb[115].mxu0 }
 0x6ee   :  { %4426 = vst.msk [vmem:[%s10585_s7 + $0x3d0] sm:$0xff] %vm4303_vm1, %v4290_v39 }
 0x6ef   :  { %v4294_v36 = vpop.f32.mrb[116].mxu0 }
 0x6f0   :  { %v4295_v11 = vadd.f32 %v7083_v13, %v4294_v36  ;;  %v6093_v51 = vpop.f32.mrb[117].mxu0 }
 0x6f2   :  { %4427 = vst.msk [vmem:[%s10585_s7 + $0x3d8] sm:$0xff] %vm4303_vm1, %v4295_v11 }
 0x6f3   :  { %v4299_v62 = vpop.f32.mrb[118].mxu0 }
 0x6f4   :  { %v4300_v31 = vadd.f32 %v7083_v13, %v4299_v62  ;;  %v6096_v19 = vpop.f32.mrb[119].mxu0 }
 0x6f6   :  { %4428 = vst.msk [vmem:[%s10585_s7 + $0x3e0] sm:$0xff] %vm4303_vm1, %v4300_v31 }

</bundles_post_ra>
